<compile_context>
chip_gen: v5e
topology: v5e:2x2
jax: 0.10.0
libtpu: 0.0.40
codegen_flags: <defaults>
</compile_context>

<pallas_src>
from functools import partial

import numpy as np
import jax
import jax.numpy as jnp
from jax.experimental import pallas as pl
from jax.experimental.pallas import tpu as pltpu


def _round_up(n, m):
    return ((n + m - 1) // m) * m


# ----------------------------------------------------------------------------
# Kernel: one output tile = im2col into a VMEM scratch + one fat MXU matmul.
#   w_ref   : (C, T*C)    bf16  fused conv weight (+ residual identity), lane-dense
#   xa_ref  : (C, NQc)    bf16  padded-flat input, chunk q
#   xb_ref  : (C, NQc)    bf16  padded-flat input, chunk q+1 (halo)
#   out_ref : (C, NQc)    f32   conv + residual for chunk q
#   win_ref : (C, 2*NQc)  bf16  scratch: contiguous [chunk | halo] window
#   col_ref : (T*C, NQc)  bf16  scratch: stacked im2col operand
# ----------------------------------------------------------------------------
def adapt3d_kernel(w_ref, xa_ref, xb_ref, out_ref, win_ref, col_ref,
                   *, offsets, nqc, c):
    # Stage chunk + halo contiguously (aligned stores only).
    win_ref[:, :nqc] = xa_ref[...]
    win_ref[:, nqc:2 * nqc] = xb_ref[...]

    # im2col: T static lane-shifted copies, paid once per tile, feeds the MXU.
    for t, off in enumerate(offsets):
        col_ref[t * c:(t + 1) * c, :] = win_ref[:, off:off + nqc]

    # One K = T*C (=1440) deep contraction on the MXU, f32 accumulation.
    out_ref[...] = jnp.dot(w_ref[...], col_ref[...],
                           preferred_element_type=jnp.float32
                           ).astype(out_ref.dtype)


def adapt_3d_2_forward(x, n_scale, params, *, nqc=512):
    wp = params["weight_pool"]                    # [E, Cout, Cin, KD, KH, KW]
    E, Cout, Cin, KD, KH, KW = wp.shape
    B, C, D, H, W = x.shape
    assert C == Cin == Cout and C % 8 == 0
    T = KD * KH * KW

    pd, ph, pw = (KD - 1) // 2, (KH - 1) // 2, (KW - 1) // 2       # (2, 1, 1)
    Hp, Wp = H + 2 * ph, W + 2 * pw
    Dp = D + 2 * pd
    Np = Dp * Hp * Wp
    max_off = (KD - 1) * Hp * Wp + (KH - 1) * Wp + (KW - 1)

    # Tap halo must fit in one extra chunk so every kernel index stays static.
    NQc = max(_round_up(nqc, 128), _round_up(max_off, 128))
    n_chunks = pl.cdiv(Np, NQc)

    # Fold the chunk/halo tail slack into the single spatial pad (extra trailing
    # D planes) -- no second HBM pad pass over the flattened array.
    need = (n_chunks + 1) * NQc                   # halo block q+1 must be in-bounds
    extra_d = max(0, -(-(need - Np) // (Hp * Wp)))
    x_pad = jnp.pad(x.astype(jnp.bfloat16),
                    ((0, 0), (0, 0), (pd, pd + extra_d), (ph, ph), (pw, pw)))
    Npp = (Dp + extra_d) * Hp * Wp
    assert Npp >= need
    x_flat = x_pad.reshape(B, C, Npp)

    # --- routing MLP + expert fusion, hoisted out of the kernel (tiny) -------
    scale = jnp.full((1, 1), 1.0 / n_scale, jnp.float32)
    h1 = jax.nn.relu(scale @ params["w1"] + params["b1"])          # [1, 64]
    r = jax.nn.softmax(h1 @ params["w2"] + params["b2"], axis=1)   # [1, E]
    fused = jnp.einsum("e,eoidhw->oidhw", r[0], wp)                # f32
    # Residual folded in: conv(x, fused + I_center) == conv(x, fused) + x.
    fused = fused.at[:, :, pd, ph, pw].add(jnp.eye(C, dtype=fused.dtype))
    # Lane-dense slab [Cout, T*Cin], taps row-major over (kd, kh, kw).
    w_slab = jnp.transpose(fused, (0, 2, 3, 4, 1)).reshape(C, T * C)
    w_slab = w_slab.astype(jnp.bfloat16)

    offsets = tuple(kd * Hp * Wp + kh * Wp + kw
                    for kd in range(KD) for kh in range(KH) for kw in range(KW))

    kern = partial(adapt3d_kernel, offsets=offsets, nqc=NQc, c=C)
    cost = pl.CostEstimate(
        flops=2 * B * C * (T * C) * (n_chunks * NQc),
        transcendentals=0,
        bytes_accessed=2 * x_flat.size * 2                 # x read twice (halo)
                       + B * C * n_chunks * NQc * 4        # f32 output
                       + w_slab.size * 2)

    out_flat = pl.pallas_call(
        kern,
        out_shape=jax.ShapeDtypeStruct((B, C, n_chunks * NQc), jnp.float32),
        grid=(B, n_chunks),
        in_specs=[
            pl.BlockSpec((C, T * C), lambda b, q: (0, 0)),             # weights
            pl.BlockSpec((None, C, NQc), lambda b, q: (b, 0, q)),      # chunk q
            pl.BlockSpec((None, C, NQc), lambda b, q: (b, 0, q + 1)),  # halo q+1
        ],
        out_specs=pl.BlockSpec((None, C, NQc), lambda b, q: (b, 0, q)),
        scratch_shapes=[
            pltpu.VMEM((C, 2 * NQc), jnp.bfloat16),   # staged chunk+halo window
            pltpu.VMEM((T * C, NQc), jnp.bfloat16),   # im2col stacked operand
        ],
        compiler_params=pltpu.CompilerParams(
            dimension_semantics=("parallel", "parallel")),
        cost_estimate=cost,
    )(w_slab, x_flat, x_flat)

    # Crop the padded-flat output back to NCDHW (valid positions only).
    out = out_flat[:, :, :D * Hp * Wp].reshape(B, C, D, Hp, Wp)[:, :, :, :H, :W]
    return out


# ----------------------------------------------------------------------------
# Pure-JAX f32 reference matching the PyTorch forward semantics.
# ----------------------------------------------------------------------------
def reference_forward(x, n_scale, params):
    wp = params["weight_pool"]
    E, Cout, Cin, KD, KH, KW = wp.shape
    pd, ph, pw = (KD - 1) // 2, (KH - 1) // 2, (KW - 1) // 2
    scale = jnp.full((1, 1), 1.0 / n_scale, jnp.float32)
    h1 = jax.nn.relu(scale @ params["w1"] + params["b1"])
    r = jax.nn.softmax(h1 @ params["w2"] + params["b2"], axis=1)       # [1, E]
    fused = jnp.einsum("e,eoidhw->oidhw", r[0], wp)
    out = jax.lax.conv_general_dilated(
        x, fused, window_strides=(1, 1, 1),
        padding=((pd, pd), (ph, ph), (pw, pw)),
        dimension_numbers=("NCDHW", "OIDHW", "NCDHW"))
    return out + x


# ----------------------------------------------------------------------------
# Deterministic synthetic parameters (shapes from Adapt_3d_2.__init__).
# Routing Linear weights stored transposed (input-dim first) for x @ W form.
# ----------------------------------------------------------------------------
def init_params(key, n_feats, num_experts=4, kernel_size=(5, 3, 3)):
    ks = jax.random.split(key, 5)
    rn = lambda k, shp, s=0.1: jax.random.normal(k, shp, jnp.float32) * s
    return dict(
        weight_pool=rn(ks[0], (num_experts, n_feats, n_feats, *kernel_size)),
        w1=rn(ks[1], (1, 64)), b1=rn(ks[2], (1, 64)),
        w2=rn(ks[3], (64, num_experts)), b2=rn(ks[4], (1, num_experts)),
    )


if __name__ == "__main__":
    key = jax.random.PRNGKey(0)
    kx, kp = jax.random.split(key)
    B, C, D, H, W = 2, 32, 5, 8, 8            # n_feats=32 (module default)
    E = 4
    n_scale = 2.0
    x = jax.random.normal(kx, (B, C, D, H, W), jnp.float32)
    params = init_params(kp, C, num_experts=E, kernel_size=(5, 3, 3))

    out = adapt_3d_2_forward(x, n_scale, params)
    out = jax.block_until_ready(out)

    ref = reference_forward(x, n_scale, params)
    assert out.shape == (B, C, D, H, W)
    # bf16 operands with f32 accumulation vs a pure-f32 reference -> loose tol.
    np.testing.assert_allclose(np.asarray(out), np.asarray(ref),
                               rtol=5e-2, atol=5e-2)
    print("KERNEL_OK")
</pallas_src>

<mosaic_0001>
module attributes {stable_mosaic.version = 11 : i64} {
  func.func @adapt3d_kernel(%arg0: i32, %arg1: i32, %arg2: memref<32x1440xbf16, #tpu.memory_space<vmem>>, %arg3: memref<1x32x512xbf16, #tpu.memory_space<vmem>>, %arg4: memref<1x32x512xbf16, #tpu.memory_space<vmem>>, %arg5: memref<1x32x512xf32, #tpu.memory_space<vmem>>, %arg6: memref<32x1024xbf16, #tpu.memory_space<vmem>>, %arg7: memref<1440x512xbf16, #tpu.memory_space<vmem>>) attributes {dimension_semantics = [#tpu.dimension_semantics<parallel>, #tpu.dimension_semantics<parallel>], iteration_bounds = array<i64: 2, 2>, scalar_prefetch = 0 : i64, scratch_operands = 2 : i64, tpu.core_type = #tpu.core_type<tc>, window_params = [{pipeline_mode = #tpu.pipeline_mode<synchronous>, transform_indices = @transform_0, window_bounds = array<i64: 32, 1440>}, {transform_indices = @transform_1, window_bounds = array<i64: 1, 32, 512>}, {transform_indices = @transform_2, window_bounds = array<i64: 1, 32, 512>}, {transform_indices = @transform_3, window_bounds = array<i64: 1, 32, 512>}]} {
    %c0 = arith.constant 0 : index
    %c0_0 = arith.constant 0 : index
    %c0_1 = arith.constant 0 : index
    %0 = vector.load %arg3[%c0, %c0_0, %c0_1] : memref<1x32x512xbf16, #tpu.memory_space<vmem>>, vector<1x32x512xbf16>
    %1 = vector.shape_cast %0 : vector<1x32x512xbf16> to vector<32x512xbf16>
    %c0_2 = arith.constant 0 : index
    %c0_3 = arith.constant 0 : index
    %2 = vector.load %arg6[%c0_2, %c0_3] : memref<32x1024xbf16, #tpu.memory_space<vmem>>, vector<32x512xbf16>
    tpu.vector_store %arg6[%c0_2, %c0_3], %1 {strides = array<i32>} : memref<32x1024xbf16, #tpu.memory_space<vmem>>, vector<32x512xbf16>,
    %c0_4 = arith.constant 0 : index
    %c0_5 = arith.constant 0 : index
    %c0_6 = arith.constant 0 : index
    %3 = vector.load %arg4[%c0_4, %c0_5, %c0_6] : memref<1x32x512xbf16, #tpu.memory_space<vmem>>, vector<1x32x512xbf16>
    %4 = vector.shape_cast %3 : vector<1x32x512xbf16> to vector<32x512xbf16>
    %c0_7 = arith.constant 0 : index
    %c512 = arith.constant 512 : index
    %5 = vector.load %arg6[%c0_7, %c512] : memref<32x1024xbf16, #tpu.memory_space<vmem>>, vector<32x512xbf16>
    tpu.vector_store %arg6[%c0_7, %c512], %4 {strides = array<i32>} : memref<32x1024xbf16, #tpu.memory_space<vmem>>, vector<32x512xbf16>,
    %c0_8 = arith.constant 0 : index
    %c0_9 = arith.constant 0 : index
    %6 = vector.load %arg6[%c0_8, %c0_9] : memref<32x1024xbf16, #tpu.memory_space<vmem>>, vector<32x512xbf16>
    %c0_10 = arith.constant 0 : index
    %c0_11 = arith.constant 0 : index
    %7 = vector.load %arg7[%c0_10, %c0_11] : memref<1440x512xbf16, #tpu.memory_space<vmem>>, vector<32x512xbf16>
    tpu.vector_store %arg7[%c0_10, %c0_11], %6 {strides = array<i32>} : memref<1440x512xbf16, #tpu.memory_space<vmem>>, vector<32x512xbf16>,
    %c0_12 = arith.constant 0 : index
    %c1 = arith.constant 1 : index
    %8 = vector.load %arg6[%c0_12, %c1] : memref<32x1024xbf16, #tpu.memory_space<vmem>>, vector<32x512xbf16>
    %c32 = arith.constant 32 : index
    %c0_13 = arith.constant 0 : index
    %9 = vector.load %arg7[%c32, %c0_13] : memref<1440x512xbf16, #tpu.memory_space<vmem>>, vector<32x512xbf16>
    tpu.vector_store %arg7[%c32, %c0_13], %8 {strides = array<i32>} : memref<1440x512xbf16, #tpu.memory_space<vmem>>, vector<32x512xbf16>,
    %c0_14 = arith.constant 0 : index
    %c2 = arith.constant 2 : index
    %10 = vector.load %arg6[%c0_14, %c2] : memref<32x1024xbf16, #tpu.memory_space<vmem>>, vector<32x512xbf16>
    %c64 = arith.constant 64 : index
    %c0_15 = arith.constant 0 : index
    %11 = vector.load %arg7[%c64, %c0_15] : memref<1440x512xbf16, #tpu.memory_space<vmem>>, vector<32x512xbf16>
    tpu.vector_store %arg7[%c64, %c0_15], %10 {strides = array<i32>} : memref<1440x512xbf16, #tpu.memory_space<vmem>>, vector<32x512xbf16>,
    %c0_16 = arith.constant 0 : index
    %c10 = arith.constant 10 : index
    %12 = vector.load %arg6[%c0_16, %c10] : memref<32x1024xbf16, #tpu.memory_space<vmem>>, vector<32x512xbf16>
    %c96 = arith.constant 96 : index
    %c0_17 = arith.constant 0 : index
    %13 = vector.load %arg7[%c96, %c0_17] : memref<1440x512xbf16, #tpu.memory_space<vmem>>, vector<32x512xbf16>
    tpu.vector_store %arg7[%c96, %c0_17], %12 {strides = array<i32>} : memref<1440x512xbf16, #tpu.memory_space<vmem>>, vector<32x512xbf16>,
    %c0_18 = arith.constant 0 : index
    %c11 = arith.constant 11 : index
    %14 = vector.load %arg6[%c0_18, %c11] : memref<32x1024xbf16, #tpu.memory_space<vmem>>, vector<32x512xbf16>
    %c128 = arith.constant 128 : index
    %c0_19 = arith.constant 0 : index
    %15 = vector.load %arg7[%c128, %c0_19] : memref<1440x512xbf16, #tpu.memory_space<vmem>>, vector<32x512xbf16>
    tpu.vector_store %arg7[%c128, %c0_19], %14 {strides = array<i32>} : memref<1440x512xbf16, #tpu.memory_space<vmem>>, vector<32x512xbf16>,
    %c0_20 = arith.constant 0 : index
    %c12 = arith.constant 12 : index
    %16 = vector.load %arg6[%c0_20, %c12] : memref<32x1024xbf16, #tpu.memory_space<vmem>>, vector<32x512xbf16>
    %c160 = arith.constant 160 : index
    %c0_21 = arith.constant 0 : index
    %17 = vector.load %arg7[%c160, %c0_21] : memref<1440x512xbf16, #tpu.memory_space<vmem>>, vector<32x512xbf16>
    tpu.vector_store %arg7[%c160, %c0_21], %16 {strides = array<i32>} : memref<1440x512xbf16, #tpu.memory_space<vmem>>, vector<32x512xbf16>,
    %c0_22 = arith.constant 0 : index
    %c20 = arith.constant 20 : index
    %18 = vector.load %arg6[%c0_22, %c20] : memref<32x1024xbf16, #tpu.memory_space<vmem>>, vector<32x512xbf16>
    %c192 = arith.constant 192 : index
    %c0_23 = arith.constant 0 : index
    %19 = vector.load %arg7[%c192, %c0_23] : memref<1440x512xbf16, #tpu.memory_space<vmem>>, vector<32x512xbf16>
    tpu.vector_store %arg7[%c192, %c0_23], %18 {strides = array<i32>} : memref<1440x512xbf16, #tpu.memory_space<vmem>>, vector<32x512xbf16>,
    %c0_24 = arith.constant 0 : index
    %c21 = arith.constant 21 : index
    %20 = vector.load %arg6[%c0_24, %c21] : memref<32x1024xbf16, #tpu.memory_space<vmem>>, vector<32x512xbf16>
    %c224 = arith.constant 224 : index
    %c0_25 = arith.constant 0 : index
    %21 = vector.load %arg7[%c224, %c0_25] : memref<1440x512xbf16, #tpu.memory_space<vmem>>, vector<32x512xbf16>
    tpu.vector_store %arg7[%c224, %c0_25], %20 {strides = array<i32>} : memref<1440x512xbf16, #tpu.memory_space<vmem>>, vector<32x512xbf16>,
    %c0_26 = arith.constant 0 : index
    %c22 = arith.constant 22 : index
    %22 = vector.load %arg6[%c0_26, %c22] : memref<32x1024xbf16, #tpu.memory_space<vmem>>, vector<32x512xbf16>
    %c256 = arith.constant 256 : index
    %c0_27 = arith.constant 0 : index
    %23 = vector.load %arg7[%c256, %c0_27] : memref<1440x512xbf16, #tpu.memory_space<vmem>>, vector<32x512xbf16>
    tpu.vector_store %arg7[%c256, %c0_27], %22 {strides = array<i32>} : memref<1440x512xbf16, #tpu.memory_space<vmem>>, vector<32x512xbf16>,
    %c0_28 = arith.constant 0 : index
    %c100 = arith.constant 100 : index
    %24 = vector.load %arg6[%c0_28, %c100] : memref<32x1024xbf16, #tpu.memory_space<vmem>>, vector<32x512xbf16>
    %c288 = arith.constant 288 : index
    %c0_29 = arith.constant 0 : index
    %25 = vector.load %arg7[%c288, %c0_29] : memref<1440x512xbf16, #tpu.memory_space<vmem>>, vector<32x512xbf16>
    tpu.vector_store %arg7[%c288, %c0_29], %24 {strides = array<i32>} : memref<1440x512xbf16, #tpu.memory_space<vmem>>, vector<32x512xbf16>,
    %c0_30 = arith.constant 0 : index
    %c101 = arith.constant 101 : index
    %26 = vector.load %arg6[%c0_30, %c101] : memref<32x1024xbf16, #tpu.memory_space<vmem>>, vector<32x512xbf16>
    %c320 = arith.constant 320 : index
    %c0_31 = arith.constant 0 : index
    %27 = vector.load %arg7[%c320, %c0_31] : memref<1440x512xbf16, #tpu.memory_space<vmem>>, vector<32x512xbf16>
    tpu.vector_store %arg7[%c320, %c0_31], %26 {strides = array<i32>} : memref<1440x512xbf16, #tpu.memory_space<vmem>>, vector<32x512xbf16>,
    %c0_32 = arith.constant 0 : index
    %c102 = arith.constant 102 : index
    %28 = vector.load %arg6[%c0_32, %c102] : memref<32x1024xbf16, #tpu.memory_space<vmem>>, vector<32x512xbf16>
    %c352 = arith.constant 352 : index
    %c0_33 = arith.constant 0 : index
    %29 = vector.load %arg7[%c352, %c0_33] : memref<1440x512xbf16, #tpu.memory_space<vmem>>, vector<32x512xbf16>
    tpu.vector_store %arg7[%c352, %c0_33], %28 {strides = array<i32>} : memref<1440x512xbf16, #tpu.memory_space<vmem>>, vector<32x512xbf16>,
    %c0_34 = arith.constant 0 : index
    %c110 = arith.constant 110 : index
    %30 = vector.load %arg6[%c0_34, %c110] : memref<32x1024xbf16, #tpu.memory_space<vmem>>, vector<32x512xbf16>
    %c384 = arith.constant 384 : index
    %c0_35 = arith.constant 0 : index
    %31 = vector.load %arg7[%c384, %c0_35] : memref<1440x512xbf16, #tpu.memory_space<vmem>>, vector<32x512xbf16>
    tpu.vector_store %arg7[%c384, %c0_35], %30 {strides = array<i32>} : memref<1440x512xbf16, #tpu.memory_space<vmem>>, vector<32x512xbf16>,
    %c0_36 = arith.constant 0 : index
    %c111 = arith.constant 111 : index
    %32 = vector.load %arg6[%c0_36, %c111] : memref<32x1024xbf16, #tpu.memory_space<vmem>>, vector<32x512xbf16>
    %c416 = arith.constant 416 : index
    %c0_37 = arith.constant 0 : index
    %33 = vector.load %arg7[%c416, %c0_37] : memref<1440x512xbf16, #tpu.memory_space<vmem>>, vector<32x512xbf16>
    tpu.vector_store %arg7[%c416, %c0_37], %32 {strides = array<i32>} : memref<1440x512xbf16, #tpu.memory_space<vmem>>, vector<32x512xbf16>,
    %c0_38 = arith.constant 0 : index
    %c112 = arith.constant 112 : index
    %34 = vector.load %arg6[%c0_38, %c112] : memref<32x1024xbf16, #tpu.memory_space<vmem>>, vector<32x512xbf16>
    %c448 = arith.constant 448 : index
    %c0_39 = arith.constant 0 : index
    %35 = vector.load %arg7[%c448, %c0_39] : memref<1440x512xbf16, #tpu.memory_space<vmem>>, vector<32x512xbf16>
    tpu.vector_store %arg7[%c448, %c0_39], %34 {strides = array<i32>} : memref<1440x512xbf16, #tpu.memory_space<vmem>>, vector<32x512xbf16>,
    %c0_40 = arith.constant 0 : index
    %c120 = arith.constant 120 : index
    %36 = vector.load %arg6[%c0_40, %c120] : memref<32x1024xbf16, #tpu.memory_space<vmem>>, vector<32x512xbf16>
    %c480 = arith.constant 480 : index
    %c0_41 = arith.constant 0 : index
    %37 = vector.load %arg7[%c480, %c0_41] : memref<1440x512xbf16, #tpu.memory_space<vmem>>, vector<32x512xbf16>
    tpu.vector_store %arg7[%c480, %c0_41], %36 {strides = array<i32>} : memref<1440x512xbf16, #tpu.memory_space<vmem>>, vector<32x512xbf16>,
    %c0_42 = arith.constant 0 : index
    %c121 = arith.constant 121 : index
    %38 = vector.load %arg6[%c0_42, %c121] : memref<32x1024xbf16, #tpu.memory_space<vmem>>, vector<32x512xbf16>
    %c512_43 = arith.constant 512 : index
    %c0_44 = arith.constant 0 : index
    %39 = vector.load %arg7[%c512_43, %c0_44] : memref<1440x512xbf16, #tpu.memory_space<vmem>>, vector<32x512xbf16>
    tpu.vector_store %arg7[%c512_43, %c0_44], %38 {strides = array<i32>} : memref<1440x512xbf16, #tpu.memory_space<vmem>>, vector<32x512xbf16>,
    %c0_45 = arith.constant 0 : index
    %c122 = arith.constant 122 : index
    %40 = vector.load %arg6[%c0_45, %c122] : memref<32x1024xbf16, #tpu.memory_space<vmem>>, vector<32x512xbf16>
    %c544 = arith.constant 544 : index
    %c0_46 = arith.constant 0 : index
    %41 = vector.load %arg7[%c544, %c0_46] : memref<1440x512xbf16, #tpu.memory_space<vmem>>, vector<32x512xbf16>
    tpu.vector_store %arg7[%c544, %c0_46], %40 {strides = array<i32>} : memref<1440x512xbf16, #tpu.memory_space<vmem>>, vector<32x512xbf16>,
    %c0_47 = arith.constant 0 : index
    %c200 = arith.constant 200 : index
    %42 = vector.load %arg6[%c0_47, %c200] : memref<32x1024xbf16, #tpu.memory_space<vmem>>, vector<32x512xbf16>
    %c576 = arith.constant 576 : index
    %c0_48 = arith.constant 0 : index
    %43 = vector.load %arg7[%c576, %c0_48] : memref<1440x512xbf16, #tpu.memory_space<vmem>>, vector<32x512xbf16>
    tpu.vector_store %arg7[%c576, %c0_48], %42 {strides = array<i32>} : memref<1440x512xbf16, #tpu.memory_space<vmem>>, vector<32x512xbf16>,
    %c0_49 = arith.constant 0 : index
    %c201 = arith.constant 201 : index
    %44 = vector.load %arg6[%c0_49, %c201] : memref<32x1024xbf16, #tpu.memory_space<vmem>>, vector<32x512xbf16>
    %c608 = arith.constant 608 : index
    %c0_50 = arith.constant 0 : index
    %45 = vector.load %arg7[%c608, %c0_50] : memref<1440x512xbf16, #tpu.memory_space<vmem>>, vector<32x512xbf16>
    tpu.vector_store %arg7[%c608, %c0_50], %44 {strides = array<i32>} : memref<1440x512xbf16, #tpu.memory_space<vmem>>, vector<32x512xbf16>,
    %c0_51 = arith.constant 0 : index
    %c202 = arith.constant 202 : index
    %46 = vector.load %arg6[%c0_51, %c202] : memref<32x1024xbf16, #tpu.memory_space<vmem>>, vector<32x512xbf16>
    %c640 = arith.constant 640 : index
    %c0_52 = arith.constant 0 : index
    %47 = vector.load %arg7[%c640, %c0_52] : memref<1440x512xbf16, #tpu.memory_space<vmem>>, vector<32x512xbf16>
    tpu.vector_store %arg7[%c640, %c0_52], %46 {strides = array<i32>} : memref<1440x512xbf16, #tpu.memory_space<vmem>>, vector<32x512xbf16>,
    %c0_53 = arith.constant 0 : index
    %c210 = arith.constant 210 : index
    %48 = vector.load %arg6[%c0_53, %c210] : memref<32x1024xbf16, #tpu.memory_space<vmem>>, vector<32x512xbf16>
    %c672 = arith.constant 672 : index
    %c0_54 = arith.constant 0 : index
    %49 = vector.load %arg7[%c672, %c0_54] : memref<1440x512xbf16, #tpu.memory_space<vmem>>, vector<32x512xbf16>
    tpu.vector_store %arg7[%c672, %c0_54], %48 {strides = array<i32>} : memref<1440x512xbf16, #tpu.memory_space<vmem>>, vector<32x512xbf16>,
    %c0_55 = arith.constant 0 : index
    %c211 = arith.constant 211 : index
    %50 = vector.load %arg6[%c0_55, %c211] : memref<32x1024xbf16, #tpu.memory_space<vmem>>, vector<32x512xbf16>
    %c704 = arith.constant 704 : index
    %c0_56 = arith.constant 0 : index
    %51 = vector.load %arg7[%c704, %c0_56] : memref<1440x512xbf16, #tpu.memory_space<vmem>>, vector<32x512xbf16>
    tpu.vector_store %arg7[%c704, %c0_56], %50 {strides = array<i32>} : memref<1440x512xbf16, #tpu.memory_space<vmem>>, vector<32x512xbf16>,
    %c0_57 = arith.constant 0 : index
    %c212 = arith.constant 212 : index
    %52 = vector.load %arg6[%c0_57, %c212] : memref<32x1024xbf16, #tpu.memory_space<vmem>>, vector<32x512xbf16>
    %c736 = arith.constant 736 : index
    %c0_58 = arith.constant 0 : index
    %53 = vector.load %arg7[%c736, %c0_58] : memref<1440x512xbf16, #tpu.memory_space<vmem>>, vector<32x512xbf16>
    tpu.vector_store %arg7[%c736, %c0_58], %52 {strides = array<i32>} : memref<1440x512xbf16, #tpu.memory_space<vmem>>, vector<32x512xbf16>,
    %c0_59 = arith.constant 0 : index
    %c220 = arith.constant 220 : index
    %54 = vector.load %arg6[%c0_59, %c220] : memref<32x1024xbf16, #tpu.memory_space<vmem>>, vector<32x512xbf16>
    %c768 = arith.constant 768 : index
    %c0_60 = arith.constant 0 : index
    %55 = vector.load %arg7[%c768, %c0_60] : memref<1440x512xbf16, #tpu.memory_space<vmem>>, vector<32x512xbf16>
    tpu.vector_store %arg7[%c768, %c0_60], %54 {strides = array<i32>} : memref<1440x512xbf16, #tpu.memory_space<vmem>>, vector<32x512xbf16>,
    %c0_61 = arith.constant 0 : index
    %c221 = arith.constant 221 : index
    %56 = vector.load %arg6[%c0_61, %c221] : memref<32x1024xbf16, #tpu.memory_space<vmem>>, vector<32x512xbf16>
    %c800 = arith.constant 800 : index
    %c0_62 = arith.constant 0 : index
    %57 = vector.load %arg7[%c800, %c0_62] : memref<1440x512xbf16, #tpu.memory_space<vmem>>, vector<32x512xbf16>
    tpu.vector_store %arg7[%c800, %c0_62], %56 {strides = array<i32>} : memref<1440x512xbf16, #tpu.memory_space<vmem>>, vector<32x512xbf16>,
    %c0_63 = arith.constant 0 : index
    %c222 = arith.constant 222 : index
    %58 = vector.load %arg6[%c0_63, %c222] : memref<32x1024xbf16, #tpu.memory_space<vmem>>, vector<32x512xbf16>
    %c832 = arith.constant 832 : index
    %c0_64 = arith.constant 0 : index
    %59 = vector.load %arg7[%c832, %c0_64] : memref<1440x512xbf16, #tpu.memory_space<vmem>>, vector<32x512xbf16>
    tpu.vector_store %arg7[%c832, %c0_64], %58 {strides = array<i32>} : memref<1440x512xbf16, #tpu.memory_space<vmem>>, vector<32x512xbf16>,
    %c0_65 = arith.constant 0 : index
    %c300 = arith.constant 300 : index
    %60 = vector.load %arg6[%c0_65, %c300] : memref<32x1024xbf16, #tpu.memory_space<vmem>>, vector<32x512xbf16>
    %c864 = arith.constant 864 : index
    %c0_66 = arith.constant 0 : index
    %61 = vector.load %arg7[%c864, %c0_66] : memref<1440x512xbf16, #tpu.memory_space<vmem>>, vector<32x512xbf16>
    tpu.vector_store %arg7[%c864, %c0_66], %60 {strides = array<i32>} : memref<1440x512xbf16, #tpu.memory_space<vmem>>, vector<32x512xbf16>,
    %c0_67 = arith.constant 0 : index
    %c301 = arith.constant 301 : index
    %62 = vector.load %arg6[%c0_67, %c301] : memref<32x1024xbf16, #tpu.memory_space<vmem>>, vector<32x512xbf16>
    %c896 = arith.constant 896 : index
    %c0_68 = arith.constant 0 : index
    %63 = vector.load %arg7[%c896, %c0_68] : memref<1440x512xbf16, #tpu.memory_space<vmem>>, vector<32x512xbf16>
    tpu.vector_store %arg7[%c896, %c0_68], %62 {strides = array<i32>} : memref<1440x512xbf16, #tpu.memory_space<vmem>>, vector<32x512xbf16>,
    %c0_69 = arith.constant 0 : index
    %c302 = arith.constant 302 : index
    %64 = vector.load %arg6[%c0_69, %c302] : memref<32x1024xbf16, #tpu.memory_space<vmem>>, vector<32x512xbf16>
    %c928 = arith.constant 928 : index
    %c0_70 = arith.constant 0 : index
    %65 = vector.load %arg7[%c928, %c0_70] : memref<1440x512xbf16, #tpu.memory_space<vmem>>, vector<32x512xbf16>
    tpu.vector_store %arg7[%c928, %c0_70], %64 {strides = array<i32>} : memref<1440x512xbf16, #tpu.memory_space<vmem>>, vector<32x512xbf16>,
    %c0_71 = arith.constant 0 : index
    %c310 = arith.constant 310 : index
    %66 = vector.load %arg6[%c0_71, %c310] : memref<32x1024xbf16, #tpu.memory_space<vmem>>, vector<32x512xbf16>
    %c960 = arith.constant 960 : index
    %c0_72 = arith.constant 0 : index
    %67 = vector.load %arg7[%c960, %c0_72] : memref<1440x512xbf16, #tpu.memory_space<vmem>>, vector<32x512xbf16>
    tpu.vector_store %arg7[%c960, %c0_72], %66 {strides = array<i32>} : memref<1440x512xbf16, #tpu.memory_space<vmem>>, vector<32x512xbf16>,
    %c0_73 = arith.constant 0 : index
    %c311 = arith.constant 311 : index
    %68 = vector.load %arg6[%c0_73, %c311] : memref<32x1024xbf16, #tpu.memory_space<vmem>>, vector<32x512xbf16>
    %c992 = arith.constant 992 : index
    %c0_74 = arith.constant 0 : index
    %69 = vector.load %arg7[%c992, %c0_74] : memref<1440x512xbf16, #tpu.memory_space<vmem>>, vector<32x512xbf16>
    tpu.vector_store %arg7[%c992, %c0_74], %68 {strides = array<i32>} : memref<1440x512xbf16, #tpu.memory_space<vmem>>, vector<32x512xbf16>,
    %c0_75 = arith.constant 0 : index
    %c312 = arith.constant 312 : index
    %70 = vector.load %arg6[%c0_75, %c312] : memref<32x1024xbf16, #tpu.memory_space<vmem>>, vector<32x512xbf16>
    %c1024 = arith.constant 1024 : index
    %c0_76 = arith.constant 0 : index
    %71 = vector.load %arg7[%c1024, %c0_76] : memref<1440x512xbf16, #tpu.memory_space<vmem>>, vector<32x512xbf16>
    tpu.vector_store %arg7[%c1024, %c0_76], %70 {strides = array<i32>} : memref<1440x512xbf16, #tpu.memory_space<vmem>>, vector<32x512xbf16>,
    %c0_77 = arith.constant 0 : index
    %c320_78 = arith.constant 320 : index
    %72 = vector.load %arg6[%c0_77, %c320_78] : memref<32x1024xbf16, #tpu.memory_space<vmem>>, vector<32x512xbf16>
    %c1056 = arith.constant 1056 : index
    %c0_79 = arith.constant 0 : index
    %73 = vector.load %arg7[%c1056, %c0_79] : memref<1440x512xbf16, #tpu.memory_space<vmem>>, vector<32x512xbf16>
    tpu.vector_store %arg7[%c1056, %c0_79], %72 {strides = array<i32>} : memref<1440x512xbf16, #tpu.memory_space<vmem>>, vector<32x512xbf16>,
    %c0_80 = arith.constant 0 : index
    %c321 = arith.constant 321 : index
    %74 = vector.load %arg6[%c0_80, %c321] : memref<32x1024xbf16, #tpu.memory_space<vmem>>, vector<32x512xbf16>
    %c1088 = arith.constant 1088 : index
    %c0_81 = arith.constant 0 : index
    %75 = vector.load %arg7[%c1088, %c0_81] : memref<1440x512xbf16, #tpu.memory_space<vmem>>, vector<32x512xbf16>
    tpu.vector_store %arg7[%c1088, %c0_81], %74 {strides = array<i32>} : memref<1440x512xbf16, #tpu.memory_space<vmem>>, vector<32x512xbf16>,
    %c0_82 = arith.constant 0 : index
    %c322 = arith.constant 322 : index
    %76 = vector.load %arg6[%c0_82, %c322] : memref<32x1024xbf16, #tpu.memory_space<vmem>>, vector<32x512xbf16>
    %c1120 = arith.constant 1120 : index
    %c0_83 = arith.constant 0 : index
    %77 = vector.load %arg7[%c1120, %c0_83] : memref<1440x512xbf16, #tpu.memory_space<vmem>>, vector<32x512xbf16>
    tpu.vector_store %arg7[%c1120, %c0_83], %76 {strides = array<i32>} : memref<1440x512xbf16, #tpu.memory_space<vmem>>, vector<32x512xbf16>,
    %c0_84 = arith.constant 0 : index
    %c400 = arith.constant 400 : index
    %78 = vector.load %arg6[%c0_84, %c400] : memref<32x1024xbf16, #tpu.memory_space<vmem>>, vector<32x512xbf16>
    %c1152 = arith.constant 1152 : index
    %c0_85 = arith.constant 0 : index
    %79 = vector.load %arg7[%c1152, %c0_85] : memref<1440x512xbf16, #tpu.memory_space<vmem>>, vector<32x512xbf16>
    tpu.vector_store %arg7[%c1152, %c0_85], %78 {strides = array<i32>} : memref<1440x512xbf16, #tpu.memory_space<vmem>>, vector<32x512xbf16>,
    %c0_86 = arith.constant 0 : index
    %c401 = arith.constant 401 : index
    %80 = vector.load %arg6[%c0_86, %c401] : memref<32x1024xbf16, #tpu.memory_space<vmem>>, vector<32x512xbf16>
    %c1184 = arith.constant 1184 : index
    %c0_87 = arith.constant 0 : index
    %81 = vector.load %arg7[%c1184, %c0_87] : memref<1440x512xbf16, #tpu.memory_space<vmem>>, vector<32x512xbf16>
    tpu.vector_store %arg7[%c1184, %c0_87], %80 {strides = array<i32>} : memref<1440x512xbf16, #tpu.memory_space<vmem>>, vector<32x512xbf16>,
    %c0_88 = arith.constant 0 : index
    %c402 = arith.constant 402 : index
    %82 = vector.load %arg6[%c0_88, %c402] : memref<32x1024xbf16, #tpu.memory_space<vmem>>, vector<32x512xbf16>
    %c1216 = arith.constant 1216 : index
    %c0_89 = arith.constant 0 : index
    %83 = vector.load %arg7[%c1216, %c0_89] : memref<1440x512xbf16, #tpu.memory_space<vmem>>, vector<32x512xbf16>
    tpu.vector_store %arg7[%c1216, %c0_89], %82 {strides = array<i32>} : memref<1440x512xbf16, #tpu.memory_space<vmem>>, vector<32x512xbf16>,
    %c0_90 = arith.constant 0 : index
    %c410 = arith.constant 410 : index
    %84 = vector.load %arg6[%c0_90, %c410] : memref<32x1024xbf16, #tpu.memory_space<vmem>>, vector<32x512xbf16>
    %c1248 = arith.constant 1248 : index
    %c0_91 = arith.constant 0 : index
    %85 = vector.load %arg7[%c1248, %c0_91] : memref<1440x512xbf16, #tpu.memory_space<vmem>>, vector<32x512xbf16>
    tpu.vector_store %arg7[%c1248, %c0_91], %84 {strides = array<i32>} : memref<1440x512xbf16, #tpu.memory_space<vmem>>, vector<32x512xbf16>,
    %c0_92 = arith.constant 0 : index
    %c411 = arith.constant 411 : index
    %86 = vector.load %arg6[%c0_92, %c411] : memref<32x1024xbf16, #tpu.memory_space<vmem>>, vector<32x512xbf16>
    %c1280 = arith.constant 1280 : index
    %c0_93 = arith.constant 0 : index
    %87 = vector.load %arg7[%c1280, %c0_93] : memref<1440x512xbf16, #tpu.memory_space<vmem>>, vector<32x512xbf16>
    tpu.vector_store %arg7[%c1280, %c0_93], %86 {strides = array<i32>} : memref<1440x512xbf16, #tpu.memory_space<vmem>>, vector<32x512xbf16>,
    %c0_94 = arith.constant 0 : index
    %c412 = arith.constant 412 : index
    %88 = vector.load %arg6[%c0_94, %c412] : memref<32x1024xbf16, #tpu.memory_space<vmem>>, vector<32x512xbf16>
    %c1312 = arith.constant 1312 : index
    %c0_95 = arith.constant 0 : index
    %89 = vector.load %arg7[%c1312, %c0_95] : memref<1440x512xbf16, #tpu.memory_space<vmem>>, vector<32x512xbf16>
    tpu.vector_store %arg7[%c1312, %c0_95], %88 {strides = array<i32>} : memref<1440x512xbf16, #tpu.memory_space<vmem>>, vector<32x512xbf16>,
    %c0_96 = arith.constant 0 : index
    %c420 = arith.constant 420 : index
    %90 = vector.load %arg6[%c0_96, %c420] : memref<32x1024xbf16, #tpu.memory_space<vmem>>, vector<32x512xbf16>
    %c1344 = arith.constant 1344 : index
    %c0_97 = arith.constant 0 : index
    %91 = vector.load %arg7[%c1344, %c0_97] : memref<1440x512xbf16, #tpu.memory_space<vmem>>, vector<32x512xbf16>
    tpu.vector_store %arg7[%c1344, %c0_97], %90 {strides = array<i32>} : memref<1440x512xbf16, #tpu.memory_space<vmem>>, vector<32x512xbf16>,
    %c0_98 = arith.constant 0 : index
    %c421 = arith.constant 421 : index
    %92 = vector.load %arg6[%c0_98, %c421] : memref<32x1024xbf16, #tpu.memory_space<vmem>>, vector<32x512xbf16>
    %c1376 = arith.constant 1376 : index
    %c0_99 = arith.constant 0 : index
    %93 = vector.load %arg7[%c1376, %c0_99] : memref<1440x512xbf16, #tpu.memory_space<vmem>>, vector<32x512xbf16>
    tpu.vector_store %arg7[%c1376, %c0_99], %92 {strides = array<i32>} : memref<1440x512xbf16, #tpu.memory_space<vmem>>, vector<32x512xbf16>,
    %c0_100 = arith.constant 0 : index
    %c422 = arith.constant 422 : index
    %94 = vector.load %arg6[%c0_100, %c422] : memref<32x1024xbf16, #tpu.memory_space<vmem>>, vector<32x512xbf16>
    %c1408 = arith.constant 1408 : index
    %c0_101 = arith.constant 0 : index
    %95 = vector.load %arg7[%c1408, %c0_101] : memref<1440x512xbf16, #tpu.memory_space<vmem>>, vector<32x512xbf16>
    tpu.vector_store %arg7[%c1408, %c0_101], %94 {strides = array<i32>} : memref<1440x512xbf16, #tpu.memory_space<vmem>>, vector<32x512xbf16>,
    %c0_102 = arith.constant 0 : index
    %c0_103 = arith.constant 0 : index
    %96 = vector.load %arg2[%c0_102, %c0_103] : memref<32x1440xbf16, #tpu.memory_space<vmem>>, vector<32x1440xbf16>
    %c0_104 = arith.constant 0 : index
    %c0_105 = arith.constant 0 : index
    %97 = vector.load %arg7[%c0_104, %c0_105] : memref<1440x512xbf16, #tpu.memory_space<vmem>>, vector<1440x512xbf16>
    %cst = arith.constant dense<0.000000e+00> : vector<32x512xf32>
    %98 = tpu.matmul %96, %97, %cst {dimension_numbers = #tpu.dot_dimension_numbers<[1], [0], [0], [1], [0, 0, 1, 1], [], []>} : vector<32x1440xbf16>, vector<1440x512xbf16>, vector<32x512xf32> -> vector<32x512xf32>
    %c0_106 = arith.constant 0 : index
    %c0_107 = arith.constant 0 : index
    %c0_108 = arith.constant 0 : index
    %99 = vector.load %arg5[%c0_106, %c0_107, %c0_108] : memref<1x32x512xf32, #tpu.memory_space<vmem>>, vector<1x32x512xf32>
    %100 = vector.shape_cast %99 : vector<1x32x512xf32> to vector<32x512xf32>
    %101 = vector.shape_cast %98 : vector<32x512xf32> to vector<1x32x512xf32>
    tpu.vector_store %arg5[%c0_106, %c0_107, %c0_108], %101 {strides = array<i32>} : memref<1x32x512xf32, #tpu.memory_space<vmem>>, vector<1x32x512xf32>,
    return
  }
  func.func @transform_0(%arg0: i32, %arg1: i32) -> (i32, i32) {
    %c0_i32 = arith.constant 0 : i32
    %c0_i32_0 = arith.constant 0 : i32
    %c0_i32_1 = arith.constant 0 : i32
    return %c0_i32, %c0_i32_0 : i32, i32
  }
  func.func @transform_1(%arg0: i32, %arg1: i32) -> (i32, i32, i32) {
    %c0_i32 = arith.constant 0 : i32
    %c0_i32_0 = arith.constant 0 : i32
    return %arg0, %c0_i32, %arg1 : i32, i32, i32
  }
  func.func @transform_2(%arg0: i32, %arg1: i32) -> (i32, i32, i32) {
    %c1_i32 = arith.constant 1 : i32
    %0 = arith.addi %arg1, %c1_i32 : i32
    %c0_i32 = arith.constant 0 : i32
    %c0_i32_0 = arith.constant 0 : i32
    return %arg0, %c0_i32, %0 : i32, i32, i32
  }
  func.func @transform_3(%arg0: i32, %arg1: i32) -> (i32, i32, i32) {
    %c0_i32 = arith.constant 0 : i32
    %c0_i32_0 = arith.constant 0 : i32
    return %arg0, %c0_i32, %arg1 : i32, i32, i32
  }
}

</mosaic_0001>

<bundles_post_ra>
// kernel: tpu_custom_call.1
= control target key start
LH: loop header
LB: loop body
LE: loop exit
PB: predicated region body
PF: predicated region fallthrough
CT: control target
= control target key end

     0   :  { %s13584_s0 = inlined_call_operand.hbm [shape: bf16[32,1440], index: 0, kind: input, shape index: {}]   ;;  %s13585_s1 = inlined_call_operand.hbm [shape: bf16[2,32,1600], index: 1, kind: input, shape index: {}]   ;;  %s13586_s2 = inlined_call_operand.hbm [shape: bf16[2,32,1600], index: 2, kind: input, shape index: {}]   ;;  %s13587_s3 = inlined_call_operand.hbm [shape: f32[2,32,1024], index: 3, kind: output, shape index: {}]  }
   0x1   :  { %13759 = sst [smem:[#allocation71_spill]] %s13584_s0 }
   0x2   :  { %13760 = sst [smem:[#allocation72_spill]] %s13585_s1 }
   0x3   :  { %13761 = sst [smem:[#allocation73_spill]] %s13587_s3 }
   0x4   :  { %8 = vsyncpa [#allocation5], 0 }
   0x5   :  { %9 = vsyncpa [#allocation8], 0 }
   0x6   :  { %11 = vsyncpa [#allocation8 + $0x1], 0 }
   0x7   :  { %12 = vsyncpa [#allocation6], 0 }
   0x8   :  { %14 = vsyncpa [#allocation6 + $0x1], 0  ;;  %s10273_s12 = smov 0   ;;  %s10275_s13 = smov 0  }
   0x9   :  { %s10277_s14 = smov 0   ;;  %s10279_s15 = smov 0  }
   0xa   :  { %s10281_s16 = smov 0   ;;  %s10283_s17 = smov 0  }
   0xb   :  { %s10285_s18 = smov 0   ;;  %s10287_s19 = smov 0  }
   0xc   :  { %s10289_s20 = smov 0   ;;  %s10291_s21 = smov 0  }
   0xd   :  { %s10293_s22 = smov 0  }
   0xe LB: > { %13762 = sst [smem:[#allocation15_spill]] %s10165_s15  ;;  %s10329_s23 = sadd.s32 4294967295, %s10193_s22   ;;  %s10193_s22 = sphi %s10293_s22, %s20_s22   ;;  %s10189_s21 = sphi %s10291_s21, %s13985_s21   ;;  %s10185_s20 = sphi %s10289_s20, %s13984_s20   ;;  %s10181_s19 = sphi %s10287_s19, %s13983_s19   ;;  %s10177_s18 = sphi %s10285_s18, %s13982_s18   ;;  %s10173_s17 = sphi %s10283_s17, %s13974_s17   ;;  %s10169_s16 = sphi %s10281_s16, %s13981_s16   ;;  %s10165_s15 = sphi %s10279_s15, %s13980_s15   ;;  %s10161_s14 = sphi %s10277_s14, %s13979_s14   ;;  %s10157_s13 = sphi %s10275_s13, %s13978_s13   ;;  %s10153_s12 = sphi %s10273_s12, %s13977_s12  }
   0xf   : > { %13763 = sst [smem:[#allocation16_spill]] %s10173_s17  ;;  %s29_s25 = sadd.s32 1, %s10185_s20 }
  0x10   : > { %s32_s26 = sadd.s32 1, %s10189_s21  ;;  %p30_p0 = scmp.ge.s32.totalorder %s29_s25, 2 }
  0x11   : > { %s62_s27 = sadd.s32 1, %s10173_s17  ;;  %p13589_p1 = scmp.ne.s32.totalorder %s10173_s17, %s10169_s16 }
  0x12   : > { %p70_p2 = scmp.eq.s32.totalorder %s10193_s22, 0  ;;  %s13987_s26 = smov (!%p30_p0, %s32_s26), %s10189_s21 }
  0x13   : > { %s10338_s28 = scalar_select %p30_p0, 0, %s29_s25  }
  0x14   : > { %p10348_p3 = por %p70_p2, %p13589_p1  ;;  %p34_p4 = scmp.ge.s32.totalorder %s13987_s26, 2 }
  0x15   : > { %13764 = sst [smem:[#allocation17_spill]] %s10338_s28  ;;  %s58_s29 = ssub.s32 %s10185_s20, %s10338_s28 }
  0x16   : > { %p13588_p5 = scmp.ne.s32.totalorder %s10169_s16, %s10165_s15  ;;  %p76_p6 = scmp.eq.s32.totalorder %s10329_s23, 0 }
  0x17   : > { %s86_s4 = sadd.s32 1, %s10338_s28  ;;  %s13989_s26 = smov (%p34_p4, %s13987_s26), 0 }
  0x18   : > { %13766 = sst [smem:[#allocation18_spill]] %s13989_s26  ;;  %p10363_p7 = por %p76_p6, %p13588_p5 }
  0x19   : > { %s88_s6 = ssub.s32 %s29_s25, %s86_s4  ;;  %s57_s7 = ssub.s32 %s10189_s21, %s13989_s26 }
  0x1a   : > { %s13767_s5 = scalar_select %p10363_p7, 1, 0 }
  0x1b   : > { %s92_s8 = sadd.s32 1, %s10161_s14  ;;  %s59_s9 = sor.u32 %s58_s29, %s57_s7 }
  0x1c   : > { %s89_s10 = sor.u32 %s88_s6, %s57_s7  ;;  %p60_p8 = scmp.eq.s32.totalorder %s59_s9, 0 }
  0x1d   : > { %p90_p9 = scmp.eq.s32.totalorder %s89_s10, 0  ;;  %p99_p10 = scmp.ne.s32.totalorder %s10161_s14, %s10157_s13 }
  0x1e   : > { %p105_p11 = scmp.ne.s32.totalorder %s10157_s13, %s10153_s12  ;;  %p131_p0 = scmp.eq.s32.totalorder %s10329_s23, 3 }
  0x1f   : > { %s10375_s11 = scalar_select %p60_p8, %s10173_s17, %s62_s27  }
  0x20   : > { %s10378_s24 = scalar_select %p90_p9, %s10161_s14, %s92_s8  }
  0x21   : > { %13768 = sst [smem:[#allocation19_spill]] %s10375_s11  ;;  %p10382_p12 = por %p99_p10, %p70_p2 }
  0x22   : > { %13769 = sst [smem:[#allocation20_spill]] %s10378_s24  ;;  %p10388_p13 = por %p105_p11, %p76_p6 }
  0x23   : > { %s13772_s29 = sadd.s32 4294967294, %s10193_s22   ;;  %p7825_p5 = scmp.ge.s32.totalorder %s10193_s22, 1 }
  0x24   : > { %p137_p4 = scmp.eq.s32.totalorder %s13772_s29, 3  ;;  %p144_p1 = scmp.lt.s32.totalorder %s10193_s22, 5 }
  0x25   : > { %p13773_p8 = scmp.ne.s32.totalorder %s10173_s17, %s10169_s16  ;;  %p13776_p9 = scmp.ne.s32.totalorder %s10169_s16, %s10165_s15 }
  0x26   : > { %p10411_p10 = pnand %p7825_p5, %p144_p1  ;;  %s13780_s0 = sld [smem:[#allocation71_spill]] }
  0x27   : > { %p10400_p7 = por %p131_p0, %p13773_p8  ;;  %p10407_p2 = por %p137_p4, %p13776_p9 }
  0x28   : > { %p9799_p11 = pneg %p10411_p10  ;;  %s10195_s10 = smov [#allocation4]  }
  0x29   : > { %s13774_s12 = scalar_select %p10400_p7, 1, 0 }
  0x2a   : > { %s13777_s27 = scalar_select %p10407_p2, 1, 0 }
  0x2b   : > { %13775 = sst [smem:[#allocation21_spill]] %s13774_s12  ;;  %s157_s29 = sshll.u32 %s10195_s10, 4  ;;  %s158_s29 = int_to_ptr.vmem [resolvable:$true] %s157_s29 }
  0x2c   : > { %13778 = sst [smem:[#allocation22_spill]] %s13777_s27  ;;  %s155_s9 = sshll.u32 %s13780_s0, 4  ;;  %s156_s9 = int_to_ptr.hbm [resolvable:$true] %s155_s9 }
  0x2d   : > { %p9800_p0 = pnand %p9799_p11, %p76_p6  ;;  %s10196_s26 = smov 768  }
  0x2e   : > { %s10197_s28 = smov 48   ;;  %p7827_p1 = scmp.ge.s32.totalorder %s10193_s22, 4 }
  0x2f   : > { %9802 = dma.hbm_to_vmem [thread:$0]  (!%p9800_p0), %s156_s9, 3072, %s158_s29, [#allocation5], %s10196_s26, %s10196_s26, %s10197_s28  }
  0x30   : > { %167 = sbr.rel (%p7827_p1) target bundleno = 99 (0x63), region = 20 }
  0x35   : > { %170 = sbr.rel (!%p10348_p3) target bundleno = 82 (0x52), region = 24  ;;  %s171_s7 = sand.u32 (%p10348_p3), 1, %s10193_s22  }
  0x36   : > { %s173_s8 = sand.u32 (%p10348_p3), 1, %s10173_s17   ;;  %s7829_s10 = sshll.u32 (%p10348_p3), %s10185_s20, 2 }
  0x37   : > { %s7828_s0 = sshll.u32 (%p10348_p3), %s173_s8, 6  ;;  %s10428_s11 = scalar_lea.sflag (%p10348_p3), [#allocation8], %s171_s7 }
  0x38   : > { %s175_s24 = scalar_lea.vmem (%p10348_p3), [#allocation7], %s7828_s0  ;;  %s9790_s27 = smul.u32 (%p10348_p3), 52, %s10189_s21 }
  0x39   : > { %s10431_s15 = sshll.u32 (%p10348_p3), %s175_s24, 4  ;;  %s13781_s1 = sld [smem:[#allocation72_spill]] (%p10348_p3)  ;;  %s194_s15 = int_to_ptr.vmem [resolvable:$true] %s10431_s15 }
  0x3a   : > { %s186_s26 = sadd.s32 %s9790_s27, %s7829_s10 }
  0x3b   : > { %s7832_s28 = sshll.u32 %s186_s26, 2 }
  0x3f   : > { %s188_s29 = scalar_lea.hbm %s13781_s1, %s7832_s28  ;;  %s9993_s0 = scalar_lea.hbm %s13781_s1, 416 }
  0x40   : > { %s191_s12 = sshll.u32 %s188_s29, 4  ;;  %s192_s12 = int_to_ptr.hbm [resolvable:$true] %s191_s12 }
  0x41   : > { %s9982_s3 = sshra.s32 %s192_s12, 4  ;;  %s9983_s3 = int_to_ptr.hbm [resolvable:$true] %s9982_s3 }
  0x42   : > { %s9989_s8 = scalar_lea.hbm %s9983_s3, 64 }
  0x43   : > { %p9990_p3 = scmp.ne.s32.totalorder %s9983_s3, %s9989_s8  ;;  %p9995_p5 = scmp.lt.s32.totalorder %s9993_s0, %s9989_s8 }
  0x45   : > { %p9997_p4 = pnand %p9995_p5, %p9990_p3 }
  0x47   : > { %10000 = shalt.err (!%p9997_p4)
}
  0x48   : > { %s10001_s24 = sshra.s32 %s194_s15, 4  ;;  %s10198_s10 = smov [#allocation7]   ;;  %s10002_s24 = int_to_ptr.vmem [resolvable:$true] %s10001_s24 }
  0x49   : > { %s10008_s27 = scalar_lea.vmem %s10002_s24, 64  ;;  %s10012_s26 = scalar_lea.vmem %s10198_s10, 128 }
  0x4a   : > { %p10009_p8 = scmp.ne.s32.totalorder %s10002_s24, %s10008_s27  ;;  %p10014_p9 = scmp.lt.s32.totalorder %s10012_s26, %s10008_s27 }
  0x4c   : > { %p10016_p11 = pnand %p10014_p9, %p10009_p8 }
  0x4e   : > { %10019 = shalt.err (!%p10016_p11)
}
  0x4f   : > { %s10199_s28 = smov 832   ;;  %s10200_s3 = smov 256  }
  0x50   : > { %s10201_s17 = smov 16  }
  0x51   : > { %199 = dma.hbm_to_vmem [thread:$0]  %s192_s12, 1024, %s194_s15, %s10428_s11, %s10199_s28, %s10200_s3, %s10201_s17  }
  0x52 PF: > { %202 = sbr.rel (!%p10382_p12) target bundleno = 99 (0x63), region = 28  ;;  %s203_s30 = sand.u32 (%p10382_p12), 1, %s10193_s22  }
  0x53   : > { %s205_s9 = sand.u32 (%p10382_p12), 1, %s10161_s14   ;;  %s9402_s8 = sshll.u32 (%p10382_p12), %s10185_s20, 2 }
  0x54   : > { %s7836_s29 = sshll.u32 (%p10382_p12), %s205_s9, 6  ;;  %s204_s7 = scalar_lea.sflag (%p10382_p12), [#allocation8], %s203_s30 }
  0x55   : > { %s207_s0 = scalar_lea.vmem (%p10382_p12), [#allocation9], %s7836_s29  ;;  %s7739_s24 = smul.u32 (%p10382_p12), 52, %s10189_s21 }
  0x56   : > { %s226_s27 = sshll.u32 (%p10382_p12), %s207_s0, 4  ;;  %s10202_s9 = smov (%p10382_p12), [#allocation9]   ;;  %s227_s27 = int_to_ptr.vmem [resolvable:$true] %s226_s27 }
  0x57   : > { %s7740_s10 = sadd.s32 %s9402_s8, %s7739_s24  ;;  %s10040_s3 = sshra.s32 %s227_s27, 4  ;;  %s10041_s3 = int_to_ptr.vmem [resolvable:$true] %s10040_s3 }
  0x58   : > { %s7841_s26 = sshll.u32 %s7740_s10, 2  ;;  %s10047_s17 = scalar_lea.vmem %s10041_s3, 64 }
  0x59   : > { %s7742_s25 = scalar_lea.hbm %s13586_s2, %s7841_s26  ;;  %p10048_p12 = scmp.ne.s32.totalorder %s10041_s3, %s10047_s17 }
  0x5a   : > { %s7743_s12 = scalar_lea.hbm %s7742_s25, 16  ;;  %s10051_s1 = scalar_lea.vmem %s10202_s9, 128 }
  0x5b   : > { %s224_s28 = sshll.u32 %s7743_s12, 4  ;;  %p10053_p0 = scmp.lt.s32.totalorder %s10051_s1, %s10047_s17  ;;  %s225_s28 = int_to_ptr.hbm [resolvable:$true] %s224_s28 }
  0x5d   : > { %p10055_p1 = pnand %p10053_p0, %p10048_p12 }
  0x5f   : > { %10058 = shalt.err (!%p10055_p1)
}
  0x60   : > { %s10203_s30 = smov 832   ;;  %s10204_s29 = smov 256  }
  0x61   : > { %s10205_s8 = smov 16  }
  0x62   : > { %232 = dma.hbm_to_vmem [thread:$0]  %s225_s28, 1024, %s227_s27, %s204_s7, %s10203_s30, %s10204_s29, %s10205_s8  }
  0x63 PF: > { %238 = sbr.rel (%p10411_p10) target bundleno = 1951 (0x79f), region = 32 }
  0x68   : > { %10133 = dma.done.wait (%p76_p6), [#allocation5], 3072  }
  0x69   : > { %10135 = vsyncadd (%p76_p6), [#allocation5], 4294964224  ;;  %s245_s1 = sand.u32 1, %s10329_s23   ;;  %s10462_s0 = sand.u32 1, %s10169_s16  }
  0x6a   : > { %s7847_s24 = sshll.u32 %s10462_s0, 6  ;;  %s246_s7 = scalar_lea.sflag [#allocation8], %s245_s1 }
  0x6b   : > { %s10465_s27 = scalar_lea.vmem [#allocation7], %s7847_s24  ;;  %p13782_p3 = scmp.ne.s32.totalorder %s13767_s5, 0 }
  0x6d   : > { %10137 = dma.done.wait (%p13782_p3), %s246_s7, 1024  }
  0x6e   : > { %10139 = vsyncadd (%p13782_p3), %s246_s7, 4294966272  ;;  %s257_s6 = sand.u32 1, %s10157_s13  }
  0x6f   : > { %s7848_s10 = sshll.u32 %s257_s6, 6 }
  0x70   : > { %s10472_s26 = scalar_lea.vmem [#allocation9], %s7848_s10 }
  0x71   : > { %10141 = dma.done.wait (%p10388_p13), %s246_s7, 1024  }
  0x72   : > { %10143 = vsyncadd (%p10388_p13), %s246_s7, 4294966272  ;;  %v317_v0 = vld [vmem:[%s10472_s26] sm:$0xff]  ;;  %v10480_v1 = vld [vmem:[%s10465_s27 + $0x18] sm:$0xff]  ;;  %s10206_s23 = smov 127   ;;  %s10207_s5 = smov 126   ;;  %vm409_vm0 = vcmask 1043456  }
  0x73   : > { %v10483_v2 = vld [vmem:[%s10465_s27] sm:$0xff]  ;;  %325 = vst [vmem:[#allocation2 + $0x10] sm:$0xff] %v317_v0  ;;  %381 = vrot.lane.b32.xlu2 %v10480_v1, %s10206_s23  ;;  %v319_v3 = vld [vmem:[%s10472_s26 + $0x10] sm:$0xff]  ;;  %v10498_v6 = vld [vmem:[%s10465_s27 + $0x8] sm:$0xff]  ;;  %s10208_s4 = smov 118   ;;  %s10209_s15 = smov 117  }
  0x74   : > { %373 = vrot.lane.b32.xlu0 %v10483_v2, %s10206_s23  ;;  %312 = vst [vmem:[#allocation2 + $0x28] sm:$0xff] %v10480_v1  ;;  %v10493_v4 = vld [vmem:[%s10465_s27 + $0x10] sm:$0xff]  ;;  %v321_v5 = vld [vmem:[%s10472_s26 + $0x20] sm:$0xff]  ;;  %v10502_v7 = vld [vmem:[%s10465_s27 + $0x28] sm:$0xff]  ;;  %vm411_vm1 = vcmask 1039360   ;;  %s10210_s11 = smov 116  }
  0x75   : > { %309 = vst [vmem:[#allocation2] sm:$0xff] %v10483_v2  ;;  %v323_v8 = vld [vmem:[%s10472_s26 + $0x30] sm:$0xff]  ;;  %v10507_v10 = vld [vmem:[%s10465_s27 + $0x20] sm:$0xff]  ;;  %v10514_v11 = vld [vmem:[%s10465_s27 + $0x38] sm:$0xff]  ;;  %vm504_vm2 = vcmask 1031168   ;;  %s10211_s25 = smov 108  }
  0x76   : > { %327 = vst [vmem:[#allocation2 + $0x30] sm:$0xff] %v319_v3  ;;  %v10518_v13 = vld [vmem:[%s10465_s27 + $0x30] sm:$0xff]  ;;  %vm597_vm3 = vcmask 965632   ;;  %s10212_s12 = smov 107   ;;  %vm690_vm4 = vcmask 957440   ;;  %s10213_s28 = smov 106  }
  0x77   : > { %311 = vst [vmem:[#allocation2 + $0x20] sm:$0xff] %v10493_v4  ;;  %vm783_vm5 = vcmask 949248   ;;  %s10214_s3 = smov 28   ;;  %vm876_vm6 = vcmask 883712   ;;  %s10215_s17 = smov 27   ;;  %vm969_vm7 = vcmask 875520  }
  0x78   : > { %310 = vst [vmem:[#allocation2 + $0x8] sm:$0xff] %v10498_v6  ;;  %s10216_s9 = smov 26   ;;  %vm1062_vm8 = vcmask 867328   ;;  %s10217_s30 = smov 18   ;;  %vm1155_vm9 = vcmask 228352   ;;  %vm1248_vm10 = vcmask 220160  }
  0x79   : > { %329 = vst [vmem:[#allocation2 + $0x50] sm:$0xff] %v321_v5  ;;  %s10218_s29 = smov 17   ;;  %s10219_s8 = smov 16   ;;  %vm1341_vm11 = vcmask 211968   ;;  %vm1434_vm12 = vcmask 146432   ;;  %vm1527_vm13 = vcmask 138240  }
  0x7a   : > { %v351_v9 = vld [vmem:[#allocation2 + $0x10] sm:$0xf]  ;;  %314 = vst [vmem:[#allocation2 + $0x48] sm:$0xff] %v10502_v7  ;;  %s10220_s1 = smov 8   ;;  %s10221_s24 = smov 7   ;;  %vm1620_vm14 = vcmask 130048  }
  0x7b   : > { %377 = vrot.lane.b32.xlu1 %v351_v9, %s10206_s23  ;;  %313 = vst [vmem:[#allocation2 + $0x40] sm:$0xff] %v10507_v10  ;;  %v445_v16 = vld [vmem:[#allocation2 + $0x10] sm:$0xf]  ;;  %s10222_s7 = smov 6   ;;  %s10223_s27 = smov 56   ;;  %vm1713_vm15 = vcmask 64512  }
  0x7c   : > { %375 = vrot.lane.b32.xlu0 %v10498_v6, %s10206_s23  ;;  %331 = vst [vmem:[#allocation2 + $0x70] sm:$0xff] %v323_v8  ;;  %v538_v20 = vld [vmem:[#allocation2 + $0x10] sm:$0xf]  ;;  %s10224_s6 = smov 55   ;;  %s10225_s10 = smov 54  }
  0x7d   : > { %v354_v12 = vld [vmem:[#allocation2 + $0x30] sm:$0xf]  ;;  %316 = vst [vmem:[#allocation2 + $0x68] sm:$0xff] %v10514_v11 }
  0x7e   : > { %383 = vrot.lane.b32.xlu2 %v354_v12, %s10206_s23  ;;  %315 = vst [vmem:[#allocation2 + $0x60] sm:$0xff] %v10518_v13  ;;  %v448_v17 = vld [vmem:[#allocation2 + $0x30] sm:$0xf] }
  0x7f   : > { %v541_v21 = vld [vmem:[#allocation2 + $0x30] sm:$0xf] }
  0x80   : > { %v357_v14 = vld [vmem:[#allocation2 + $0x50] sm:$0xf] }
  0x81   : > { %v451_v18 = vld [vmem:[#allocation2 + $0x50] sm:$0xf] }
  0x82   : > { %v544_v22 = vld [vmem:[#allocation2 + $0x50] sm:$0xf] }
  0x83   : > { %379 = vrot.lane.b32.xlu1 %v10493_v4, %s10206_s23  ;;  %v360_v15 = vld [vmem:[#allocation2 + $0x70] sm:$0xf] }
  0x84   : > { %385 = vrot.lane.b32.xlu0 %v10507_v10, %s10206_s23  ;;  %v454_v19 = vld [vmem:[#allocation2 + $0x70] sm:$0xf] }
  0x85   : > { %v547_v23 = vld [vmem:[#allocation2 + $0x70] sm:$0xf] }
  0x86   : > { %389 = vrot.lane.b32.xlu2 %v357_v14, %s10206_s23  ;;  %v631_v25 = vld [vmem:[#allocation2 + $0x10] sm:$0xf] }
  0x87   : > { %v634_v30 = vld [vmem:[#allocation2 + $0x30] sm:$0xf] }
  0x88   : > { %v637_v33 = vld [vmem:[#allocation2 + $0x50] sm:$0xf] }
  0x89   : > { %v640_v36 = vld [vmem:[#allocation2 + $0x70] sm:$0xf] }
  0x8a   : > { %v724_v47 = vld [vmem:[#allocation2 + $0x10] sm:$0xf] }
  0x8b   : > { %387 = vrot.lane.b32.xlu1 %v10502_v7, %s10206_s23  ;;  %v727_v54 = vld [vmem:[#allocation2 + $0x30] sm:$0xf] }
  0x8c   : > { %391 = vrot.lane.b32.xlu0 %v10518_v13, %s10206_s23  ;;  %v730_v3 = vld [vmem:[#allocation2 + $0x50] sm:$0xf] }
  0x8e   : > { %395 = vrot.lane.b32.xlu2 %v360_v15, %s10206_s23 }
  0x93   : > { %393 = vrot.lane.b32.xlu1 %v10514_v11, %s10206_s23  ;;  %s10226_s23 = smov 46  }
  0x94   : > { %467 = vrot.lane.b32.xlu0 %v10483_v2, %s10207_s5 }
  0x96   : > { %471 = vrot.lane.b32.xlu2 %v445_v16, %s10207_s5 }
  0x9b   : > { %469 = vrot.lane.b32.xlu1 %v10498_v6, %s10207_s5 }
  0x9c   : > { %473 = vrot.lane.b32.xlu0 %v10493_v4, %s10207_s5 }
  0x9e   : > { %477 = vrot.lane.b32.xlu2 %v448_v17, %s10207_s5 }
  0xa3   : > { %475 = vrot.lane.b32.xlu1 %v10480_v1, %s10207_s5 }
  0xa4   : > { %479 = vrot.lane.b32.xlu0 %v10507_v10, %s10207_s5 }
  0xa6   : > { %483 = vrot.lane.b32.xlu2 %v451_v18, %s10207_s5 }
  0xab   : > { %481 = vrot.lane.b32.xlu1 %v10502_v7, %s10207_s5 }
  0xac   : > { %485 = vrot.lane.b32.xlu0 %v10518_v13, %s10207_s5 }
  0xae   : > { %489 = vrot.lane.b32.xlu2 %v454_v19, %s10207_s5 }
  0xb3   : > { %487 = vrot.lane.b32.xlu1 %v10514_v11, %s10207_s5  ;;  %s10227_s5 = smov 45  }
  0xb4   : > { %560 = vrot.lane.b32.xlu0 %v10483_v2, %s10208_s4 }
  0xb6   : > { %564 = vrot.lane.b32.xlu2 %v538_v20, %s10208_s4  ;;  %v733_v20 = vld [vmem:[#allocation2 + $0x70] sm:$0xf] }
  0xbb   : > { %562 = vrot.lane.b32.xlu1 %v10498_v6, %s10208_s4 }
  0xbc   : > { %566 = vrot.lane.b32.xlu0 %v10493_v4, %s10208_s4 }
  0xbe   : > { %570 = vrot.lane.b32.xlu2 %v541_v21, %s10208_s4 }
  0xc3   : > { %568 = vrot.lane.b32.xlu1 %v10480_v1, %s10208_s4 }
  0xc4   : > { %572 = vrot.lane.b32.xlu0 %v10507_v10, %s10208_s4 }
  0xc6   : > { %576 = vrot.lane.b32.xlu2 %v544_v22, %s10208_s4 }
  0xcb   : > { %574 = vrot.lane.b32.xlu1 %v10502_v7, %s10208_s4 }
  0xcc   : > { %578 = vrot.lane.b32.xlu0 %v10518_v13, %s10208_s4 }
  0xcd   : > { %v382_v24 = vpop.permute.xlu2 %381 }
  0xce   : > { %582 = vrot.lane.b32.xlu2 %v547_v23, %s10208_s4  ;;  %v401_v26 = vrot.slane %v382_v24, 4 }
  0xd3   : > { %580 = vrot.lane.b32.xlu1 %v10514_v11, %s10208_s4  ;;  %s10228_s4 = smov 44  }
  0xd4   : > { %653 = vrot.lane.b32.xlu0 %v10483_v2, %s10209_s15 }
  0xd6   : > { %657 = vrot.lane.b32.xlu2 %v631_v25, %s10209_s15 }
  0xd8   : > { %v384_v27 = vpop.permute.xlu2 %383 }
  0xd9   : > { %v402_v28 = vrot.slane %v384_v27, 4 }
  0xdb   : > { %655 = vrot.lane.b32.xlu1 %v10498_v6, %s10209_s15  ;;  %v417_v29 = vsel %vm409_vm0, %v401_v26, %v402_v28 }
  0xdc   : > { %659 = vrot.lane.b32.xlu0 %v10493_v4, %s10209_s15  ;;  %v418_v31 = vsel %vm411_vm1, %v382_v24, %v417_v29 }
  0xdd   : > { %438 = vst [vmem:[#allocation3 + $0x58] sm:$0xff] %v418_v31  ;;  %v817_v31 = vld [vmem:[#allocation2 + $0x10] sm:$0xf] }
  0xde   : > { %663 = vrot.lane.b32.xlu2 %v634_v30, %s10209_s15 }
  0xe0   : > { %v390_v32 = vpop.permute.xlu2 %389 }
  0xe1   : > { %v405_v55 = vrot.slane %v390_v32, 4 }
  0xe3   : > { %661 = vrot.lane.b32.xlu1 %v10480_v1, %s10209_s15 }
  0xe4   : > { %665 = vrot.lane.b32.xlu0 %v10507_v10, %s10209_s15 }
  0xe6   : > { %v374_v34 = vpop.permute.xlu0 %373  ;;  %669 = vrot.lane.b32.xlu2 %v637_v33, %s10209_s15 }
  0xe7   : > { %v397_v37 = vrot.slane %v374_v34, 4 }
  0xe8   : > { %v396_v35 = vpop.permute.xlu2 %395 }
  0xe9   : > { %v408_v5 = vrot.slane %v396_v35, 4 }
  0xeb   : > { %667 = vrot.lane.b32.xlu1 %v10502_v7, %s10209_s15 }
  0xec   : > { %671 = vrot.lane.b32.xlu0 %v10518_v13, %s10209_s15 }
  0xed   : > { %v378_v38 = vpop.permute.xlu1 %377 }
  0xee   : > { %v376_v39 = vpop.permute.xlu0 %375  ;;  %v399_v40 = vrot.slane %v378_v38, 4  ;;  %675 = vrot.lane.b32.xlu2 %v640_v36, %s10209_s15 }
  0xef   : > { %v398_v41 = vrot.slane %v376_v39, 4 }
  0xf0   : > { %v10570_v42 = vpop.permute.xlu2 %471 }
  0xf1   : > { %v410_v43 = vsel %vm409_vm0, %v397_v37, %v398_v41  ;;  %v413_v44 = vsel %vm409_vm0, %v398_v41, %v399_v40  ;;  %v493_v21 = vrot.slane %v10570_v42, 4  ;;  %v820_v42 = vld [vmem:[#allocation2 + $0x30] sm:$0xf] }
  0xf2   : > { %v412_v45 = vsel %vm411_vm1, %v374_v34, %v410_v43  ;;  %v414_v46 = vsel %vm411_vm1, %v376_v39, %v413_v44 }
  0xf3   : > { %435 = vst [vmem:[#allocation3 + $0x40] sm:$0xff] %v412_v45  ;;  %673 = vrot.lane.b32.xlu1 %v10514_v11, %s10209_s15  ;;  %s10229_s15 = smov 36  }
  0xf4   : > { %436 = vst [vmem:[#allocation3 + $0x48] sm:$0xff] %v414_v46  ;;  %746 = vrot.lane.b32.xlu0 %v10483_v2, %s10210_s11 }
  0xf5   : > { %v380_v48 = vpop.permute.xlu1 %379 }
  0xf6   : > { %v386_v49 = vpop.permute.xlu0 %385  ;;  %v400_v50 = vrot.slane %v380_v48, 4  ;;  %750 = vrot.lane.b32.xlu2 %v724_v47, %s10210_s11 }
  0xf7   : > { %v403_v56 = vrot.slane %v386_v49, 4 }
  0xf8   : > { %v415_v51 = vsel %vm409_vm0, %v400_v50, %v401_v26  ;;  %v10582_v52 = vpop.permute.xlu2 %477 }
  0xf9   : > { %v416_v53 = vsel %vm411_vm1, %v380_v48, %v415_v51  ;;  %v496_v32 = vrot.slane %v10582_v52, 4 }
  0xfa   : > { %437 = vst [vmem:[#allocation3 + $0x50] sm:$0xff] %v416_v53  ;;  %v823_v53 = vld [vmem:[#allocation2 + $0x50] sm:$0xf] }
  0xfb   : > { %748 = vrot.lane.b32.xlu1 %v10498_v6, %s10210_s11 }
  0xfc   : > { %752 = vrot.lane.b32.xlu0 %v10493_v4, %s10210_s11 }
  0xfd   : > { %v388_v57 = vpop.permute.xlu1 %387 }
  0xfe   : > { %v392_v58 = vpop.permute.xlu0 %391  ;;  %v404_v59 = vrot.slane %v388_v57, 4  ;;  %756 = vrot.lane.b32.xlu2 %v727_v54, %s10210_s11 }
  0xff   : > { %v406_v8 = vrot.slane %v392_v58, 4 }
 0x100   : > { %v421_v60 = vsel %vm409_vm0, %v404_v59, %v405_v55  ;;  %v419_v61 = vsel %vm409_vm0, %v403_v56, %v404_v59  ;;  %v10592_v62 = vpop.permute.xlu2 %483 }
 0x101   : > { %v422_v63 = vsel %vm411_vm1, %v388_v57, %v421_v60  ;;  %v420_v0 = vsel %vm411_vm1, %v386_v49, %v419_v61  ;;  %v499_v43 = vrot.slane %v10592_v62, 4 }
 0x102   : > { %440 = vst [vmem:[#allocation3 + $0x68] sm:$0xff] %v422_v63 }
 0x103   : > { %439 = vst [vmem:[#allocation3 + $0x60] sm:$0xff] %v420_v0  ;;  %754 = vrot.lane.b32.xlu1 %v10480_v1, %s10210_s11  ;;  %v826_v0 = vld [vmem:[#allocation2 + $0x70] sm:$0xf] }
 0x104   : > { %758 = vrot.lane.b32.xlu0 %v10507_v10, %s10210_s11 }
 0x105   : > { %v394_v9 = vpop.permute.xlu1 %393 }
 0x106   : > { %v468_v12 = vpop.permute.xlu0 %467  ;;  %v407_v14 = vrot.slane %v394_v9, 4  ;;  %762 = vrot.lane.b32.xlu2 %v730_v3, %s10210_s11 }
 0x107   : > { %v491_v22 = vrot.slane %v468_v12, 4 }
 0x108   : > { %v425_v15 = vsel %vm409_vm0, %v407_v14, %v408_v5  ;;  %v423_v16 = vsel %vm409_vm0, %v406_v8, %v407_v14  ;;  %v10603_v17 = vpop.permute.xlu2 %489 }
 0x109   : > { %v426_v18 = vsel %vm411_vm1, %v394_v9, %v425_v15  ;;  %v424_v19 = vsel %vm411_vm1, %v392_v58, %v423_v16  ;;  %v502_v54 = vrot.slane %v10603_v17, 4  ;;  %vm1806_vm1 = vcmask 56320  }
 0x10a   : > { %442 = vst [vmem:[#allocation3 + $0x78] sm:$0xff] %v426_v18 }
 0x10b   : > { %441 = vst [vmem:[#allocation3 + $0x70] sm:$0xff] %v424_v19  ;;  %760 = vrot.lane.b32.xlu1 %v10502_v7, %s10210_s11  ;;  %v910_v19 = vld [vmem:[#allocation2 + $0x10] sm:$0xf] }
 0x10c   : > { %764 = vrot.lane.b32.xlu0 %v10518_v13, %s10210_s11 }
 0x10d   : > { %v470_v23 = vpop.permute.xlu1 %469 }
 0x10e   : > { %v474_v24 = vpop.permute.xlu0 %473  ;;  %v492_v25 = vrot.slane %v470_v23, 4  ;;  %768 = vrot.lane.b32.xlu2 %v733_v20, %s10210_s11 }
 0x10f   : > { %v494_v33 = vrot.slane %v474_v24, 4 }
 0x110   : > { %v506_v26 = vsel %vm409_vm0, %v492_v25, %v493_v21  ;;  %v503_v27 = vsel %vm409_vm0, %v491_v22, %v492_v25  ;;  %v10615_v28 = vpop.permute.xlu2 %564 }
 0x111   : > { %v507_v29 = vsel %vm504_vm2, %v470_v23, %v506_v26  ;;  %v505_v30 = vsel %vm504_vm2, %v468_v12, %v503_v27  ;;  %v586_v3 = vrot.slane %v10615_v28, 4 }
 0x112   : > { %529 = vst [vmem:[#allocation3 + $0x88] sm:$0xff] %v507_v29 }
 0x113   : > { %528 = vst [vmem:[#allocation3 + $0x80] sm:$0xff] %v505_v30  ;;  %766 = vrot.lane.b32.xlu1 %v10514_v11, %s10210_s11  ;;  %v913_v30 = vld [vmem:[#allocation2 + $0x30] sm:$0xf]  ;;  %s10230_s11 = smov 35  }
 0x114   : > { %839 = vrot.lane.b32.xlu0 %v10483_v2, %s10211_s25 }
 0x115   : > { %v476_v34 = vpop.permute.xlu1 %475 }
 0x116   : > { %v480_v35 = vpop.permute.xlu0 %479  ;;  %v495_v36 = vrot.slane %v476_v34, 4  ;;  %843 = vrot.lane.b32.xlu2 %v817_v31, %s10211_s25 }
 0x117   : > { %v497_v44 = vrot.slane %v480_v35, 4 }
 0x118   : > { %v510_v37 = vsel %vm409_vm0, %v495_v36, %v496_v32  ;;  %v508_v38 = vsel %vm409_vm0, %v494_v33, %v495_v36  ;;  %v10627_v39 = vpop.permute.xlu2 %570 }
 0x119   : > { %v511_v40 = vsel %vm504_vm2, %v476_v34, %v510_v37  ;;  %v509_v41 = vsel %vm504_vm2, %v474_v24, %v508_v38  ;;  %v589_v20 = vrot.slane %v10627_v39, 4 }
 0x11a   : > { %531 = vst [vmem:[#allocation3 + $0x98] sm:$0xff] %v511_v40 }
 0x11b   : > { %530 = vst [vmem:[#allocation3 + $0x90] sm:$0xff] %v509_v41  ;;  %841 = vrot.lane.b32.xlu1 %v10498_v6, %s10211_s25  ;;  %v916_v41 = vld [vmem:[#allocation2 + $0x50] sm:$0xf] }
 0x11c   : > { %845 = vrot.lane.b32.xlu0 %v10493_v4, %s10211_s25 }
 0x11d   : > { %v482_v45 = vpop.permute.xlu1 %481 }
 0x11e   : > { %v486_v46 = vpop.permute.xlu0 %485  ;;  %v498_v47 = vrot.slane %v482_v45, 4  ;;  %849 = vrot.lane.b32.xlu2 %v820_v42, %s10211_s25 }
 0x11f   : > { %v500_v55 = vrot.slane %v486_v46, 4 }
 0x120   : > { %v514_v48 = vsel %vm409_vm0, %v498_v47, %v499_v43  ;;  %v512_v49 = vsel %vm409_vm0, %v497_v44, %v498_v47  ;;  %v10639_v50 = vpop.permute.xlu2 %576 }
 0x121   : > { %v515_v51 = vsel %vm504_vm2, %v482_v45, %v514_v48  ;;  %v513_v52 = vsel %vm504_vm2, %v480_v35, %v512_v49  ;;  %v592_v31 = vrot.slane %v10639_v50, 4 }
 0x122   : > { %533 = vst [vmem:[#allocation3 + $0xa8] sm:$0xff] %v515_v51 }
 0x123   : > { %532 = vst [vmem:[#allocation3 + $0xa0] sm:$0xff] %v513_v52  ;;  %847 = vrot.lane.b32.xlu1 %v10480_v1, %s10211_s25  ;;  %v919_v52 = vld [vmem:[#allocation2 + $0x70] sm:$0xf] }
 0x124   : > { %851 = vrot.lane.b32.xlu0 %v10507_v10, %s10211_s25 }
 0x125   : > { %v488_v56 = vpop.permute.xlu1 %487 }
 0x126   : > { %v561_v57 = vpop.permute.xlu0 %560  ;;  %v501_v58 = vrot.slane %v488_v56, 4  ;;  %855 = vrot.lane.b32.xlu2 %v823_v53, %s10211_s25 }
 0x127   : > { %v584_v5 = vrot.slane %v561_v57, 4 }
 0x128   : > { %v518_v59 = vsel %vm409_vm0, %v501_v58, %v502_v54  ;;  %v516_v60 = vsel %vm409_vm0, %v500_v55, %v501_v58  ;;  %v10651_v61 = vpop.permute.xlu2 %582 }
 0x129   : > { %v519_v62 = vsel %vm504_vm2, %v488_v56, %v518_v59  ;;  %v517_v63 = vsel %vm504_vm2, %v486_v46, %v516_v60  ;;  %v595_v42 = vrot.slane %v10651_v61, 4  ;;  %vm1899_vm2 = vcmask 48128  }
 0x12a   : > { %535 = vst [vmem:[#allocation3 + $0xb8] sm:$0xff] %v519_v62 }
 0x12b   : > { %534 = vst [vmem:[#allocation3 + $0xb0] sm:$0xff] %v517_v63  ;;  %853 = vrot.lane.b32.xlu1 %v10502_v7, %s10211_s25 }
 0x12c   : > { %857 = vrot.lane.b32.xlu0 %v10518_v13, %s10211_s25 }
 0x12d   : > { %v563_v8 = vpop.permute.xlu1 %562 }
 0x12e   : > { %v567_v9 = vpop.permute.xlu0 %566  ;;  %v585_v12 = vrot.slane %v563_v8, 4  ;;  %861 = vrot.lane.b32.xlu2 %v826_v0, %s10211_s25 }
 0x12f   : > { %v587_v21 = vrot.slane %v567_v9, 4 }
 0x130   : > { %v599_v14 = vsel %vm409_vm0, %v585_v12, %v586_v3  ;;  %v596_v15 = vsel %vm409_vm0, %v584_v5, %v585_v12  ;;  %v10663_v16 = vpop.permute.xlu2 %657  ;;  %v1003_v5 = vld [vmem:[#allocation2 + $0x10] sm:$0xf] }
 0x131   : > { %v600_v17 = vsel %vm597_vm3, %v563_v8, %v599_v14  ;;  %v598_v18 = vsel %vm597_vm3, %v561_v57, %v596_v15  ;;  %v679_v53 = vrot.slane %v10663_v16, 4 }
 0x132   : > { %622 = vst [vmem:[#allocation3 + $0xc8] sm:$0xff] %v600_v17 }
 0x133   : > { %621 = vst [vmem:[#allocation3 + $0xc0] sm:$0xff] %v598_v18  ;;  %859 = vrot.lane.b32.xlu1 %v10514_v11, %s10211_s25  ;;  %s10231_s25 = smov 34  }
 0x134   : > { %932 = vrot.lane.b32.xlu0 %v10483_v2, %s10212_s12 }
 0x135   : > { %v569_v22 = vpop.permute.xlu1 %568 }
 0x136   : > { %v573_v23 = vpop.permute.xlu0 %572  ;;  %v588_v24 = vrot.slane %v569_v22, 4  ;;  %936 = vrot.lane.b32.xlu2 %v910_v19, %s10212_s12 }
 0x137   : > { %v590_v32 = vrot.slane %v573_v23, 4 }
 0x138   : > { %v603_v25 = vsel %vm409_vm0, %v588_v24, %v589_v20  ;;  %v601_v26 = vsel %vm409_vm0, %v587_v21, %v588_v24  ;;  %v10675_v27 = vpop.permute.xlu2 %663  ;;  %v9452_v21 = vld [vmem:[#allocation3 + $0xac] sm:$0xf0] }
 0x139   : > { %v604_v28 = vsel %vm597_vm3, %v569_v22, %v603_v25  ;;  %v602_v29 = vsel %vm597_vm3, %v567_v9, %v601_v26  ;;  %v682_v8 = vrot.slane %v10675_v27, 4  ;;  %v8028_v25 = vld [vmem:[#allocation3 + $0xa0] sm:$0xf]  ;;  %v1006_v27 = vld [vmem:[#allocation2 + $0x30] sm:$0xf] }
 0x13a   : > { %624 = vst [vmem:[#allocation3 + $0xd8] sm:$0xff] %v604_v28  ;;  %v8044_v17 = vld [vmem:[#allocation3 + $0xc0] sm:$0xf]  ;;  %v8029_v26 = vor.u32 %v9452_v21, %v8028_v25 }
 0x13b   : > { %623 = vst [vmem:[#allocation3 + $0xd0] sm:$0xff] %v602_v29  ;;  %934 = vrot.lane.b32.xlu1 %v10498_v6, %s10212_s12 }
 0x13c   : > { %938 = vrot.lane.b32.xlu0 %v10493_v4, %s10212_s12 }
 0x13d   : > { %v575_v33 = vpop.permute.xlu1 %574 }
 0x13e   : > { %v579_v34 = vpop.permute.xlu0 %578  ;;  %v591_v35 = vrot.slane %v575_v33, 4  ;;  %942 = vrot.lane.b32.xlu2 %v913_v30, %s10212_s12  ;;  %v9448_v30 = vld [vmem:[#allocation3 + $0x8c] sm:$0xf0] }
 0x13f   : > { %v593_v43 = vrot.slane %v579_v34, 4 }
 0x140   : > { %v607_v36 = vsel %vm409_vm0, %v591_v35, %v592_v31  ;;  %v605_v37 = vsel %vm409_vm0, %v590_v32, %v591_v35  ;;  %v10687_v38 = vpop.permute.xlu2 %669 }
 0x141   : > { %v608_v39 = vsel %vm597_vm3, %v575_v33, %v607_v36  ;;  %v606_v40 = vsel %vm597_vm3, %v573_v23, %v605_v37  ;;  %v685_v28 = vrot.slane %v10687_v38, 4 }
 0x142   : > { %626 = vst [vmem:[#allocation3 + $0xe8] sm:$0xff] %v608_v39  ;;  %v9456_v12 = vld [vmem:[#allocation3 + $0xcc] sm:$0xf0] }
 0x143   : > { %625 = vst [vmem:[#allocation3 + $0xe0] sm:$0xff] %v606_v40  ;;  %940 = vrot.lane.b32.xlu1 %v10480_v1, %s10212_s12  ;;  %v8045_v18 = vor.u32 %v9456_v12, %v8044_v17  ;;  %v9444_v39 = vld [vmem:[#allocation3 + $0x6c] sm:$0xf0] }
 0x144   : > { %944 = vrot.lane.b32.xlu0 %v10507_v10, %s10212_s12 }
 0x145   : > { %v581_v44 = vpop.permute.xlu1 %580 }
 0x146   : > { %v654_v45 = vpop.permute.xlu0 %653  ;;  %v594_v46 = vrot.slane %v581_v44, 4  ;;  %948 = vrot.lane.b32.xlu2 %v916_v41, %s10212_s12 }
 0x147   : > { %v677_v54 = vrot.slane %v654_v45, 4 }
 0x148   : > { %v611_v47 = vsel %vm409_vm0, %v594_v46, %v595_v42  ;;  %v609_v48 = vsel %vm409_vm0, %v593_v43, %v594_v46  ;;  %v10699_v49 = vpop.permute.xlu2 %675  ;;  %v7996_v42 = vld [vmem:[#allocation3 + $0x60] sm:$0xf] }
 0x149   : > { %v612_v50 = vsel %vm597_vm3, %v581_v44, %v611_v47  ;;  %v610_v51 = vsel %vm597_vm3, %v579_v34, %v609_v48  ;;  %v8012_v34 = vld [vmem:[#allocation3 + $0x80] sm:$0xf]  ;;  %v7997_v43 = vor.u32 %v9444_v39, %v7996_v42  ;;  %v1009_v44 = vld [vmem:[#allocation2 + $0x50] sm:$0xf]  ;;  %vm1992_vm3 = vcmask 457728  }
 0x14a   : > { %628 = vst [vmem:[#allocation3 + $0xf8] sm:$0xff] %v612_v50  ;;  %v8060_v63 = vld [vmem:[#allocation3 + $0xe0] sm:$0xf]  ;;  %v8013_v35 = vor.u32 %v9448_v30, %v8012_v34  ;;  %v9440_v47 = vld [vmem:[#allocation3 + $0x4c] sm:$0xf0] }
 0x14b   : > { %627 = vst [vmem:[#allocation3 + $0xf0] sm:$0xff] %v610_v51  ;;  %946 = vrot.lane.b32.xlu1 %v10502_v7, %s10212_s12 }
 0x14c   : > { %950 = vrot.lane.b32.xlu0 %v10518_v13, %s10212_s12 }
 0x14d   : > { %v656_v55 = vpop.permute.xlu1 %655 }
 0x14e   : > { %v660_v56 = vpop.permute.xlu0 %659  ;;  %v678_v57 = vrot.slane %v656_v55, 4  ;;  %954 = vrot.lane.b32.xlu2 %v919_v52, %s10212_s12  ;;  %v7980_v52 = vld [vmem:[#allocation3 + $0x40] sm:$0xf] }
 0x14f   : > { %v680_v9 = vrot.slane %v660_v56, 4 }
 0x150   : > { %v692_v58 = vsel %vm409_vm0, %v678_v57, %v679_v53  ;;  %v689_v59 = vsel %vm409_vm0, %v677_v54, %v678_v57  ;;  %v10711_v60 = vpop.permute.xlu2 %750  ;;  %v7981_v53 = vor.u32 %v9440_v47, %v7980_v52  ;;  %v1189_v52 = vld [vmem:[#allocation2 + $0x10] sm:$0xf] }
 0x151   : > { %v693_v61 = vsel %vm690_vm4, %v656_v55, %v692_v58  ;;  %v691_v62 = vsel %vm690_vm4, %v654_v45, %v689_v59  ;;  %v688_v45 = vrot.slane %v10699_v49, 4  ;;  %v1012_v58 = vld [vmem:[#allocation2 + $0x70] sm:$0xf]  ;;  %v772_v59 = vrot.slane %v10711_v60, 4 }
 0x152   : > { %715 = vst [vmem:[#allocation3 + $0x108] sm:$0xff] %v693_v61  ;;  %v9460_v0 = vld [vmem:[#allocation3 + $0xec] sm:$0xf0] }
 0x153   : > { %714 = vst [vmem:[#allocation3 + $0x100] sm:$0xff] %v691_v62  ;;  %952 = vrot.lane.b32.xlu1 %v10514_v11, %s10212_s12  ;;  %v8061_v3 = vor.u32 %v9460_v0, %v8060_v63  ;;  %v1096_v60 = vld [vmem:[#allocation2 + $0x10] sm:$0xf]  ;;  %s10233_s12 = smov 83  }
 0x154   : > { %1025 = vrot.lane.b32.xlu0 %v10483_v2, %s10213_s28 }
 0x155   : > { %6751 = vmatpush.bf16.msra.mxu0 %v8061_v3  ;;  %v662_v14 = vpop.permute.xlu1 %661 }
 0x156   : > { %v666_v15 = vpop.permute.xlu0 %665  ;;  %v681_v16 = vrot.slane %v662_v14, 4  ;;  %1029 = vrot.lane.b32.xlu2 %v1003_v5, %s10213_s28 }
 0x157   : > { %v683_v29 = vrot.slane %v666_v15, 4 }
 0x158   : > { %v696_v19 = vsel %vm409_vm0, %v681_v16, %v682_v8  ;;  %v694_v20 = vsel %vm409_vm0, %v680_v9, %v681_v16  ;;  %v10723_v22 = vpop.permute.xlu2 %756 }
 0x159   : > { %v697_v23 = vsel %vm690_vm4, %v662_v14, %v696_v19  ;;  %v695_v24 = vsel %vm690_vm4, %v660_v56, %v694_v20  ;;  %6752 = vmatpush.bf16.msra.mxu0 %v8045_v18  ;;  %v775_v14 = vrot.slane %v10723_v22, 4 }
 0x15a   : > { %717 = vst [vmem:[#allocation3 + $0x118] sm:$0xff] %v697_v23 }
 0x15b   : > { %716 = vst [vmem:[#allocation3 + $0x110] sm:$0xff] %v695_v24  ;;  %1027 = vrot.lane.b32.xlu1 %v10498_v6, %s10213_s28 }
 0x15c   : > { %1031 = vrot.lane.b32.xlu0 %v10493_v4, %s10213_s28 }
 0x15d   : > { %6753 = vmatpush.bf16.msra.mxu0 %v8029_v26  ;;  %v668_v31 = vpop.permute.xlu1 %667 }
 0x15e   : > { %v672_v32 = vpop.permute.xlu0 %671  ;;  %v684_v33 = vrot.slane %v668_v31, 4  ;;  %1035 = vrot.lane.b32.xlu2 %v1006_v27, %s10213_s28 }
 0x15f   : > { %v686_v46 = vrot.slane %v672_v32, 4 }
 0x160   : > { %v700_v36 = vsel %vm409_vm0, %v684_v33, %v685_v28  ;;  %v698_v37 = vsel %vm409_vm0, %v683_v29, %v684_v33  ;;  %v10735_v40 = vpop.permute.xlu2 %762 }
 0x161   : > { %v701_v41 = vsel %vm690_vm4, %v668_v31, %v700_v36  ;;  %v699_v38 = vsel %vm690_vm4, %v666_v15, %v698_v37  ;;  %6754 = vmatpush.bf16.msra.mxu0 %v8013_v35  ;;  %v778_v22 = vrot.slane %v10735_v40, 4 }
 0x162   : > { %719 = vst [vmem:[#allocation3 + $0x128] sm:$0xff] %v701_v41 }
 0x163   : > { %718 = vst [vmem:[#allocation3 + $0x120] sm:$0xff] %v699_v38  ;;  %1033 = vrot.lane.b32.xlu1 %v10480_v1, %s10213_s28 }
 0x164   : > { %1037 = vrot.lane.b32.xlu0 %v10507_v10, %s10213_s28 }
 0x165   : > { %6755 = vmatpush.bf16.msra.mxu0 %v7997_v43  ;;  %v674_v48 = vpop.permute.xlu1 %673 }
 0x166   : > { %v747_v50 = vpop.permute.xlu0 %746  ;;  %v687_v51 = vrot.slane %v674_v48, 4  ;;  %1041 = vrot.lane.b32.xlu2 %v1009_v44, %s10213_s28 }
 0x167   : > { %v770_v61 = vrot.slane %v747_v50, 4 }
 0x168   : > { %v704_v54 = vsel %vm409_vm0, %v687_v51, %v688_v45  ;;  %v702_v55 = vsel %vm409_vm0, %v686_v46, %v687_v51  ;;  %v10747_v56 = vpop.permute.xlu2 %768 }
 0x169   : > { %v705_v57 = vsel %vm690_vm4, %v674_v48, %v704_v54  ;;  %v703_v49 = vsel %vm690_vm4, %v672_v32, %v702_v55  ;;  %6756 = vmatpush.bf16.msra.mxu0 %v7981_v53  ;;  %v781_v33 = vrot.slane %v10747_v56, 4  ;;  %vm2085_vm4 = vcmask 449536  }
 0x16a   : > { %721 = vst [vmem:[#allocation3 + $0x138] sm:$0xff] %v705_v57 }
 0x16b   : > { %720 = vst [vmem:[#allocation3 + $0x130] sm:$0xff] %v703_v49  ;;  %1039 = vrot.lane.b32.xlu1 %v10502_v7, %s10213_s28 }
 0x16c   : > { %1043 = vrot.lane.b32.xlu0 %v10518_v13, %s10213_s28 }
 0x16d   : > { %v749_v62 = vpop.permute.xlu1 %748 }
 0x16e   : > { %v753_v63 = vpop.permute.xlu0 %752  ;;  %v771_v0 = vrot.slane %v749_v62, 4  ;;  %1047 = vrot.lane.b32.xlu2 %v1012_v58, %s10213_s28 }
 0x16f   : > { %v773_v15 = vrot.slane %v753_v63, 4 }
 0x170   : > { %v785_v3 = vsel %vm409_vm0, %v771_v0, %v772_v59  ;;  %v782_v5 = vsel %vm409_vm0, %v770_v61, %v771_v0  ;;  %v10759_v8 = vpop.permute.xlu2 %843  ;;  %v10821_v59 = vld [vmem:[#allocation2 + $0x8] sm:$0xff]  ;;  %v10825_v61 = vld [vmem:[#allocation2 + $0x20] sm:$0xff]  ;;  %v1192_v0 = vld [vmem:[#allocation2 + $0x30] sm:$0xf] }
 0x171   : > { %v786_v9 = vsel %vm783_vm5, %v749_v62, %v785_v3  ;;  %v784_v12 = vsel %vm783_vm5, %v747_v50, %v782_v5  ;;  %v865_v42 = vrot.slane %v10759_v8, 4 }
 0x172   : > { %808 = vst [vmem:[#allocation3 + $0x148] sm:$0xff] %v786_v9 }
 0x173   : > { %807 = vst [vmem:[#allocation3 + $0x140] sm:$0xff] %v784_v12  ;;  %1045 = vrot.lane.b32.xlu1 %v10514_v11, %s10213_s28  ;;  %s10234_s28 = smov 82  }
 0x174   : > { %1118 = vrot.lane.b32.xlu0 %v10483_v2, %s10214_s3  ;;  %v1099_v2 = vld [vmem:[#allocation2 + $0x30] sm:$0xf] }
 0x175   : > { %v755_v16 = vpop.permute.xlu1 %754 }
 0x176   : > { %v759_v17 = vpop.permute.xlu0 %758  ;;  %v774_v18 = vrot.slane %v755_v16, 4  ;;  %1122 = vrot.lane.b32.xlu2 %v1096_v60, %s10214_s3 }
 0x177   : > { %v776_v25 = vrot.slane %v759_v17, 4 }
 0x178   : > { %v789_v19 = vsel %vm409_vm0, %v774_v18, %v775_v14  ;;  %v787_v20 = vsel %vm409_vm0, %v773_v15, %v774_v18  ;;  %v10771_v21 = vpop.permute.xlu2 %849  ;;  %v10837_v15 = vld [vmem:[#allocation2 + $0x28] sm:$0xff] }
 0x179   : > { %v790_v23 = vsel %vm783_vm5, %v755_v16, %v789_v19  ;;  %v788_v24 = vsel %vm783_vm5, %v753_v63, %v787_v20  ;;  %v868_v53 = vrot.slane %v10771_v21, 4  ;;  %v1195_v20 = vld [vmem:[#allocation2 + $0x50] sm:$0xf] }
 0x17a   : > { %810 = vst [vmem:[#allocation3 + $0x158] sm:$0xff] %v790_v23 }
 0x17b   : > { %809 = vst [vmem:[#allocation3 + $0x150] sm:$0xff] %v788_v24  ;;  %1120 = vrot.lane.b32.xlu1 %v10498_v6, %s10214_s3 }
 0x17c   : > { %1124 = vrot.lane.b32.xlu0 %v10493_v4, %s10214_s3  ;;  %v1102_v4 = vld [vmem:[#allocation2 + $0x50] sm:$0xf] }
 0x17d   : > { %v761_v26 = vpop.permute.xlu1 %760 }
 0x17e   : > { %v765_v27 = vpop.permute.xlu0 %764  ;;  %v777_v28 = vrot.slane %v761_v26, 4  ;;  %1128 = vrot.lane.b32.xlu2 %v1099_v2, %s10214_s3 }
 0x17f   : > { %v779_v34 = vrot.slane %v765_v27, 4 }
 0x180   : > { %v793_v29 = vsel %vm409_vm0, %v777_v28, %v778_v22  ;;  %v791_v30 = vsel %vm409_vm0, %v776_v25, %v777_v28  ;;  %v10783_v31 = vpop.permute.xlu2 %855 }
 0x181   : > { %v794_v6 = vsel %vm783_vm5, %v761_v26, %v793_v29  ;;  %v792_v32 = vsel %vm783_vm5, %v759_v17, %v791_v30  ;;  %v871_v3 = vrot.slane %v10783_v31, 4  ;;  %v10841_v17 = vld [vmem:[#allocation2 + $0x40] sm:$0xff] }
 0x182   : > { %812 = vst [vmem:[#allocation3 + $0x168] sm:$0xff] %v794_v6  ;;  %v10857_v29 = vld [vmem:[#allocation2 + $0x60] sm:$0xff]  ;;  %v1198_v6 = vld [vmem:[#allocation2 + $0x70] sm:$0xf] }
 0x183   : > { %811 = vst [vmem:[#allocation3 + $0x160] sm:$0xff] %v792_v32  ;;  %1126 = vrot.lane.b32.xlu1 %v10480_v1, %s10214_s3 }
 0x184   : > { %1130 = vrot.lane.b32.xlu0 %v10507_v10, %s10214_s3  ;;  %v1105_v10 = vld [vmem:[#allocation2 + $0x70] sm:$0xf] }
 0x185   : > { %v767_v35 = vpop.permute.xlu1 %766 }
 0x186   : > { %v840_v36 = vpop.permute.xlu0 %839  ;;  %v780_v37 = vrot.slane %v767_v35, 4  ;;  %1134 = vrot.lane.b32.xlu2 %v1102_v4, %s10214_s3 }
 0x187   : > { %v863_v43 = vrot.slane %v840_v36, 4 }
 0x188   : > { %v797_v39 = vsel %vm409_vm0, %v780_v37, %v781_v33  ;;  %v795_v40 = vsel %vm409_vm0, %v779_v34, %v780_v37  ;;  %v10795_v41 = vpop.permute.xlu2 %861 }
 0x189   : > { %v798_v1 = vsel %vm783_vm5, %v767_v35, %v797_v39  ;;  %v796_v38 = vsel %vm783_vm5, %v765_v27, %v795_v40  ;;  %v874_v21 = vrot.slane %v10795_v41, 4  ;;  %v10853_v27 = vld [vmem:[#allocation2 + $0x48] sm:$0xff]  ;;  %vm2178_vm5 = vcmask 441344  }
 0x18a   : > { %814 = vst [vmem:[#allocation3 + $0x178] sm:$0xff] %v798_v1  ;;  %v10869_v39 = vld [vmem:[#allocation2 + $0x68] sm:$0xff] }
 0x18b   : > { %813 = vst [vmem:[#allocation3 + $0x170] sm:$0xff] %v796_v38  ;;  %1132 = vrot.lane.b32.xlu1 %v10502_v7, %s10214_s3  ;;  %v10809_v7 = vld [vmem:[#allocation2] sm:$0xff]  ;;  %v1282_v38 = vld [vmem:[#allocation2 + $0x10] sm:$0xf] }
 0x18c   : > { %1136 = vrot.lane.b32.xlu0 %v10518_v13, %s10214_s3 }
 0x18d   : > { %v842_v44 = vpop.permute.xlu1 %841 }
 0x18e   : > { %v846_v45 = vpop.permute.xlu0 %845  ;;  %v864_v46 = vrot.slane %v842_v44, 4  ;;  %1140 = vrot.lane.b32.xlu2 %v1105_v10, %s10214_s3 }
 0x18f   : > { %v866_v54 = vrot.slane %v846_v45, 4 }
 0x190   : > { %v878_v47 = vsel %vm409_vm0, %v864_v46, %v865_v42  ;;  %v875_v48 = vsel %vm409_vm0, %v863_v43, %v864_v46  ;;  %v10807_v50 = vpop.permute.xlu2 %936 }
 0x191   : > { %v879_v51 = vsel %vm876_vm6, %v842_v44, %v878_v47  ;;  %v877_v13 = vsel %vm876_vm6, %v840_v36, %v875_v48  ;;  %v958_v32 = vrot.slane %v10807_v50, 4 }
 0x192   : > { %901 = vst [vmem:[#allocation3 + $0x188] sm:$0xff] %v879_v51 }
 0x193   : > { %900 = vst [vmem:[#allocation3 + $0x180] sm:$0xff] %v877_v13  ;;  %1138 = vrot.lane.b32.xlu1 %v10514_v11, %s10214_s3  ;;  %v1285_v13 = vld [vmem:[#allocation2 + $0x30] sm:$0xf]  ;;  %s10235_s3 = smov 73  }
 0x194   : > { %1211 = vrot.lane.b32.xlu0 %v10809_v7, %s10215_s17 }
 0x195   : > { %v848_v55 = vpop.permute.xlu1 %847 }
 0x196   : > { %v852_v56 = vpop.permute.xlu0 %851  ;;  %v867_v57 = vrot.slane %v848_v55, 4  ;;  %1215 = vrot.lane.b32.xlu2 %v1189_v52, %s10215_s17 }
 0x197   : > { %v869_v5 = vrot.slane %v852_v56, 4 }
 0x198   : > { %v882_v49 = vsel %vm409_vm0, %v867_v57, %v868_v53  ;;  %v880_v58 = vsel %vm409_vm0, %v866_v54, %v867_v57  ;;  %v10823_v11 = vpop.permute.xlu2 %942 }
 0x199   : > { %v883_v62 = vsel %vm876_vm6, %v848_v55, %v882_v49  ;;  %v881_v63 = vsel %vm876_vm6, %v846_v45, %v880_v58  ;;  %v961_v10 = vrot.slane %v10823_v11, 4 }
 0x19a   : > { %903 = vst [vmem:[#allocation3 + $0x198] sm:$0xff] %v883_v62 }
 0x19b   : > { %902 = vst [vmem:[#allocation3 + $0x190] sm:$0xff] %v881_v63  ;;  %1213 = vrot.lane.b32.xlu1 %v10821_v59, %s10215_s17  ;;  %v1288_v63 = vld [vmem:[#allocation2 + $0x50] sm:$0xf] }
 0x19c   : > { %1217 = vrot.lane.b32.xlu0 %v10825_v61, %s10215_s17 }
 0x19d   : > { %v854_v8 = vpop.permute.xlu1 %853 }
 0x19e   : > { %v858_v9 = vpop.permute.xlu0 %857  ;;  %v870_v12 = vrot.slane %v854_v8, 4  ;;  %1221 = vrot.lane.b32.xlu2 %v1192_v0, %s10215_s17 }
 0x19f   : > { %v872_v23 = vrot.slane %v858_v9, 4 }
 0x1a0   : > { %v886_v60 = vsel %vm409_vm0, %v870_v12, %v871_v3  ;;  %v884_v14 = vsel %vm409_vm0, %v869_v5, %v870_v12  ;;  %v10839_v16 = vpop.permute.xlu2 %948 }
 0x1a1   : > { %v887_v18 = vsel %vm876_vm6, %v854_v8, %v886_v60  ;;  %v885_v19 = vsel %vm876_vm6, %v852_v56, %v884_v14  ;;  %v964_v52 = vrot.slane %v10839_v16, 4 }
 0x1a2   : > { %905 = vst [vmem:[#allocation3 + $0x1a8] sm:$0xff] %v887_v18 }
 0x1a3   : > { %904 = vst [vmem:[#allocation3 + $0x1a0] sm:$0xff] %v885_v19  ;;  %1219 = vrot.lane.b32.xlu1 %v10837_v15, %s10215_s17  ;;  %v1291_v19 = vld [vmem:[#allocation2 + $0x70] sm:$0xf] }
 0x1a4   : > { %1223 = vrot.lane.b32.xlu0 %v10841_v17, %s10215_s17 }
 0x1a5   : > { %v860_v24 = vpop.permute.xlu1 %859 }
 0x1a6   : > { %v933_v2 = vpop.permute.xlu0 %932  ;;  %v873_v22 = vrot.slane %v860_v24, 4  ;;  %1227 = vrot.lane.b32.xlu2 %v1195_v20, %s10215_s17 }
 0x1a7   : > { %v956_v4 = vrot.slane %v933_v2, 4 }
 0x1a8   : > { %v890_v25 = vsel %vm409_vm0, %v873_v22, %v874_v21  ;;  %v888_v26 = vsel %vm409_vm0, %v872_v23, %v873_v22  ;;  %v10855_v28 = vpop.permute.xlu2 %954 }
 0x1a9   : > { %v891_v30 = vsel %vm876_vm6, %v860_v24, %v890_v25  ;;  %v889_v31 = vsel %vm876_vm6, %v858_v9, %v888_v26  ;;  %v967_v0 = vrot.slane %v10855_v28, 4  ;;  %vm2271_vm6 = vcmask 375808  }
 0x1aa   : > { %907 = vst [vmem:[#allocation3 + $0x1b8] sm:$0xff] %v891_v30 }
 0x1ab   : > { %906 = vst [vmem:[#allocation3 + $0x1b0] sm:$0xff] %v889_v31  ;;  %1225 = vrot.lane.b32.xlu1 %v10853_v27, %s10215_s17 }
 0x1ac   : > { %1229 = vrot.lane.b32.xlu0 %v10857_v29, %s10215_s17 }
 0x1ad   : > { %v935_v33 = vpop.permute.xlu1 %934 }
 0x1ae   : > { %v939_v34 = vpop.permute.xlu0 %938  ;;  %v957_v35 = vrot.slane %v935_v33, 4  ;;  %1233 = vrot.lane.b32.xlu2 %v1198_v6, %s10215_s17 }
 0x1af   : > { %v959_v42 = vrot.slane %v939_v34, 4 }
 0x1b0   : > { %v971_v36 = vsel %vm409_vm0, %v957_v35, %v958_v32  ;;  %v968_v37 = vsel %vm409_vm0, %v956_v4, %v957_v35  ;;  %v10871_v40 = vpop.permute.xlu2 %1029  ;;  %v1375_v4 = vld [vmem:[#allocation2 + $0x10] sm:$0xf] }
 0x1b1   : > { %v972_v41 = vsel %vm969_vm7, %v935_v33, %v971_v36  ;;  %v970_v1 = vsel %vm969_vm7, %v933_v2, %v968_v37  ;;  %v1051_v20 = vrot.slane %v10871_v40, 4 }
 0x1b2   : > { %994 = vst [vmem:[#allocation3 + $0x1c8] sm:$0xff] %v972_v41 }
 0x1b3   : > { %993 = vst [vmem:[#allocation3 + $0x1c0] sm:$0xff] %v970_v1  ;;  %1231 = vrot.lane.b32.xlu1 %v10869_v39, %s10215_s17  ;;  %s10236_s17 = smov 74  }
 0x1b4   : > { %1304 = vrot.lane.b32.xlu0 %v10809_v7, %s10216_s9 }
 0x1b5   : > { %v941_v43 = vpop.permute.xlu1 %940 }
 0x1b6   : > { %v945_v44 = vpop.permute.xlu0 %944  ;;  %v960_v45 = vrot.slane %v941_v43, 4  ;;  %1308 = vrot.lane.b32.xlu2 %v1282_v38, %s10216_s9 }
 0x1b7   : > { %v962_v53 = vrot.slane %v945_v44, 4 }
 0x1b8   : > { %v975_v46 = vsel %vm409_vm0, %v960_v45, %v961_v10  ;;  %v973_v47 = vsel %vm409_vm0, %v959_v42, %v960_v45  ;;  %v10883_v48 = vpop.permute.xlu2 %1035  ;;  %v9484_v42 = vld [vmem:[#allocation3 + $0x1ac] sm:$0xf0] }
 0x1b9   : > { %v976_v50 = vsel %vm969_vm7, %v941_v43, %v975_v46  ;;  %v974_v51 = vsel %vm969_vm7, %v939_v34, %v973_v47  ;;  %v1054_v33 = vrot.slane %v10883_v48, 4  ;;  %v8156_v46 = vld [vmem:[#allocation3 + $0x1a0] sm:$0xf]  ;;  %v1378_v48 = vld [vmem:[#allocation2 + $0x30] sm:$0xf] }
 0x1ba   : > { %996 = vst [vmem:[#allocation3 + $0x1d8] sm:$0xff] %v976_v50  ;;  %v8172_v41 = vld [vmem:[#allocation3 + $0x1c0] sm:$0xf]  ;;  %v8157_v47 = vor.u32 %v9484_v42, %v8156_v46 }
 0x1bb   : > { %995 = vst [vmem:[#allocation3 + $0x1d0] sm:$0xff] %v974_v51  ;;  %1306 = vrot.lane.b32.xlu1 %v10821_v59, %s10216_s9 }
 0x1bc   : > { %1310 = vrot.lane.b32.xlu0 %v10825_v61, %s10216_s9 }
 0x1bd   : > { %v947_v54 = vpop.permute.xlu1 %946 }
 0x1be   : > { %v951_v55 = vpop.permute.xlu0 %950  ;;  %v963_v56 = vrot.slane %v947_v54, 4  ;;  %1314 = vrot.lane.b32.xlu2 %v1285_v13, %s10216_s9  ;;  %v9480_v13 = vld [vmem:[#allocation3 + $0x18c] sm:$0xf0] }
 0x1bf   : > { %v965_v3 = vrot.slane %v951_v55, 4 }
 0x1c0   : > { %v979_v57 = vsel %vm409_vm0, %v963_v56, %v964_v52  ;;  %v977_v49 = vsel %vm409_vm0, %v962_v53, %v963_v56  ;;  %v10895_v58 = vpop.permute.xlu2 %1041 }
 0x1c1   : > { %v980_v11 = vsel %vm969_vm7, %v947_v54, %v979_v57  ;;  %v978_v62 = vsel %vm969_vm7, %v945_v44, %v977_v49  ;;  %v1057_v50 = vrot.slane %v10895_v58, 4 }
 0x1c2   : > { %998 = vst [vmem:[#allocation3 + $0x1e8] sm:$0xff] %v980_v11  ;;  %v9488_v35 = vld [vmem:[#allocation3 + $0x1cc] sm:$0xf0] }
 0x1c3   : > { %997 = vst [vmem:[#allocation3 + $0x1e0] sm:$0xff] %v978_v62  ;;  %1312 = vrot.lane.b32.xlu1 %v10837_v15, %s10216_s9  ;;  %v8173_v1 = vor.u32 %v9488_v35, %v8172_v41  ;;  %v9476_v11 = vld [vmem:[#allocation3 + $0x16c] sm:$0xf0]  ;;  %v8076_v35 = vld [vmem:[#allocation3 + $0x100] sm:$0xf] }
 0x1c4   : > { %1316 = vrot.lane.b32.xlu0 %v10841_v17, %s10216_s9 }
 0x1c5   : > { %v953_v5 = vpop.permute.xlu1 %952 }
 0x1c6   : > { %v1026_v8 = vpop.permute.xlu0 %1025  ;;  %v966_v9 = vrot.slane %v953_v5, 4  ;;  %1320 = vrot.lane.b32.xlu2 %v1288_v63, %s10216_s9 }
 0x1c7   : > { %v1049_v21 = vrot.slane %v1026_v8, 4 }
 0x1c8   : > { %v983_v12 = vsel %vm409_vm0, %v966_v9, %v967_v0  ;;  %v981_v60 = vsel %vm409_vm0, %v965_v3, %v966_v9  ;;  %v10907_v14 = vpop.permute.xlu2 %1047  ;;  %v8124_v0 = vld [vmem:[#allocation3 + $0x160] sm:$0xf] }
 0x1c9   : > { %v984_v16 = vsel %vm969_vm7, %v953_v5, %v983_v12  ;;  %v982_v18 = vsel %vm969_vm7, %v951_v55, %v981_v60  ;;  %v8140_v55 = vld [vmem:[#allocation3 + $0x180] sm:$0xf]  ;;  %v8125_v3 = vor.u32 %v9476_v11, %v8124_v0  ;;  %v1381_v5 = vld [vmem:[#allocation2 + $0x50] sm:$0xf]  ;;  %vm2364_vm7 = vcmask 367616  }
 0x1ca   : > { %1000 = vst [vmem:[#allocation3 + $0x1f8] sm:$0xff] %v984_v16  ;;  %v8188_v31 = vld [vmem:[#allocation3 + $0x1e0] sm:$0xf]  ;;  %v8141_v56 = vor.u32 %v9480_v13, %v8140_v55  ;;  %v9472_v12 = vld [vmem:[#allocation3 + $0x14c] sm:$0xf0] }
 0x1cb   : > { %999 = vst [vmem:[#allocation3 + $0x1f0] sm:$0xff] %v982_v18  ;;  %1318 = vrot.lane.b32.xlu1 %v10853_v27, %s10216_s9 }
 0x1cc   : > { %1322 = vrot.lane.b32.xlu0 %v10857_v29, %s10216_s9 }
 0x1cd   : > { %v1028_v23 = vpop.permute.xlu1 %1027 }
 0x1ce   : > { %v1032_v24 = vpop.permute.xlu0 %1031  ;;  %v1050_v2 = vrot.slane %v1028_v23, 4  ;;  %1326 = vrot.lane.b32.xlu2 %v1291_v19, %s10216_s9  ;;  %v8108_v19 = vld [vmem:[#allocation3 + $0x140] sm:$0xf] }
 0x1cf   : > { %v1052_v34 = vrot.slane %v1032_v24, 4 }
 0x1d0   : > { %v1064_v22 = vsel %vm409_vm0, %v1050_v2, %v1051_v20  ;;  %v1061_v25 = vsel %vm409_vm0, %v1049_v21, %v1050_v2  ;;  %v10919_v26 = vpop.permute.xlu2 %1122  ;;  %v8109_v20 = vor.u32 %v9472_v12, %v8108_v19 }
 0x1d1   : > { %v1065_v28 = vsel %vm1062_vm8, %v1028_v23, %v1064_v22  ;;  %v1063_v30 = vsel %vm1062_vm8, %v1026_v8, %v1061_v25  ;;  %v1060_v8 = vrot.slane %v10907_v14, 4  ;;  %v8092_v25 = vld [vmem:[#allocation3 + $0x120] sm:$0xf] }
 0x1d2   : > { %1087 = vst [vmem:[#allocation3 + $0x208] sm:$0xff] %v1065_v28  ;;  %v9492_v6 = vld [vmem:[#allocation3 + $0x1ec] sm:$0xf0] }
 0x1d3   : > { %1086 = vst [vmem:[#allocation3 + $0x200] sm:$0xff] %v1063_v30  ;;  %1324 = vrot.lane.b32.xlu1 %v10869_v39, %s10216_s9  ;;  %v8189_v32 = vor.u32 %v9492_v6, %v8188_v31  ;;  %v1384_v30 = vld [vmem:[#allocation2 + $0x70] sm:$0xf]  ;;  %v1144_v31 = vrot.slane %v10919_v26, 4  ;;  %s10237_s9 = smov 91  }
 0x1d4   : > { %1397 = vrot.lane.b32.xlu0 %v10809_v7, %s10217_s30 }
 0x1d5   : > { %6770 = vmatpush.bf16.msra.mxu1 %v8189_v32  ;;  %v1034_v36 = vpop.permute.xlu1 %1033  ;;  %v9464_v32 = vld [vmem:[#allocation3 + $0x10c] sm:$0xf0] }
 0x1d6   : > { %v1038_v37 = vpop.permute.xlu0 %1037  ;;  %v1053_v40 = vrot.slane %v1034_v36, 4  ;;  %1401 = vrot.lane.b32.xlu2 %v1375_v4, %s10217_s30 }
 0x1d7   : > { %v1055_v51 = vrot.slane %v1038_v37, 4 }
 0x1d8   : > { %v1068_v38 = vsel %vm409_vm0, %v1053_v40, %v1054_v33  ;;  %v1066_v10 = vsel %vm409_vm0, %v1052_v34, %v1053_v40  ;;  %v10931_v43 = vpop.permute.xlu2 %1128 }
 0x1d9   : > { %v1069_v44 = vsel %vm1062_vm8, %v1034_v36, %v1068_v38  ;;  %v1067_v45 = vsel %vm1062_vm8, %v1032_v24, %v1066_v10  ;;  %6771 = vmatpush.bf16.msra.mxu1 %v8173_v1  ;;  %v9468_v24 = vld [vmem:[#allocation3 + $0x12c] sm:$0xf0]  ;;  %v8077_v36 = vor.u32 %v9464_v32, %v8076_v35  ;;  %v1147_v10 = vrot.slane %v10931_v43, 4 }
 0x1da   : > { %1089 = vst [vmem:[#allocation3 + $0x218] sm:$0xff] %v1069_v44  ;;  %v8093_v28 = vor.u32 %v9468_v24, %v8092_v25  ;;  %v1468_v38 = vld [vmem:[#allocation2 + $0x10] sm:$0xf] }
 0x1db   : > { %1088 = vst [vmem:[#allocation3 + $0x210] sm:$0xff] %v1067_v45  ;;  %1399 = vrot.lane.b32.xlu1 %v10821_v59, %s10217_s30  ;;  %v1471_v43 = vld [vmem:[#allocation2 + $0x30] sm:$0xf] }
 0x1dc   : > { %1403 = vrot.lane.b32.xlu0 %v10825_v61, %s10217_s30 }
 0x1dd   : > { %6772 = vmatpush.bf16.msra.mxu1 %v8157_v47  ;;  %v1040_v52 = vpop.permute.xlu1 %1039 }
 0x1de   : > { %v1044_v53 = vpop.permute.xlu0 %1043  ;;  %v1056_v54 = vrot.slane %v1040_v52, 4  ;;  %1407 = vrot.lane.b32.xlu2 %v1378_v48, %s10217_s30 }
 0x1df   : > { %v1058_v9 = vrot.slane %v1044_v53, 4 }
 0x1e0   : > { %v1072_v57 = vsel %vm409_vm0, %v1056_v54, %v1057_v50  ;;  %v1070_v49 = vsel %vm409_vm0, %v1055_v51, %v1056_v54  ;;  %v10943_v62 = vpop.permute.xlu2 %1134 }
 0x1e1   : > { %v1073_v63 = vsel %vm1062_vm8, %v1040_v52, %v1072_v57  ;;  %v1071_v58 = vsel %vm1062_vm8, %v1038_v37, %v1070_v49  ;;  %6773 = vmatpush.bf16.msra.mxu1 %v8141_v56  ;;  %v1150_v52 = vrot.slane %v10943_v62, 4  ;;  %v1474_v62 = vld [vmem:[#allocation2 + $0x50] sm:$0xf] }
 0x1e2   : > { %1091 = vst [vmem:[#allocation3 + $0x228] sm:$0xff] %v1073_v63 }
 0x1e3   : > { %1090 = vst [vmem:[#allocation3 + $0x220] sm:$0xff] %v1071_v58  ;;  %1405 = vrot.lane.b32.xlu1 %v10837_v15, %s10217_s30 }
 0x1e4   : > { %1409 = vrot.lane.b32.xlu0 %v10841_v17, %s10217_s30 }
 0x1e5   : > { %6774 = vmatpush.bf16.msra.mxu1 %v8125_v3  ;;  %v1046_v60 = vpop.permute.xlu1 %1045 }
 0x1e6   : > { %v1119_v16 = vpop.permute.xlu0 %1118  ;;  %v1059_v18 = vrot.slane %v1046_v60, 4  ;;  %1413 = vrot.lane.b32.xlu2 %v1381_v5, %s10217_s30 }
 0x1e7   : > { %v1142_v6 = vrot.slane %v1119_v16, 4 }
 0x1e8   : > { %v1076_v21 = vsel %vm409_vm0, %v1059_v18, %v1060_v8  ;;  %v1074_v23 = vsel %vm409_vm0, %v1058_v9, %v1059_v18  ;;  %v10955_v2 = vpop.permute.xlu2 %1140 }
 0x1e9   : > { %v1077_v22 = vsel %vm1062_vm8, %v1046_v60, %v1076_v21  ;;  %v1075_v14 = vsel %vm1062_vm8, %v1044_v53, %v1074_v23  ;;  %6775 = vmatpush.bf16.msra.mxu1 %v8109_v20  ;;  %v1153_v0 = vrot.slane %v10955_v2, 4  ;;  %v1477_v20 = vld [vmem:[#allocation2 + $0x70] sm:$0xf]  ;;  %vm2457_vm8 = vcmask 359424  }
 0x1ea   : > { %1093 = vst [vmem:[#allocation3 + $0x238] sm:$0xff] %v1077_v22 }
 0x1eb   : > { %1092 = vst [vmem:[#allocation3 + $0x230] sm:$0xff] %v1075_v14  ;;  %1411 = vrot.lane.b32.xlu1 %v10853_v27, %s10217_s30 }
 0x1ec   : > { %1415 = vrot.lane.b32.xlu0 %v10857_v29, %s10217_s30 }
 0x1ed   : > { %6776 = vmatpush.bf16.msra.mxu1 %v8093_v28  ;;  %v1121_v4 = vpop.permute.xlu1 %1120 }
 0x1ee   : > { %v1125_v33 = vpop.permute.xlu0 %1124  ;;  %v1143_v34 = vrot.slane %v1121_v4, 4  ;;  %1419 = vrot.lane.b32.xlu2 %v1384_v30, %s10217_s30 }
 0x1ef   : > { %v1145_v42 = vrot.slane %v1125_v33, 4 }
 0x1f0   : > { %v1157_v37 = vsel %vm409_vm0, %v1143_v34, %v1144_v31  ;;  %v1154_v40 = vsel %vm409_vm0, %v1142_v6, %v1143_v34  ;;  %v10967_v41 = vpop.permute.xlu2 %1215  ;;  %v1561_v6 = vld [vmem:[#allocation2 + $0x10] sm:$0xf] }
 0x1f1   : > { %v1158_v1 = vsel %vm1155_vm9, %v1121_v4, %v1157_v37  ;;  %v1156_v26 = vsel %vm1155_vm9, %v1119_v16, %v1154_v40  ;;  %6777 = vmatpush.bf16.msra.mxu1 %v8077_v36  ;;  %v1237_v21 = vrot.slane %v10967_v41, 4 }
 0x1f2   : > { %1180 = vst [vmem:[#allocation3 + $0x248] sm:$0xff] %v1158_v1 }
 0x1f3   : > { %1179 = vst [vmem:[#allocation3 + $0x240] sm:$0xff] %v1156_v26  ;;  %1417 = vrot.lane.b32.xlu1 %v10869_v39, %s10217_s30  ;;  %v1564_v26 = vld [vmem:[#allocation2 + $0x30] sm:$0xf]  ;;  %s10238_s30 = smov 62  }
 0x1f4   : > { %1490 = vrot.lane.b32.xlu0 %v10809_v7, %s10218_s29 }
 0x1f5   : > { %v1127_v44 = vpop.permute.xlu1 %1126 }
 0x1f6   : > { %v1131_v45 = vpop.permute.xlu0 %1130  ;;  %v1146_v46 = vrot.slane %v1127_v44, 4  ;;  %1494 = vrot.lane.b32.xlu2 %v1468_v38, %s10218_s29 }
 0x1f7   : > { %v1148_v53 = vrot.slane %v1131_v45, 4 }
 0x1f8   : > { %v1161_v47 = vsel %vm409_vm0, %v1146_v46, %v1147_v10  ;;  %v1159_v48 = vsel %vm409_vm0, %v1145_v42, %v1146_v46  ;;  %v10979_v50 = vpop.permute.xlu2 %1221 }
 0x1f9   : > { %v1162_v51 = vsel %vm1155_vm9, %v1127_v44, %v1161_v47  ;;  %v1160_v13 = vsel %vm1155_vm9, %v1125_v33, %v1159_v48  ;;  %v1240_v32 = vrot.slane %v10979_v50, 4 }
 0x1fa   : > { %1182 = vst [vmem:[#allocation3 + $0x258] sm:$0xff] %v1162_v51 }
 0x1fb   : > { %1181 = vst [vmem:[#allocation3 + $0x250] sm:$0xff] %v1160_v13  ;;  %1492 = vrot.lane.b32.xlu1 %v10821_v59, %s10218_s29  ;;  %v1567_v13 = vld [vmem:[#allocation2 + $0x50] sm:$0xf] }
 0x1fc   : > { %1496 = vrot.lane.b32.xlu0 %v10825_v61, %s10218_s29 }
 0x1fd   : > { %v1133_v54 = vpop.permute.xlu1 %1132 }
 0x1fe   : > { %v1137_v55 = vpop.permute.xlu0 %1136  ;;  %v1149_v56 = vrot.slane %v1133_v54, 4  ;;  %1500 = vrot.lane.b32.xlu2 %v1471_v43, %s10218_s29 }
 0x1ff   : > { %v1151_v3 = vrot.slane %v1137_v55, 4 }
 0x200   : > { %v1165_v57 = vsel %vm409_vm0, %v1149_v56, %v1150_v52  ;;  %v1163_v49 = vsel %vm409_vm0, %v1148_v53, %v1149_v56  ;;  %v10991_v11 = vpop.permute.xlu2 %1227 }
 0x201   : > { %v1166_v63 = vsel %vm1155_vm9, %v1133_v54, %v1165_v57  ;;  %v1164_v58 = vsel %vm1155_vm9, %v1131_v45, %v1163_v49  ;;  %v1243_v38 = vrot.slane %v10991_v11, 4 }
 0x202   : > { %1184 = vst [vmem:[#allocation3 + $0x268] sm:$0xff] %v1166_v63 }
 0x203   : > { %1183 = vst [vmem:[#allocation3 + $0x260] sm:$0xff] %v1164_v58  ;;  %1498 = vrot.lane.b32.xlu1 %v10837_v15, %s10218_s29  ;;  %v1570_v58 = vld [vmem:[#allocation2 + $0x70] sm:$0xf] }
 0x204   : > { %1502 = vrot.lane.b32.xlu0 %v10841_v17, %s10218_s29 }
 0x205   : > { %v1139_v5 = vpop.permute.xlu1 %1138 }
 0x206   : > { %v1212_v8 = vpop.permute.xlu0 %1211  ;;  %v1152_v9 = vrot.slane %v1139_v5, 4  ;;  %1506 = vrot.lane.b32.xlu2 %v1474_v62, %s10218_s29 }
 0x207   : > { %v1235_v23 = vrot.slane %v1212_v8, 4 }
 0x208   : > { %v1169_v12 = vsel %vm409_vm0, %v1152_v9, %v1153_v0  ;;  %v1167_v60 = vsel %vm409_vm0, %v1151_v3, %v1152_v9  ;;  %v11003_v16 = vpop.permute.xlu2 %1233 }
 0x209   : > { %v1170_v18 = vsel %vm1155_vm9, %v1139_v5, %v1169_v12  ;;  %v1168_v19 = vsel %vm1155_vm9, %v1137_v55, %v1167_v60  ;;  %v1246_v43 = vrot.slane %v11003_v16, 4  ;;  %vm2550_vm9 = vcmask 293888  }
 0x20a   : > { %1186 = vst [vmem:[#allocation3 + $0x278] sm:$0xff] %v1170_v18 }
 0x20b   : > { %1185 = vst [vmem:[#allocation3 + $0x270] sm:$0xff] %v1168_v19  ;;  %1504 = vrot.lane.b32.xlu1 %v10853_v27, %s10218_s29  ;;  %v1654_v19 = vld [vmem:[#allocation2 + $0x10] sm:$0xf] }
 0x20c   : > { %1508 = vrot.lane.b32.xlu0 %v10857_v29, %s10218_s29 }
 0x20d   : > { %v1214_v24 = vpop.permute.xlu1 %1213 }
 0x20e   : > { %v1218_v2 = vpop.permute.xlu0 %1217  ;;  %v1236_v22 = vrot.slane %v1214_v24, 4  ;;  %1512 = vrot.lane.b32.xlu2 %v1477_v20, %s10218_s29 }
 0x20f   : > { %v1238_v4 = vrot.slane %v1218_v2, 4 }
 0x210   : > { %v1250_v14 = vsel %vm409_vm0, %v1236_v22, %v1237_v21  ;;  %v1247_v25 = vsel %vm409_vm0, %v1235_v23, %v1236_v22  ;;  %v11015_v28 = vpop.permute.xlu2 %1308 }
 0x211   : > { %v1251_v30 = vsel %vm1248_vm10, %v1214_v24, %v1250_v14  ;;  %v1249_v31 = vsel %vm1248_vm10, %v1212_v8, %v1247_v25  ;;  %v1330_v62 = vrot.slane %v11015_v28, 4 }
 0x212   : > { %1273 = vst [vmem:[#allocation3 + $0x288] sm:$0xff] %v1251_v30 }
 0x213   : > { %1272 = vst [vmem:[#allocation3 + $0x280] sm:$0xff] %v1249_v31  ;;  %1510 = vrot.lane.b32.xlu1 %v10869_v39, %s10218_s29  ;;  %v1657_v31 = vld [vmem:[#allocation2 + $0x30] sm:$0xf]  ;;  %s10239_s29 = smov 102  }
 0x214   : > { %1583 = vrot.lane.b32.xlu0 %v10809_v7, %s10219_s8 }
 0x215   : > { %v1220_v33 = vpop.permute.xlu1 %1219 }
 0x216   : > { %v1224_v34 = vpop.permute.xlu0 %1223  ;;  %v1239_v35 = vrot.slane %v1220_v33, 4  ;;  %1587 = vrot.lane.b32.xlu2 %v1561_v6, %s10219_s8 }
 0x217   : > { %v1241_v10 = vrot.slane %v1224_v34, 4 }
 0x218   : > { %v1254_v36 = vsel %vm409_vm0, %v1239_v35, %v1240_v32  ;;  %v1252_v37 = vsel %vm409_vm0, %v1238_v4, %v1239_v35  ;;  %v11027_v40 = vpop.permute.xlu2 %1314 }
 0x219   : > { %v1255_v41 = vsel %vm1248_vm10, %v1220_v33, %v1254_v36  ;;  %v1253_v1 = vsel %vm1248_vm10, %v1218_v2, %v1252_v37  ;;  %v1333_v20 = vrot.slane %v11027_v40, 4 }
 0x21a   : > { %1275 = vst [vmem:[#allocation3 + $0x298] sm:$0xff] %v1255_v41 }
 0x21b   : > { %1274 = vst [vmem:[#allocation3 + $0x290] sm:$0xff] %v1253_v1  ;;  %1585 = vrot.lane.b32.xlu1 %v10821_v59, %s10219_s8  ;;  %v1660_v1 = vld [vmem:[#allocation2 + $0x50] sm:$0xf] }
 0x21c   : > { %1589 = vrot.lane.b32.xlu0 %v10825_v61, %s10219_s8 }
 0x21d   : > { %v1226_v42 = vpop.permute.xlu1 %1225 }
 0x21e   : > { %v1230_v44 = vpop.permute.xlu0 %1229  ;;  %v1242_v45 = vrot.slane %v1226_v42, 4  ;;  %1593 = vrot.lane.b32.xlu2 %v1564_v26, %s10219_s8 }
 0x21f   : > { %v1244_v52 = vrot.slane %v1230_v44, 4 }
 0x220   : > { %v1258_v46 = vsel %vm409_vm0, %v1242_v45, %v1243_v38  ;;  %v1256_v47 = vsel %vm409_vm0, %v1241_v10, %v1242_v45  ;;  %v11039_v48 = vpop.permute.xlu2 %1320 }
 0x221   : > { %v1259_v50 = vsel %vm1248_vm10, %v1226_v42, %v1258_v46  ;;  %v1257_v51 = vsel %vm1248_vm10, %v1224_v34, %v1256_v47  ;;  %v1336_v6 = vrot.slane %v11039_v48, 4 }
 0x222   : > { %1277 = vst [vmem:[#allocation3 + $0x2a8] sm:$0xff] %v1259_v50 }
 0x223   : > { %1276 = vst [vmem:[#allocation3 + $0x2a0] sm:$0xff] %v1257_v51  ;;  %1591 = vrot.lane.b32.xlu1 %v10837_v15, %s10219_s8  ;;  %v1663_v51 = vld [vmem:[#allocation2 + $0x70] sm:$0xf] }
 0x224   : > { %1595 = vrot.lane.b32.xlu0 %v10841_v17, %s10219_s8 }
 0x225   : > { %v1232_v53 = vpop.permute.xlu1 %1231 }
 0x226   : > { %v1305_v54 = vpop.permute.xlu0 %1304  ;;  %v1245_v55 = vrot.slane %v1232_v53, 4  ;;  %1599 = vrot.lane.b32.xlu2 %v1567_v13, %s10219_s8 }
 0x227   : > { %v1328_v0 = vrot.slane %v1305_v54, 4 }
 0x228   : > { %v1262_v56 = vsel %vm409_vm0, %v1245_v55, %v1246_v43  ;;  %v1260_v57 = vsel %vm409_vm0, %v1244_v52, %v1245_v55  ;;  %v11051_v49 = vpop.permute.xlu2 %1326 }
 0x229   : > { %v1263_v11 = vsel %vm1248_vm10, %v1232_v53, %v1262_v56  ;;  %v1261_v63 = vsel %vm1248_vm10, %v1230_v44, %v1260_v57  ;;  %v1339_v26 = vrot.slane %v11051_v49, 4  ;;  %vm2643_vm10 = vcmask 285696  }
 0x22a   : > { %1279 = vst [vmem:[#allocation3 + $0x2b8] sm:$0xff] %v1263_v11 }
 0x22b   : > { %1278 = vst [vmem:[#allocation3 + $0x2b0] sm:$0xff] %v1261_v63  ;;  %1597 = vrot.lane.b32.xlu1 %v10853_v27, %s10219_s8 }
 0x22c   : > { %1601 = vrot.lane.b32.xlu0 %v10857_v29, %s10219_s8 }
 0x22d   : > { %v1307_v3 = vpop.permute.xlu1 %1306 }
 0x22e   : > { %v1311_v5 = vpop.permute.xlu0 %1310  ;;  %v1329_v8 = vrot.slane %v1307_v3, 4  ;;  %1605 = vrot.lane.b32.xlu2 %v1570_v58, %s10219_s8 }
 0x22f   : > { %v1331_v21 = vrot.slane %v1311_v5, 4 }
 0x230   : > { %v1343_v9 = vsel %vm409_vm0, %v1329_v8, %v1330_v62  ;;  %v1340_v12 = vsel %vm409_vm0, %v1328_v0, %v1329_v8  ;;  %v11063_v60 = vpop.permute.xlu2 %1401  ;;  %v1747_v0 = vld [vmem:[#allocation2 + $0x10] sm:$0xf] }
 0x231   : > { %v1344_v16 = vsel %vm1341_vm11, %v1307_v3, %v1343_v9  ;;  %v1342_v18 = vsel %vm1341_vm11, %v1305_v54, %v1340_v12  ;;  %v1423_v13 = vrot.slane %v11063_v60, 4 }
 0x232   : > { %1366 = vst [vmem:[#allocation3 + $0x2c8] sm:$0xff] %v1344_v16 }
 0x233   : > { %1365 = vst [vmem:[#allocation3 + $0x2c0] sm:$0xff] %v1342_v18  ;;  %1603 = vrot.lane.b32.xlu1 %v10869_v39, %s10219_s8  ;;  %s10240_s8 = smov 92  }
 0x234   : > { %1676 = vrot.lane.b32.xlu0 %v10809_v7, %s10220_s1 }
 0x235   : > { %v1313_v23 = vpop.permute.xlu1 %1312 }
 0x236   : > { %v1317_v24 = vpop.permute.xlu0 %1316  ;;  %v1332_v2 = vrot.slane %v1313_v23, 4  ;;  %1680 = vrot.lane.b32.xlu2 %v1654_v19, %s10220_s1 }
 0x237   : > { %v1334_v32 = vrot.slane %v1317_v24, 4 }
 0x238   : > { %v1347_v22 = vsel %vm409_vm0, %v1332_v2, %v1333_v20  ;;  %v1345_v14 = vsel %vm409_vm0, %v1331_v21, %v1332_v2  ;;  %v11075_v25 = vpop.permute.xlu2 %1407  ;;  %v9516_v21 = vld [vmem:[#allocation3 + $0x2ac] sm:$0xf0]  ;;  %v8284_v2 = vld [vmem:[#allocation3 + $0x2a0] sm:$0xf] }
 0x239   : > { %v1348_v28 = vsel %vm1341_vm11, %v1313_v23, %v1347_v22  ;;  %v1346_v30 = vsel %vm1341_vm11, %v1311_v5, %v1345_v14  ;;  %v1426_v3 = vrot.slane %v11075_v25, 4  ;;  %v8285_v22 = vor.u32 %v9516_v21, %v8284_v2  ;;  %v1750_v14 = vld [vmem:[#allocation2 + $0x30] sm:$0xf] }
 0x23a   : > { %1368 = vst [vmem:[#allocation3 + $0x2d8] sm:$0xff] %v1348_v28  ;;  %v8300_v16 = vld [vmem:[#allocation3 + $0x2c0] sm:$0xf] }
 0x23b   : > { %1367 = vst [vmem:[#allocation3 + $0x2d0] sm:$0xff] %v1346_v30  ;;  %1678 = vrot.lane.b32.xlu1 %v10821_v59, %s10220_s1  ;;  %v9512_v30 = vld [vmem:[#allocation3 + $0x28c] sm:$0xf0] }
 0x23c   : > { %1682 = vrot.lane.b32.xlu0 %v10825_v61, %s10220_s1 }
 0x23d   : > { %v1319_v4 = vpop.permute.xlu1 %1318 }
 0x23e   : > { %v1323_v33 = vpop.permute.xlu0 %1322  ;;  %v1335_v34 = vrot.slane %v1319_v4, 4  ;;  %1686 = vrot.lane.b32.xlu2 %v1657_v31, %s10220_s1 }
 0x23f   : > { %v1337_v38 = vrot.slane %v1323_v33, 4 }
 0x240   : > { %v1351_v35 = vsel %vm409_vm0, %v1335_v34, %v1336_v6  ;;  %v1349_v36 = vsel %vm409_vm0, %v1334_v32, %v1335_v34  ;;  %v11087_v37 = vpop.permute.xlu2 %1413 }
 0x241   : > { %v1352_v40 = vsel %vm1341_vm11, %v1319_v4, %v1351_v35  ;;  %v1350_v41 = vsel %vm1341_vm11, %v1317_v24, %v1349_v36  ;;  %v1429_v25 = vrot.slane %v11087_v37, 4  ;;  %v8268_v4 = vld [vmem:[#allocation3 + $0x280] sm:$0xf]  ;;  %v9508_v35 = vld [vmem:[#allocation3 + $0x26c] sm:$0xf0] }
 0x242   : > { %1370 = vst [vmem:[#allocation3 + $0x2e8] sm:$0xff] %v1352_v40  ;;  %v9520_v8 = vld [vmem:[#allocation3 + $0x2cc] sm:$0xf0]  ;;  %v8252_v40 = vld [vmem:[#allocation3 + $0x260] sm:$0xf] }
 0x243   : > { %1369 = vst [vmem:[#allocation3 + $0x2e0] sm:$0xff] %v1350_v41  ;;  %1684 = vrot.lane.b32.xlu1 %v10837_v15, %s10220_s1  ;;  %v8301_v18 = vor.u32 %v9520_v8, %v8300_v16  ;;  %v8253_v41 = vor.u32 %v9508_v35, %v8252_v40 }
 0x244   : > { %1688 = vrot.lane.b32.xlu0 %v10841_v17, %s10220_s1 }
 0x245   : > { %v1325_v10 = vpop.permute.xlu1 %1324 }
 0x246   : > { %v1398_v42 = vpop.permute.xlu0 %1397  ;;  %v1338_v44 = vrot.slane %v1325_v10, 4  ;;  %1692 = vrot.lane.b32.xlu2 %v1660_v1, %s10220_s1  ;;  %v1753_v1 = vld [vmem:[#allocation2 + $0x50] sm:$0xf] }
 0x247   : > { %v1421_v43 = vrot.slane %v1398_v42, 4 }
 0x248   : > { %v1355_v45 = vsel %vm409_vm0, %v1338_v44, %v1339_v26  ;;  %v1353_v46 = vsel %vm409_vm0, %v1337_v38, %v1338_v44  ;;  %v11099_v47 = vpop.permute.xlu2 %1419 }
 0x249   : > { %v1356_v48 = vsel %vm1341_vm11, %v1325_v10, %v1355_v45  ;;  %v1354_v50 = vsel %vm1341_vm11, %v1323_v33, %v1353_v46  ;;  %v8269_v33 = vor.u32 %v9512_v30, %v8268_v4  ;;  %v1432_v26 = vrot.slane %v11099_v47, 4  ;;  %v9504_v10 = vld [vmem:[#allocation3 + $0x24c] sm:$0xf0]  ;;  %v11144_v45 = vld [vmem:[#allocation2 + $0x40] sm:$0xff] }
 0x24a   : > { %1372 = vst [vmem:[#allocation3 + $0x2f8] sm:$0xff] %v1356_v48  ;;  %v8316_v63 = vld [vmem:[#allocation3 + $0x2e0] sm:$0xf]  ;;  %vm2736_vm11 = vcmask 277504  }
 0x24b   : > { %1371 = vst [vmem:[#allocation3 + $0x2f0] sm:$0xff] %v1354_v50  ;;  %1690 = vrot.lane.b32.xlu1 %v10853_v27, %s10220_s1  ;;  %v8236_v48 = vld [vmem:[#allocation3 + $0x240] sm:$0xf] }
 0x24c   : > { %1694 = vrot.lane.b32.xlu0 %v10857_v29, %s10220_s1  ;;  %345 = vst [vmem:[#allocation3 + $0x20] sm:$0xff] %v11144_v45 }
 0x24d   : > { %v1400_v52 = vpop.permute.xlu1 %1399 }
 0x24e   : > { %v1404_v53 = vpop.permute.xlu0 %1403  ;;  %v1422_v54 = vrot.slane %v1400_v52, 4  ;;  %1698 = vrot.lane.b32.xlu2 %v1663_v51, %s10220_s1  ;;  %v9500_v51 = vld [vmem:[#allocation3 + $0x22c] sm:$0xf0] }
 0x24f   : > { %v1424_v5 = vrot.slane %v1404_v53, 4 }
 0x250   : > { %v1436_v55 = vsel %vm409_vm0, %v1422_v54, %v1423_v13  ;;  %v1433_v56 = vsel %vm409_vm0, %v1421_v43, %v1422_v54  ;;  %v11111_v57 = vpop.permute.xlu2 %1494  ;;  %v1756_v54 = vld [vmem:[#allocation2 + $0x70] sm:$0xf] }
 0x251   : > { %v1437_v49 = vsel %vm1434_vm12, %v1400_v52, %v1436_v55  ;;  %v1435_v11 = vsel %vm1434_vm12, %v1398_v42, %v1433_v56  ;;  %v8220_v52 = vld [vmem:[#allocation3 + $0x220] sm:$0xf]  ;;  %v1516_v55 = vrot.slane %v11111_v57, 4 }
 0x252   : > { %1459 = vst [vmem:[#allocation3 + $0x308] sm:$0xff] %v1437_v49  ;;  %v9524_v58 = vld [vmem:[#allocation3 + $0x2ec] sm:$0xf0] }
 0x253   : > { %1458 = vst [vmem:[#allocation3 + $0x300] sm:$0xff] %v1435_v11  ;;  %1696 = vrot.lane.b32.xlu1 %v10869_v39, %s10220_s1  ;;  %v8317_v62 = vor.u32 %v9524_v58, %v8316_v63  ;;  %v9496_v49 = vld [vmem:[#allocation3 + $0x20c] sm:$0xf0]  ;;  %v11159_v58 = vld [vmem:[#allocation2 + $0x60] sm:$0xff]  ;;  %s10241_s1 = smov 63  }
 0x254   : > { %1769 = vrot.lane.b32.xlu0 %v10809_v7, %s10221_s24  ;;  %347 = vst [vmem:[#allocation3 + $0x30] sm:$0xff] %v11159_v58 }
 0x255   : > { %6789 = vmatpush.bf16.msra.mxu2 %v8317_v62  ;;  %v1406_v9 = vpop.permute.xlu1 %1405 }
 0x256   : > { %v1410_v12 = vpop.permute.xlu0 %1409  ;;  %v1425_v60 = vrot.slane %v1406_v9, 4  ;;  %1773 = vrot.lane.b32.xlu2 %v1747_v0, %s10221_s24  ;;  %v8204_v0 = vld [vmem:[#allocation3 + $0x200] sm:$0xf] }
 0x257   : > { %v1427_v28 = vrot.slane %v1410_v12, 4 }
 0x258   : > { %v1440_v19 = vsel %vm409_vm0, %v1425_v60, %v1426_v3  ;;  %v1438_v20 = vsel %vm409_vm0, %v1424_v5, %v1425_v60  ;;  %v11123_v23 = vpop.permute.xlu2 %1500  ;;  %v1838_v5 = vld [vmem:[#allocation2] sm:$0xff] }
 0x259   : > { %v1441_v7 = vsel %vm1434_vm12, %v1406_v9, %v1440_v19  ;;  %v1439_v24 = vsel %vm1434_vm12, %v1404_v53, %v1438_v20  ;;  %6790 = vmatpush.bf16.msra.mxu2 %v8301_v18  ;;  %v8221_v53 = vor.u32 %v9500_v51, %v8220_v52  ;;  %v1519_v60 = vrot.slane %v11123_v23, 4  ;;  %v1843_v23 = vld [vmem:[#allocation2 + $0x30] sm:$0xf] }
 0x25a   : > { %1461 = vst [vmem:[#allocation3 + $0x318] sm:$0xff] %v1441_v7 }
 0x25b   : > { %1460 = vst [vmem:[#allocation3 + $0x310] sm:$0xff] %v1439_v24  ;;  %1771 = vrot.lane.b32.xlu1 %v10821_v59, %s10221_s24  ;;  %v1839_v24 = vld [vmem:[#allocation2 + $0x8] sm:$0xff] }
 0x25c   : > { %1775 = vrot.lane.b32.xlu0 %v10825_v61, %s10221_s24 }
 0x25d   : > { %6791 = vmatpush.bf16.msra.mxu2 %v8285_v22  ;;  %v1412_v31 = vpop.permute.xlu1 %1411 }
 0x25e   : > { %v1416_v6 = vpop.permute.xlu0 %1415  ;;  %v1428_v32 = vrot.slane %v1412_v31, 4  ;;  %1779 = vrot.lane.b32.xlu2 %v1750_v14, %s10221_s24 }
 0x25f   : > { %v1430_v38 = vrot.slane %v1416_v6, 4 }
 0x260   : > { %v1444_v34 = vsel %vm409_vm0, %v1428_v32, %v1429_v25  ;;  %v1442_v59 = vsel %vm409_vm0, %v1427_v28, %v1428_v32  ;;  %v11135_v36 = vpop.permute.xlu2 %1506 }
 0x261   : > { %v1445_v61 = vsel %vm1434_vm12, %v1412_v31, %v1444_v34  ;;  %v1443_v37 = vsel %vm1434_vm12, %v1410_v12, %v1442_v59  ;;  %6792 = vmatpush.bf16.msra.mxu2 %v8269_v33  ;;  %v1840_v12 = vld [vmem:[#allocation2 + $0x10] sm:$0xf]  ;;  %v1522_v25 = vrot.slane %v11135_v36, 4  ;;  %v1842_v33 = vld [vmem:[#allocation2 + $0x28] sm:$0xff] }
 0x262   : > { %1463 = vst [vmem:[#allocation3 + $0x328] sm:$0xff] %v1445_v61  ;;  %v1846_v36 = vld [vmem:[#allocation2 + $0x50] sm:$0xf] }
 0x263   : > { %1462 = vst [vmem:[#allocation3 + $0x320] sm:$0xff] %v1443_v37  ;;  %1777 = vrot.lane.b32.xlu1 %v10837_v15, %s10221_s24  ;;  %v8237_v15 = vor.u32 %v9504_v10, %v8236_v48  ;;  %v1845_v10 = vld [vmem:[#allocation2 + $0x48] sm:$0xff] }
 0x264   : > { %1781 = vrot.lane.b32.xlu0 %v10841_v17, %s10221_s24 }
 0x265   : > { %6793 = vmatpush.bf16.msra.mxu2 %v8253_v41  ;;  %v1418_v42 = vpop.permute.xlu1 %1417 }
 0x266   : > { %v1491_v44 = vpop.permute.xlu0 %1490  ;;  %v1431_v46 = vrot.slane %v1418_v42, 4  ;;  %1785 = vrot.lane.b32.xlu2 %v1753_v1, %s10221_s24 }
 0x267   : > { %v1514_v56 = vrot.slane %v1491_v44, 4 }
 0x268   : > { %v1448_v50 = vsel %vm409_vm0, %v1431_v46, %v1432_v26  ;;  %v1446_v17 = vsel %vm409_vm0, %v1430_v38, %v1431_v46  ;;  %v11150_v47 = vpop.permute.xlu2 %1512 }
 0x269   : > { %v1449_v13 = vsel %vm1434_vm12, %v1418_v42, %v1448_v50  ;;  %v1447_v43 = vsel %vm1434_vm12, %v1416_v6, %v1446_v17  ;;  %6794 = vmatpush.bf16.msra.mxu2 %v8237_v15  ;;  %v1525_v61 = vrot.slane %v11150_v47, 4  ;;  %vm2829_vm12 = vcmask 687104  }
 0x26a   : > { %1465 = vst [vmem:[#allocation3 + $0x338] sm:$0xff] %v1449_v13 }
 0x26b   : > { %1464 = vst [vmem:[#allocation3 + $0x330] sm:$0xff] %v1447_v43  ;;  %1783 = vrot.lane.b32.xlu1 %v10853_v27, %s10221_s24  ;;  %v8205_v27 = vor.u32 %v9496_v49, %v8204_v0  ;;  %v1848_v43 = vld [vmem:[#allocation2 + $0x68] sm:$0xff] }
 0x26c   : > { %1787 = vrot.lane.b32.xlu0 %v10857_v29, %s10221_s24 }
 0x26d   : > { %6795 = vmatpush.bf16.msra.mxu2 %v8221_v53  ;;  %v1493_v11 = vpop.permute.xlu1 %1492  ;;  %v11210_v53 = vld [vmem:[#allocation2 + $0x4] sm:$0xff] }
 0x26e   : > { %v1497_v63 = vpop.permute.xlu0 %1496  ;;  %v1515_v62 = vrot.slane %v1493_v11, 4  ;;  %1791 = vrot.lane.b32.xlu2 %v1756_v54, %s10221_s24 }
 0x26f   : > { %v1517_v16 = vrot.slane %v1497_v63, 4 }
 0x270   : > { %v1529_v3 = vsel %vm409_vm0, %v1515_v62, %v1516_v55  ;;  %v1526_v29 = vsel %vm409_vm0, %v1514_v56, %v1515_v62  ;;  %v11165_v57 = vpop.permute.xlu2 %1587  ;;  %v1933_v56 = vld [vmem:[#allocation2 + $0x14] sm:$0xf] }
 0x271   : > { %v1530_v8 = vsel %vm1527_vm13, %v1493_v11, %v1529_v3  ;;  %v1528_v9 = vsel %vm1527_vm13, %v1491_v44, %v1526_v29  ;;  %6796 = vmatpush.bf16.msra.mxu2 %v8205_v27  ;;  %v1609_v48 = vrot.slane %v11165_v57, 4  ;;  %v11221_v3 = vld [vmem:[#allocation2 + $0xc] sm:$0xff]  ;;  %v11225_v57 = vld [vmem:[#allocation2 + $0x24] sm:$0xff] }
 0x272   : > { %1552 = vst [vmem:[#allocation3 + $0x348] sm:$0xff] %v1530_v8 }
 0x273   : > { %1551 = vst [vmem:[#allocation3 + $0x340] sm:$0xff] %v1528_v9  ;;  %1789 = vrot.lane.b32.xlu1 %v10869_v39, %s10221_s24  ;;  %v1841_v39 = vld [vmem:[#allocation2 + $0x20] sm:$0xff]  ;;  %v1936_v9 = vld [vmem:[#allocation2 + $0x34] sm:$0xf]  ;;  %s10242_s24 = smov 110  }
 0x274   : > { %1862 = vrot.lane.b32.xlu0 %v1838_v5, %s10222_s7 }
 0x275   : > { %v1499_v18 = vpop.permute.xlu1 %1498 }
 0x276   : > { %v1503_v19 = vpop.permute.xlu0 %1502  ;;  %v1518_v20 = vrot.slane %v1499_v18, 4  ;;  %1866 = vrot.lane.b32.xlu2 %v1840_v12, %s10222_s7 }
 0x277   : > { %v1520_v28 = vrot.slane %v1503_v19, 4 }
 0x278   : > { %v1533_v21 = vsel %vm409_vm0, %v1518_v20, %v1519_v60  ;;  %v1531_v7 = vsel %vm409_vm0, %v1517_v16, %v1518_v20  ;;  %v11176_v2 = vpop.permute.xlu2 %1593 }
 0x279   : > { %v1534_v22 = vsel %vm1527_vm13, %v1499_v18, %v1533_v21  ;;  %v1532_v14 = vsel %vm1527_vm13, %v1497_v63, %v1531_v7  ;;  %v1612_v49 = vrot.slane %v11176_v2, 4  ;;  %v11237_v7 = vld [vmem:[#allocation2 + $0x2c] sm:$0xff]  ;;  %v11241_v2 = vld [vmem:[#allocation2 + $0x44] sm:$0xff] }
 0x27a   : > { %1554 = vst [vmem:[#allocation3 + $0x358] sm:$0xff] %v1534_v22 }
 0x27b   : > { %1553 = vst [vmem:[#allocation3 + $0x350] sm:$0xff] %v1532_v14  ;;  %1864 = vrot.lane.b32.xlu1 %v1839_v24, %s10222_s7  ;;  %v1939_v14 = vld [vmem:[#allocation2 + $0x54] sm:$0xf] }
 0x27c   : > { %1868 = vrot.lane.b32.xlu0 %v1841_v39, %s10222_s7 }
 0x27d   : > { %v1505_v30 = vpop.permute.xlu1 %1504 }
 0x27e   : > { %v1509_v31 = vpop.permute.xlu0 %1508  ;;  %v1521_v6 = vrot.slane %v1505_v30, 4  ;;  %1872 = vrot.lane.b32.xlu2 %v1843_v23, %s10222_s7 }
 0x27f   : > { %v1523_v37 = vrot.slane %v1509_v31, 4 }
 0x280   : > { %v1537_v32 = vsel %vm409_vm0, %v1521_v6, %v1522_v25  ;;  %v1535_v4 = vsel %vm409_vm0, %v1520_v28, %v1521_v6  ;;  %v11186_v34 = vpop.permute.xlu2 %1599 }
 0x281   : > { %v1538_v59 = vsel %vm1527_vm13, %v1505_v30, %v1537_v32  ;;  %v1536_v35 = vsel %vm1527_vm13, %v1503_v19, %v1535_v4  ;;  %v1615_v12 = vrot.slane %v11186_v34, 4  ;;  %v11253_v4 = vld [vmem:[#allocation2 + $0x4c] sm:$0xff]  ;;  %v11257_v34 = vld [vmem:[#allocation2 + $0x64] sm:$0xff] }
 0x282   : > { %1556 = vst [vmem:[#allocation3 + $0x368] sm:$0xff] %v1538_v59 }
 0x283   : > { %1555 = vst [vmem:[#allocation3 + $0x360] sm:$0xff] %v1536_v35  ;;  %1870 = vrot.lane.b32.xlu1 %v1842_v33, %s10222_s7 }
 0x284   : > { %1874 = vrot.lane.b32.xlu0 %v11144_v45, %s10222_s7  ;;  %v1849_v45 = vld [vmem:[#allocation2 + $0x70] sm:$0xf] }
 0x285   : > { %v1511_v40 = vpop.permute.xlu1 %1510 }
 0x286   : > { %v1584_v41 = vpop.permute.xlu0 %1583  ;;  %v1524_v1 = vrot.slane %v1511_v40, 4  ;;  %1878 = vrot.lane.b32.xlu2 %v1846_v36, %s10222_s7  ;;  %v1942_v36 = vld [vmem:[#allocation2 + $0x74] sm:$0xf] }
 0x287   : > { %v1607_v15 = vrot.slane %v1584_v41, 4 }
 0x288   : > { %v1541_v26 = vsel %vm409_vm0, %v1524_v1, %v1525_v61  ;;  %v1539_v38 = vsel %vm409_vm0, %v1523_v37, %v1524_v1  ;;  %v11197_v42 = vpop.permute.xlu2 %1605 }
 0x289   : > { %v1542_v44 = vsel %vm1527_vm13, %v1511_v40, %v1541_v26  ;;  %v1540_v46 = vsel %vm1527_vm13, %v1509_v31, %v1539_v38  ;;  %v1618_v23 = vrot.slane %v11197_v42, 4  ;;  %vm2922_vm13 = vcmask 678912  }
 0x28a   : > { %1558 = vst [vmem:[#allocation3 + $0x378] sm:$0xff] %v1542_v44 }
 0x28b   : > { %1557 = vst [vmem:[#allocation3 + $0x370] sm:$0xff] %v1540_v46  ;;  %1876 = vrot.lane.b32.xlu1 %v1845_v10, %s10222_s7  ;;  %v11269_v10 = vld [vmem:[#allocation2 + $0x6c] sm:$0xff] }
 0x28c   : > { %1880 = vrot.lane.b32.xlu0 %v11159_v58, %s10222_s7 }
 0x28d   : > { %v1586_v50 = vpop.permute.xlu1 %1585 }
 0x28e   : > { %v1590_v17 = vpop.permute.xlu0 %1589  ;;  %v1608_v51 = vrot.slane %v1586_v50, 4  ;;  %1884 = vrot.lane.b32.xlu2 %v1849_v45, %s10222_s7  ;;  %v2026_v45 = vld [vmem:[#allocation2 + $0x14] sm:$0xf] }
 0x28f   : > { %v1610_v11 = vrot.slane %v1590_v17, 4 }
 0x290   : > { %v1622_v47 = vsel %vm409_vm0, %v1608_v51, %v1609_v48  ;;  %v1619_v13 = vsel %vm409_vm0, %v1607_v15, %v1608_v51  ;;  %v11208_v52 = vpop.permute.xlu2 %1680 }
 0x291   : > { %v1623_v54 = vsel %vm1620_vm14, %v1586_v50, %v1622_v47  ;;  %v1621_v55 = vsel %vm1620_vm14, %v1584_v41, %v1619_v13  ;;  %v1702_v61 = vrot.slane %v11208_v52, 4 }
 0x292   : > { %1645 = vst [vmem:[#allocation3 + $0x388] sm:$0xff] %v1623_v54 }
 0x293   : > { %1644 = vst [vmem:[#allocation3 + $0x380] sm:$0xff] %v1621_v55  ;;  %1882 = vrot.lane.b32.xlu1 %v1848_v43, %s10222_s7  ;;  %v2029_v55 = vld [vmem:[#allocation2 + $0x34] sm:$0xf]  ;;  %s10243_s7 = smov 100  }
 0x294   : > { %1955 = vrot.lane.b32.xlu0 %v11210_v53, %s10223_s27 }
 0x295   : > { %v1592_v63 = vpop.permute.xlu1 %1591 }
 0x296   : > { %v1596_v58 = vpop.permute.xlu0 %1595  ;;  %v1611_v62 = vrot.slane %v1592_v63, 4  ;;  %1959 = vrot.lane.b32.xlu2 %v1933_v56, %s10223_s27 }
 0x297   : > { %v1613_v60 = vrot.slane %v1596_v58, 4 }
 0x298   : > { %v1626_v0 = vsel %vm409_vm0, %v1611_v62, %v1612_v49  ;;  %v1624_v27 = vsel %vm409_vm0, %v1610_v11, %v1611_v62  ;;  %v11223_v29 = vpop.permute.xlu2 %1686 }
 0x299   : > { %v1627_v5 = vsel %vm1620_vm14, %v1592_v63, %v1626_v0  ;;  %v1625_v8 = vsel %vm1620_vm14, %v1590_v17, %v1624_v27  ;;  %v1705_v48 = vrot.slane %v11223_v29, 4 }
 0x29a   : > { %1647 = vst [vmem:[#allocation3 + $0x398] sm:$0xff] %v1627_v5 }
 0x29b   : > { %1646 = vst [vmem:[#allocation3 + $0x390] sm:$0xff] %v1625_v8  ;;  %1957 = vrot.lane.b32.xlu1 %v11221_v3, %s10223_s27  ;;  %v2032_v8 = vld [vmem:[#allocation2 + $0x54] sm:$0xf] }
 0x29c   : > { %1961 = vrot.lane.b32.xlu0 %v11225_v57, %s10223_s27 }
 0x29d   : > { %v1598_v16 = vpop.permute.xlu1 %1597 }
 0x29e   : > { %v1602_v18 = vpop.permute.xlu0 %1601  ;;  %v1614_v19 = vrot.slane %v1598_v16, 4  ;;  %1965 = vrot.lane.b32.xlu2 %v1936_v9, %s10223_s27 }
 0x29f   : > { %v1616_v25 = vrot.slane %v1602_v18, 4 }
 0x2a0   : > { %v1630_v20 = vsel %vm409_vm0, %v1614_v19, %v1615_v12  ;;  %v1628_v21 = vsel %vm409_vm0, %v1613_v60, %v1614_v19  ;;  %v11239_v24 = vpop.permute.xlu2 %1692 }
 0x2a1   : > { %v1631_v39 = vsel %vm1620_vm14, %v1598_v16, %v1630_v20  ;;  %v1629_v22 = vsel %vm1620_vm14, %v1596_v58, %v1628_v21  ;;  %v1708_v56 = vrot.slane %v11239_v24, 4 }
 0x2a2   : > { %1649 = vst [vmem:[#allocation3 + $0x3a8] sm:$0xff] %v1631_v39 }
 0x2a3   : > { %1648 = vst [vmem:[#allocation3 + $0x3a0] sm:$0xff] %v1629_v22  ;;  %1963 = vrot.lane.b32.xlu1 %v11237_v7, %s10223_s27  ;;  %v2035_v22 = vld [vmem:[#allocation2 + $0x74] sm:$0xf] }
 0x2a4   : > { %1967 = vrot.lane.b32.xlu0 %v11241_v2, %s10223_s27 }
 0x2a5   : > { %v1604_v28 = vpop.permute.xlu1 %1603 }
 0x2a6   : > { %v1677_v30 = vpop.permute.xlu0 %1676  ;;  %v1617_v31 = vrot.slane %v1604_v28, 4  ;;  %1971 = vrot.lane.b32.xlu2 %v1939_v14, %s10223_s27 }
 0x2a7   : > { %v1700_v37 = vrot.slane %v1677_v30, 4 }
 0x2a8   : > { %v1634_v6 = vsel %vm409_vm0, %v1617_v31, %v1618_v23  ;;  %v1632_v32 = vsel %vm409_vm0, %v1616_v25, %v1617_v31  ;;  %v11255_v33 = vpop.permute.xlu2 %1698 }
 0x2a9   : > { %v1635_v59 = vsel %vm1620_vm14, %v1604_v28, %v1634_v6  ;;  %v1633_v35 = vsel %vm1620_vm14, %v1602_v18, %v1632_v32  ;;  %v1711_v9 = vrot.slane %v11255_v33, 4  ;;  %vm3015_vm14 = vcmask 670720  }
 0x2aa   : > { %1651 = vst [vmem:[#allocation3 + $0x3b8] sm:$0xff] %v1635_v59 }
 0x2ab   : > { %1650 = vst [vmem:[#allocation3 + $0x3b0] sm:$0xff] %v1633_v35  ;;  %1969 = vrot.lane.b32.xlu1 %v11253_v4, %s10223_s27 }
 0x2ac   : > { %1973 = vrot.lane.b32.xlu0 %v11257_v34, %s10223_s27 }
 0x2ad   : > { %v1679_v40 = vpop.permute.xlu1 %1678 }
 0x2ae   : > { %v1683_v41 = vpop.permute.xlu0 %1682  ;;  %v1701_v1 = vrot.slane %v1679_v40, 4  ;;  %1977 = vrot.lane.b32.xlu2 %v1942_v36, %s10223_s27 }
 0x2af   : > { %v1703_v15 = vrot.slane %v1683_v41, 4 }
 0x2b0   : > { %v1715_v26 = vsel %vm409_vm0, %v1701_v1, %v1702_v61  ;;  %v1712_v38 = vsel %vm409_vm0, %v1700_v37, %v1701_v1  ;;  %v11271_v42 = vpop.permute.xlu2 %1773  ;;  %v2119_v37 = vld [vmem:[#allocation2 + $0x14] sm:$0xf] }
 0x2b1   : > { %v1716_v44 = vsel %vm1713_vm15, %v1679_v40, %v1715_v26  ;;  %v1714_v46 = vsel %vm1713_vm15, %v1677_v30, %v1712_v38  ;;  %v1795_v14 = vrot.slane %v11271_v42, 4 }
 0x2b2   : > { %1738 = vst [vmem:[#allocation3 + $0x3c8] sm:$0xff] %v1716_v44 }
 0x2b3   : > { %1737 = vst [vmem:[#allocation3 + $0x3c0] sm:$0xff] %v1714_v46  ;;  %1975 = vrot.lane.b32.xlu1 %v11269_v10, %s10223_s27  ;;  %s10244_s27 = smov 64  }
 0x2b4   : > { %2048 = vrot.lane.b32.xlu0 %v11210_v53, %s10224_s6 }
 0x2b5   : > { %v1685_v50 = vpop.permute.xlu1 %1684 }
 0x2b6   : > { %v1689_v17 = vpop.permute.xlu0 %1688  ;;  %v1704_v51 = vrot.slane %v1685_v50, 4  ;;  %2052 = vrot.lane.b32.xlu2 %v2026_v45, %s10224_s6 }
 0x2b7   : > { %v1706_v49 = vrot.slane %v1689_v17, 4 }
 0x2b8   : > { %v1719_v47 = vsel %vm409_vm0, %v1704_v51, %v1705_v48  ;;  %v1717_v13 = vsel %vm409_vm0, %v1703_v15, %v1704_v51  ;;  %v11283_v43 = vpop.permute.xlu2 %1779  ;;  %v9548_v15 = vld [vmem:[#allocation3 + $0x3ac] sm:$0xf0] }
 0x2b9   : > { %v1720_v52 = vsel %vm1713_vm15, %v1685_v50, %v1719_v47  ;;  %v1718_v54 = vsel %vm1713_vm15, %v1683_v41, %v1717_v13  ;;  %v1798_v40 = vrot.slane %v11283_v43, 4  ;;  %v8412_v47 = vld [vmem:[#allocation3 + $0x3a0] sm:$0xf]  ;;  %v2122_v43 = vld [vmem:[#allocation2 + $0x34] sm:$0xf] }
 0x2ba   : > { %1740 = vst [vmem:[#allocation3 + $0x3d8] sm:$0xff] %v1720_v52  ;;  %v8428_v44 = vld [vmem:[#allocation3 + $0x3c0] sm:$0xf]  ;;  %v8413_v13 = vor.u32 %v9548_v15, %v8412_v47 }
 0x2bb   : > { %1739 = vst [vmem:[#allocation3 + $0x3d0] sm:$0xff] %v1718_v54  ;;  %2050 = vrot.lane.b32.xlu1 %v11221_v3, %s10224_s6 }
 0x2bc   : > { %2054 = vrot.lane.b32.xlu0 %v11225_v57, %s10224_s6 }
 0x2bd   : > { %v1691_v11 = vpop.permute.xlu1 %1690 }
 0x2be   : > { %v1695_v63 = vpop.permute.xlu0 %1694  ;;  %v1707_v58 = vrot.slane %v1691_v11, 4  ;;  %2058 = vrot.lane.b32.xlu2 %v2029_v55, %s10224_s6  ;;  %v9544_v55 = vld [vmem:[#allocation3 + $0x38c] sm:$0xf0] }
 0x2bf   : > { %v1709_v12 = vrot.slane %v1695_v63, 4 }
 0x2c0   : > { %v1723_v62 = vsel %vm409_vm0, %v1707_v58, %v1708_v56  ;;  %v1721_v0 = vsel %vm409_vm0, %v1706_v49, %v1707_v58  ;;  %v11295_v27 = vpop.permute.xlu2 %1785 }
 0x2c1   : > { %v1724_v29 = vsel %vm1713_vm15, %v1691_v11, %v1723_v62  ;;  %v1722_v5 = vsel %vm1713_vm15, %v1689_v17, %v1721_v0  ;;  %v1801_v52 = vrot.slane %v11295_v27, 4 }
 0x2c2   : > { %1742 = vst [vmem:[#allocation3 + $0x3e8] sm:$0xff] %v1724_v29  ;;  %v9552_v1 = vld [vmem:[#allocation3 + $0x3cc] sm:$0xf0] }
 0x2c3   : > { %1741 = vst [vmem:[#allocation3 + $0x3e0] sm:$0xff] %v1722_v5  ;;  %2056 = vrot.lane.b32.xlu1 %v11237_v7, %s10224_s6  ;;  %v8429_v46 = vor.u32 %v9552_v1, %v8428_v44  ;;  %v9540_v29 = vld [vmem:[#allocation3 + $0x36c] sm:$0xf0]  ;;  %v8332_v1 = vld [vmem:[#allocation3 + $0x300] sm:$0xf] }
 0x2c4   : > { %2060 = vrot.lane.b32.xlu0 %v11241_v2, %s10224_s6 }
 0x2c5   : > { %v1697_v60 = vpop.permute.xlu1 %1696 }
 0x2c6   : > { %v1770_v16 = vpop.permute.xlu0 %1769  ;;  %v1710_v18 = vrot.slane %v1697_v60, 4  ;;  %2064 = vrot.lane.b32.xlu2 %v2032_v8, %s10224_s6 }
 0x2c7   : > { %v1793_v23 = vrot.slane %v1770_v16, 4 }
 0x2c8   : > { %v1727_v19 = vsel %vm409_vm0, %v1710_v18, %v1711_v9  ;;  %v1725_v20 = vsel %vm409_vm0, %v1709_v12, %v1710_v18  ;;  %v11307_v21 = vpop.permute.xlu2 %1791  ;;  %v8380_v9 = vld [vmem:[#allocation3 + $0x360] sm:$0xf] }
 0x2c9   : > { %v1728_v24 = vsel %vm1713_vm15, %v1697_v60, %v1727_v19  ;;  %v1726_v39 = vsel %vm1713_vm15, %v1695_v63, %v1725_v20  ;;  %v8396_v63 = vld [vmem:[#allocation3 + $0x380] sm:$0xf]  ;;  %v8381_v12 = vor.u32 %v9540_v29, %v8380_v9  ;;  %v2125_v60 = vld [vmem:[#allocation2 + $0x54] sm:$0xf]  ;;  %v9536_v19 = vld [vmem:[#allocation3 + $0x34c] sm:$0xf0] }
 0x2ca   : > { %1744 = vst [vmem:[#allocation3 + $0x3f8] sm:$0xff] %v1728_v24  ;;  %v8444_v35 = vld [vmem:[#allocation3 + $0x3e0] sm:$0xf]  ;;  %v8397_v58 = vor.u32 %v9544_v55, %v8396_v63  ;;  %vm3201_vm15 = vcmask 596992  }
 0x2cb   : > { %1743 = vst [vmem:[#allocation3 + $0x3f0] sm:$0xff] %v1726_v39  ;;  %2062 = vrot.lane.b32.xlu1 %v11253_v4, %s10224_s6 }
 0x2cc   : > { %2066 = vrot.lane.b32.xlu0 %v11257_v34, %s10224_s6 }
 0x2cd   : > { %v1772_v25 = vpop.permute.xlu1 %1771 }
 0x2ce   : > { %v1776_v28 = vpop.permute.xlu0 %1775  ;;  %v1794_v30 = vrot.slane %v1772_v25, 4  ;;  %2070 = vrot.lane.b32.xlu2 %v2035_v22, %s10224_s6  ;;  %v8364_v22 = vld [vmem:[#allocation3 + $0x340] sm:$0xf] }
 0x2cf   : > { %v1796_v41 = vrot.slane %v1776_v28, 4 }
 0x2d0   : > { %v1808_v31 = vsel %vm409_vm0, %v1794_v30, %v1795_v14  ;;  %v1805_v6 = vsel %vm409_vm0, %v1793_v23, %v1794_v30  ;;  %v11319_v32 = vpop.permute.xlu2 %1866  ;;  %v8365_v14 = vor.u32 %v9536_v19, %v8364_v22 }
 0x2d1   : > { %v1809_v33 = vsel %vm1806_vm1, %v1772_v25, %v1808_v31  ;;  %v1807_v59 = vsel %vm1806_vm1, %v1770_v16, %v1805_v6  ;;  %v1804_v16 = vrot.slane %v11307_v21, 4  ;;  %v8348_v6 = vld [vmem:[#allocation3 + $0x320] sm:$0xf] }
 0x2d2   : > { %1831 = vst [vmem:[#allocation3 + $0x408] sm:$0xff] %v1809_v33  ;;  %v9556_v36 = vld [vmem:[#allocation3 + $0x3ec] sm:$0xf0] }
 0x2d3   : > { %1830 = vst [vmem:[#allocation3 + $0x400] sm:$0xff] %v1807_v59  ;;  %2068 = vrot.lane.b32.xlu1 %v11269_v10, %s10224_s6  ;;  %v8445_v61 = vor.u32 %v9556_v36, %v8444_v35  ;;  %v2128_v59 = vld [vmem:[#allocation2 + $0x74] sm:$0xf]  ;;  %v1888_v35 = vrot.slane %v11319_v32, 4  ;;  %s10245_s6 = smov 111  }
 0x2d4   : > { %2141 = vrot.lane.b32.xlu0 %v11210_v53, %s10225_s10 }
 0x2d5   : > { %6808 = vmatpush.bf16.msra.mxu3 %v8445_v61  ;;  %v1778_v26 = vpop.permute.xlu1 %1777  ;;  %v9528_v61 = vld [vmem:[#allocation3 + $0x30c] sm:$0xf0] }
 0x2d6   : > { %v1782_v38 = vpop.permute.xlu0 %1781  ;;  %v1797_v42 = vrot.slane %v1778_v26, 4  ;;  %2145 = vrot.lane.b32.xlu2 %v2119_v37, %s10225_s10 }
 0x2d7   : > { %v1799_v54 = vrot.slane %v1782_v38, 4 }
 0x2d8   : > { %v1812_v45 = vsel %vm409_vm0, %v1797_v42, %v1798_v40  ;;  %v1810_v48 = vsel %vm409_vm0, %v1796_v41, %v1797_v42  ;;  %v11331_v50 = vpop.permute.xlu2 %1872 }
 0x2d9   : > { %v1813_v17 = vsel %vm1806_vm1, %v1778_v26, %v1812_v45  ;;  %v1811_v51 = vsel %vm1806_vm1, %v1776_v28, %v1810_v48  ;;  %6809 = vmatpush.bf16.msra.mxu3 %v8429_v46  ;;  %v9532_v28 = vld [vmem:[#allocation3 + $0x32c] sm:$0xf0]  ;;  %v8333_v26 = vor.u32 %v9528_v61, %v8332_v1  ;;  %v2212_v45 = vld [vmem:[#allocation2 + $0x14] sm:$0xf]  ;;  %v1891_v48 = vrot.slane %v11331_v50, 4 }
 0x2da   : > { %1833 = vst [vmem:[#allocation3 + $0x418] sm:$0xff] %v1813_v17  ;;  %v8349_v33 = vor.u32 %v9532_v28, %v8348_v6  ;;  %v2215_v50 = vld [vmem:[#allocation2 + $0x34] sm:$0xf] }
 0x2db   : > { %1832 = vst [vmem:[#allocation3 + $0x410] sm:$0xff] %v1811_v51  ;;  %2143 = vrot.lane.b32.xlu1 %v11221_v3, %s10225_s10 }
 0x2dc   : > { %2147 = vrot.lane.b32.xlu0 %v11225_v57, %s10225_s10 }
 0x2dd   : > { %6810 = vmatpush.bf16.msra.mxu3 %v8413_v13  ;;  %v1784_v56 = vpop.permute.xlu1 %1783 }
 0x2de   : > { %v1788_v49 = vpop.permute.xlu0 %1787  ;;  %v1800_v11 = vrot.slane %v1784_v56, 4  ;;  %2151 = vrot.lane.b32.xlu2 %v2122_v43, %s10225_s10 }
 0x2df   : > { %v1802_v18 = vrot.slane %v1788_v49, 4 }
 0x2e0   : > { %v1816_v62 = vsel %vm409_vm0, %v1800_v11, %v1801_v52  ;;  %v1814_v0 = vsel %vm409_vm0, %v1799_v54, %v1800_v11  ;;  %v11343_v5 = vpop.permute.xlu2 %1878 }
 0x2e1   : > { %v1817_v8 = vsel %vm1806_vm1, %v1784_v56, %v1816_v62  ;;  %v1815_v27 = vsel %vm1806_vm1, %v1782_v38, %v1814_v0  ;;  %6811 = vmatpush.bf16.msra.mxu3 %v8397_v58  ;;  %v1894_v56 = vrot.slane %v11343_v5, 4  ;;  %v2218_v5 = vld [vmem:[#allocation2 + $0x54] sm:$0xf] }
 0x2e2   : > { %1835 = vst [vmem:[#allocation3 + $0x428] sm:$0xff] %v1817_v8 }
 0x2e3   : > { %1834 = vst [vmem:[#allocation3 + $0x420] sm:$0xff] %v1815_v27  ;;  %2149 = vrot.lane.b32.xlu1 %v11237_v7, %s10225_s10 }
 0x2e4   : > { %2153 = vrot.lane.b32.xlu0 %v11241_v2, %s10225_s10 }
 0x2e5   : > { %6812 = vmatpush.bf16.msra.mxu3 %v8381_v12  ;;  %v1790_v20 = vpop.permute.xlu1 %1789 }
 0x2e6   : > { %v1863_v24 = vpop.permute.xlu0 %1862  ;;  %v1803_v39 = vrot.slane %v1790_v20, 4  ;;  %2157 = vrot.lane.b32.xlu2 %v2125_v60, %s10225_s10 }
 0x2e7   : > { %v1886_v36 = vrot.slane %v1863_v24, 4 }
 0x2e8   : > { %v1820_v23 = vsel %vm409_vm0, %v1803_v39, %v1804_v16  ;;  %v1818_v25 = vsel %vm409_vm0, %v1802_v18, %v1803_v39  ;;  %v11355_v30 = vpop.permute.xlu2 %1884 }
 0x2e9   : > { %v1821_v31 = vsel %vm1806_vm1, %v1790_v20, %v1820_v23  ;;  %v1819_v21 = vsel %vm1806_vm1, %v1788_v49, %v1818_v25  ;;  %6813 = vmatpush.bf16.msra.mxu3 %v8365_v14  ;;  %v1897_v9 = vrot.slane %v11355_v30, 4  ;;  %v2221_v14 = vld [vmem:[#allocation2 + $0x74] sm:$0xf]  ;;  %vm3108_vm1 = vcmask 605184  }
 0x2ea   : > { %1837 = vst [vmem:[#allocation3 + $0x438] sm:$0xff] %v1821_v31 }
 0x2eb   : > { %1836 = vst [vmem:[#allocation3 + $0x430] sm:$0xff] %v1819_v21  ;;  %2155 = vrot.lane.b32.xlu1 %v11253_v4, %s10225_s10 }
 0x2ec   : > { %2159 = vrot.lane.b32.xlu0 %v11257_v34, %s10225_s10 }
 0x2ed   : > { %6814 = vmatpush.bf16.msra.mxu3 %v8349_v33  ;;  %v1865_v37 = vpop.permute.xlu1 %1864 }
 0x2ee   : > { %v1869_v40 = vpop.permute.xlu0 %1868  ;;  %v1887_v41 = vrot.slane %v1865_v37, 4  ;;  %2163 = vrot.lane.b32.xlu2 %v2128_v59, %s10225_s10 }
 0x2ef   : > { %v1889_v15 = vrot.slane %v1869_v40, 4 }
 0x2f0   : > { %v1901_v38 = vsel %vm409_vm0, %v1887_v41, %v1888_v35  ;;  %v1898_v42 = vsel %vm409_vm0, %v1886_v36, %v1887_v41  ;;  %v11367_v44 = vpop.permute.xlu2 %1959  ;;  %v2305_v36 = vld [vmem:[#allocation2 + $0x14] sm:$0xf] }
 0x2f1   : > { %v1902_v46 = vsel %vm1899_vm2, %v1865_v37, %v1901_v38  ;;  %v1900_v32 = vsel %vm1899_vm2, %v1863_v24, %v1898_v42  ;;  %6815 = vmatpush.bf16.msra.mxu3 %v8333_v26  ;;  %v1981_v23 = vrot.slane %v11367_v44, 4 }
 0x2f2   : > { %1924 = vst [vmem:[#allocation3 + $0x448] sm:$0xff] %v1902_v46 }
 0x2f3   : > { %1923 = vst [vmem:[#allocation3 + $0x440] sm:$0xff] %v1900_v32  ;;  %2161 = vrot.lane.b32.xlu1 %v11269_v10, %s10225_s10  ;;  %v2308_v32 = vld [vmem:[#allocation2 + $0x34] sm:$0xf]  ;;  %s10246_s10 = smov 101  }
 0x2f4   : > { %2234 = vrot.lane.b32.xlu0 %v11210_v53, %s10226_s23 }
 0x2f5   : > { %v1871_v17 = vpop.permute.xlu1 %1870 }
 0x2f6   : > { %v1875_v51 = vpop.permute.xlu0 %1874  ;;  %v1890_v47 = vrot.slane %v1871_v17, 4  ;;  %2238 = vrot.lane.b32.xlu2 %v2212_v45, %s10226_s23 }
 0x2f7   : > { %v1892_v49 = vrot.slane %v1875_v51, 4 }
 0x2f8   : > { %v1905_v13 = vsel %vm409_vm0, %v1890_v47, %v1891_v48  ;;  %v1903_v43 = vsel %vm409_vm0, %v1889_v15, %v1890_v47  ;;  %v11379_v52 = vpop.permute.xlu2 %1965 }
 0x2f9   : > { %v1906_v54 = vsel %vm1899_vm2, %v1871_v17, %v1905_v13  ;;  %v1904_v55 = vsel %vm1899_vm2, %v1869_v40, %v1903_v43  ;;  %v1984_v61 = vrot.slane %v11379_v52, 4 }
 0x2fa   : > { %1926 = vst [vmem:[#allocation3 + $0x458] sm:$0xff] %v1906_v54 }
 0x2fb   : > { %1925 = vst [vmem:[#allocation3 + $0x450] sm:$0xff] %v1904_v55  ;;  %2236 = vrot.lane.b32.xlu1 %v11221_v3, %s10226_s23  ;;  %v2311_v55 = vld [vmem:[#allocation2 + $0x54] sm:$0xf] }
 0x2fc   : > { %2240 = vrot.lane.b32.xlu0 %v11225_v57, %s10226_s23 }
 0x2fd   : > { %v1877_v11 = vpop.permute.xlu1 %1876 }
 0x2fe   : > { %v1881_v63 = vpop.permute.xlu0 %1880  ;;  %v1893_v58 = vrot.slane %v1877_v11, 4  ;;  %2244 = vrot.lane.b32.xlu2 %v2215_v50, %s10226_s23 }
 0x2ff   : > { %v1895_v12 = vrot.slane %v1881_v63, 4 }
 0x300   : > { %v1909_v62 = vsel %vm409_vm0, %v1893_v58, %v1894_v56  ;;  %v1907_v0 = vsel %vm409_vm0, %v1892_v49, %v1893_v58  ;;  %v11391_v29 = vpop.permute.xlu2 %1971 }
 0x301   : > { %v1910_v8 = vsel %vm1899_vm2, %v1877_v11, %v1909_v62  ;;  %v1908_v27 = vsel %vm1899_vm2, %v1875_v51, %v1907_v0  ;;  %v1987_v45 = vrot.slane %v11391_v29, 4 }
 0x302   : > { %1928 = vst [vmem:[#allocation3 + $0x468] sm:$0xff] %v1910_v8 }
 0x303   : > { %1927 = vst [vmem:[#allocation3 + $0x460] sm:$0xff] %v1908_v27  ;;  %2242 = vrot.lane.b32.xlu1 %v11237_v7, %s10226_s23  ;;  %v2314_v27 = vld [vmem:[#allocation2 + $0x74] sm:$0xf] }
 0x304   : > { %2246 = vrot.lane.b32.xlu0 %v11241_v2, %s10226_s23 }
 0x305   : > { %v1883_v60 = vpop.permute.xlu1 %1882 }
 0x306   : > { %v1956_v16 = vpop.permute.xlu0 %1955  ;;  %v1896_v18 = vrot.slane %v1883_v60, 4  ;;  %2250 = vrot.lane.b32.xlu2 %v2218_v5, %s10226_s23  ;;  %v333_v5 = vld [vmem:[#allocation2] sm:$0xff] }
 0x307   : > { %v1979_v25 = vrot.slane %v1956_v16, 4  ;;  %341 = vst [vmem:[#allocation3] sm:$0xff] %v333_v5 }
 0x308   : > { %v1913_v19 = vsel %vm409_vm0, %v1896_v18, %v1897_v9  ;;  %v1911_v20 = vsel %vm409_vm0, %v1895_v12, %v1896_v18  ;;  %v11403_v24 = vpop.permute.xlu2 %1977  ;;  %v335_v9 = vld [vmem:[#allocation2 + $0x20] sm:$0xff] }
 0x309   : > { %v1914_v39 = vsel %vm1899_vm2, %v1883_v60, %v1913_v19  ;;  %v1912_v22 = vsel %vm1899_vm2, %v1881_v63, %v1911_v20  ;;  %v1990_v50 = vrot.slane %v11403_v24, 4  ;;  %343 = vst [vmem:[#allocation3 + $0x10] sm:$0xff] %v335_v9  ;;  %v7964_v20 = vld [vmem:[#allocation3 + $0x20] sm:$0xf]  ;;  %v9436_v24 = vld [vmem:[#allocation3 + $0x2c] sm:$0xf0] }
 0x30a   : > { %1930 = vst [vmem:[#allocation3 + $0x478] sm:$0xff] %v1914_v39  ;;  %vm4317_vm2 = vcmask 744448  }
 0x30b   : > { %1929 = vst [vmem:[#allocation3 + $0x470] sm:$0xff] %v1912_v22  ;;  %2248 = vrot.lane.b32.xlu1 %v11253_v4, %s10226_s23 }
 0x30c   : > { %2252 = vrot.lane.b32.xlu0 %v11257_v34, %s10226_s23 }
 0x30d   : > { %v1958_v28 = vpop.permute.xlu1 %1957 }
 0x30e   : > { %v1962_v30 = vpop.permute.xlu0 %1961  ;;  %v1980_v31 = vrot.slane %v1958_v28, 4  ;;  %2256 = vrot.lane.b32.xlu2 %v2221_v14, %s10226_s23 }
 0x30f   : > { %v1982_v37 = vrot.slane %v1962_v30, 4 }
 0x310   : > { %v1994_v21 = vsel %vm409_vm0, %v1980_v31, %v1981_v23  ;;  %v1991_v6 = vsel %vm409_vm0, %v1979_v25, %v1980_v31  ;;  %v11415_v33 = vpop.permute.xlu2 %2052  ;;  %v7965_v23 = vor.u32 %v9436_v24, %v7964_v20  ;;  %v7948_v31 = vld [vmem:[#allocation3] sm:$0xf] }
 0x311   : > { %v1995_v59 = vsel %vm1992_vm3, %v1958_v28, %v1994_v21  ;;  %v1993_v35 = vsel %vm1992_vm3, %v1956_v16, %v1991_v6  ;;  %v2074_v12 = vrot.slane %v11415_v33, 4  ;;  %v9432_v33 = vld [vmem:[#allocation3 + $0xc] sm:$0xf0] }
 0x312   : > { %2017 = vst [vmem:[#allocation3 + $0x488] sm:$0xff] %v1995_v59  ;;  %6757 = vmatpush.bf16.msra.mxu0 %v7965_v23 }
 0x313   : > { %2016 = vst [vmem:[#allocation3 + $0x480] sm:$0xff] %v1993_v35  ;;  %2254 = vrot.lane.b32.xlu1 %v11269_v10, %s10226_s23  ;;  %s10247_s23 = smov 72  }
 0x314   : > { %2327 = vrot.lane.b32.xlu0 %v11210_v53, %s10227_s5 }
 0x315   : > { %v1964_v40 = vpop.permute.xlu1 %1963 }
 0x316   : > { %v1968_v41 = vpop.permute.xlu0 %1967  ;;  %v1983_v1 = vrot.slane %v1964_v40, 4  ;;  %2331 = vrot.lane.b32.xlu2 %v2305_v36, %s10227_s5  ;;  %v7949_v36 = vor.u32 %v9432_v33, %v7948_v31 }
 0x317   : > { %v1985_v48 = vrot.slane %v1968_v41, 4 }
 0x318   : > { %v1998_v26 = vsel %vm409_vm0, %v1983_v1, %v1984_v61  ;;  %v1996_v38 = vsel %vm409_vm0, %v1982_v37, %v1983_v1  ;;  %v11427_v42 = vpop.permute.xlu2 %2058  ;;  %6758 = vmatpush.bf16.msra.mxu0 %v7949_v36 }
 0x319   : > { %v1999_v44 = vsel %vm1992_vm3, %v1964_v40, %v1998_v26  ;;  %v1997_v46 = vsel %vm1992_vm3, %v1962_v30, %v1996_v38  ;;  %v2398_v30 = vld [vmem:[#allocation2 + $0x14] sm:$0xf]  ;;  %v2077_v21 = vrot.slane %v11427_v42, 4 }
 0x31a   : > { %2019 = vst [vmem:[#allocation3 + $0x498] sm:$0xff] %v1999_v44  ;;  %v2401_v38 = vld [vmem:[#allocation2 + $0x34] sm:$0xf] }
 0x31b   : > { %2018 = vst [vmem:[#allocation3 + $0x490] sm:$0xff] %v1997_v46  ;;  %2329 = vrot.lane.b32.xlu1 %v11221_v3, %s10227_s5 }
 0x31c   : > { %2333 = vrot.lane.b32.xlu0 %v11225_v57, %s10227_s5 }
 0x31d   : > { %v1970_v15 = vpop.permute.xlu1 %1969 }
 0x31e   : > { %v1974_v17 = vpop.permute.xlu0 %1973  ;;  %v1986_v51 = vrot.slane %v1970_v15, 4  ;;  %2337 = vrot.lane.b32.xlu2 %v2308_v32, %s10227_s5 }
 0x31f   : > { %v1988_v56 = vrot.slane %v1974_v17, 4 }
 0x320   : > { %v2002_v47 = vsel %vm409_vm0, %v1986_v51, %v1987_v45  ;;  %v2000_v13 = vsel %vm409_vm0, %v1985_v48, %v1986_v51  ;;  %v11439_v43 = vpop.permute.xlu2 %2064 }
 0x321   : > { %v2003_v52 = vsel %vm1992_vm3, %v1970_v15, %v2002_v47  ;;  %v2001_v54 = vsel %vm1992_vm3, %v1968_v41, %v2000_v13  ;;  %v2080_v42 = vrot.slane %v11439_v43, 4  ;;  %v2404_v13 = vld [vmem:[#allocation2 + $0x54] sm:$0xf] }
 0x322   : > { %2021 = vst [vmem:[#allocation3 + $0x4a8] sm:$0xff] %v2003_v52 }
 0x323   : > { %2020 = vst [vmem:[#allocation3 + $0x4a0] sm:$0xff] %v2001_v54  ;;  %2335 = vrot.lane.b32.xlu1 %v11237_v7, %s10227_s5 }
 0x324   : > { %2339 = vrot.lane.b32.xlu0 %v11241_v2, %s10227_s5 }
 0x325   : > { %v1976_v49 = vpop.permute.xlu1 %1975 }
 0x326   : > { %v2049_v11 = vpop.permute.xlu0 %2048  ;;  %v1989_v63 = vrot.slane %v1976_v49, 4  ;;  %2343 = vrot.lane.b32.xlu2 %v2311_v55, %s10227_s5 }
 0x327   : > { %v2072_v60 = vrot.slane %v2049_v11, 4 }
 0x328   : > { %v2006_v58 = vsel %vm409_vm0, %v1989_v63, %v1990_v50  ;;  %v2004_v62 = vsel %vm409_vm0, %v1988_v56, %v1989_v63  ;;  %v11451_v0 = vpop.permute.xlu2 %2070 }
 0x329   : > { %v2007_v29 = vsel %vm1992_vm3, %v1976_v49, %v2006_v58  ;;  %v2005_v8 = vsel %vm1992_vm3, %v1974_v17, %v2004_v62  ;;  %v2083_v43 = vrot.slane %v11451_v0, 4  ;;  %vm3573_vm3 = vcmask 506880  }
 0x32a   : > { %2023 = vst [vmem:[#allocation3 + $0x4b8] sm:$0xff] %v2007_v29  ;;  %v8540_v33 = vld [vmem:[#allocation3 + $0x4a0] sm:$0xf] }
 0x32b   : > { %2022 = vst [vmem:[#allocation3 + $0x4b0] sm:$0xff] %v2005_v8  ;;  %2341 = vrot.lane.b32.xlu1 %v11253_v4, %s10227_s5 }
 0x32c   : > { %2345 = vrot.lane.b32.xlu0 %v11257_v34, %s10227_s5 }
 0x32d   : > { %v2051_v16 = vpop.permute.xlu1 %2050 }
 0x32e   : > { %v2055_v18 = vpop.permute.xlu0 %2054  ;;  %v2073_v19 = vrot.slane %v2051_v16, 4  ;;  %2349 = vrot.lane.b32.xlu2 %v2314_v27, %s10227_s5 }
 0x32f   : > { %v2075_v6 = vrot.slane %v2055_v18, 4 }
 0x330   : > { %v2087_v39 = vsel %vm409_vm0, %v2073_v19, %v2074_v12  ;;  %v2084_v22 = vsel %vm409_vm0, %v2072_v60, %v2073_v19  ;;  %v11463_v14 = vpop.permute.xlu2 %2145  ;;  %v2491_v19 = vld [vmem:[#allocation2 + $0x14] sm:$0xf] }
 0x331   : > { %v2088_v25 = vsel %vm2085_vm4, %v2051_v16, %v2087_v39  ;;  %v2086_v28 = vsel %vm2085_vm4, %v2049_v11, %v2084_v22  ;;  %v2167_v62 = vrot.slane %v11463_v14, 4 }
 0x332   : > { %2110 = vst [vmem:[#allocation3 + $0x4c8] sm:$0xff] %v2088_v25  ;;  %v9580_v31 = vld [vmem:[#allocation3 + $0x4ac] sm:$0xf0] }
 0x333   : > { %2109 = vst [vmem:[#allocation3 + $0x4c0] sm:$0xff] %v2086_v28  ;;  %2347 = vrot.lane.b32.xlu1 %v11269_v10, %s10227_s5  ;;  %s10248_s5 = smov 90  }
 0x334   : > { %2420 = vrot.lane.b32.xlu0 %v11210_v53, %s10228_s4 }
 0x335   : > { %v2057_v59 = vpop.permute.xlu1 %2056 }
 0x336   : > { %v2061_v35 = vpop.permute.xlu0 %2060  ;;  %v2076_v61 = vrot.slane %v2057_v59, 4  ;;  %2424 = vrot.lane.b32.xlu2 %v2398_v30, %s10228_s4 }
 0x337   : > { %v2078_v44 = vrot.slane %v2061_v35, 4 }
 0x338   : > { %v2091_v37 = vsel %vm409_vm0, %v2076_v61, %v2077_v21  ;;  %v2089_v40 = vsel %vm409_vm0, %v2075_v6, %v2076_v61  ;;  %v11475_v41 = vpop.permute.xlu2 %2151 }
 0x339   : > { %v2092_v1 = vsel %vm2085_vm4, %v2057_v59, %v2091_v37  ;;  %v2090_v26 = vsel %vm2085_vm4, %v2055_v18, %v2089_v40  ;;  %v2170_v20 = vrot.slane %v11475_v41, 4  ;;  %v8541_v59 = vor.u32 %v9580_v31, %v8540_v33  ;;  %v9576_v37 = vld [vmem:[#allocation3 + $0x48c] sm:$0xf0] }
 0x33a   : > { %2112 = vst [vmem:[#allocation3 + $0x4d8] sm:$0xff] %v2092_v1  ;;  %v8556_v25 = vld [vmem:[#allocation3 + $0x4c0] sm:$0xf]  ;;  %v11581_v33 = vld [vmem:[#allocation2 + $0xc] sm:$0xff] }
 0x33b   : > { %2111 = vst [vmem:[#allocation3 + $0x4d0] sm:$0xff] %v2090_v26  ;;  %2422 = vrot.lane.b32.xlu1 %v11221_v3, %s10228_s4  ;;  %v8524_v26 = vld [vmem:[#allocation3 + $0x480] sm:$0xf] }
 0x33c   : > { %2426 = vrot.lane.b32.xlu0 %v11225_v57, %s10228_s4 }
 0x33d   : > { %v2063_v46 = vpop.permute.xlu1 %2062 }
 0x33e   : > { %v2067_v32 = vpop.permute.xlu0 %2066  ;;  %v2079_v45 = vrot.slane %v2063_v46, 4  ;;  %2430 = vrot.lane.b32.xlu2 %v2401_v38, %s10228_s4  ;;  %v8525_v38 = vor.u32 %v9576_v37, %v8524_v26 }
 0x33f   : > { %v2081_v52 = vrot.slane %v2067_v32, 4 }
 0x340   : > { %v2095_v48 = vsel %vm409_vm0, %v2079_v45, %v2080_v42  ;;  %v2093_v15 = vsel %vm409_vm0, %v2078_v44, %v2079_v45  ;;  %v11487_v17 = vpop.permute.xlu2 %2157  ;;  %v9572_v44 = vld [vmem:[#allocation3 + $0x46c] sm:$0xf0] }
 0x341   : > { %v2096_v51 = vsel %vm2085_vm4, %v2063_v46, %v2095_v48  ;;  %v2094_v47 = vsel %vm2085_vm4, %v2061_v35, %v2093_v15  ;;  %v2494_v35 = vld [vmem:[#allocation2 + $0x34] sm:$0xf]  ;;  %v2173_v36 = vrot.slane %v11487_v17, 4  ;;  %v8508_v48 = vld [vmem:[#allocation3 + $0x460] sm:$0xf] }
 0x342   : > { %2114 = vst [vmem:[#allocation3 + $0x4e8] sm:$0xff] %v2096_v51  ;;  %v9584_v39 = vld [vmem:[#allocation3 + $0x4cc] sm:$0xf0]  ;;  %v8509_v15 = vor.u32 %v9572_v44, %v8508_v48  ;;  %v2497_v17 = vld [vmem:[#allocation2 + $0x54] sm:$0xf] }
 0x343   : > { %2113 = vst [vmem:[#allocation3 + $0x4e0] sm:$0xff] %v2094_v47  ;;  %2428 = vrot.lane.b32.xlu1 %v11237_v7, %s10228_s4  ;;  %v8557_v28 = vor.u32 %v9584_v39, %v8556_v25 }
 0x344   : > { %2432 = vrot.lane.b32.xlu0 %v11241_v2, %s10228_s4  ;;  %v2407_v2 = vld [vmem:[#allocation2 + $0x74] sm:$0xf] }
 0x345   : > { %v2069_v54 = vpop.permute.xlu1 %2068 }
 0x346   : > { %v2142_v55 = vpop.permute.xlu0 %2141  ;;  %v2082_v50 = vrot.slane %v2069_v54, 4  ;;  %2436 = vrot.lane.b32.xlu2 %v2404_v13, %s10228_s4  ;;  %v9568_v13 = vld [vmem:[#allocation3 + $0x44c] sm:$0xf0] }
 0x347   : > { %v2165_v0 = vrot.slane %v2142_v55, 4 }
 0x348   : > { %v2099_v56 = vsel %vm409_vm0, %v2082_v50, %v2083_v43  ;;  %v2097_v49 = vsel %vm409_vm0, %v2081_v52, %v2082_v50  ;;  %v11499_v11 = vpop.permute.xlu2 %2163 }
 0x349   : > { %v2100_v63 = vsel %vm2085_vm4, %v2069_v54, %v2099_v56  ;;  %v2098_v58 = vsel %vm2085_vm4, %v2067_v32, %v2097_v49  ;;  %v2176_v51 = vrot.slane %v11499_v11, 4  ;;  %v11549_v49 = vld [vmem:[#allocation2 + $0x4c] sm:$0xff]  ;;  %v11553_v11 = vld [vmem:[#allocation2 + $0x64] sm:$0xff]  ;;  %vm3945_vm4 = vcmask 834560  }
 0x34a   : > { %2116 = vst [vmem:[#allocation3 + $0x4f8] sm:$0xff] %v2100_v63  ;;  %v9564_v63 = vld [vmem:[#allocation3 + $0x42c] sm:$0xf0] }
 0x34b   : > { %2115 = vst [vmem:[#allocation3 + $0x4f0] sm:$0xff] %v2098_v58  ;;  %2434 = vrot.lane.b32.xlu1 %v11253_v4, %s10228_s4 }
 0x34c   : > { %2438 = vrot.lane.b32.xlu0 %v11257_v34, %s10228_s4  ;;  %v8572_v34 = vld [vmem:[#allocation3 + $0x4e0] sm:$0xf] }
 0x34d   : > { %v2144_v29 = vpop.permute.xlu1 %2143 }
 0x34e   : > { %v2148_v8 = vpop.permute.xlu0 %2147  ;;  %v2166_v27 = vrot.slane %v2144_v29, 4  ;;  %2442 = vrot.lane.b32.xlu2 %v2407_v2, %s10228_s4 }
 0x34f   : > { %v2168_v24 = vrot.slane %v2148_v8, 4 }
 0x350   : > { %v2180_v5 = vsel %vm409_vm0, %v2166_v27, %v2167_v62  ;;  %v2177_v9 = vsel %vm409_vm0, %v2165_v0, %v2166_v27  ;;  %v11511_v12 = vpop.permute.xlu2 %2238  ;;  %v8476_v0 = vld [vmem:[#allocation3 + $0x420] sm:$0xf] }
 0x351   : > { %v2181_v4 = vsel %vm2178_vm5, %v2144_v29, %v2180_v5  ;;  %v2179_v60 = vsel %vm2178_vm5, %v2142_v55, %v2177_v9  ;;  %v8492_v55 = vld [vmem:[#allocation3 + $0x440] sm:$0xf]  ;;  %v8477_v29 = vor.u32 %v9564_v63, %v8476_v0  ;;  %v2260_v27 = vrot.slane %v11511_v12, 4  ;;  %v9560_v9 = vld [vmem:[#allocation3 + $0x40c] sm:$0xf0]  ;;  %v11569_v12 = vld [vmem:[#allocation2 + $0x4] sm:$0xff] }
 0x352   : > { %2203 = vst [vmem:[#allocation3 + $0x508] sm:$0xff] %v2181_v4  ;;  %v9588_v16 = vld [vmem:[#allocation3 + $0x4ec] sm:$0xf0]  ;;  %v8493_v50 = vor.u32 %v9568_v13, %v8492_v55 }
 0x353   : > { %2202 = vst [vmem:[#allocation3 + $0x500] sm:$0xff] %v2179_v60  ;;  %2440 = vrot.lane.b32.xlu1 %v11269_v10, %s10228_s4  ;;  %v8573_v18 = vor.u32 %v9588_v16, %v8572_v34  ;;  %v8460_v16 = vld [vmem:[#allocation3 + $0x400] sm:$0xf]  ;;  %s10249_s4 = smov 112  }
 0x354   : > { %2513 = vrot.lane.b32.xlu0 %v11210_v53, %s10229_s15 }
 0x355   : > { %6827 = vmatpush.bf16.msrb.mxu0 %v8573_v18  ;;  %v2150_v22 = vpop.permute.xlu1 %2149  ;;  %v8461_v18 = vor.u32 %v9560_v9, %v8460_v16  ;;  %v2677_v9 = vld [vmem:[#allocation2 + $0x14] sm:$0xf] }
 0x356   : > { %v2154_v14 = vpop.permute.xlu0 %2153  ;;  %v2169_v23 = vrot.slane %v2150_v22, 4  ;;  %2517 = vrot.lane.b32.xlu2 %v2491_v19, %s10229_s15 }
 0x357   : > { %v2171_v61 = vrot.slane %v2154_v14, 4 }
 0x358   : > { %v2184_v10 = vsel %vm409_vm0, %v2169_v23, %v2170_v20  ;;  %v2182_v30 = vsel %vm409_vm0, %v2168_v24, %v2169_v23  ;;  %v11523_v21 = vpop.permute.xlu2 %2244  ;;  %v11565_v24 = vld [vmem:[#allocation2 + $0x6c] sm:$0xff]  ;;  %v2584_v23 = vld [vmem:[#allocation2 + $0x14] sm:$0xf] }
 0x359   : > { %v2185_v53 = vsel %vm2178_vm5, %v2150_v22, %v2184_v10  ;;  %v2183_v6 = vsel %vm2178_vm5, %v2148_v8, %v2182_v30  ;;  %6828 = vmatpush.bf16.msrb.mxu0 %v8557_v28  ;;  %v2500_v8 = vld [vmem:[#allocation2 + $0x74] sm:$0xf]  ;;  %v2263_v25 = vrot.slane %v11523_v21, 4 }
 0x35a   : > { %2205 = vst [vmem:[#allocation3 + $0x518] sm:$0xff] %v2185_v53 }
 0x35b   : > { %2204 = vst [vmem:[#allocation3 + $0x510] sm:$0xff] %v2183_v6  ;;  %2515 = vrot.lane.b32.xlu1 %v11221_v3, %s10229_s15 }
 0x35c   : > { %2519 = vrot.lane.b32.xlu0 %v11225_v57, %s10229_s15  ;;  %v11537_v57 = vld [vmem:[#allocation2 + $0x44] sm:$0xff] }
 0x35d   : > { %6829 = vmatpush.bf16.msrb.mxu0 %v8541_v59  ;;  %v2156_v40 = vpop.permute.xlu1 %2155 }
 0x35e   : > { %v2160_v41 = vpop.permute.xlu0 %2159  ;;  %v2172_v1 = vrot.slane %v2156_v40, 4  ;;  %2523 = vrot.lane.b32.xlu2 %v2494_v35, %s10229_s15  ;;  %v11585_v35 = vld [vmem:[#allocation2 + $0x24] sm:$0xff] }
 0x35f   : > { %v2174_v47 = vrot.slane %v2160_v41, 4 }
 0x360   : > { %v2188_v42 = vsel %vm409_vm0, %v2172_v1, %v2173_v36  ;;  %v2186_v3 = vsel %vm409_vm0, %v2171_v61, %v2172_v1  ;;  %v11535_v46 = vpop.permute.xlu2 %2250  ;;  %v2587_v61 = vld [vmem:[#allocation2 + $0x34] sm:$0xf] }
 0x361   : > { %v2189_v32 = vsel %vm2178_vm5, %v2156_v40, %v2188_v42  ;;  %v2187_v45 = vsel %vm2178_vm5, %v2154_v14, %v2186_v3  ;;  %6830 = vmatpush.bf16.msrb.mxu0 %v8525_v38  ;;  %v2266_v37 = vrot.slane %v11535_v46, 4  ;;  %v11597_v3 = vld [vmem:[#allocation2 + $0x2c] sm:$0xff]  ;;  %v2590_v46 = vld [vmem:[#allocation2 + $0x54] sm:$0xf] }
 0x362   : > { %2207 = vst [vmem:[#allocation3 + $0x528] sm:$0xff] %v2189_v32 }
 0x363   : > { %2206 = vst [vmem:[#allocation3 + $0x520] sm:$0xff] %v2187_v45  ;;  %2521 = vrot.lane.b32.xlu1 %v11237_v7, %s10229_s15 }
 0x364   : > { %2525 = vrot.lane.b32.xlu0 %v11537_v57, %s10229_s15 }
 0x365   : > { %6831 = vmatpush.bf16.msrb.mxu0 %v8509_v15  ;;  %v2162_v43 = vpop.permute.xlu1 %2161 }
 0x366   : > { %v2235_v52 = vpop.permute.xlu0 %2234  ;;  %v2175_v54 = vrot.slane %v2162_v43, 4  ;;  %2529 = vrot.lane.b32.xlu2 %v2497_v17, %s10229_s15 }
 0x367   : > { %v2258_v5 = vrot.slane %v2235_v52, 4 }
 0x368   : > { %v2192_v56 = vsel %vm409_vm0, %v2175_v54, %v2176_v51  ;;  %v2190_v7 = vsel %vm409_vm0, %v2174_v47, %v2175_v54  ;;  %v11551_v58 = vpop.permute.xlu2 %2256 }
 0x369   : > { %v2193_v2 = vsel %vm2178_vm5, %v2162_v43, %v2192_v56  ;;  %v2191_v62 = vsel %vm2178_vm5, %v2160_v41, %v2190_v7  ;;  %6832 = vmatpush.bf16.msrb.mxu0 %v8493_v50  ;;  %v2269_v48 = vrot.slane %v11551_v58, 4  ;;  %v2593_v50 = vld [vmem:[#allocation2 + $0x74] sm:$0xf]  ;;  %vm4224_vm5 = vcmask 752640  }
 0x36a   : > { %2209 = vst [vmem:[#allocation3 + $0x538] sm:$0xff] %v2193_v2  ;;  %v318_v2 = vld [vmem:[%s10472_s26 + $0x8] sm:$0xff] }
 0x36b   : > { %2208 = vst [vmem:[#allocation3 + $0x530] sm:$0xff] %v2191_v62  ;;  %2527 = vrot.lane.b32.xlu1 %v11549_v49, %s10229_s15 }
 0x36c   : > { %2531 = vrot.lane.b32.xlu0 %v11553_v11, %s10229_s15  ;;  %326 = vst [vmem:[#allocation2 + $0x18] sm:$0xff] %v318_v2  ;;  %v11689_v2 = vld [vmem:[#allocation2 + $0x10] sm:$0xff] }
 0x36d   : > { %6833 = vmatpush.bf16.msrb.mxu0 %v8477_v29  ;;  %v2237_v4 = vpop.permute.xlu1 %2236 }
 0x36e   : > { %v2241_v60 = vpop.permute.xlu0 %2240  ;;  %v2259_v34 = vrot.slane %v2237_v4, 4  ;;  %2535 = vrot.lane.b32.xlu2 %v2500_v8, %s10229_s15 }
 0x36f   : > { %v2261_v28 = vrot.slane %v2241_v60, 4 }
 0x370   : > { %v2273_v19 = vsel %vm409_vm0, %v2259_v34, %v2260_v27  ;;  %v2270_v20 = vsel %vm409_vm0, %v2258_v5, %v2259_v34  ;;  %v11567_v39 = vpop.permute.xlu2 %2331 }
 0x371   : > { %v2274_v22 = vsel %vm2271_vm6, %v2237_v4, %v2273_v19  ;;  %v2272_v14 = vsel %vm2271_vm6, %v2235_v52, %v2270_v20  ;;  %6834 = vmatpush.bf16.msrb.mxu0 %v8461_v18  ;;  %v2353_v56 = vrot.slane %v11567_v39, 4  ;;  %v320_v18 = vld [vmem:[%s10472_s26 + $0x18] sm:$0xff] }
 0x372   : > { %2296 = vst [vmem:[#allocation3 + $0x548] sm:$0xff] %v2274_v22 }
 0x373   : > { %2295 = vst [vmem:[#allocation3 + $0x540] sm:$0xff] %v2272_v14  ;;  %2533 = vrot.lane.b32.xlu1 %v11565_v24, %s10229_s15  ;;  %s7849_s15 = sshll.u32 %s10462_s0, 7 }
 0x374   : > { %2606 = vrot.lane.b32.xlu0 %v11569_v12, %s10230_s11  ;;  %328 = vst [vmem:[#allocation2 + $0x38] sm:$0xff] %v320_v18  ;;  %v11705_v18 = vld [vmem:[#allocation2 + $0x30] sm:$0xff] }
 0x375   : > { %v2243_v10 = vpop.permute.xlu1 %2242 }
 0x376   : > { %v2247_v30 = vpop.permute.xlu0 %2246  ;;  %v2262_v31 = vrot.slane %v2243_v10, 4  ;;  %2610 = vrot.lane.b32.xlu2 %v2584_v23, %s10230_s11  ;;  %v2680_v23 = vld [vmem:[#allocation2 + $0x34] sm:$0xf] }
 0x377   : > { %v2264_v40 = vrot.slane %v2247_v30, 4 }
 0x378   : > { %v2277_v53 = vsel %vm409_vm0, %v2262_v31, %v2263_v25  ;;  %v2275_v6 = vsel %vm409_vm0, %v2261_v28, %v2262_v31  ;;  %v11583_v59 = vpop.permute.xlu2 %2337  ;;  %v322_v31 = vld [vmem:[%s10472_s26 + $0x28] sm:$0xff] }
 0x379   : > { %v2278_v36 = vsel %vm2271_vm6, %v2243_v10, %v2277_v53  ;;  %v2276_v21 = vsel %vm2271_vm6, %v2241_v60, %v2275_v6  ;;  %v2356_v4 = vrot.slane %v11583_v59, 4  ;;  %330 = vst [vmem:[#allocation2 + $0x58] sm:$0xff] %v322_v31 }
 0x37a   : > { %2298 = vst [vmem:[#allocation3 + $0x558] sm:$0xff] %v2278_v36 }
 0x37b   : > { %2297 = vst [vmem:[#allocation3 + $0x550] sm:$0xff] %v2276_v21  ;;  %2608 = vrot.lane.b32.xlu1 %v11581_v33, %s10230_s11  ;;  %v2683_v21 = vld [vmem:[#allocation2 + $0x54] sm:$0xf] }
 0x37c   : > { %2612 = vrot.lane.b32.xlu0 %v11585_v35, %s10230_s11 }
 0x37d   : > { %v2249_v41 = vpop.permute.xlu1 %2248 }
 0x37e   : > { %v2253_v1 = vpop.permute.xlu0 %2252  ;;  %v2265_v26 = vrot.slane %v2249_v41, 4  ;;  %2616 = vrot.lane.b32.xlu2 %v2587_v61, %s10230_s11 }
 0x37f   : > { %v2267_v15 = vrot.slane %v2253_v1, 4 }
 0x380   : > { %v2281_v38 = vsel %vm409_vm0, %v2265_v26, %v2266_v37  ;;  %v2279_v42 = vsel %vm409_vm0, %v2264_v40, %v2265_v26  ;;  %v11599_v44 = vpop.permute.xlu2 %2343 }
 0x381   : > { %v2282_v32 = vsel %vm2271_vm6, %v2249_v41, %v2281_v38  ;;  %v2280_v45 = vsel %vm2271_vm6, %v2247_v30, %v2279_v42  ;;  %v2359_v25 = vrot.slane %v11599_v44, 4 }
 0x382   : > { %2300 = vst [vmem:[#allocation3 + $0x568] sm:$0xff] %v2282_v32  ;;  %v2686_v32 = vld [vmem:[#allocation2 + $0x74] sm:$0xf] }
 0x383   : > { %2299 = vst [vmem:[#allocation3 + $0x560] sm:$0xff] %v2280_v45  ;;  %2614 = vrot.lane.b32.xlu1 %v11597_v3, %s10230_s11 }
 0x384   : > { %2618 = vrot.lane.b32.xlu0 %v11537_v57, %s10230_s11 }
 0x385   : > { %v2255_v17 = vpop.permute.xlu1 %2254 }
 0x386   : > { %v2328_v51 = vpop.permute.xlu0 %2327  ;;  %v2268_v47 = vrot.slane %v2255_v17, 4  ;;  %2622 = vrot.lane.b32.xlu2 %v2590_v46, %s10230_s11 }
 0x387   : > { %v2351_v7 = vrot.slane %v2328_v51, 4 }
 0x388   : > { %v2285_v13 = vsel %vm409_vm0, %v2268_v47, %v2269_v48  ;;  %v2283_v43 = vsel %vm409_vm0, %v2267_v15, %v2268_v47  ;;  %v11611_v52 = vpop.permute.xlu2 %2349 }
 0x389   : > { %v2286_v54 = vsel %vm2271_vm6, %v2255_v17, %v2285_v13  ;;  %v2284_v55 = vsel %vm2271_vm6, %v2253_v1, %v2283_v43  ;;  %v2362_v61 = vrot.slane %v11611_v52, 4  ;;  %v324_v1 = vld [vmem:[%s10472_s26 + $0x38] sm:$0xff]  ;;  %s10232_s26 = smov 84   ;;  %vm3480_vm6 = vcmask 515072  }
 0x38a   : > { %2302 = vst [vmem:[#allocation3 + $0x578] sm:$0xff] %v2286_v54  ;;  %v2770_v52 = vld [vmem:[#allocation2 + $0x18] sm:$0xf] }
 0x38b   : > { %2301 = vst [vmem:[#allocation3 + $0x570] sm:$0xff] %v2284_v55  ;;  %2620 = vrot.lane.b32.xlu1 %v11549_v49, %s10230_s11 }
 0x38c   : > { %2624 = vrot.lane.b32.xlu0 %v11553_v11, %s10230_s11  ;;  %332 = vst [vmem:[#allocation2 + $0x78] sm:$0xff] %v324_v1 }
 0x38d   : > { %v2330_v63 = vpop.permute.xlu1 %2329 }
 0x38e   : > { %v2334_v58 = vpop.permute.xlu0 %2333  ;;  %v2352_v62 = vrot.slane %v2330_v63, 4  ;;  %2628 = vrot.lane.b32.xlu2 %v2593_v50, %s10230_s11 }
 0x38f   : > { %v2354_v60 = vrot.slane %v2334_v58, 4 }
 0x390   : > { %v2366_v0 = vsel %vm409_vm0, %v2352_v62, %v2353_v56  ;;  %v2363_v29 = vsel %vm409_vm0, %v2351_v7, %v2352_v62  ;;  %v11624_v8 = vpop.permute.xlu2 %2424  ;;  %v11693_v62 = vld [vmem:[#allocation2 + $0x28] sm:$0xff] }
 0x391   : > { %v2367_v27 = vsel %vm2364_vm7, %v2330_v63, %v2366_v0  ;;  %v2365_v5 = vsel %vm2364_vm7, %v2328_v51, %v2363_v29  ;;  %v2446_v45 = vrot.slane %v11624_v8, 4  ;;  %v2773_v8 = vld [vmem:[#allocation2 + $0x38] sm:$0xf] }
 0x392   : > { %2389 = vst [vmem:[#allocation3 + $0x588] sm:$0xff] %v2367_v27 }
 0x393   : > { %2388 = vst [vmem:[#allocation3 + $0x580] sm:$0xff] %v2365_v5  ;;  %2626 = vrot.lane.b32.xlu1 %v11565_v24, %s10230_s11  ;;  %s13289_s11 = scalar_lea.vmem [#allocation10], %s7849_s15 }
 0x394   : > { %2699 = vrot.lane.b32.xlu0 %v11569_v12, %s10231_s25 }
 0x395   : > { %v2336_v34 = vpop.permute.xlu1 %2335 }
 0x396   : > { %v2340_v16 = vpop.permute.xlu0 %2339  ;;  %v2355_v19 = vrot.slane %v2336_v34, 4  ;;  %2703 = vrot.lane.b32.xlu2 %v2677_v9, %s10231_s25 }
 0x397   : > { %v2357_v28 = vrot.slane %v2340_v16, 4 }
 0x398   : > { %v2370_v20 = vsel %vm409_vm0, %v2355_v19, %v2356_v4  ;;  %v2368_v39 = vsel %vm409_vm0, %v2354_v60, %v2355_v19  ;;  %v11637_v22 = vpop.permute.xlu2 %2430 }
 0x399   : > { %v2371_v14 = vsel %vm2364_vm7, %v2336_v34, %v2370_v20  ;;  %v2369_v12 = vsel %vm2364_vm7, %v2334_v58, %v2368_v39  ;;  %v2449_v54 = vrot.slane %v11637_v22, 4  ;;  %v11709_v20 = vld [vmem:[#allocation2 + $0x48] sm:$0xff] }
 0x39a   : > { %2391 = vst [vmem:[#allocation3 + $0x598] sm:$0xff] %v2371_v14  ;;  %v2776_v14 = vld [vmem:[#allocation2 + $0x58] sm:$0xf] }
 0x39b   : > { %2390 = vst [vmem:[#allocation3 + $0x590] sm:$0xff] %v2369_v12  ;;  %2701 = vrot.lane.b32.xlu1 %v11581_v33, %s10231_s25 }
 0x39c   : > { %2705 = vrot.lane.b32.xlu0 %v11585_v35, %s10231_s25 }
 0x39d   : > { %v2342_v10 = vpop.permute.xlu1 %2341 }
 0x39e   : > { %v2346_v30 = vpop.permute.xlu0 %2345  ;;  %v2358_v53 = vrot.slane %v2342_v10, 4  ;;  %2709 = vrot.lane.b32.xlu2 %v2680_v23, %s10231_s25 }
 0x39f   : > { %v2360_v37 = vrot.slane %v2346_v30, 4 }
 0x3a0   : > { %v2374_v6 = vsel %vm409_vm0, %v2358_v53, %v2359_v25  ;;  %v2372_v59 = vsel %vm409_vm0, %v2357_v28, %v2358_v53  ;;  %v11650_v33 = vpop.permute.xlu2 %2436  ;;  %v11721_v53 = vld [vmem:[#allocation2 + $0x50] sm:$0xff] }
 0x3a1   : > { %v2375_v36 = vsel %vm2364_vm7, %v2342_v10, %v2374_v6  ;;  %v2373_v35 = vsel %vm2364_vm7, %v2340_v16, %v2372_v59  ;;  %v2452_v27 = vrot.slane %v11650_v33, 4  ;;  %v11725_v59 = vld [vmem:[#allocation2 + $0x68] sm:$0xff] }
 0x3a2   : > { %2393 = vst [vmem:[#allocation3 + $0x5a8] sm:$0xff] %v2375_v36 }
 0x3a3   : > { %2392 = vst [vmem:[#allocation3 + $0x5a0] sm:$0xff] %v2373_v35  ;;  %2707 = vrot.lane.b32.xlu1 %v11597_v3, %s10231_s25  ;;  %v2779_v35 = vld [vmem:[#allocation2 + $0x78] sm:$0xf] }
 0x3a4   : > { %2711 = vrot.lane.b32.xlu0 %v11537_v57, %s10231_s25 }
 0x3a5   : > { %v2348_v40 = vpop.permute.xlu1 %2347 }
 0x3a6   : > { %v2421_v41 = vpop.permute.xlu0 %2420  ;;  %v2361_v26 = vrot.slane %v2348_v40, 4  ;;  %2715 = vrot.lane.b32.xlu2 %v2683_v21, %s10231_s25 }
 0x3a7   : > { %v2444_v46 = vrot.slane %v2421_v41, 4 }
 0x3a8   : > { %v2378_v38 = vsel %vm409_vm0, %v2361_v26, %v2362_v61  ;;  %v2376_v42 = vsel %vm409_vm0, %v2360_v37, %v2361_v26  ;;  %v11663_v44 = vpop.permute.xlu2 %2442 }
 0x3a9   : > { %v2379_v3 = vsel %vm2364_vm7, %v2348_v40, %v2378_v38  ;;  %v2377_v57 = vsel %vm2364_vm7, %v2346_v30, %v2376_v42  ;;  %v2455_v12 = vrot.slane %v11663_v44, 4  ;;  %v11737_v38 = vld [vmem:[#allocation2 + $0x70] sm:$0xff]  ;;  %vm3852_vm7 = vcmask 900096  }
 0x3aa   : > { %2395 = vst [vmem:[#allocation3 + $0x5b8] sm:$0xff] %v2379_v3 }
 0x3ab   : > { %2394 = vst [vmem:[#allocation3 + $0x5b0] sm:$0xff] %v2377_v57  ;;  %2713 = vrot.lane.b32.xlu1 %v11549_v49, %s10231_s25  ;;  %v11677_v49 = vld [vmem:[#allocation2 + $0x8] sm:$0xff] }
 0x3ac   : > { %2717 = vrot.lane.b32.xlu0 %v11553_v11, %s10231_s25 }
 0x3ad   : > { %v2423_v48 = vpop.permute.xlu1 %2422 }
 0x3ae   : > { %v2427_v15 = vpop.permute.xlu0 %2426  ;;  %v2445_v17 = vrot.slane %v2423_v48, 4  ;;  %2721 = vrot.lane.b32.xlu2 %v2686_v32, %s10231_s25 }
 0x3af   : > { %v2447_v55 = vrot.slane %v2427_v15, 4 }
 0x3b0   : > { %v2459_v51 = vsel %vm409_vm0, %v2445_v17, %v2446_v45  ;;  %v2456_v47 = vsel %vm409_vm0, %v2444_v46, %v2445_v17  ;;  %v11675_v13 = vpop.permute.xlu2 %2517  ;;  %v2863_v46 = vld [vmem:[#allocation2 + $0x18] sm:$0xf] }
 0x3b1   : > { %v2460_v43 = vsel %vm2457_vm8, %v2423_v48, %v2459_v51  ;;  %v2458_v11 = vsel %vm2457_vm8, %v2421_v41, %v2456_v47  ;;  %v2539_v21 = vrot.slane %v11675_v13, 4 }
 0x3b2   : > { %2482 = vst [vmem:[#allocation3 + $0x5c8] sm:$0xff] %v2460_v43 }
 0x3b3   : > { %2481 = vst [vmem:[#allocation3 + $0x5c0] sm:$0xff] %v2458_v11  ;;  %2719 = vrot.lane.b32.xlu1 %v11565_v24, %s10231_s25  ;;  %s9395_s25 = sshll.u32 %s10177_s18, 2 }
 0x3b4   : > { %2792 = vrot.lane.b32.xlu0 %v11677_v49, %s10232_s26 }
 0x3b5   : > { %v2429_v50 = vpop.permute.xlu1 %2428 }
 0x3b6   : > { %v2433_v56 = vpop.permute.xlu0 %2432  ;;  %v2448_v7 = vrot.slane %v2429_v50, 4  ;;  %2796 = vrot.lane.b32.xlu2 %v2770_v52, %s10232_s26 }
 0x3b7   : > { %v2450_v5 = vrot.slane %v2433_v56, 4 }
 0x3b8   : > { %v2463_v63 = vsel %vm409_vm0, %v2448_v7, %v2449_v54  ;;  %v2461_v58 = vsel %vm409_vm0, %v2447_v55, %v2448_v7  ;;  %v11691_v24 = vpop.permute.xlu2 %2523  ;;  %v9612_v55 = vld [vmem:[#allocation3 + $0x5ac] sm:$0xf0] }
 0x3b9   : > { %v2464_v0 = vsel %vm2457_vm8, %v2429_v50, %v2463_v63  ;;  %v2462_v29 = vsel %vm2457_vm8, %v2427_v15, %v2461_v58  ;;  %v2542_v48 = vrot.slane %v11691_v24, 4  ;;  %v8668_v63 = vld [vmem:[#allocation3 + $0x5a0] sm:$0xf]  ;;  %v2866_v24 = vld [vmem:[#allocation2 + $0x38] sm:$0xf] }
 0x3ba   : > { %2484 = vst [vmem:[#allocation3 + $0x5d8] sm:$0xff] %v2464_v0  ;;  %v8684_v43 = vld [vmem:[#allocation3 + $0x5c0] sm:$0xf]  ;;  %v8669_v58 = vor.u32 %v9612_v55, %v8668_v63 }
 0x3bb   : > { %2483 = vst [vmem:[#allocation3 + $0x5d0] sm:$0xff] %v2462_v29  ;;  %2794 = vrot.lane.b32.xlu1 %v11689_v2, %s10232_s26 }
 0x3bc   : > { %2798 = vrot.lane.b32.xlu0 %v11693_v62, %s10232_s26 }
 0x3bd   : > { %v2435_v9 = vpop.permute.xlu1 %2434 }
 0x3be   : > { %v2439_v4 = vpop.permute.xlu0 %2438  ;;  %v2451_v60 = vrot.slane %v2435_v9, 4  ;;  %2802 = vrot.lane.b32.xlu2 %v2773_v8, %s10232_s26  ;;  %v9608_v8 = vld [vmem:[#allocation3 + $0x58c] sm:$0xf0] }
 0x3bf   : > { %v2453_v23 = vrot.slane %v2439_v4, 4 }
 0x3c0   : > { %v2467_v34 = vsel %vm409_vm0, %v2451_v60, %v2452_v27  ;;  %v2465_v16 = vsel %vm409_vm0, %v2450_v5, %v2451_v60  ;;  %v11707_v19 = vpop.permute.xlu2 %2529 }
 0x3c1   : > { %v2468_v39 = vsel %vm2457_vm8, %v2435_v9, %v2467_v34  ;;  %v2466_v22 = vsel %vm2457_vm8, %v2433_v56, %v2465_v16  ;;  %v2545_v0 = vrot.slane %v11707_v19, 4 }
 0x3c2   : > { %2486 = vst [vmem:[#allocation3 + $0x5e8] sm:$0xff] %v2468_v39  ;;  %v9616_v17 = vld [vmem:[#allocation3 + $0x5cc] sm:$0xf0] }
 0x3c3   : > { %2485 = vst [vmem:[#allocation3 + $0x5e0] sm:$0xff] %v2466_v22  ;;  %2800 = vrot.lane.b32.xlu1 %v11705_v18, %s10232_s26  ;;  %v8685_v11 = vor.u32 %v9616_v17, %v8684_v43  ;;  %v9604_v39 = vld [vmem:[#allocation3 + $0x56c] sm:$0xf0]  ;;  %v8588_v17 = vld [vmem:[#allocation3 + $0x500] sm:$0xf] }
 0x3c4   : > { %2804 = vrot.lane.b32.xlu0 %v11709_v20, %s10232_s26 }
 0x3c5   : > { %v2441_v25 = vpop.permute.xlu1 %2440 }
 0x3c6   : > { %v2514_v28 = vpop.permute.xlu0 %2513  ;;  %v2454_v10 = vrot.slane %v2441_v25, 4  ;;  %2808 = vrot.lane.b32.xlu2 %v2776_v14, %s10232_s26 }
 0x3c7   : > { %v2537_v61 = vrot.slane %v2514_v28, 4 }
 0x3c8   : > { %v2471_v30 = vsel %vm409_vm0, %v2454_v10, %v2455_v12  ;;  %v2469_v31 = vsel %vm409_vm0, %v2453_v23, %v2454_v10  ;;  %v11723_v6 = vpop.permute.xlu2 %2535  ;;  %v8636_v12 = vld [vmem:[#allocation3 + $0x560] sm:$0xf] }
 0x3c9   : > { %v2472_v33 = vsel %vm2457_vm8, %v2441_v25, %v2471_v30  ;;  %v2470_v36 = vsel %vm2457_vm8, %v2439_v4, %v2469_v31  ;;  %v8652_v4 = vld [vmem:[#allocation3 + $0x580] sm:$0xf]  ;;  %v8637_v23 = vor.u32 %v9604_v39, %v8636_v12  ;;  %v2869_v25 = vld [vmem:[#allocation2 + $0x58] sm:$0xf]  ;;  %v9600_v30 = vld [vmem:[#allocation3 + $0x54c] sm:$0xf0] }
 0x3ca   : > { %2488 = vst [vmem:[#allocation3 + $0x5f8] sm:$0xff] %v2472_v33  ;;  %v8700_v57 = vld [vmem:[#allocation3 + $0x5e0] sm:$0xf]  ;;  %v8653_v60 = vor.u32 %v9608_v8, %v8652_v4  ;;  %vm4131_vm8 = vcmask 818176  }
 0x3cb   : > { %2487 = vst [vmem:[#allocation3 + $0x5f0] sm:$0xff] %v2470_v36  ;;  %2806 = vrot.lane.b32.xlu1 %v11721_v53, %s10232_s26 }
 0x3cc   : > { %2810 = vrot.lane.b32.xlu0 %v11725_v59, %s10232_s26 }
 0x3cd   : > { %v2516_v37 = vpop.permute.xlu1 %2515 }
 0x3ce   : > { %v2520_v40 = vpop.permute.xlu0 %2519  ;;  %v2538_v41 = vrot.slane %v2516_v37, 4  ;;  %2814 = vrot.lane.b32.xlu2 %v2779_v35, %s10232_s26  ;;  %v8620_v35 = vld [vmem:[#allocation3 + $0x540] sm:$0xf] }
 0x3cf   : > { %v2540_v15 = vrot.slane %v2520_v40, 4 }
 0x3d0   : > { %v2552_v1 = vsel %vm409_vm0, %v2538_v41, %v2539_v21  ;;  %v2549_v26 = vsel %vm409_vm0, %v2537_v61, %v2538_v41  ;;  %v11739_v42 = vpop.permute.xlu2 %2610  ;;  %v8621_v21 = vor.u32 %v9600_v30, %v8620_v35 }
 0x3d1   : > { %v2553_v44 = vsel %vm2550_vm9, %v2516_v37, %v2552_v1  ;;  %v2551_v3 = vsel %vm2550_vm9, %v2514_v28, %v2549_v26  ;;  %v2548_v28 = vrot.slane %v11723_v6, 4  ;;  %v8604_v26 = vld [vmem:[#allocation3 + $0x520] sm:$0xf] }
 0x3d2   : > { %2575 = vst [vmem:[#allocation3 + $0x608] sm:$0xff] %v2553_v44  ;;  %v9620_v32 = vld [vmem:[#allocation3 + $0x5ec] sm:$0xf0] }
 0x3d3   : > { %2574 = vst [vmem:[#allocation3 + $0x600] sm:$0xff] %v2551_v3  ;;  %2812 = vrot.lane.b32.xlu1 %v11737_v38, %s10232_s26  ;;  %v8701_v45 = vor.u32 %v9620_v32, %v8700_v57  ;;  %v2872_v3 = vld [vmem:[#allocation2 + $0x78] sm:$0xf]  ;;  %v2632_v57 = vrot.slane %v11739_v42, 4  ;;  %s9396_s26 = sshll.u32 %s10181_s19, 5 }
 0x3d4   : > { %2885 = vrot.lane.b32.xlu0 %v11677_v49, %s10233_s12 }
 0x3d5   : > { %6846 = vmatpush.bf16.msrb.mxu1 %v8701_v45  ;;  %v2522_v51 = vpop.permute.xlu1 %2521  ;;  %v9592_v45 = vld [vmem:[#allocation3 + $0x50c] sm:$0xf0] }
 0x3d6   : > { %v2526_v47 = vpop.permute.xlu0 %2525  ;;  %v2541_v13 = vrot.slane %v2522_v51, 4  ;;  %2889 = vrot.lane.b32.xlu2 %v2863_v46, %s10233_s12 }
 0x3d7   : > { %v2543_v29 = vrot.slane %v2526_v47, 4 }
 0x3d8   : > { %v2556_v52 = vsel %vm409_vm0, %v2541_v13, %v2542_v48  ;;  %v2554_v54 = vsel %vm409_vm0, %v2540_v15, %v2541_v13  ;;  %v11751_v50 = vpop.permute.xlu2 %2616 }
 0x3d9   : > { %v2557_v56 = vsel %vm2550_vm9, %v2522_v51, %v2556_v52  ;;  %v2555_v7 = vsel %vm2550_vm9, %v2520_v40, %v2554_v54  ;;  %6847 = vmatpush.bf16.msrb.mxu1 %v8685_v11  ;;  %v9596_v40 = vld [vmem:[#allocation3 + $0x52c] sm:$0xf0]  ;;  %v8589_v51 = vor.u32 %v9592_v45, %v8588_v17  ;;  %v2956_v52 = vld [vmem:[#allocation2 + $0x18] sm:$0xf]  ;;  %v2635_v54 = vrot.slane %v11751_v50, 4 }
 0x3da   : > { %2577 = vst [vmem:[#allocation3 + $0x618] sm:$0xff] %v2557_v56  ;;  %v8605_v44 = vor.u32 %v9596_v40, %v8604_v26 }
 0x3db   : > { %2576 = vst [vmem:[#allocation3 + $0x610] sm:$0xff] %v2555_v7  ;;  %2887 = vrot.lane.b32.xlu1 %v11689_v2, %s10233_s12 }
 0x3dc   : > { %2891 = vrot.lane.b32.xlu0 %v11693_v62, %s10233_s12 }
 0x3dd   : > { %6848 = vmatpush.bf16.msrb.mxu1 %v8669_v58  ;;  %v2528_v27 = vpop.permute.xlu1 %2527 }
 0x3de   : > { %v2532_v5 = vpop.permute.xlu0 %2531  ;;  %v2544_v9 = vrot.slane %v2528_v27, 4  ;;  %2895 = vrot.lane.b32.xlu2 %v2866_v24, %s10233_s12 }
 0x3df   : > { %v2546_v10 = vrot.slane %v2532_v5, 4 }
 0x3e0   : > { %v2560_v34 = vsel %vm409_vm0, %v2544_v9, %v2545_v0  ;;  %v2558_v16 = vsel %vm409_vm0, %v2543_v29, %v2544_v9  ;;  %v11763_v22 = vpop.permute.xlu2 %2622 }
 0x3e1   : > { %v2561_v14 = vsel %vm2550_vm9, %v2528_v27, %v2560_v34  ;;  %v2559_v19 = vsel %vm2550_vm9, %v2526_v47, %v2558_v16  ;;  %6849 = vmatpush.bf16.msrb.mxu1 %v8653_v60  ;;  %v2638_v50 = vrot.slane %v11763_v22, 4 }
 0x3e2   : > { %2579 = vst [vmem:[#allocation3 + $0x628] sm:$0xff] %v2561_v14 }
 0x3e3   : > { %2578 = vst [vmem:[#allocation3 + $0x620] sm:$0xff] %v2559_v19  ;;  %2893 = vrot.lane.b32.xlu1 %v11705_v18, %s10233_s12 }
 0x3e4   : > { %2897 = vrot.lane.b32.xlu0 %v11709_v20, %s10233_s12 }
 0x3e5   : > { %6850 = vmatpush.bf16.msrb.mxu1 %v8637_v23  ;;  %v2534_v31 = vpop.permute.xlu1 %2533 }
 0x3e6   : > { %v2607_v33 = vpop.permute.xlu0 %2606  ;;  %v2547_v36 = vrot.slane %v2534_v31, 4  ;;  %2901 = vrot.lane.b32.xlu2 %v2869_v25, %s10233_s12 }
 0x3e7   : > { %v2630_v32 = vrot.slane %v2607_v33, 4 }
 0x3e8   : > { %v2564_v61 = vsel %vm409_vm0, %v2547_v36, %v2548_v28  ;;  %v2562_v37 = vsel %vm409_vm0, %v2546_v10, %v2547_v36  ;;  %v11775_v41 = vpop.permute.xlu2 %2628 }
 0x3e9   : > { %v2565_v1 = vsel %vm2550_vm9, %v2534_v31, %v2564_v61  ;;  %v2563_v6 = vsel %vm2550_vm9, %v2532_v5, %v2562_v37  ;;  %6851 = vmatpush.bf16.msrb.mxu1 %v8621_v21  ;;  %v2641_v22 = vrot.slane %v11775_v41, 4  ;;  %vm3387_vm9 = vcmask 523264  }
 0x3ea   : > { %2581 = vst [vmem:[#allocation3 + $0x638] sm:$0xff] %v2565_v1 }
 0x3eb   : > { %2580 = vst [vmem:[#allocation3 + $0x630] sm:$0xff] %v2563_v6  ;;  %2899 = vrot.lane.b32.xlu1 %v11721_v53, %s10233_s12 }
 0x3ec   : > { %2903 = vrot.lane.b32.xlu0 %v11725_v59, %s10233_s12 }
 0x3ed   : > { %6852 = vmatpush.bf16.msrb.mxu1 %v8605_v44  ;;  %v2609_v46 = vpop.permute.xlu1 %2608 }
 0x3ee   : > { %v2613_v48 = vpop.permute.xlu0 %2612  ;;  %v2631_v15 = vrot.slane %v2609_v46, 4  ;;  %2907 = vrot.lane.b32.xlu2 %v2872_v3, %s10233_s12 }
 0x3ef   : > { %v2633_v55 = vrot.slane %v2613_v48, 4 }
 0x3f0   : > { %v2645_v47 = vsel %vm409_vm0, %v2631_v15, %v2632_v57  ;;  %v2642_v13 = vsel %vm409_vm0, %v2630_v32, %v2631_v15  ;;  %v11787_v43 = vpop.permute.xlu2 %2703 }
 0x3f1   : > { %v2646_v11 = vsel %vm2643_vm10, %v2609_v46, %v2645_v47  ;;  %v2644_v42 = vsel %vm2643_vm10, %v2607_v33, %v2642_v13  ;;  %6853 = vmatpush.bf16.msrb.mxu1 %v8589_v51  ;;  %v2725_v36 = vrot.slane %v11787_v43, 4 }
 0x3f2   : > { %2668 = vst [vmem:[#allocation3 + $0x648] sm:$0xff] %v2646_v11 }
 0x3f3   : > { %2667 = vst [vmem:[#allocation3 + $0x640] sm:$0xff] %v2644_v42  ;;  %2905 = vrot.lane.b32.xlu1 %v11737_v38, %s10233_s12  ;;  %s7691_s12 = sadd.s32 %s9396_s26, %s9395_s25 }
 0x3f4   : > { %2978 = vrot.lane.b32.xlu0 %v11677_v49, %s10234_s28 }
 0x3f5   : > { %v2615_v56 = vpop.permute.xlu1 %2614 }
 0x3f6   : > { %v2619_v7 = vpop.permute.xlu0 %2618  ;;  %v2634_v63 = vrot.slane %v2615_v56, 4  ;;  %2982 = vrot.lane.b32.xlu2 %v2956_v52, %s10234_s28 }
 0x3f7   : > { %v2636_v27 = vrot.slane %v2619_v7, 4 }
 0x3f8   : > { %v2649_v58 = vsel %vm409_vm0, %v2634_v63, %v2635_v54  ;;  %v2647_v24 = vsel %vm409_vm0, %v2633_v55, %v2634_v63  ;;  %v11799_v0 = vpop.permute.xlu2 %2709 }
 0x3f9   : > { %v2650_v29 = vsel %vm2643_vm10, %v2615_v56, %v2649_v58  ;;  %v2648_v8 = vsel %vm2643_vm10, %v2613_v48, %v2647_v24  ;;  %v2728_v44 = vrot.slane %v11799_v0, 4 }
 0x3fa   : > { %2670 = vst [vmem:[#allocation3 + $0x658] sm:$0xff] %v2650_v29 }
 0x3fb   : > { %2669 = vst [vmem:[#allocation3 + $0x650] sm:$0xff] %v2648_v8  ;;  %2980 = vrot.lane.b32.xlu1 %v11689_v2, %s10234_s28 }
 0x3fc   : > { %2984 = vrot.lane.b32.xlu0 %v11693_v62, %s10234_s28 }
 0x3fd   : > { %v2621_v5 = vpop.permute.xlu1 %2620 }
 0x3fe   : > { %v2625_v9 = vpop.permute.xlu0 %2624  ;;  %v2637_v4 = vrot.slane %v2621_v5, 4  ;;  %3176 = vrot.lane.b32.xlu2 %v11709_v20, %s10235_s3 }
 0x3ff   : > { %v2639_v19 = vrot.slane %v2625_v9, 4 }
 0x400   : > { %v2653_v60 = vsel %vm409_vm0, %v2637_v4, %v2638_v50  ;;  %v2651_v34 = vsel %vm409_vm0, %v2636_v27, %v2637_v4  ;;  %v2716_v16 = vpop.permute.xlu2 %2715 }
 0x401   : > { %v2654_v39 = vsel %vm2643_vm10, %v2621_v5, %v2653_v60  ;;  %v2652_v14 = vsel %vm2643_vm10, %v2619_v7, %v2651_v34  ;;  %v2731_v47 = vrot.slane %v2716_v16, 4 }
 0x402   : > { %2672 = vst [vmem:[#allocation3 + $0x668] sm:$0xff] %v2654_v39 }
 0x403   : > { %2671 = vst [vmem:[#allocation3 + $0x660] sm:$0xff] %v2652_v14  ;;  %2986 = vrot.lane.b32.xlu1 %v11705_v18, %s10234_s28 }
 0x404   : > { %3178 = vrot.lane.b32.xlu0 %v11721_v53, %s10235_s3 }
 0x405   : > { %v2627_v12 = vpop.permute.xlu1 %2626 }
 0x406   : > { %v2700_v23 = vpop.permute.xlu0 %2699  ;;  %v2640_v25 = vrot.slane %v2627_v12, 4  ;;  %3184 = vrot.lane.b32.xlu2 %v11737_v38, %s10235_s3 }
 0x407   : > { %v2723_v35 = vrot.slane %v2700_v23, 4 }
 0x408   : > { %v2657_v28 = vsel %vm409_vm0, %v2640_v25, %v2641_v22  ;;  %v2655_v10 = vsel %vm409_vm0, %v2639_v19, %v2640_v25  ;;  %v2722_v30 = vpop.permute.xlu2 %2721  ;;  %v11887_v25 = vld [vmem:[#allocation2 + $0x54] sm:$0xff] }
 0x409   : > { %v2658_v31 = vsel %vm2643_vm10, %v2627_v12, %v2657_v28  ;;  %v2656_v33 = vsel %vm2643_vm10, %v2625_v9, %v2655_v10  ;;  %v2734_v63 = vrot.slane %v2722_v30, 4  ;;  %vm13700_vm10 = vcmask 908288  }
 0x40a   : > { %2674 = vst [vmem:[#allocation3 + $0x678] sm:$0xff] %v2658_v31 }
 0x40b   : > { %2673 = vst [vmem:[#allocation3 + $0x670] sm:$0xff] %v2656_v33  ;;  %3182 = vrot.lane.b32.xlu1 %v11725_v59, %s10235_s3 }
 0x40c   : > { %3164 = vrot.lane.b32.xlu0 %v11677_v49, %s10235_s3 }
 0x40d   : > { %v2702_v21 = vpop.permute.xlu1 %2701 }
 0x40e   : > { %v2706_v61 = vpop.permute.xlu0 %2705  ;;  %v2724_v37 = vrot.slane %v2702_v21, 4  ;;  %3170 = vrot.lane.b32.xlu2 %v11693_v62, %s10235_s3 }
 0x40f   : > { %v2726_v3 = vrot.slane %v2706_v61, 4 }
 0x410   : > { %v2738_v40 = vsel %vm409_vm0, %v2724_v37, %v2725_v36  ;;  %v2735_v41 = vsel %vm409_vm0, %v2723_v35, %v2724_v37  ;;  %v2797_v1 = vpop.permute.xlu2 %2796  ;;  %v11900_v37 = vld [vmem:[#allocation2 + $0x6c] sm:$0xff] }
 0x411   : > { %v2739_v6 = vsel %vm2736_vm11, %v2702_v21, %v2738_v40  ;;  %v2737_v26 = vsel %vm2736_vm11, %v2700_v23, %v2735_v41  ;;  %v2818_v4 = vrot.slane %v2797_v1, 4  ;;  %v11896_v21 = vld [vmem:[#allocation2 + $0x4c] sm:$0xff] }
 0x412   : > { %2761 = vst [vmem:[#allocation3 + $0x688] sm:$0xff] %v2739_v6 }
 0x413   : > { %2760 = vst [vmem:[#allocation3 + $0x680] sm:$0xff] %v2737_v26  ;;  %3166 = vrot.lane.b32.xlu1 %v11689_v2, %s10235_s3 }
 0x414   : > { %3172 = vrot.lane.b32.xlu0 %v11705_v18, %s10235_s3 }
 0x415   : > { %v2708_v57 = vpop.permute.xlu1 %2707 }
 0x416   : > { %v2712_v32 = vpop.permute.xlu0 %2711  ;;  %v2727_v45 = vrot.slane %v2708_v57, 4  ;;  %3085 = vrot.lane.b32.xlu2 %v11721_v53, %s10236_s17 }
 0x417   : > { %v2729_v13 = vrot.slane %v2712_v32, 4 }
 0x418   : > { %v2742_v46 = vsel %vm409_vm0, %v2727_v45, %v2728_v44  ;;  %v2740_v48 = vsel %vm409_vm0, %v2726_v3, %v2727_v45  ;;  %v11845_v15 = vpop.permute.xlu2 %2802  ;;  %v11913_v45 = vld [vmem:[#allocation2 + $0x74] sm:$0xff] }
 0x419   : > { %v2743_v17 = vsel %vm2736_vm11, %v2708_v57, %v2742_v46  ;;  %v2741_v51 = vsel %vm2736_vm11, %v2706_v61, %v2740_v48  ;;  %v2821_v28 = vrot.slane %v11845_v15, 4 }
 0x41a   : > { %2763 = vst [vmem:[#allocation3 + $0x698] sm:$0xff] %v2743_v17 }
 0x41b   : > { %2762 = vst [vmem:[#allocation3 + $0x690] sm:$0xff] %v2741_v51  ;;  %3083 = vrot.lane.b32.xlu1 %v11709_v20, %s10236_s17 }
 0x41c   : > { %3089 = vrot.lane.b32.xlu0 %v11725_v59, %s10236_s17 }
 0x41d   : > { %v2714_v43 = vpop.permute.xlu1 %2713 }
 0x41e   : > { %v2718_v11 = vpop.permute.xlu0 %2717  ;;  %v2730_v42 = vrot.slane %v2714_v43, 4  ;;  %3071 = vrot.lane.b32.xlu2 %v11677_v49, %s10236_s17 }
 0x41f   : > { %v2732_v58 = vrot.slane %v2718_v11, 4 }
 0x420   : > { %v2746_v52 = vsel %vm409_vm0, %v2730_v42, %v2731_v47  ;;  %v2744_v54 = vsel %vm409_vm0, %v2729_v13, %v2730_v42  ;;  %v11857_v55 = vpop.permute.xlu2 %2808 }
 0x421   : > { %v2747_v56 = vsel %vm2736_vm11, %v2714_v43, %v2746_v52  ;;  %v2745_v7 = vsel %vm2736_vm11, %v2712_v32, %v2744_v54  ;;  %v2824_v1 = vrot.slane %v11857_v55, 4 }
 0x422   : > { %2765 = vst [vmem:[#allocation3 + $0x6a8] sm:$0xff] %v2747_v56 }
 0x423   : > { %2764 = vst [vmem:[#allocation3 + $0x6a0] sm:$0xff] %v2745_v7  ;;  %3091 = vrot.lane.b32.xlu1 %v11737_v38, %s10236_s17 }
 0x424   : > { %3073 = vrot.lane.b32.xlu0 %v11689_v2, %s10236_s17 }
 0x425   : > { %v2720_v24 = vpop.permute.xlu1 %2719 }
 0x426   : > { %v2793_v0 = vpop.permute.xlu0 %2792  ;;  %v2733_v29 = vrot.slane %v2720_v24, 4  ;;  %3079 = vrot.lane.b32.xlu2 %v11705_v18, %s10236_s17 }
 0x427   : > { %v2816_v60 = vrot.slane %v2793_v0, 4 }
 0x428   : > { %v2750_v8 = vsel %vm409_vm0, %v2733_v29, %v2734_v63  ;;  %v2748_v50 = vsel %vm409_vm0, %v2732_v58, %v2733_v29  ;;  %v11869_v27 = vpop.permute.xlu2 %2814 }
 0x429   : > { %v2751_v5 = vsel %vm2736_vm11, %v2720_v24, %v2750_v8  ;;  %v2749_v9 = vsel %vm2736_vm11, %v2718_v11, %v2748_v50  ;;  %v2827_v17 = vrot.slane %v11869_v27, 4  ;;  %vm4038_vm11 = vcmask 826368  }
 0x42a   : > { %2767 = vst [vmem:[#allocation3 + $0x6b8] sm:$0xff] %v2751_v5 }
 0x42b   : > { %2766 = vst [vmem:[#allocation3 + $0x6b0] sm:$0xff] %v2749_v9  ;;  %3077 = vrot.lane.b32.xlu1 %v11693_v62, %s10236_s17 }
 0x42c   : > { %2990 = vrot.lane.b32.xlu0 %v11709_v20, %s10234_s28 }
 0x42d   : > { %v2795_v34 = vpop.permute.xlu1 %2794 }
 0x42e   : > { %v2799_v16 = vpop.permute.xlu0 %2798  ;;  %v2817_v39 = vrot.slane %v2795_v34, 4  ;;  %2996 = vrot.lane.b32.xlu2 %v11725_v59, %s10234_s28 }
 0x42f   : > { %v2819_v10 = vrot.slane %v2799_v16, 4 }
 0x430   : > { %v2831_v14 = vsel %vm409_vm0, %v2817_v39, %v2818_v4  ;;  %v2828_v22 = vsel %vm409_vm0, %v2816_v60, %v2817_v39  ;;  %v11881_v19 = vpop.permute.xlu2 %2889  ;;  %v11947_v60 = vld [vmem:[#allocation2 + $0x14] sm:$0xff] }
 0x431   : > { %v2832_v12 = vsel %vm2829_vm12, %v2795_v34, %v2831_v14  ;;  %v2830_v23 = vsel %vm2829_vm12, %v2793_v0, %v2828_v22  ;;  %v2911_v56 = vrot.slane %v11881_v19, 4 }
 0x432   : > { %2854 = vst [vmem:[#allocation3 + $0x6c8] sm:$0xff] %v2832_v12 }
 0x433   : > { %2853 = vst [vmem:[#allocation3 + $0x6c0] sm:$0xff] %v2830_v23  ;;  %2992 = vrot.lane.b32.xlu1 %v11721_v53, %s10234_s28 }
 0x434   : > { %2998 = vrot.lane.b32.xlu0 %v11737_v38, %s10234_s28 }
 0x435   : > { %v2801_v30 = vpop.permute.xlu1 %2800 }
 0x436   : > { %v2805_v31 = vpop.permute.xlu0 %2804  ;;  %v2820_v33 = vrot.slane %v2801_v30, 4  ;;  %4294 = vrot.lane.b32.xlu2 %v11887_v25, %s10237_s9 }
 0x437   : > { %v2822_v6 = vrot.slane %v2805_v31, 4 }
 0x438   : > { %v2835_v36 = vsel %vm409_vm0, %v2820_v33, %v2821_v28  ;;  %v2833_v35 = vsel %vm409_vm0, %v2819_v10, %v2820_v33  ;;  %v11898_v61 = vpop.permute.xlu2 %2895 }
 0x439   : > { %v2836_v40 = vsel %vm2829_vm12, %v2801_v30, %v2835_v36  ;;  %v2834_v41 = vsel %vm2829_vm12, %v2799_v16, %v2833_v35  ;;  %v2914_v34 = vrot.slane %v11898_v61, 4  ;;  %v11956_v30 = vld [vmem:[#allocation2 + $0xc] sm:$0xff] }
 0x43a   : > { %2856 = vst [vmem:[#allocation3 + $0x6d8] sm:$0xff] %v2836_v40  ;;  %v8812_v12 = vld [vmem:[#allocation3 + $0x6c0] sm:$0xf]  ;;  %v11960_v36 = vld [vmem:[#allocation2 + $0x2c] sm:$0xff] }
 0x43b   : > { %2855 = vst [vmem:[#allocation3 + $0x6d0] sm:$0xff] %v2834_v41  ;;  %4292 = vrot.lane.b32.xlu1 %v11896_v21, %s10237_s9  ;;  %v8796_v40 = vld [vmem:[#allocation3 + $0x6a0] sm:$0xf] }
 0x43c   : > { %4298 = vrot.lane.b32.xlu0 %v11900_v37, %s10237_s9 }
 0x43d   : > { %v2807_v26 = vpop.permute.xlu1 %2806 }
 0x43e   : > { %v2811_v44 = vpop.permute.xlu0 %2810  ;;  %v2823_v3 = vrot.slane %v2807_v26, 4  ;;  %3548 = vrot.lane.b32.xlu2 %v11709_v20, %s10238_s30 }
 0x43f   : > { %v2825_v51 = vrot.slane %v2811_v44, 4 }
 0x440   : > { %v2839_v57 = vsel %vm409_vm0, %v2823_v3, %v2824_v1  ;;  %v2837_v32 = vsel %vm409_vm0, %v2822_v6, %v2823_v3  ;;  %v11915_v46 = vpop.permute.xlu2 %2901 }
 0x441   : > { %v2840_v48 = vsel %vm2829_vm12, %v2807_v26, %v2839_v57  ;;  %v2838_v15 = vsel %vm2829_vm12, %v2805_v31, %v2837_v32  ;;  %v9644_v31 = vld [vmem:[#allocation3 + $0x6ac] sm:$0xf0]  ;;  %v2917_v1 = vrot.slane %v11915_v46, 4  ;;  %v8780_v32 = vld [vmem:[#allocation3 + $0x680] sm:$0xf] }
 0x442   : > { %2858 = vst [vmem:[#allocation3 + $0x6e8] sm:$0xff] %v2840_v48  ;;  %v9648_v39 = vld [vmem:[#allocation3 + $0x6cc] sm:$0xf0]  ;;  %v8797_v41 = vor.u32 %v9644_v31, %v8796_v40 }
 0x443   : > { %2857 = vst [vmem:[#allocation3 + $0x6e0] sm:$0xff] %v2838_v15  ;;  %4300 = vrot.lane.b32.xlu1 %v11913_v45, %s10237_s9  ;;  %v8813_v23 = vor.u32 %v9648_v39, %v8812_v12  ;;  %v9640_v26 = vld [vmem:[#allocation3 + $0x68c] sm:$0xf0] }
 0x444   : > { %3550 = vrot.lane.b32.xlu0 %v11721_v53, %s10238_s30  ;;  %v8781_v48 = vor.u32 %v9640_v26, %v8780_v32 }
 0x445   : > { %v2813_v47 = vpop.permute.xlu1 %2812 }
 0x446   : > { %v2886_v13 = vpop.permute.xlu0 %2885  ;;  %v2826_v43 = vrot.slane %v2813_v47, 4  ;;  %3556 = vrot.lane.b32.xlu2 %v11737_v38, %s10238_s30 }
 0x447   : > { %v2909_v7 = vrot.slane %v2886_v13, 4 }
 0x448   : > { %v2843_v11 = vsel %vm409_vm0, %v2826_v43, %v2827_v17  ;;  %v2841_v42 = vsel %vm409_vm0, %v2825_v51, %v2826_v43  ;;  %v11928_v52 = vpop.permute.xlu2 %2907  ;;  %v11973_v51 = vld [vmem:[#allocation2 + $0x34] sm:$0xff] }
 0x449   : > { %v2844_v54 = vsel %vm2829_vm12, %v2813_v47, %v2843_v11  ;;  %v2842_v55 = vsel %vm2829_vm12, %v2811_v44, %v2841_v42  ;;  %v9636_v47 = vld [vmem:[#allocation3 + $0x66c] sm:$0xf0]  ;;  %v8764_v11 = vld [vmem:[#allocation3 + $0x660] sm:$0xf]  ;;  %v2920_v42 = vrot.slane %v11928_v52, 4  ;;  %vm3294_vm12 = vcmask 588800  }
 0x44a   : > { %2860 = vst [vmem:[#allocation3 + $0x6f8] sm:$0xff] %v2844_v54  ;;  %v8828_v5 = vld [vmem:[#allocation3 + $0x6e0] sm:$0xf] }
 0x44b   : > { %2859 = vst [vmem:[#allocation3 + $0x6f0] sm:$0xff] %v2842_v55  ;;  %3554 = vrot.lane.b32.xlu1 %v11725_v59, %s10238_s30  ;;  %v9632_v55 = vld [vmem:[#allocation3 + $0x64c] sm:$0xf0] }
 0x44c   : > { %3920 = vrot.lane.b32.xlu0 %v11896_v21, %s10239_s29 }
 0x44d   : > { %v2888_v63 = vpop.permute.xlu1 %2887 }
 0x44e   : > { %v2892_v58 = vpop.permute.xlu0 %2891  ;;  %v2910_v24 = vrot.slane %v2888_v63, 4  ;;  %3926 = vrot.lane.b32.xlu2 %v11900_v37, %s10239_s29 }
 0x44f   : > { %v2912_v16 = vrot.slane %v2892_v58, 4 }
 0x450   : > { %v2924_v0 = vsel %vm409_vm0, %v2910_v24, %v2911_v56  ;;  %v2921_v29 = vsel %vm409_vm0, %v2909_v7, %v2910_v24  ;;  %v11941_v8 = vpop.permute.xlu2 %2982 }
 0x451   : > { %v2925_v50 = vsel %vm2922_vm13, %v2888_v63, %v2924_v0  ;;  %v2923_v27 = vsel %vm2922_vm13, %v2886_v13, %v2921_v29 }
 0x452   : > { %2947 = vst [vmem:[#allocation3 + $0x708] sm:$0xff] %v2925_v50  ;;  %v9652_v9 = vld [vmem:[#allocation3 + $0x6ec] sm:$0xf0] }
 0x453   : > { %2946 = vst [vmem:[#allocation3 + $0x700] sm:$0xff] %v2923_v27  ;;  %3922 = vrot.lane.b32.xlu1 %v11887_v25, %s10239_s29  ;;  %v8829_v4 = vor.u32 %v9652_v9, %v8828_v5  ;;  %v9628_v50 = vld [vmem:[#allocation3 + $0x62c] sm:$0xf0]  ;;  %v8732_v5 = vld [vmem:[#allocation3 + $0x620] sm:$0xf]  ;;  %v3004_v9 = vrot.slane %v11941_v8, 4 }
 0x454   : > { %3928 = vrot.lane.b32.xlu0 %v11913_v45, %s10239_s29 }
 0x455   : > { %6865 = vmatpush.bf16.msrb.mxu2 %v8829_v4  ;;  %v2894_v14 = vpop.permute.xlu1 %2893 }
 0x456   : > { %v2898_v22 = vpop.permute.xlu0 %2897  ;;  %v2913_v19 = vrot.slane %v2894_v14, 4  ;;  %4282 = vrot.lane.b32.xlu2 %v11947_v60, %s10237_s9 }
 0x457   : > { %v2915_v6 = vrot.slane %v2898_v22, 4 }
 0x458   : > { %v2928_v28 = vsel %vm409_vm0, %v2913_v19, %v2914_v34  ;;  %v2926_v10 = vsel %vm409_vm0, %v2912_v16, %v2913_v19  ;;  %v11958_v33 = vpop.permute.xlu2 %3176  ;;  %v9624_v34 = vld [vmem:[#allocation3 + $0x60c] sm:$0xf0] }
 0x459   : > { %v2929_v35 = vsel %vm2922_vm13, %v2894_v14, %v2928_v28  ;;  %v2927_v61 = vsel %vm2922_vm13, %v2892_v58, %v2926_v10  ;;  %6866 = vmatpush.bf16.msrb.mxu2 %v8813_v23  ;;  %v8748_v58 = vld [vmem:[#allocation3 + $0x640] sm:$0xf]  ;;  %v3194_v10 = vrot.slane %v11958_v33, 4 }
 0x45a   : > { %2949 = vst [vmem:[#allocation3 + $0x718] sm:$0xff] %v2929_v35  ;;  %v8749_v24 = vor.u32 %v9632_v55, %v8748_v58 }
 0x45b   : > { %2948 = vst [vmem:[#allocation3 + $0x710] sm:$0xff] %v2927_v61  ;;  %4280 = vrot.lane.b32.xlu1 %v11956_v30, %s10237_s9 }
 0x45c   : > { %4286 = vrot.lane.b32.xlu0 %v11960_v36, %s10237_s9 }
 0x45d   : > { %6867 = vmatpush.bf16.msrb.mxu2 %v8797_v41  ;;  %v2900_v44 = vpop.permute.xlu1 %2899 }
 0x45e   : > { %v2904_v3 = vpop.permute.xlu0 %2903  ;;  %v2916_v57 = vrot.slane %v2900_v44, 4  ;;  %3536 = vrot.lane.b32.xlu2 %v11677_v49, %s10238_s30  ;;  %v8765_v49 = vor.u32 %v9636_v47, %v8764_v11 }
 0x45f   : > { %v2918_v54 = vrot.slane %v2904_v3, 4 }
 0x460   : > { %v2932_v15 = vsel %vm409_vm0, %v2916_v57, %v2917_v1  ;;  %v2930_v17 = vsel %vm409_vm0, %v2915_v6, %v2916_v57  ;;  %v11975_v13 = vpop.permute.xlu2 %3184 }
 0x461   : > { %v2933_v46 = vsel %vm2922_vm13, %v2900_v44, %v2932_v15  ;;  %v2931_v43 = vsel %vm2922_vm13, %v2898_v22, %v2930_v17  ;;  %6868 = vmatpush.bf16.msrb.mxu2 %v8781_v48  ;;  %v8716_v22 = vld [vmem:[#allocation3 + $0x600] sm:$0xf]  ;;  %v13626_v57 = vrot.slane %v11975_v13, 4 }
 0x462   : > { %2951 = vst [vmem:[#allocation3 + $0x728] sm:$0xff] %v2933_v46  ;;  %v8717_v19 = vor.u32 %v9624_v34, %v8716_v22 }
 0x463   : > { %2950 = vst [vmem:[#allocation3 + $0x720] sm:$0xff] %v2931_v43  ;;  %4288 = vrot.lane.b32.xlu1 %v11973_v51, %s10237_s9 }
 0x464   : > { %3538 = vrot.lane.b32.xlu0 %v11689_v2, %s10238_s30 }
 0x465   : > { %6869 = vmatpush.bf16.msrb.mxu2 %v8765_v49  ;;  %v2906_v56 = vpop.permute.xlu1 %2905 }
 0x466   : > { %v2979_v7 = vpop.permute.xlu0 %2978  ;;  %v2919_v63 = vrot.slane %v2906_v56, 4  ;;  %3544 = vrot.lane.b32.xlu2 %v11705_v18, %s10238_s30  ;;  %v8733_v18 = vor.u32 %v9628_v50, %v8732_v5 }
 0x467   : > { %v3002_v4 = vrot.slane %v2979_v7, 4 }
 0x468   : > { %v2936_v0 = vsel %vm409_vm0, %v2919_v63, %v2920_v42  ;;  %v2934_v29 = vsel %vm409_vm0, %v2918_v54, %v2919_v63  ;;  %v11988_v27 = vpop.permute.xlu2 %3170 }
 0x469   : > { %v2937_v2 = vsel %vm2922_vm13, %v2906_v56, %v2936_v0  ;;  %v2935_v52 = vsel %vm2922_vm13, %v2904_v3, %v2934_v29  ;;  %6870 = vmatpush.bf16.msrb.mxu2 %v8749_v24  ;;  %v3191_v46 = vrot.slane %v11988_v27, 4  ;;  %vm13749_vm13 = vcmask 736256  }
 0x46a   : > { %2953 = vst [vmem:[#allocation3 + $0x738] sm:$0xff] %v2937_v2 }
 0x46b   : > { %2952 = vst [vmem:[#allocation3 + $0x730] sm:$0xff] %v2935_v52  ;;  %3542 = vrot.lane.b32.xlu1 %v11693_v62, %s10238_s30 }
 0x46c   : > { %3908 = vrot.lane.b32.xlu0 %v11956_v30, %s10239_s29 }
 0x46d   : > { %6871 = vmatpush.bf16.msrb.mxu2 %v8733_v18  ;;  %v2981_v16 = vpop.permute.xlu1 %2980 }
 0x46e   : > { %v2985_v39 = vpop.permute.xlu0 %2984  ;;  %v3003_v14 = vrot.slane %v2981_v16, 4  ;;  %3914 = vrot.lane.b32.xlu2 %v11960_v36, %s10239_s29 }
 0x46f   : > { %v3005_v31 = vrot.slane %v2985_v39, 4 }
 0x470   : > { %v3017_v62 = vsel %vm409_vm0, %v3003_v14, %v3004_v9  ;;  %v3014_v12 = vsel %vm409_vm0, %v3002_v4, %v3003_v14  ;;  %v12001_v23 = vpop.permute.xlu2 %3085 }
 0x471   : > { %v3018_v8 = vsel %vm3015_vm14, %v2981_v16, %v3017_v62  ;;  %v3016_v28 = vsel %vm3015_vm14, %v2979_v7, %v3014_v12  ;;  %6872 = vmatpush.bf16.msrb.mxu2 %v8717_v19  ;;  %v13617_v24 = vrot.slane %v12001_v23, 4 }
 0x472   : > { %3040 = vst [vmem:[#allocation3 + $0x748] sm:$0xff] %v3018_v8 }
 0x473   : > { %3039 = vst [vmem:[#allocation3 + $0x740] sm:$0xff] %v3016_v28  ;;  %3910 = vrot.lane.b32.xlu1 %v11947_v60, %s10239_s29  ;;  %v12105_v28 = vld [vmem:[#allocation2 + $0x8] sm:$0xff] }
 0x474   : > { %3916 = vrot.lane.b32.xlu0 %v11973_v51, %s10239_s29 }
 0x475   : > { %v12010_v35 = vpop.permute.xlu1 %2986 }
 0x476   : > { %v12012_v61 = vpop.permute.xlu0 %3178  ;;  %v13601_v40 = vrot.slane %v12010_v35, 4  ;;  %4201 = vrot.lane.b32.xlu2 %v11887_v25, %s10240_s8 }
 0x477   : > { %v13628_v41 = vrot.slane %v12012_v61, 4 }
 0x478   : > { %v3019_v1 = vsel %vm409_vm0, %v3005_v31, %v13601_v40  ;;  %v12021_v6 = vpop.permute.xlu2 %3071 }
 0x479   : > { %v3209_v26 = vsel %vm409_vm0, %v3194_v10, %v13628_v41  ;;  %v3020_v44 = vsel %vm3015_vm14, %v2985_v39, %v3019_v1  ;;  %v3095_v9 = vrot.slane %v12021_v6, 4 }
 0x47a   : > { %v3210_v3 = vsel %vm3201_vm15, %v11958_v33, %v3209_v26  ;;  %3041 = vst [vmem:[#allocation3 + $0x750] sm:$0xff] %v3020_v44 }
 0x47b   : > { %4199 = vrot.lane.b32.xlu1 %v11896_v21, %s10240_s8  ;;  %3229 = vst [vmem:[#allocation3 + $0x7e0] sm:$0xff] %v3210_v3  ;;  %v12117_v3 = vld [vmem:[#allocation2 + $0x10] sm:$0xff] }
 0x47c   : > { %4205 = vrot.lane.b32.xlu0 %v11900_v37, %s10240_s8 }
 0x47d   : > { %v3183_v32 = vpop.permute.xlu1 %3182 }
 0x47e   : > { %v3165_v48 = vpop.permute.xlu0 %3164  ;;  %v3197_v15 = vrot.slane %v3183_v32, 4  ;;  %3455 = vrot.lane.b32.xlu2 %v11709_v20, %s10241_s1 }
 0x47f   : > { %v3188_v43 = vrot.slane %v3165_v48, 4 }
 0x480   : > { %v3213_v33 = vsel %vm409_vm0, %v3197_v15, %v13626_v57  ;;  %v12039_v17 = vpop.permute.xlu2 %3079 }
 0x481   : > { %v3214_v47 = vsel %vm3201_vm15, %v3183_v32, %v3213_v33  ;;  %v13608_v10 = vrot.slane %v12039_v17, 4 }
 0x482   : > { %3231 = vst [vmem:[#allocation3 + $0x7f0] sm:$0xff] %v3214_v47  ;;  %v8956_v7 = vld [vmem:[#allocation3 + $0x7e0] sm:$0xf]  ;;  %v12122_v47 = vld [vmem:[#allocation2 + $0x30] sm:$0xff] }
 0x483   : > { %4207 = vrot.lane.b32.xlu1 %v11913_v45, %s10240_s8 }
 0x484   : > { %3457 = vrot.lane.b32.xlu0 %v11721_v53, %s10241_s1 }
 0x485   : > { %v12047_v11 = vpop.permute.xlu1 %3166 }
 0x486   : > { %v12049_v20 = vpop.permute.xlu0 %3172  ;;  %v13637_v49 = vrot.slane %v12047_v11, 4  ;;  %3463 = vrot.lane.b32.xlu2 %v11737_v38, %s10241_s1 }
 0x487   : > { %v13619_v42 = vrot.slane %v12049_v20, 4 }
 0x488   : > { %v3200_v54 = vsel %vm409_vm0, %v3188_v43, %v13637_v49  ;;  %v12058_v55 = vpop.permute.xlu2 %2996  ;;  %v9413_v43 = vld [vmem:[#allocation4 + $0x34] sm:$0xf0] }
 0x489   : > { %v3205_v53 = vsel %vm409_vm0, %v3191_v46, %v13619_v42  ;;  %v3202_v56 = vsel %vm3201_vm15, %v3165_v48, %v3200_v54  ;;  %v9684_v63 = vld [vmem:[#allocation3 + $0x7ec] sm:$0xf0]  ;;  %v7860_v46 = vld [vmem:[#allocation4 + $0x8] sm:$0xf]  ;;  %v3011_v54 = vrot.slane %v12058_v55, 4 }
 0x48a   : > { %v3206_v58 = vsel %vm3201_vm15, %v11988_v27, %v3205_v53  ;;  %3225 = vst [vmem:[#allocation3 + $0x7c0] sm:$0xff] %v3202_v56  ;;  %v8957_v38 = vor.u32 %v9684_v63, %v8956_v7  ;;  %v12127_v56 = vor.u32 %v9413_v43, %v7860_v46  ;;  %v3142_v49 = vld [vmem:[#allocation2 + $0x18] sm:$0xf] }
 0x48b   : > { %3461 = vrot.lane.b32.xlu1 %v11725_v59, %s10241_s1  ;;  %3227 = vst [vmem:[#allocation3 + $0x7d0] sm:$0xff] %v3206_v58 }
 0x48c   : > { %3827 = vrot.lane.b32.xlu0 %v11896_v21, %s10242_s24  ;;  %6884 = vmatpush.bf16.msrb.mxu3 %v8957_v38  ;;  %13783 = vst [vmem:[#allocation23_spill] sm:$0xff] %v12127_v56 }
 0x48d   : > { %v3084_v0 = vpop.permute.xlu1 %3083  ;;  %6797 = vmatmul.bf16.vlgmr.msra.gmra.mxu2 %v12127_v56 }
 0x48e   : > { %v3090_v29 = vpop.permute.xlu0 %3089  ;;  %v3101_v50 = vrot.slane %v3084_v0, 4  ;;  %3833 = vrot.lane.b32.xlu2 %v11900_v37, %s10242_s24 }
 0x48f   : > { %v3104_v4 = vrot.slane %v3090_v29, 4 }
 0x490   : > { %v3116_v27 = vsel %vm409_vm0, %v3101_v50, %v13617_v24  ;;  %v12076_v59 = vpop.permute.xlu2 %4294 }
 0x491   : > { %v3117_v2 = vsel %vm3108_vm1, %v3084_v0, %v3116_v27  ;;  %v8940_v52 = vld [vmem:[#allocation3 + $0x7c0] sm:$0xf] }
 0x492   : > { %3136 = vst [vmem:[#allocation3 + $0x7a0] sm:$0xff] %v3117_v2  ;;  %v9680_v5 = vld [vmem:[#allocation3 + $0x7cc] sm:$0xf0] }
 0x493   : > { %3829 = vrot.lane.b32.xlu1 %v11887_v25, %s10242_s24  ;;  %v8941_v18 = vor.u32 %v9680_v5, %v8940_v52 }
 0x494   : > { %3835 = vrot.lane.b32.xlu0 %v11913_v45, %s10242_s24 }
 0x495   : > { %v12084_v34 = vpop.permute.xlu1 %3091  ;;  %6885 = vmatpush.bf16.msrb.mxu3 %v8941_v18 }
 0x496   : > { %v12086_v16 = vpop.permute.xlu0 %3073  ;;  %v13630_v39 = vrot.slane %v12084_v34, 4  ;;  %4189 = vrot.lane.b32.xlu2 %v11947_v60, %s10240_s8 }
 0x497   : > { %v13610_v14 = vrot.slane %v12086_v16, 4 }
 0x498   : > { %v3120_v22 = vsel %vm409_vm0, %v3104_v4, %v13630_v39  ;;  %v12095_v19 = vpop.permute.xlu2 %3548  ;;  %v7852_v4 = vld [vmem:[#allocation4] sm:$0xf] }
 0x499   : > { %v3107_v62 = vsel %vm409_vm0, %v3095_v9, %v13610_v14  ;;  %v3121_v12 = vsel %vm3108_vm1, %v3090_v29, %v3120_v22  ;;  %v8924_v48 = vld [vmem:[#allocation3 + $0x7a0] sm:$0xf]  ;;  %v12141_v29 = vld [vmem:[#allocation2 + $0x28] sm:$0xff]  ;;  %v9412_v22 = vld [vmem:[#allocation4 + $0x2c] sm:$0xf0]  ;;  %v3566_v46 = vrot.slane %v12095_v19, 4 }
 0x49a   : > { %v3109_v8 = vsel %vm3108_vm1, %v12021_v6, %v3107_v62  ;;  %3138 = vst [vmem:[#allocation3 + $0x7b0] sm:$0xff] %v3121_v12  ;;  %v13627_v62 = vrot.slane %v12076_v59, 4  ;;  %v12156_v12 = vor.u32 %v9412_v22, %v7852_v4 }
 0x49b   : > { %4187 = vrot.lane.b32.xlu1 %v11956_v30, %s10240_s8  ;;  %3132 = vst [vmem:[#allocation3 + $0x780] sm:$0xff] %v3109_v8 }
 0x49c   : > { %4193 = vrot.lane.b32.xlu0 %v11960_v36, %s10240_s8  ;;  %6759 = vmatmul.bf16.vlgmr.msra.gmra.mxu0 %v12156_v12 }
 0x49d   : > { %v3078_v31 = vpop.permute.xlu1 %3077 }
 0x49e   : > { %v2991_v1 = vpop.permute.xlu0 %2990  ;;  %v3098_v26 = vrot.slane %v3078_v31, 4  ;;  %3443 = vrot.lane.b32.xlu2 %v12105_v28, %s10241_s1 }
 0x49f   : > { %v3008_v53 = vrot.slane %v2991_v1, 4 }
 0x4a0   : > { %v3112_v6 = vsel %vm409_vm0, %v3098_v26, %v13608_v10  ;;  %v12115_v44 = vpop.permute.xlu2 %3556 }
 0x4a1   : > { %v3113_v32 = vsel %vm3108_vm1, %v3078_v31, %v3112_v6  ;;  %v9676_v15 = vld [vmem:[#allocation3 + $0x7ac] sm:$0xf0] }
 0x4a2   : > { %3134 = vst [vmem:[#allocation3 + $0x790] sm:$0xff] %v3113_v32  ;;  %v8925_v33 = vor.u32 %v9676_v15, %v8924_v48  ;;  %v8908_v52 = vld [vmem:[#allocation3 + $0x780] sm:$0xf] }
 0x4a3   : > { %4195 = vrot.lane.b32.xlu1 %v11973_v51, %s10240_s8 }
 0x4a4   : > { %3445 = vrot.lane.b32.xlu0 %v12117_v3, %s10241_s1  ;;  %6886 = vmatpush.bf16.msrb.mxu3 %v8925_v33  ;;  %v9664_v33 = vld [vmem:[#allocation3 + $0x74c] sm:$0xf0] }
 0x4a5   : > { %v12129_v7 = vpop.permute.xlu1 %2992 }
 0x4a6   : > { %v12131_v63 = vpop.permute.xlu0 %2998  ;;  %v13629_v58 = vrot.slane %v12129_v7, 4  ;;  %3451 = vrot.lane.b32.xlu2 %v12122_v47, %s10241_s1 }
 0x4a7   : > { %v13602_v38 = vrot.slane %v12131_v63, 4 }
 0x4a8   : > { %v3023_v0 = vsel %vm409_vm0, %v3008_v53, %v13629_v58  ;;  %v12143_v50 = vpop.permute.xlu2 %3926  ;;  %v7854_v53 = vld [vmem:[#allocation4 + $0x30] sm:$0xf0] }
 0x4a9   : > { %v3027_v27 = vsel %vm409_vm0, %v3011_v54, %v13602_v38  ;;  %v3024_v2 = vsel %vm3015_vm14, %v2991_v1, %v3023_v0  ;;  %v9672_v5 = vld [vmem:[#allocation3 + $0x78c] sm:$0xf0]  ;;  %v9406_v54 = vld [vmem:[#allocation4 + $0x4] sm:$0xf] }
 0x4aa   : > { %v3028_v18 = vsel %vm3015_vm14, %v12058_v55, %v3027_v27  ;;  %3043 = vst [vmem:[#allocation3 + $0x760] sm:$0xff] %v3024_v2  ;;  %v8909_v9 = vor.u32 %v9672_v5, %v8908_v52  ;;  %v12176_v2 = vor.u32 %v9406_v54, %v7854_v53  ;;  %v8844_v54 = vld [vmem:[#allocation3 + $0x700] sm:$0xf] }
 0x4ab   : > { %3449 = vrot.lane.b32.xlu1 %v12141_v29, %s10241_s1  ;;  %3045 = vst [vmem:[#allocation3 + $0x770] sm:$0xff] %v3028_v18  ;;  %v8876_v18 = vld [vmem:[#allocation3 + $0x740] sm:$0xf] }
 0x4ac   : > { %3815 = vrot.lane.b32.xlu0 %v11956_v30, %s10242_s24  ;;  %6887 = vmatpush.bf16.msrb.mxu3 %v8909_v9  ;;  %v8877_v9 = vor.u32 %v9664_v33, %v8876_v18  ;;  %v13618_v33 = vrot.slane %v12115_v44, 4 }
 0x4ad   : > { %v4293_v8 = vpop.permute.xlu1 %4292  ;;  %6778 = vmatmul.bf16.vlgmr.msra.gmra.mxu1 %v12176_v2 }
 0x4ae   : > { %v4299_v31 = vpop.permute.xlu0 %4298  ;;  %v4310_v55 = vrot.slane %v4293_v8, 4  ;;  %3821 = vrot.lane.b32.xlu2 %v11960_v36, %s10242_s24 }
 0x4af   : > { %v4313_v43 = vrot.slane %v4299_v31, 4 }
 0x4b0   : > { %v4325_v1 = vsel %vm409_vm0, %v4310_v55, %v13627_v62  ;;  %v12164_v26 = vpop.permute.xlu2 %4282  ;;  %v9660_v55 = vld [vmem:[#allocation3 + $0x72c] sm:$0xf0] }
 0x4b1   : > { %v4326_v6 = vsel %vm4317_vm2, %v4293_v8, %v4325_v1  ;;  %v8892_v32 = vld [vmem:[#allocation3 + $0x760] sm:$0xf] }
 0x4b2   : > { %4345 = vst [vmem:[#allocation3 + $0xae0] sm:$0xff] %v4326_v6  ;;  %v9668_v48 = vld [vmem:[#allocation3 + $0x76c] sm:$0xf0] }
 0x4b3   : > { %3817 = vrot.lane.b32.xlu1 %v11947_v60, %s10242_s24  ;;  %v8893_v15 = vor.u32 %v9668_v48, %v8892_v32  ;;  %v8860_v32 = vld [vmem:[#allocation3 + $0x720] sm:$0xf]  ;;  %v12196_v48 = vld [vmem:[#allocation2 + $0x48] sm:$0xff] }
 0x4b4   : > { %3823 = vrot.lane.b32.xlu0 %v11973_v51, %s10242_s24 }
 0x4b5   : > { %v12172_v0 = vpop.permute.xlu1 %4300  ;;  %6888 = vmatpush.bf16.msrb.mxu3 %v8893_v15  ;;  %v8861_v15 = vor.u32 %v9660_v55, %v8860_v32  ;;  %v12213_v32 = vld [vmem:[#allocation2 + $0x70] sm:$0xff] }
 0x4b6   : > { %v12174_v27 = vpop.permute.xlu0 %3550  ;;  %v13600_v52 = vrot.slane %v12172_v0, 4  ;;  %4108 = vrot.lane.b32.xlu2 %v11887_v25, %s10243_s7 }
 0x4b7   : > { %v13599_v5 = vrot.slane %v12174_v27, 4 }
 0x4b8   : > { %v4329_v4 = vsel %vm409_vm0, %v4313_v43, %v13600_v52  ;;  %v12186_v22 = vpop.permute.xlu2 %3536 }
 0x4b9   : > { %v3581_v8 = vsel %vm409_vm0, %v3566_v46, %v13599_v5  ;;  %v4330_v1 = vsel %vm4317_vm2, %v4299_v31, %v4329_v4  ;;  %6889 = vmatpush.bf16.msrb.mxu3 %v8877_v9  ;;  %v9656_v46 = vld [vmem:[#allocation3 + $0x70c] sm:$0xf0]  ;;  %v9340_v55 = vld [vmem:[#allocation3 + $0xae0] sm:$0xf] }
 0x4ba   : > { %v3582_v6 = vsel %vm3573_vm3, %v12095_v19, %v3581_v8  ;;  %4347 = vst [vmem:[#allocation3 + $0xaf0] sm:$0xff] %v4330_v1  ;;  %v8845_v53 = vor.u32 %v9656_v46, %v8844_v54  ;;  %v12208_v4 = vld [vmem:[#allocation2 + $0x50] sm:$0xff] }
 0x4bb   : > { %4106 = vrot.lane.b32.xlu1 %v11896_v21, %s10243_s7  ;;  %3601 = vst [vmem:[#allocation3 + $0x8e0] sm:$0xff] %v3582_v6 }
 0x4bc   : > { %4112 = vrot.lane.b32.xlu0 %v11900_v37, %s10243_s7 }
 0x4bd   : > { %v3555_v31 = vpop.permute.xlu1 %3554  ;;  %6890 = vmatpush.bf16.msrb.mxu3 %v8861_v15  ;;  %v3941_v15 = vrot.slane %v12143_v50, 4 }
 0x4be   : > { %v3921_v43 = vpop.permute.xlu0 %3920  ;;  %v3569_v19 = vrot.slane %v3555_v31, 4  ;;  %3362 = vrot.lane.b32.xlu2 %v12196_v48, %s10244_s27 }
 0x4bf   : > { %v3938_v46 = vrot.slane %v3921_v43, 4 }
 0x4c0   : > { %v3585_v18 = vsel %vm409_vm0, %v3569_v19, %v13618_v33  ;;  %v12206_v9 = vpop.permute.xlu2 %3544 }
 0x4c1   : > { %v3586_v8 = vsel %vm3573_vm3, %v3555_v31, %v3585_v18  ;;  %v9780_v1 = vld [vmem:[#allocation3 + $0xaec] sm:$0xf0]  ;;  %6891 = vmatpush.bf16.msrb.mxu3 %v8845_v53 }
 0x4c2   : > { %3603 = vst [vmem:[#allocation3 + $0x8f0] sm:$0xff] %v3586_v8  ;;  %v9341_v6 = vor.u32 %v9780_v1, %v9340_v55  ;;  %v12229_v8 = vld [vmem:[#allocation2 + $0x68] sm:$0xff]  ;;  %v9084_v5 = vld [vmem:[#allocation3 + $0x8e0] sm:$0xf] }
 0x4c3   : > { %4114 = vrot.lane.b32.xlu1 %v11913_v45, %s10243_s7 }
 0x4c4   : > { %3364 = vrot.lane.b32.xlu0 %v12208_v4, %s10244_s27  ;;  %6941 = vmatpush.bf16.msra.mxu2 %v9341_v6 }
 0x4c5   : > { %v12218_v19 = vpop.permute.xlu1 %3922 }
 0x4c6   : > { %v12220_v31 = vpop.permute.xlu0 %3928  ;;  %v13606_v54 = vrot.slane %v12218_v19, 4  ;;  %3370 = vrot.lane.b32.xlu2 %v12213_v32, %s10244_s27 }
 0x4c7   : > { %v13604_v53 = vrot.slane %v12220_v31, 4 }
 0x4c8   : > { %v3953_v18 = vsel %vm409_vm0, %v3938_v46, %v13606_v54  ;;  %v12231_v55 = vpop.permute.xlu2 %3914  ;;  %v13609_v46 = vrot.slane %v12164_v26, 4 }
 0x4c9   : > { %v3957_v1 = vsel %vm409_vm0, %v3941_v15, %v13604_v53  ;;  %v3954_v6 = vsel %vm3945_vm4, %v3921_v43, %v3953_v18  ;;  %v9716_v52 = vld [vmem:[#allocation3 + $0x8ec] sm:$0xf0] }
 0x4ca   : > { %v3958_v40 = vsel %vm3945_vm4, %v12143_v50, %v3957_v1  ;;  %3973 = vst [vmem:[#allocation3 + $0x9e0] sm:$0xff] %v3954_v6  ;;  %v9085_v38 = vor.u32 %v9716_v52, %v9084_v5 }
 0x4cb   : > { %3368 = vrot.lane.b32.xlu1 %v12229_v8, %s10244_s27  ;;  %3975 = vst [vmem:[#allocation3 + $0x9f0] sm:$0xff] %v3958_v40 }
 0x4cc   : > { %3734 = vrot.lane.b32.xlu0 %v11896_v21, %s10245_s6  ;;  %6903 = vmatpush.bf16.msra.mxu0 %v9085_v38 }
 0x4cd   : > { %v4281_v15 = vpop.permute.xlu1 %4280 }
 0x4ce   : > { %v4287_v43 = vpop.permute.xlu0 %4286  ;;  %v4304_v18 = vrot.slane %v4281_v15, 4  ;;  %3740 = vrot.lane.b32.xlu2 %v11900_v37, %s10245_s6  ;;  %v3560_v37 = vrot.slane %v12186_v22, 4 }
 0x4cf   : > { %v4307_v1 = vrot.slane %v4287_v43, 4 }
 0x4d0   : > { %v4316_v50 = vsel %vm409_vm0, %v4304_v18, %v13609_v46  ;;  %v12249_v52 = vpop.permute.xlu2 %4201 }
 0x4d1   : > { %v4318_v40 = vsel %vm4317_vm2, %v4281_v15, %v4316_v50  ;;  %v9212_v5 = vld [vmem:[#allocation3 + $0x9e0] sm:$0xf] }
 0x4d2   : > { %4341 = vst [vmem:[#allocation3 + $0xac0] sm:$0xff] %v4318_v40  ;;  %v9748_v21 = vld [vmem:[#allocation3 + $0x9ec] sm:$0xf0] }
 0x4d3   : > { %3736 = vrot.lane.b32.xlu1 %v11887_v25, %s10245_s6  ;;  %v9213_v38 = vor.u32 %v9748_v21, %v9212_v5 }
 0x4d4   : > { %3742 = vrot.lane.b32.xlu0 %v11913_v45, %s10245_s6 }
 0x4d5   : > { %v12257_v6 = vpop.permute.xlu1 %4288  ;;  %6922 = vmatpush.bf16.msra.mxu1 %v9213_v38  ;;  %v13607_v38 = vrot.slane %v12206_v9, 4 }
 0x4d6   : > { %v12259_v18 = vpop.permute.xlu0 %3538  ;;  %v13603_v15 = vrot.slane %v12257_v6, 4  ;;  %4096 = vrot.lane.b32.xlu2 %v11947_v60, %s10243_s7 }
 0x4d7   : > { %v13605_v50 = vrot.slane %v12259_v18, 4 }
 0x4d8   : > { %v4321_v25 = vsel %vm409_vm0, %v4307_v1, %v13603_v15  ;;  %v12268_v45 = vpop.permute.xlu2 %3455 }
 0x4d9   : > { %v3572_v40 = vsel %vm409_vm0, %v3560_v37, %v13605_v50  ;;  %v4322_v5 = vsel %vm4317_vm2, %v4287_v43, %v4321_v25  ;;  %v9324_v25 = vld [vmem:[#allocation3 + $0xac0] sm:$0xf] }
 0x4da   : > { %v3574_v21 = vsel %vm3573_vm3, %v12186_v22, %v3572_v40  ;;  %4343 = vst [vmem:[#allocation3 + $0xad0] sm:$0xff] %v4322_v5 }
 0x4db   : > { %4094 = vrot.lane.b32.xlu1 %v11956_v30, %s10243_s7  ;;  %3597 = vst [vmem:[#allocation3 + $0x8c0] sm:$0xff] %v3574_v21  ;;  %v3935_v21 = vrot.slane %v12231_v55, 4 }
 0x4dc   : > { %4100 = vrot.lane.b32.xlu0 %v11960_v36, %s10243_s7 }
 0x4dd   : > { %v3543_v1 = vpop.permute.xlu1 %3542 }
 0x4de   : > { %v3909_v15 = vpop.permute.xlu0 %3908  ;;  %v3563_v53 = vrot.slane %v3543_v1, 4  ;;  %3350 = vrot.lane.b32.xlu2 %v12105_v28, %s10244_s27 }
 0x4df   : > { %v3932_v50 = vrot.slane %v3909_v15, 4 }
 0x4e0   : > { %v3577_v22 = vsel %vm409_vm0, %v3563_v53, %v13607_v38  ;;  %v12286_v43 = vpop.permute.xlu2 %3463 }
 0x4e1   : > { %v3578_v37 = vsel %vm3573_vm3, %v3543_v1, %v3577_v22  ;;  %v9776_v40 = vld [vmem:[#allocation3 + $0xacc] sm:$0xf0] }
 0x4e2   : > { %3599 = vst [vmem:[#allocation3 + $0x8d0] sm:$0xff] %v3578_v37  ;;  %v9325_v5 = vor.u32 %v9776_v40, %v9324_v25  ;;  %v9068_v38 = vld [vmem:[#allocation3 + $0x8c0] sm:$0xf] }
 0x4e3   : > { %4102 = vrot.lane.b32.xlu1 %v11973_v51, %s10243_s7 }
 0x4e4   : > { %3352 = vrot.lane.b32.xlu0 %v12117_v3, %s10244_s27  ;;  %6942 = vmatpush.bf16.msra.mxu2 %v9325_v5 }
 0x4e5   : > { %v12294_v54 = vpop.permute.xlu1 %3910 }
 0x4e6   : > { %v12296_v53 = vpop.permute.xlu0 %3916  ;;  %v13612_v1 = vrot.slane %v12294_v54, 4  ;;  %3358 = vrot.lane.b32.xlu2 %v12122_v47, %s10244_s27 }
 0x4e7   : > { %v13611_v22 = vrot.slane %v12296_v53, 4 }
 0x4e8   : > { %v3944_v37 = vsel %vm409_vm0, %v3932_v50, %v13612_v1  ;;  %v12305_v25 = vpop.permute.xlu2 %3833  ;;  %v13614_v50 = vrot.slane %v12249_v52, 4 }
 0x4e9   : > { %v3949_v40 = vsel %vm409_vm0, %v3935_v21, %v13611_v22  ;;  %v3946_v5 = vsel %vm3945_vm4, %v3909_v15, %v3944_v37  ;;  %v9712_v10 = vld [vmem:[#allocation3 + $0x8cc] sm:$0xf0]  ;;  %v3473_v37 = vrot.slane %v12268_v45, 4 }
 0x4ea   : > { %v3950_v46 = vsel %vm3945_vm4, %v12231_v55, %v3949_v40  ;;  %3969 = vst [vmem:[#allocation3 + $0x9c0] sm:$0xff] %v3946_v5  ;;  %v9069_v14 = vor.u32 %v9712_v10, %v9068_v38 }
 0x4eb   : > { %3356 = vrot.lane.b32.xlu1 %v12141_v29, %s10244_s27  ;;  %3971 = vst [vmem:[#allocation3 + $0x9d0] sm:$0xff] %v3950_v46 }
 0x4ec   : > { %3722 = vrot.lane.b32.xlu0 %v11956_v30, %s10245_s6  ;;  %6904 = vmatpush.bf16.msra.mxu0 %v9069_v14  ;;  %v12328_v14 = vld [vmem:[#allocation2 + $0x54] sm:$0xff] }
 0x4ed   : > { %v4200_v21 = vpop.permute.xlu1 %4199 }
 0x4ee   : > { %v4206_v22 = vpop.permute.xlu0 %4205  ;;  %v4217_v15 = vrot.slane %v4200_v21, 4  ;;  %3728 = vrot.lane.b32.xlu2 %v11960_v36, %s10245_s6 }
 0x4ef   : > { %v4220_v40 = vrot.slane %v4206_v22, 4 }
 0x4f0   : > { %v4232_v10 = vsel %vm409_vm0, %v4217_v15, %v13614_v50  ;;  %v12323_v55 = vpop.permute.xlu2 %4189 }
 0x4f1   : > { %v4233_v46 = vsel %vm4224_vm5, %v4200_v21, %v4232_v10  ;;  %v9196_v38 = vld [vmem:[#allocation3 + $0x9c0] sm:$0xf]  ;;  %v12344_v10 = vld [vmem:[#allocation2 + $0x4c] sm:$0xff] }
 0x4f2   : > { %4252 = vst [vmem:[#allocation3 + $0xaa0] sm:$0xff] %v4233_v46  ;;  %v9744_v30 = vld [vmem:[#allocation3 + $0x9cc] sm:$0xf0] }
 0x4f3   : > { %3724 = vrot.lane.b32.xlu1 %v11947_v60, %s10245_s6  ;;  %v9197_v36 = vor.u32 %v9744_v30, %v9196_v38  ;;  %v12351_v30 = vld [vmem:[#allocation2 + $0x6c] sm:$0xff] }
 0x4f4   : > { %3730 = vrot.lane.b32.xlu0 %v11973_v51, %s10245_s6 }
 0x4f5   : > { %v12333_v5 = vpop.permute.xlu1 %4207  ;;  %6923 = vmatpush.bf16.msra.mxu1 %v9197_v36 }
 0x4f6   : > { %v12335_v15 = vpop.permute.xlu0 %3457  ;;  %v13613_v21 = vrot.slane %v12333_v5, 4  ;;  %4015 = vrot.lane.b32.xlu2 %v12328_v14, %s10246_s10 }
 0x4f7   : > { %13784 = vst [vmem:[#allocation24_spill] sm:$0xff] %v12335_v15  ;;  %v13615_v60 = vrot.slane %v12335_v15, 4 }
 0x4f8   : > { %v4236_v51 = vsel %vm409_vm0, %v4220_v40, %v13613_v21  ;;  %v12346_v46 = vpop.permute.xlu2 %3443  ;;  %v13616_v40 = vrot.slane %v12286_v43, 4 }
 0x4f9   : > { %v3488_v38 = vsel %vm409_vm0, %v3473_v37, %v13615_v60  ;;  %v4237_v36 = vsel %vm4224_vm5, %v4206_v22, %v4236_v51  ;;  %v12366_v22 = vld [vmem:[#allocation2 + $0x74] sm:$0xff] }
 0x4fa   : > { %v3489_v1 = vsel %vm3480_vm6, %v12268_v45, %v3488_v38  ;;  %4254 = vst [vmem:[#allocation3 + $0xab0] sm:$0xff] %v4237_v36  ;;  %v9308_v38 = vld [vmem:[#allocation3 + $0xaa0] sm:$0xf] }
 0x4fb   : > { %4013 = vrot.lane.b32.xlu1 %v12344_v10, %s10246_s10  ;;  %3508 = vst [vmem:[#allocation3 + $0x8a0] sm:$0xff] %v3489_v1 }
 0x4fc   : > { %4019 = vrot.lane.b32.xlu0 %v12351_v30, %s10246_s10 }
 0x4fd   : > { %v3462_v21 = vpop.permute.xlu1 %3461 }
 0x4fe   : > { %v3828_v50 = vpop.permute.xlu0 %3827  ;;  %v3476_v37 = vrot.slane %v3462_v21, 4  ;;  %3269 = vrot.lane.b32.xlu2 %v12196_v48, %s10247_s23  ;;  %v3848_v48 = vrot.slane %v12305_v25, 4 }
 0x500   : > { %v3492_v45 = vsel %vm409_vm0, %v3476_v37, %v13616_v40  ;;  %v12368_v51 = vpop.permute.xlu2 %3451  ;;  %v3845_v37 = vrot.slane %v3828_v50, 4 }
 0x501   : > { %v3493_v1 = vsel %vm3480_vm6, %v3462_v21, %v3492_v45  ;;  %v9772_v36 = vld [vmem:[#allocation3 + $0xaac] sm:$0xf0] }
 0x502   : > { %3510 = vst [vmem:[#allocation3 + $0x8b0] sm:$0xff] %v3493_v1  ;;  %v9309_v60 = vor.u32 %v9772_v36, %v9308_v38  ;;  %v9052_v36 = vld [vmem:[#allocation3 + $0x8a0] sm:$0xf] }
 0x503   : > { %4021 = vrot.lane.b32.xlu1 %v12366_v22, %s10246_s10 }
 0x504   : > { %3271 = vrot.lane.b32.xlu0 %v12208_v4, %s10247_s23  ;;  %6943 = vmatpush.bf16.msra.mxu2 %v9309_v60 }
 0x505   : > { %v12376_v40 = vpop.permute.xlu1 %3829 }
 0x506   : > { %13785 = vst [vmem:[#allocation25_spill] sm:$0xff] %v12376_v40  ;;  %v12378_v24 = vpop.permute.xlu0 %3835  ;;  %v13621_v21 = vrot.slane %v12376_v40, 4  ;;  %3277 = vrot.lane.b32.xlu2 %v12213_v32, %s10247_s23 }
 0x507   : > { %13786 = vst [vmem:[#allocation26_spill] sm:$0xff] %v12378_v24  ;;  %v13620_v45 = vrot.slane %v12378_v24, 4  ;;  %v3517_v24 = vld [vmem:[#allocation2 + $0x38] sm:$0xf] }
 0x508   : > { %v3860_v4 = vsel %vm409_vm0, %v3845_v37, %v13621_v21  ;;  %v12387_v1 = vpop.permute.xlu2 %3821  ;;  %v13623_v37 = vrot.slane %v12323_v55, 4 }
 0x509   : > { %v3864_v60 = vsel %vm409_vm0, %v3848_v48, %v13620_v45  ;;  %v3861_v38 = vsel %vm3852_vm7, %v3828_v50, %v3860_v4  ;;  %v9708_v33 = vld [vmem:[#allocation3 + $0x8ac] sm:$0xf0] }
 0x50a   : > { %v3865_v42 = vsel %vm3852_vm7, %v12305_v25, %v3864_v60  ;;  %3880 = vst [vmem:[#allocation3 + $0x9a0] sm:$0xff] %v3861_v38  ;;  %v9053_v32 = vor.u32 %v9708_v33, %v9052_v36  ;;  %v3467_v36 = vrot.slane %v12346_v46, 4 }
 0x50b   : > { %3275 = vrot.lane.b32.xlu1 %v12229_v8, %s10247_s23  ;;  %3882 = vst [vmem:[#allocation3 + $0x9b0] sm:$0xff] %v3865_v42 }
 0x50c   : > { %4385 = vrot.lane.b32.xlu0 %v12344_v10, %s10248_s5  ;;  %6905 = vmatpush.bf16.msra.mxu0 %v9053_v32 }
 0x50d   : > { %v4188_v48 = vpop.permute.xlu1 %4187 }
 0x50e   : > { %v4194_v50 = vpop.permute.xlu0 %4193  ;;  %v4211_v4 = vrot.slane %v4188_v48, 4  ;;  %4391 = vrot.lane.b32.xlu2 %v12351_v30, %s10248_s5 }
 0x50f   : > { %v4214_v32 = vrot.slane %v4194_v50, 4 }
 0x510   : > { %v4223_v33 = vsel %vm409_vm0, %v4211_v4, %v13623_v37  ;;  %v12405_v25 = vpop.permute.xlu2 %4108 }
 0x511   : > { %13787 = vst [vmem:[#allocation27_spill] sm:$0xff] %v12405_v25  ;;  %v4225_v42 = vsel %vm4224_vm5, %v4188_v48, %v4223_v33  ;;  %v9180_v8 = vld [vmem:[#allocation3 + $0x9a0] sm:$0xf] }
 0x512   : > { %4248 = vst [vmem:[#allocation3 + $0xa80] sm:$0xff] %v4225_v42  ;;  %v9740_v60 = vld [vmem:[#allocation3 + $0x9ac] sm:$0xf0] }
 0x513   : > { %4387 = vrot.lane.b32.xlu1 %v12328_v14, %s10248_s5  ;;  %v9181_v38 = vor.u32 %v9740_v60, %v9180_v8 }
 0x514   : > { %4393 = vrot.lane.b32.xlu0 %v12366_v22, %s10248_s5 }
 0x515   : > { %v12413_v45 = vpop.permute.xlu1 %4195  ;;  %6924 = vmatpush.bf16.msra.mxu1 %v9181_v38 }
 0x516   : > { %13788 = vst [vmem:[#allocation28_spill] sm:$0xff] %v12413_v45  ;;  %v12415_v4 = vpop.permute.xlu0 %3445  ;;  %v13622_v48 = vrot.slane %v12413_v45, 4  ;;  %3643 = vrot.lane.b32.xlu2 %v12328_v14, %s10249_s4  ;;  %v12434_v14 = vld [vmem:[#allocation2 + $0xc] sm:$0xff]  ;;  %v7924_v45 = vld [vmem:[#allocation4 + $0x78] sm:$0xf] }
 0x517   : > { %13789 = vst [vmem:[#allocation29_spill] sm:$0xff] %v12415_v4  ;;  %v13624_v33 = vrot.slane %v12415_v4, 4  ;;  %v7876_v4 = vld [vmem:[#allocation4 + $0x18] sm:$0xf] }
 0x518   : > { %v4228_v42 = vsel %vm409_vm0, %v4214_v32, %v13622_v48  ;;  %v12424_v8 = vpop.permute.xlu2 %3362  ;;  %v13625_v32 = vrot.slane %v12368_v51, 4 }
 0x519   : > { %v3479_v60 = vsel %vm409_vm0, %v3467_v36, %v13624_v33  ;;  %v4229_v38 = vsel %vm4224_vm5, %v4194_v50, %v4228_v42  ;;  %v9292_v42 = vld [vmem:[#allocation3 + $0xa80] sm:$0xf] }
 0x51a   : > { %v3481_v21 = vsel %vm3480_vm6, %v12346_v46, %v3479_v60  ;;  %4250 = vst [vmem:[#allocation3 + $0xa90] sm:$0xff] %v4229_v38  ;;  %v12451_v38 = vld [vmem:[#allocation2 + $0x34] sm:$0xff] }
 0x51b   : > { %3641 = vrot.lane.b32.xlu1 %v12344_v10, %s10249_s4  ;;  %3504 = vst [vmem:[#allocation3 + $0x880] sm:$0xff] %v3481_v21  ;;  %v12446_v10 = vld [vmem:[#allocation2 + $0x14] sm:$0xff] }
 0x51c   : > { %3647 = vrot.lane.b32.xlu0 %v12351_v30, %s10249_s4 }
 0x51d   : > { %v3450_v48 = vpop.permute.xlu1 %3449 }
 0x51e   : > { %v3816_v37 = vpop.permute.xlu0 %3815  ;;  %v3470_v36 = vrot.slane %v3450_v48, 4  ;;  %4001 = vrot.lane.b32.xlu2 %v12434_v14, %s10246_s10 }
 0x51f   : > { %v3839_v33 = vrot.slane %v3816_v37, 4 }
 0x520   : > { %v3484_v46 = vsel %vm409_vm0, %v3470_v36, %v13625_v32  ;;  %v12444_v50 = vpop.permute.xlu2 %3370  ;;  %v3842_v36 = vrot.slane %v12387_v1, 4 }
 0x521   : > { %13790 = vst [vmem:[#allocation30_spill] sm:$0xff] %v12444_v50  ;;  %v3485_v21 = vsel %vm3480_vm6, %v3450_v48, %v3484_v46  ;;  %v9768_v30 = vld [vmem:[#allocation3 + $0xa8c] sm:$0xf0] }
 0x522   : > { %3506 = vst [vmem:[#allocation3 + $0x890] sm:$0xff] %v3485_v21  ;;  %v9293_v60 = vor.u32 %v9768_v30, %v9292_v42  ;;  %v12467_v21 = vld [vmem:[#allocation2 + $0x2c] sm:$0xff]  ;;  %v9036_v62 = vld [vmem:[#allocation3 + $0x880] sm:$0xf] }
 0x523   : > { %3649 = vrot.lane.b32.xlu1 %v12366_v22, %s10249_s4 }
 0x524   : > { %4003 = vrot.lane.b32.xlu0 %v12446_v10, %s10246_s10  ;;  %6944 = vmatpush.bf16.msra.mxu2 %v9293_v60 }
 0x525   : > { %v12456_v32 = vpop.permute.xlu1 %3817 }
 0x526   : > { %13791 = vst [vmem:[#allocation31_spill] sm:$0xff] %v12456_v32  ;;  %v12458_v57 = vpop.permute.xlu0 %3823  ;;  %v13634_v48 = vrot.slane %v12456_v32, 4  ;;  %4009 = vrot.lane.b32.xlu2 %v12451_v38, %s10246_s10 }
 0x527   : > { %13792 = vst [vmem:[#allocation32_spill] sm:$0xff] %v12458_v57  ;;  %v13631_v22 = vrot.slane %v12458_v57, 4 }
 0x528   : > { %v3851_v46 = vsel %vm409_vm0, %v3839_v33, %v13634_v48  ;;  %v12469_v42 = vpop.permute.xlu2 %3740  ;;  %v13636_v33 = vrot.slane %v12405_v25, 4  ;;  %v9522_v25 = vld [vmem:[#allocation3 + $0x2e4] sm:$0xf] }
 0x529   : > { %v3856_v30 = vsel %vm409_vm0, %v3842_v36, %v13631_v22  ;;  %v3853_v60 = vsel %vm3852_vm7, %v3816_v37, %v3851_v46  ;;  %v9704_v41 = vld [vmem:[#allocation3 + $0x88c] sm:$0xf0] }
 0x52a   : > { %v3857_v58 = vsel %vm3852_vm7, %v12387_v1, %v3856_v30  ;;  %3876 = vst [vmem:[#allocation3 + $0x980] sm:$0xff] %v3853_v60  ;;  %v9037_v39 = vor.u32 %v9704_v41, %v9036_v62 }
 0x52b   : > { %4007 = vrot.lane.b32.xlu1 %v12467_v21, %s10246_s10  ;;  %3878 = vst [vmem:[#allocation3 + $0x990] sm:$0xff] %v3857_v58 }
 0x52c   : > { %3257 = vrot.lane.b32.xlu0 %v12105_v28, %s10247_s23  ;;  %6906 = vmatpush.bf16.msra.mxu0 %v9037_v39 }
 0x52d   : > { %v4107_v36 = vpop.permute.xlu1 %4106 }
 0x52e   : > { %v4113_v22 = vpop.permute.xlu0 %4112  ;;  %v4124_v37 = vrot.slane %v4107_v36, 4  ;;  %3263 = vrot.lane.b32.xlu2 %v12141_v29, %s10247_s23  ;;  %v3380_v29 = vrot.slane %v12424_v8, 4 }
 0x52f   : > { %v4127_v46 = vrot.slane %v4113_v22, 4 }
 0x530   : > { %v4139_v41 = vsel %vm409_vm0, %v4124_v37, %v13636_v33  ;;  %v12487_v62 = vpop.permute.xlu2 %4096 }
 0x531   : > { %13793 = vst [vmem:[#allocation33_spill] sm:$0xff] %v12487_v62  ;;  %v4140_v58 = vsel %vm4131_vm8, %v4107_v36, %v4139_v41  ;;  %v9164_v1 = vld [vmem:[#allocation3 + $0x980] sm:$0xf] }
 0x532   : > { %4159 = vst [vmem:[#allocation3 + $0xa60] sm:$0xff] %v4140_v58  ;;  %v9736_v28 = vld [vmem:[#allocation3 + $0x98c] sm:$0xf0] }
 0x533   : > { %3259 = vrot.lane.b32.xlu1 %v12117_v3, %s10247_s23  ;;  %v9165_v39 = vor.u32 %v9736_v28, %v9164_v1  ;;  %v13635_v28 = vrot.slane %v12444_v50, 4 }
 0x534   : > { %3265 = vrot.lane.b32.xlu0 %v12122_v47, %s10247_s23 }
 0x535   : > { %v12495_v30 = vpop.permute.xlu1 %4114  ;;  %6925 = vmatpush.bf16.msra.mxu1 %v9165_v39 }
 0x536   : > { %13794 = vst [vmem:[#allocation34_spill] sm:$0xff] %v12495_v30  ;;  %v12497_v60 = vpop.permute.xlu0 %3364  ;;  %v13632_v36 = vrot.slane %v12495_v30, 4  ;;  %4375 = vrot.lane.b32.xlu2 %v12446_v10, %s10248_s5 }
 0x537   : > { %13795 = vst [vmem:[#allocation35_spill] sm:$0xff] %v12497_v60  ;;  %v13633_v3 = vrot.slane %v12497_v60, 4  ;;  %v9425_v60 = vld [vmem:[#allocation4 + $0x94] sm:$0xf0] }
 0x538   : > { %v4143_v47 = vsel %vm409_vm0, %v4127_v46, %v13632_v36  ;;  %v12506_v37 = vpop.permute.xlu2 %3350 }
 0x539   : > { %v3395_v41 = vsel %vm409_vm0, %v3380_v29, %v13633_v3  ;;  %v4144_v58 = vsel %vm4131_vm8, %v4113_v22, %v4143_v47  ;;  %v9276_v47 = vld [vmem:[#allocation3 + $0xa60] sm:$0xf] }
 0x53a   : > { %v3396_v1 = vsel %vm3387_vm9, %v12424_v8, %v3395_v41  ;;  %4161 = vst [vmem:[#allocation3 + $0xa70] sm:$0xff] %v4144_v58 }
 0x53b   : > { %4373 = vrot.lane.b32.xlu1 %v12434_v14, %s10248_s5  ;;  %3415 = vst [vmem:[#allocation3 + $0x860] sm:$0xff] %v3396_v1 }
 0x53c   : > { %4379 = vrot.lane.b32.xlu0 %v12467_v21, %s10248_s5 }
 0x53d   : > { %v3369_v39 = vpop.permute.xlu1 %3368 }
 0x53e   : > { %v3735_v46 = vpop.permute.xlu0 %3734  ;;  %v3383_v36 = vrot.slane %v3369_v39, 4  ;;  %3629 = vrot.lane.b32.xlu2 %v12434_v14, %s10249_s4  ;;  %v3755_v14 = vrot.slane %v12469_v42, 4 }
 0x53f   : > { %v3752_v1 = vrot.slane %v3735_v46, 4 }
 0x540   : > { %v3399_v8 = vsel %vm409_vm0, %v3383_v36, %v13635_v28  ;;  %v12524_v22 = vpop.permute.xlu2 %3358 }
 0x541   : > { %13796 = vst [vmem:[#allocation36_spill] sm:$0xff] %v12524_v22  ;;  %v3400_v29 = vsel %vm3387_vm9, %v3369_v39, %v3399_v8  ;;  %v9764_v41 = vld [vmem:[#allocation3 + $0xa6c] sm:$0xf0] }
 0x542   : > { %3417 = vst [vmem:[#allocation3 + $0x870] sm:$0xff] %v3400_v29  ;;  %v9277_v58 = vor.u32 %v9764_v41, %v9276_v47  ;;  %v3148_v41 = vld [vmem:[#allocation2 + $0x58] sm:$0xf]  ;;  %v9020_v48 = vld [vmem:[#allocation3 + $0x860] sm:$0xf] }
 0x543   : > { %4381 = vrot.lane.b32.xlu1 %v12451_v38, %s10248_s5 }
 0x544   : > { %3631 = vrot.lane.b32.xlu0 %v12446_v10, %s10249_s4  ;;  %6945 = vmatpush.bf16.msra.mxu2 %v9277_v58 }
 0x545   : > { %v12532_v3 = vpop.permute.xlu1 %3736 }
 0x546   : > { %13797 = vst [vmem:[#allocation37_spill] sm:$0xff] %v12532_v3  ;;  %v12534_v36 = vpop.permute.xlu0 %3742  ;;  %v13638_v39 = vrot.slane %v12532_v3, 4  ;;  %3637 = vrot.lane.b32.xlu2 %v12451_v38, %s10249_s4  ;;  %v2962_v3 = vld [vmem:[#allocation2 + $0x58] sm:$0xf] }
 0x547   : > { %13798 = vst [vmem:[#allocation38_spill] sm:$0xff] %v12534_v36  ;;  %v13639_v8 = vrot.slane %v12534_v36, 4 }
 0x548   : > { %v3767_v10 = vsel %vm409_vm0, %v3752_v1, %v13638_v39  ;;  %v12543_v29 = vpop.permute.xlu2 %3728  ;;  %v9407_v1 = vld [vmem:[#allocation4 + $0xc] sm:$0xf]  ;;  %v7862_v39 = vld [vmem:[#allocation4 + $0x38] sm:$0xf0] }
 0x549   : > { %v3771_v47 = vsel %vm409_vm0, %v3755_v14, %v13639_v8  ;;  %v3768_v58 = vsel %vm13700_vm10, %v3735_v46, %v3767_v10  ;;  %v9700_v28 = vld [vmem:[#allocation3 + $0x86c] sm:$0xf0]  ;;  %v13642_v14 = vrot.slane %v12487_v62, 4  ;;  %v12555_v46 = vor.u32 %v9407_v1, %v7862_v39  ;;  %v3523_v62 = vld [vmem:[#allocation2 + $0x78] sm:$0xf] }
 0x54a   : > { %v3772_v38 = vsel %vm13700_vm10, %v12469_v42, %v3771_v47  ;;  %3787 = vst [vmem:[#allocation3 + $0x960] sm:$0xff] %v3768_v58  ;;  %v9021_v33 = vor.u32 %v9700_v28, %v9020_v48  ;;  %v3145_v28 = vld [vmem:[#allocation2 + $0x38] sm:$0xf]  ;;  %v3374_v58 = vrot.slane %v12506_v37, 4 }
 0x54b   : > { %3635 = vrot.lane.b32.xlu1 %v12467_v21, %s10249_s4  ;;  %3789 = vst [vmem:[#allocation3 + $0x970] sm:$0xff] %v3772_v38  ;;  %6816 = vmatmul.bf16.vlgmr.msra.gmra.mxu3 %v12555_v46  ;;  %v3151_v21 = vld [vmem:[#allocation2 + $0x78] sm:$0xf] }
 0x54c   : > { %3180 = vrot.lane.b32.xlu0 %v3148_v41, %s10235_s3  ;;  %6907 = vmatpush.bf16.msra.mxu0 %v9021_v33  ;;  %v3058_v41 = vld [vmem:[#allocation2 + $0x78] sm:$0xf] }
 0x54d   : > { %v4095_v10 = vpop.permute.xlu1 %4094 }
 0x54e   : > { %v4101_v8 = vpop.permute.xlu0 %4100  ;;  %v4118_v36 = vrot.slane %v4095_v10, 4  ;;  %3168 = vrot.lane.b32.xlu2 %v3142_v49, %s10235_s3 }
 0x54f   : > { %v4121_v38 = vrot.slane %v4101_v8, 4 }
 0x550   : > { %v4130_v48 = vsel %vm409_vm0, %v4118_v36, %v13642_v14  ;;  %v12562_v42 = vpop.permute.xlu2 %4015 }
 0x551   : > { %13799 = vst [vmem:[#allocation39_spill] sm:$0xff] %v12562_v42  ;;  %v4132_v47 = vsel %vm4131_vm8, %v4095_v10, %v4130_v48  ;;  %v9148_v33 = vld [vmem:[#allocation3 + $0x960] sm:$0xf] }
 0x552   : > { %4155 = vst [vmem:[#allocation3 + $0xa40] sm:$0xff] %v4132_v47  ;;  %v9732_v39 = vld [vmem:[#allocation3 + $0x96c] sm:$0xf0] }
 0x553   : > { %3186 = vrot.lane.b32.xlu1 %v3151_v21, %s10235_s3  ;;  %v9149_v49 = vor.u32 %v9732_v39, %v9148_v33  ;;  %v3055_v21 = vld [vmem:[#allocation2 + $0x58] sm:$0xf] }
 0x554   : > { %3174 = vrot.lane.b32.xlu0 %v3145_v28, %s10235_s3  ;;  %v3049_v33 = vld [vmem:[#allocation2 + $0x18] sm:$0xf]  ;;  %s13968_s3 = sld [smem:[#allocation73_spill]] }
 0x555   : > { %v12568_v1 = vpop.permute.xlu1 %4102  ;;  %6926 = vmatpush.bf16.msra.mxu1 %v9149_v49 }
 0x556   : > { %13800 = vst [vmem:[#allocation40_spill] sm:$0xff] %v12568_v1  ;;  %v12570_v36 = vpop.permute.xlu0 %3352  ;;  %v13647_v14 = vrot.slane %v12568_v1, 4  ;;  %3093 = vrot.lane.b32.xlu2 %v3058_v41, %s10236_s17  ;;  %v7908_v41 = vld [vmem:[#allocation4 + $0x68] sm:$0xf] }
 0x557   : > { %13801 = vst [vmem:[#allocation41_spill] sm:$0xff] %v12570_v36  ;;  %v13650_v10 = vrot.slane %v12570_v36, 4  ;;  %v9424_v36 = vld [vmem:[#allocation4 + $0x8c] sm:$0xf0] }
 0x558   : > { %v4135_v48 = vsel %vm409_vm0, %v4121_v38, %v13647_v14  ;;  %v12578_v28 = vpop.permute.xlu2 %3269  ;;  %v12588_v38 = vor.u32 %v9425_v60, %v7908_v41  ;;  %v7900_v14 = vld [vmem:[#allocation4 + $0x60] sm:$0xf]  ;;  %v7902_v60 = vld [vmem:[#allocation4 + $0x90] sm:$0xf0] }
 0x559   : > { %v3386_v47 = vsel %vm409_vm0, %v3374_v58, %v13650_v10  ;;  %v4136_v39 = vsel %vm4131_vm8, %v4101_v8, %v4135_v48  ;;  %v13655_v58 = vrot.slane %v12524_v22, 4  ;;  %v12591_v10 = vor.u32 %v9424_v36, %v7900_v14  ;;  %v9419_v8 = vld [vmem:[#allocation4 + $0x6c] sm:$0xf]  ;;  %v7910_v48 = vld [vmem:[#allocation4 + $0x98] sm:$0xf0] }
 0x55a   : > { %v3388_v49 = vsel %vm3387_vm9, %v12506_v37, %v3386_v47  ;;  %4157 = vst [vmem:[#allocation3 + $0xa50] sm:$0xff] %v4136_v39  ;;  %6802 = vmatmul.bf16.gmra.mxu2 %v12588_v38  ;;  %v12594_v39 = vor.u32 %v9419_v8, %v7910_v48  ;;  %v3052_v36 = vld [vmem:[#allocation2 + $0x38] sm:$0xf]  ;;  %v9260_v1 = vld [vmem:[#allocation3 + $0xa40] sm:$0xf] }
 0x55b   : > { %3087 = vrot.lane.b32.xlu1 %v3055_v21, %s10236_s17  ;;  %3411 = vst [vmem:[#allocation3 + $0x840] sm:$0xff] %v3388_v49  ;;  %v9418_v21 = vld [vmem:[#allocation4 + $0x64] sm:$0xf]  ;;  %6764 = vmatmul.bf16.gmra.mxu0 %v12591_v10  ;;  %v2965_v8 = vld [vmem:[#allocation2 + $0x78] sm:$0xf] }
 0x55c   : > { %3075 = vrot.lane.b32.xlu0 %v3049_v33, %s10236_s17  ;;  %6821 = vmatmul.bf16.gmra.mxu3 %v12594_v39  ;;  %v12599_v33 = vor.u32 %v9418_v21, %v7902_v60  ;;  %v4264_v21 = vld [vmem:[#allocation2 + $0x5c] sm:$0xf]  ;;  %v3749_v60 = vrot.slane %v12543_v29, 4 }
 0x55d   : > { %v3357_v37 = vpop.permute.xlu1 %3356 }
 0x55e   : > { %v3723_v47 = vpop.permute.xlu0 %3722  ;;  %v3377_v49 = vrot.slane %v3357_v37, 4  ;;  %2994 = vrot.lane.b32.xlu2 %v2962_v3, %s10234_s28  ;;  %6783 = vmatmul.bf16.gmra.mxu1 %v12599_v33 }
 0x560   : > { %v3391_v14 = vsel %vm409_vm0, %v3377_v49, %v13655_v58  ;;  %v12604_v41 = vpop.permute.xlu2 %3277  ;;  %v3746_v49 = vrot.slane %v3723_v47, 4 }
 0x561   : > { %13802 = vst [vmem:[#allocation42_spill] sm:$0xff] %v12604_v41  ;;  %v3392_v48 = vsel %vm3387_vm9, %v3357_v37, %v3391_v14  ;;  %v9760_v30 = vld [vmem:[#allocation3 + $0xa4c] sm:$0xf0] }
 0x562   : > { %3413 = vst [vmem:[#allocation3 + $0x850] sm:$0xff] %v3392_v48  ;;  %v9261_v3 = vor.u32 %v9760_v30, %v9260_v1  ;;  %v2959_v1 = vld [vmem:[#allocation2 + $0x38] sm:$0xf]  ;;  %v4267_v48 = vld [vmem:[#allocation2 + $0x7c] sm:$0xf] }
 0x563   : > { %3081 = vrot.lane.b32.xlu1 %v3052_v36, %s10236_s17  ;;  %v9004_v22 = vld [vmem:[#allocation3 + $0x840] sm:$0xf] }
 0x564   : > { %3000 = vrot.lane.b32.xlu0 %v2965_v8, %s10234_s28  ;;  %6946 = vmatpush.bf16.msra.mxu2 %v9261_v3 }
 0x565   : > { %v12611_v58 = vpop.permute.xlu1 %3724 }
 0x566   : > { %13803 = vst [vmem:[#allocation43_spill] sm:$0xff] %v12611_v58  ;;  %v12613_v57 = vpop.permute.xlu0 %3730  ;;  %v13668_v37 = vrot.slane %v12611_v58, 4  ;;  %4296 = vrot.lane.b32.xlu2 %v4264_v21, %s10237_s9 }
 0x567   : > { %13804 = vst [vmem:[#allocation44_spill] sm:$0xff] %v12613_v57  ;;  %v13669_v14 = vrot.slane %v12613_v57, 4  ;;  %v4258_v57 = vld [vmem:[#allocation2 + $0x1c] sm:$0xf] }
 0x568   : > { %v3758_v30 = vsel %vm409_vm0, %v3746_v49, %v13668_v37  ;;  %v12621_v36 = vpop.permute.xlu2 %4391  ;;  %v9415_v49 = vld [vmem:[#allocation4 + $0x44] sm:$0xf0] }
 0x569   : > { %v3763_v8 = vsel %vm409_vm0, %v3749_v60, %v13669_v14  ;;  %v3760_v3 = vsel %vm13700_vm10, %v3723_v47, %v3758_v30  ;;  %v9696_v32 = vld [vmem:[#allocation3 + $0x84c] sm:$0xf0]  ;;  %v12631_v37 = vor.u32 %v9415_v49, %v7876_v4  ;;  %v9414_v14 = vld [vmem:[#allocation4 + $0x3c] sm:$0xf0]  ;;  %v13672_v47 = vrot.slane %v12562_v42, 4 }
 0x56a   : > { %v3764_v21 = vsel %vm13700_vm10, %v12543_v29, %v3763_v8  ;;  %3783 = vst [vmem:[#allocation3 + $0x940] sm:$0xff] %v3760_v3  ;;  %v9005_v58 = vor.u32 %v9696_v32, %v9004_v22  ;;  %v7868_v60 = vld [vmem:[#allocation4 + $0x10] sm:$0xf]  ;;  %v9409_v29 = vld [vmem:[#allocation4 + $0x1c] sm:$0xf]  ;;  %vm3666_vm10 = vcmask 916480  }
 0x56b   : > { %2988 = vrot.lane.b32.xlu1 %v2959_v1, %s10234_s28  ;;  %3785 = vst [vmem:[#allocation3 + $0x950] sm:$0xff] %v3764_v21  ;;  %v12634_v30 = vor.u32 %v9414_v14, %v7868_v60  ;;  %v7878_v8 = vld [vmem:[#allocation4 + $0x48] sm:$0xf0]  ;;  %6873 = vmatmul.bf16.vlgmr.msrb.gmra.mxu2 %v12631_v37  ;;  %v9408_v1 = vld [vmem:[#allocation4 + $0x14] sm:$0xf]  ;;  %s9397_s28 = sshll.u32 %s7691_s12, 3 }
 0x56c   : > { %4302 = vrot.lane.b32.xlu0 %v4267_v48, %s10237_s9  ;;  %6908 = vmatpush.bf16.msra.mxu0 %v9005_v58  ;;  %v12637_v22 = vor.u32 %v9409_v29, %v7878_v8  ;;  %v7870_v4 = vld [vmem:[#allocation4 + $0x40] sm:$0xf0]  ;;  %v3520_v21 = vld [vmem:[#allocation2 + $0x58] sm:$0xf]  ;;  %v3892_v60 = vld [vmem:[#allocation2 + $0x5c] sm:$0xf]  ;;  %s7693_s17 = scalar_lea.hbm %s13968_s3, %s9397_s28 }
 0x56d   : > { %v4014_v3 = vpop.permute.xlu1 %4013  ;;  %6835 = vmatmul.bf16.vlgmr.msrb.gmra.mxu0 %v12634_v30  ;;  %v12642_v58 = vor.u32 %v9408_v1, %v7870_v4  ;;  %v3287_v4 = vrot.slane %v12578_v28, 4 }
 0x56e   : > { %v4020_v32 = vpop.permute.xlu0 %4019  ;;  %13805 = vst [vmem:[#allocation45_spill] sm:$0xff] %v12637_v22  ;;  %v4031_v48 = vrot.slane %v4014_v3, 4  ;;  %3558 = vrot.lane.b32.xlu2 %v3523_v62, %s10238_s30  ;;  %6892 = vmatmul.bf16.vlgmr.msrb.gmra.mxu3 %v12637_v22 }
 0x56f   : > { %13806 = vst [vmem:[#allocation46_spill] sm:$0xff] %v12642_v58  ;;  %6854 = vmatmul.bf16.vlgmr.msrb.gmra.mxu1 %v12642_v58  ;;  %v9427_v58 = vld [vmem:[#allocation4 + $0xa4] sm:$0xf0] }
 0x570   : > { %v4046_v14 = vsel %vm409_vm0, %v4031_v48, %v13672_v47  ;;  %v12647_v49 = vpop.permute.xlu2 %3643  ;;  %v4034_v48 = vrot.slane %v4020_v32, 4 }
 0x571   : > { %13807 = vst [vmem:[#allocation47_spill] sm:$0xff] %v12647_v49  ;;  %v4047_v29 = vsel %vm4038_vm11, %v4014_v3, %v4046_v14  ;;  %v9132_v8 = vld [vmem:[#allocation3 + $0x940] sm:$0xf] }
 0x572   : > { %4066 = vst [vmem:[#allocation3 + $0xa20] sm:$0xff] %v4047_v29  ;;  %v9728_v62 = vld [vmem:[#allocation3 + $0x94c] sm:$0xf0] }
 0x573   : > { %3552 = vrot.lane.b32.xlu1 %v3520_v21, %s10238_s30  ;;  %v9133_v1 = vor.u32 %v9728_v62, %v9132_v8  ;;  %v4261_v62 = vld [vmem:[#allocation2 + $0x3c] sm:$0xf] }
 0x574   : > { %3924 = vrot.lane.b32.xlu0 %v3892_v60, %s10239_s29  ;;  %v3895_v60 = vld [vmem:[#allocation2 + $0x7c] sm:$0xf] }
 0x575   : > { %v12654_v47 = vpop.permute.xlu1 %4021  ;;  %6927 = vmatpush.bf16.msra.mxu1 %v9133_v1 }
 0x576   : > { %13808 = vst [vmem:[#allocation48_spill] sm:$0xff] %v12654_v47  ;;  %v12656_v42 = vpop.permute.xlu0 %3271  ;;  %v13681_v3 = vrot.slane %v12654_v47, 4  ;;  %4284 = vrot.lane.b32.xlu2 %v4258_v57, %s10237_s9 }
 0x577   : > { %13809 = vst [vmem:[#allocation49_spill] sm:$0xff] %v12656_v42  ;;  %v13684_v14 = vrot.slane %v12656_v42, 4  ;;  %v9426_v42 = vld [vmem:[#allocation4 + $0x9c] sm:$0xf0] }
 0x578   : > { %v4050_v21 = vsel %vm409_vm0, %v4034_v48, %v13681_v3  ;;  %v12664_v29 = vpop.permute.xlu2 %4001  ;;  %v12674_v48 = vor.u32 %v9427_v58, %v7924_v45  ;;  %v7916_v3 = vld [vmem:[#allocation4 + $0x70] sm:$0xf]  ;;  %v7918_v45 = vld [vmem:[#allocation4 + $0xa0] sm:$0xf0] }
 0x579   : > { %v3302_v8 = vsel %vm409_vm0, %v3287_v4, %v13684_v14  ;;  %v4051_v1 = vsel %vm4038_vm11, %v4020_v32, %v4050_v21  ;;  %v13689_v4 = vrot.slane %v12604_v41, 4  ;;  %v12677_v14 = vor.u32 %v9426_v42, %v7916_v3  ;;  %v9421_v32 = vld [vmem:[#allocation4 + $0x7c] sm:$0xf]  ;;  %v7926_v21 = vld [vmem:[#allocation4 + $0xa8] sm:$0xf0] }
 0x57a   : > { %v3303_v57 = vsel %vm3294_vm12, %v12578_v28, %v3302_v8  ;;  %4068 = vst [vmem:[#allocation3 + $0xa30] sm:$0xff] %v4051_v1  ;;  %v12680_v1 = vor.u32 %v9421_v32, %v7926_v21  ;;  %v3514_v3 = vld [vmem:[#allocation2 + $0x18] sm:$0xf]  ;;  %v3886_v32 = vld [vmem:[#allocation2 + $0x1c] sm:$0xf] }
 0x57b   : > { %3930 = vrot.lane.b32.xlu1 %v3895_v60, %s10239_s29  ;;  %3322 = vst [vmem:[#allocation3 + $0x820] sm:$0xff] %v3303_v57  ;;  %6878 = vmatmul.bf16.gmra.mxu2 %v12674_v48  ;;  %v9420_v60 = vld [vmem:[#allocation4 + $0x74] sm:$0xf]  ;;  %v9244_v47 = vld [vmem:[#allocation3 + $0xa20] sm:$0xf] }
 0x57c   : > { %4290 = vrot.lane.b32.xlu0 %v4261_v62, %s10237_s9  ;;  %13810 = vst [vmem:[#allocation50_spill] sm:$0xff] %v12677_v14  ;;  %v12685_v58 = vor.u32 %v9420_v60, %v7918_v45  ;;  %v4171_v60 = vld [vmem:[#allocation2 + $0x5c] sm:$0xf]  ;;  %v4406_v45 = vrot.slane %v12621_v36, 4 }
 0x57d   : > { %v3276_v28 = vpop.permute.xlu1 %3275  ;;  %13811 = vst [vmem:[#allocation51_spill] sm:$0xff] %v12680_v1  ;;  %6840 = vmatmul.bf16.gmra.mxu0 %v12677_v14 }
 0x57e   : > { %v4386_v8 = vpop.permute.xlu0 %4385  ;;  %v3290_v57 = vrot.slane %v3276_v28, 4  ;;  %3546 = vrot.lane.b32.xlu2 %v3517_v24, %s10238_s30  ;;  %6897 = vmatmul.bf16.gmra.mxu3 %v12680_v1  ;;  %13812 = vst [vmem:[#allocation52_spill] sm:$0xff] %v12685_v58 }
 0x57f   : > { %6859 = vmatmul.bf16.gmra.mxu1 %v12685_v58 }
 0x580   : > { %v3306_v42 = vsel %vm409_vm0, %v3290_v57, %v13689_v4  ;;  %v12690_v62 = vpop.permute.xlu2 %4009  ;;  %v4403_v57 = vrot.slane %v4386_v8, 4 }
 0x581   : > { %13813 = vst [vmem:[#allocation53_spill] sm:$0xff] %v12690_v62  ;;  %v3307_v21 = vsel %vm3294_vm12, %v3276_v28, %v3306_v42  ;;  %v9756_v50 = vld [vmem:[#allocation3 + $0xa2c] sm:$0xf0]  ;;  %v3889_v42 = vld [vmem:[#allocation2 + $0x3c] sm:$0xf] }
 0x582   : > { %3324 = vst [vmem:[#allocation3 + $0x830] sm:$0xff] %v3307_v21  ;;  %v9245_v24 = vor.u32 %v9756_v50, %v9244_v47  ;;  %v4174_v21 = vld [vmem:[#allocation2 + $0x7c] sm:$0xf]  ;;  %v8988_v58 = vld [vmem:[#allocation3 + $0x820] sm:$0xf] }
 0x583   : > { %3540 = vrot.lane.b32.xlu1 %v3514_v3, %s10238_s30  ;;  %s7694_s30 = sshll.u32 %s13289_s11, 4  ;;  %s7695_s30 = int_to_ptr.vmem [resolvable:$true] %s7694_s30 }
 0x584   : > { %3912 = vrot.lane.b32.xlu0 %v3886_v32, %s10239_s29  ;;  %6947 = vmatpush.bf16.msra.mxu2 %v9245_v24 }
 0x585   : > { %v12697_v4 = vpop.permute.xlu1 %4387 }
 0x586   : > { %13814 = vst [vmem:[#allocation54_spill] sm:$0xff] %v12697_v4  ;;  %v12699_v41 = vpop.permute.xlu0 %4393  ;;  %v13698_v28 = vrot.slane %v12697_v4, 4  ;;  %4203 = vrot.lane.b32.xlu2 %v4171_v60, %s10240_s8 }
 0x587   : > { %13815 = vst [vmem:[#allocation55_spill] sm:$0xff] %v12699_v41  ;;  %v13699_v50 = vrot.slane %v12699_v41, 4 }
 0x588   : > { %v4418_v47 = vsel %vm409_vm0, %v4403_v57, %v13698_v28  ;;  %v12707_v3 = vpop.permute.xlu2 %3263  ;;  %v3430_v57 = vld [vmem:[#allocation2 + $0x78] sm:$0xf]  ;;  %v13703_v28 = vrot.slane %v12647_v49, 4 }
 0x589   : > { %v4422_v32 = vsel %vm409_vm0, %v4406_v45, %v13699_v50  ;;  %v4419_v24 = vsel %vm13749_vm13, %v4386_v8, %v4418_v47  ;;  %v9692_v1 = vld [vmem:[#allocation3 + $0x82c] sm:$0xf0]  ;;  %v3799_v47 = vld [vmem:[#allocation2 + $0x5c] sm:$0xf] }
 0x58a   : > { %v4423_v60 = vsel %vm13749_vm13, %v12621_v36, %v4422_v32  ;;  %4438 = vst [vmem:[#allocation3 + $0xb20] sm:$0xff] %v4419_v24  ;;  %v8989_v14 = vor.u32 %v9692_v1, %v8988_v58  ;;  %v3427_v1 = vld [vmem:[#allocation2 + $0x58] sm:$0xf] }
 0x58b   : > { %3918 = vrot.lane.b32.xlu1 %v3889_v42, %s10239_s29  ;;  %4440 = vst [vmem:[#allocation3 + $0xb30] sm:$0xff] %v4423_v60  ;;  %v4025_v60 = vrot.slane %v12664_v29, 4  ;;  %s7696_s29 = sshll.u32 %s7693_s17, 4  ;;  %s7697_s29 = int_to_ptr.hbm [resolvable:$true] %s7696_s29 }
 0x58c   : > { %4209 = vrot.lane.b32.xlu0 %v4174_v21, %s10240_s8  ;;  %6909 = vmatpush.bf16.msra.mxu0 %v8989_v14  ;;  %v4165_v14 = vld [vmem:[#allocation2 + $0x1c] sm:$0xf] }
 0x58d   : > { %v3642_v45 = vpop.permute.xlu1 %3641 }
 0x58e   : > { %v3648_v50 = vpop.permute.xlu0 %3647  ;;  %v3659_v8 = vrot.slane %v3642_v45, 4  ;;  %3465 = vrot.lane.b32.xlu2 %v3430_v57, %s10241_s1 }
 0x58f   : > { %v3662_v57 = vrot.slane %v3648_v50, 4 }
 0x590   : > { %v3674_v36 = vsel %vm409_vm0, %v3659_v8, %v13703_v28  ;;  %v12722_v58 = vpop.permute.xlu2 %4375 }
 0x591   : > { %13816 = vst [vmem:[#allocation56_spill] sm:$0xff] %v12722_v58  ;;  %v3675_v42 = vsel %vm3666_vm10, %v3642_v45, %v3674_v36  ;;  %v9372_v32 = vld [vmem:[#allocation3 + $0xb20] sm:$0xf] }
 0x592   : > { %3694 = vst [vmem:[#allocation3 + $0x920] sm:$0xff] %v3675_v42  ;;  %v9788_v21 = vld [vmem:[#allocation3 + $0xb2c] sm:$0xf0] }
 0x593   : > { %3459 = vrot.lane.b32.xlu1 %v3427_v1, %s10241_s1  ;;  %v9373_v24 = vor.u32 %v9788_v21, %v9372_v32  ;;  %v3802_v1 = vld [vmem:[#allocation2 + $0x7c] sm:$0xf] }
 0x594   : > { %3831 = vrot.lane.b32.xlu0 %v3799_v47, %s10242_s24  ;;  %v4168_v32 = vld [vmem:[#allocation2 + $0x3c] sm:$0xf] }
 0x595   : > { %v12728_v41 = vpop.permute.xlu1 %3649  ;;  %6966 = vmatpush.bf16.msra.mxu3 %v9373_v24 }
 0x596   : > { %13817 = vst [vmem:[#allocation57_spill] sm:$0xff] %v12728_v41  ;;  %v12730_v8 = vpop.permute.xlu0 %4003  ;;  %v13704_v28 = vrot.slane %v12728_v41, 4  ;;  %4191 = vrot.lane.b32.xlu2 %v4165_v14, %s10240_s8  ;;  %v3424_v14 = vld [vmem:[#allocation2 + $0x38] sm:$0xf] }
 0x597   : > { %13818 = vst [vmem:[#allocation58_spill] sm:$0xff] %v12730_v8  ;;  %v13709_v45 = vrot.slane %v12730_v8, 4 }
 0x598   : > { %v3678_v36 = vsel %vm409_vm0, %v3662_v57, %v13704_v28  ;;  %v12738_v47 = vpop.permute.xlu2 %3629  ;;  %v13710_v57 = vrot.slane %v12690_v62, 4  ;;  %v9417_v62 = vld [vmem:[#allocation4 + $0x54] sm:$0xf0] }
 0x599   : > { %v4037_v42 = vsel %vm409_vm0, %v4025_v60, %v13709_v45  ;;  %v3679_v21 = vsel %vm3666_vm10, %v3648_v50, %v3678_v36  ;;  %v3421_v60 = vld [vmem:[#allocation2 + $0x18] sm:$0xf]  ;;  %v3793_v36 = vld [vmem:[#allocation2 + $0x1c] sm:$0xf] }
 0x59a   : > { %v4039_v24 = vsel %vm4038_vm11, %v12664_v29, %v4037_v42  ;;  %3696 = vst [vmem:[#allocation3 + $0x930] sm:$0xff] %v3679_v21  ;;  %v9116_v42 = vld [vmem:[#allocation3 + $0x920] sm:$0xf] }
 0x59b   : > { %3837 = vrot.lane.b32.xlu1 %v3802_v1, %s10242_s24  ;;  %4062 = vst [vmem:[#allocation3 + $0xa00] sm:$0xff] %v4039_v24  ;;  %v4078_v24 = vld [vmem:[#allocation2 + $0x5c] sm:$0xf] }
 0x59c   : > { %4197 = vrot.lane.b32.xlu0 %v4168_v32, %s10240_s8  ;;  %s7680_s8 = scalar_lea.sflag [#allocation6], %s10462_s0 }
 0x59d   : > { %v4008_v28 = vpop.permute.xlu1 %4007 }
 0x59e   : > { %v3258_v41 = vpop.permute.xlu0 %3257  ;;  %v4028_v8 = vrot.slane %v4008_v28, 4  ;;  %3453 = vrot.lane.b32.xlu2 %v3424_v14, %s10241_s1  ;;  %v3284_v14 = vrot.slane %v12707_v3, 4 }
 0x59f   : > { %v3281_v45 = vrot.slane %v3258_v41, 4 }
 0x5a0   : > { %v4042_v50 = vsel %vm409_vm0, %v4028_v8, %v13710_v57  ;;  %v12753_v29 = vpop.permute.xlu2 %3637 }
 0x5a1   : > { %13819 = vst [vmem:[#allocation59_spill] sm:$0xff] %v12753_v29  ;;  %v4043_v1 = vsel %vm4038_vm11, %v4008_v28, %v4042_v50  ;;  %v9724_v21 = vld [vmem:[#allocation3 + $0x92c] sm:$0xf0]  ;;  %v3796_v50 = vld [vmem:[#allocation2 + $0x3c] sm:$0xf] }
 0x5a2   : > { %4064 = vst [vmem:[#allocation3 + $0xa10] sm:$0xff] %v4043_v1  ;;  %v9117_v32 = vor.u32 %v9724_v21, %v9116_v42  ;;  %v8318_v1 = vld [vmem:[#allocation3 + $0x2f0] sm:$0xf0]  ;;  %v4081_v21 = vld [vmem:[#allocation2 + $0x7c] sm:$0xf] }
 0x5a3   : > { %3447 = vrot.lane.b32.xlu1 %v3421_v60, %s10241_s1  ;;  %v9228_v40 = vld [vmem:[#allocation3 + $0xa00] sm:$0xf]  ;;  %s10074_s1 = sshra.s32 %s7697_s29, 4  ;;  %s10075_s1 = int_to_ptr.hbm [resolvable:$true] %s10074_s1 }
 0x5a4   : > { %3819 = vrot.lane.b32.xlu0 %v3793_v36, %s10242_s24  ;;  %6928 = vmatpush.bf16.msra.mxu1 %v9117_v32  ;;  %v7892_v32 = vld [vmem:[#allocation4 + $0x28] sm:$0xf]  ;;  %p10081_p5 = scmp.lt.s32.totalorder %s10075_s1, %s13968_s3 }
 0x5a5   : > { %v12759_v8 = vpop.permute.xlu1 %3259 }
 0x5a6   : > { %13820 = vst [vmem:[#allocation60_spill] sm:$0xff] %v12759_v8  ;;  %v12761_v57 = vpop.permute.xlu0 %3265  ;;  %v13728_v4 = vrot.slane %v12759_v8, 4  ;;  %4110 = vrot.lane.b32.xlu2 %v4078_v24, %s10243_s7 }
 0x5a7   : > { %13821 = vst [vmem:[#allocation61_spill] sm:$0xff] %v12761_v57  ;;  %v13727_v28 = vrot.slane %v12761_v57, 4  ;;  %v4072_v57 = vld [vmem:[#allocation2 + $0x1c] sm:$0xf] }
 0x5a8   : > { %v3293_v60 = vsel %vm409_vm0, %v3281_v45, %v13728_v4  ;;  %v3169_v36 = vpop.permute.xlu2 %3168  ;;  %v13822_v45 = vrot.slane %v12047_v11, 4  ;;  %v3337_v4 = vld [vmem:[#allocation2 + $0x78] sm:$0xf] }
 0x5a9   : > { %v3298_v42 = vsel %vm409_vm0, %v3284_v14, %v13727_v28  ;;  %v3295_v49 = vsel %vm3294_vm12, %v3258_v41, %v3293_v60  ;;  %v9752_v24 = vld [vmem:[#allocation3 + $0xa0c] sm:$0xf0]  ;;  %v3190_v15 = vrot.slane %v3169_v36, 4  ;;  %v8321_v28 = vor.u32 %v9522_v25, %v8318_v1  ;;  %v9458_v1 = vld [vmem:[#allocation3 + $0xe4] sm:$0xf] }
 0x5aa   : > { %v3299_v22 = vsel %vm3294_vm12, %v12707_v3, %v3298_v42  ;;  %3318 = vst [vmem:[#allocation3 + $0x800] sm:$0xff] %v3295_v49  ;;  %v9229_v8 = vor.u32 %v9752_v24, %v9228_v40  ;;  %v12780_v41 = vor.u32 %v9417_v62, %v7892_v32  ;;  %v13729_v60 = vrot.slane %v12722_v58, 4  ;;  %v8302_v49 = vld [vmem:[#allocation3 + $0x2d0] sm:$0xf0]  ;;  %v7884_v32 = vld [vmem:[#allocation4 + $0x20] sm:$0xf] }
 0x5ab   : > { %3825 = vrot.lane.b32.xlu1 %v3796_v50, %s10242_s24  ;;  %v3203_v14 = vsel %vm409_vm0, %v13822_v45, %v3190_v15  ;;  %3320 = vst [vmem:[#allocation3 + $0x810] sm:$0xff] %v3299_v22  ;;  %v9518_v15 = vld [vmem:[#allocation3 + $0x2c4] sm:$0xf]  ;;  %v8286_v22 = vld [vmem:[#allocation3 + $0x2b0] sm:$0xf0]  ;;  %s10076_s24 = scalar_lea.hbm %s10075_s1, 128 }
 0x5ac   : > { %4116 = vrot.lane.b32.xlu0 %v4081_v21, %s10243_s7  ;;  %13823 = vst [vmem:[#allocation62_spill] sm:$0xff] %v12780_v41  ;;  %6948 = vmatpush.bf16.msra.mxu2 %v9229_v8  ;;  %v3204_v40 = vsel %vm3201_vm15, %v12047_v11, %v3203_v14  ;;  %v8305_v25 = vor.u32 %v9518_v15, %v8302_v49  ;;  %v8062_v62 = vld [vmem:[#allocation3 + $0xf0] sm:$0xf0]  ;;  %v3334_v11 = vld [vmem:[#allocation2 + $0x58] sm:$0xf]  ;;  %v13824_v15 = vrot.slane %v12084_v34, 4  ;;  %p10077_p6 = scmp.ne.s32.totalorder %s10075_s1, %s10076_s24 }
 0x5ad   : > { %3226 = vst [vmem:[#allocation3 + $0x7c8] sm:$0xff] %v3204_v40  ;;  %v4374_v3 = vpop.permute.xlu1 %4373  ;;  %v3706_v21 = vld [vmem:[#allocation2 + $0x5c] sm:$0xf]  ;;  %v9514_v14 = vld [vmem:[#allocation3 + $0x2a4] sm:$0xf]  ;;  %v8065_v49 = vor.u32 %v9458_v1, %v8062_v62 }
 0x5ae   : > { %v4380_v50 = vpop.permute.xlu0 %4379  ;;  %v4397_v36 = vrot.slane %v4374_v3, 4  ;;  %3372 = vrot.lane.b32.xlu2 %v3337_v4, %s10244_s27  ;;  %v9416_v4 = vld [vmem:[#allocation4 + $0x4c] sm:$0xf0]  ;;  %p10078_p13 = pnand %p10077_p6, %p10400_p7 }
 0x5af   : > { %6949 = vmatmul.bf16.vlgmr.msra.gmra.mxu2 %v12780_v41 }
 0x5b0   : > { %7017 = vmatpush.bf16.msrb.mxu2 %v8321_v28  ;;  %v4409_v8 = vsel %vm409_vm0, %v4397_v36, %v13729_v60  ;;  %v3094_v42 = vpop.permute.xlu2 %3093  ;;  %v8289_v60 = vor.u32 %v9514_v14, %v8286_v22  ;;  %v8046_v22 = vld [vmem:[#allocation3 + $0xd0] sm:$0xf0]  ;;  %p10079_p10 = pneg %p10078_p13 }
 0x5b1   : > { %v4411_v28 = vsel %vm13749_vm13, %v4374_v3, %v4409_v8  ;;  %v3106_v24 = vrot.slane %v3094_v42, 4  ;;  %v8972_v45 = vld [vmem:[#allocation3 + $0x800] sm:$0xf]  ;;  %v3653_v3 = vrot.slane %v12738_v47, 4  ;;  %v4400_v8 = vrot.slane %v4380_v50, 4 }
 0x5b2   : > { %4434 = vst [vmem:[#allocation3 + $0xb00] sm:$0xff] %v4411_v28  ;;  %v9688_v40 = vld [vmem:[#allocation3 + $0x80c] sm:$0xf0]  ;;  %v8270_v42 = vld [vmem:[#allocation3 + $0x290] sm:$0xf0]  ;;  %v12799_v28 = vor.u32 %v9416_v4, %v7884_v32 }
 0x5b3   : > { %3366 = vrot.lane.b32.xlu1 %v3334_v11, %s10244_s27  ;;  %v3122_v36 = vsel %vm409_vm0, %v13824_v15, %v3106_v24  ;;  %v8973_v58 = vor.u32 %v9688_v40, %v8972_v45  ;;  %v3709_v45 = vld [vmem:[#allocation2 + $0x7c] sm:$0xf]  ;;  %v8254_v32 = vld [vmem:[#allocation3 + $0x270] sm:$0xf0]  ;;  %v9454_v4 = vld [vmem:[#allocation3 + $0xc4] sm:$0xf] }
 0x5b4   : > { %7018 = vmatpush.bf16.msrb.mxu2 %v8305_v25  ;;  %3738 = vrot.lane.b32.xlu0 %v3706_v21, %s10245_s6  ;;  %v3123_v25 = vsel %vm3108_vm1, %v12084_v34, %v3122_v36  ;;  %13825 = vst [vmem:[#allocation63_spill] sm:$0xff] %v12799_v28  ;;  %v9510_v21 = vld [vmem:[#allocation3 + $0x284] sm:$0xf]  ;;  %v8049_v40 = vor.u32 %v9454_v4, %v8046_v22  ;;  %v7940_v15 = vld [vmem:[#allocation4 + $0x88] sm:$0xf] }
 0x5b5   : > { %3139 = vst [vmem:[#allocation3 + $0x7b8] sm:$0xff] %v3123_v25  ;;  %v12801_v1 = vpop.permute.xlu1 %4381  ;;  %6910 = vmatpush.bf16.msra.mxu0 %v8973_v58  ;;  %v8273_v34 = vor.u32 %v9510_v21, %v8270_v42  ;;  %v9429_v36 = vld [vmem:[#allocation4 + $0xb4] sm:$0xf0]  ;;  %v8030_v21 = vld [vmem:[#allocation3 + $0xb0] sm:$0xf0] }
 0x5b6   : > { %13826 = vst [vmem:[#allocation64_spill] sm:$0xff] %v12801_v1  ;;  %v12803_v62 = vpop.permute.xlu0 %3631  ;;  %v13735_v11 = vrot.slane %v12801_v1, 4  ;;  %4098 = vrot.lane.b32.xlu2 %v4072_v57, %s10243_s7  ;;  %v4075_v57 = vld [vmem:[#allocation2 + $0x3c] sm:$0xf] }
 0x5b7   : > { %13827 = vst [vmem:[#allocation65_spill] sm:$0xff] %v12803_v62  ;;  %v13734_v24 = vrot.slane %v12803_v62, 4  ;;  %v7894_v62 = vld [vmem:[#allocation4 + $0x58] sm:$0xf0] }
 0x5b8   : > { %7019 = vmatpush.bf16.msrb.mxu2 %v8289_v60  ;;  %v4414_v60 = vsel %vm409_vm0, %v4400_v8, %v13735_v11  ;;  %v2995_v58 = vpop.permute.xlu2 %2994  ;;  %6911 = vmatmul.bf16.vlgmr.msra.gmra.mxu0 %v12799_v28  ;;  %v9506_v8 = vld [vmem:[#allocation3 + $0x264] sm:$0xf] }
 0x5b9   : > { %6979 = vmatpush.bf16.msrb.mxu0 %v8065_v49  ;;  %v3665_v14 = vsel %vm409_vm0, %v3653_v3, %v13734_v24  ;;  %v4415_v49 = vsel %vm13749_vm13, %v4380_v50, %v4414_v60  ;;  %v3010_v25 = vrot.slane %v2995_v58, 4  ;;  %v13828_v3 = vrot.slane %v12129_v7, 4  ;;  %v3331_v24 = vld [vmem:[#allocation2 + $0x38] sm:$0xf]  ;;  %v9450_v50 = vld [vmem:[#allocation3 + $0xa4] sm:$0xf] }
 0x5ba   : > { %v3667_v42 = vsel %vm3666_vm10, %v12738_v47, %v3665_v14  ;;  %4436 = vst [vmem:[#allocation3 + $0xb10] sm:$0xff] %v4415_v49  ;;  %v8257_v4 = vor.u32 %v9506_v8, %v8254_v32  ;;  %v13746_v47 = vrot.slane %v12753_v29, 4  ;;  %v8238_v58 = vld [vmem:[#allocation3 + $0x250] sm:$0xf0]  ;;  %v8033_v14 = vor.u32 %v9450_v50, %v8030_v21  ;;  %v9446_v32 = vld [vmem:[#allocation3 + $0x84] sm:$0xf] }
 0x5bb   : > { %3744 = vrot.lane.b32.xlu1 %v3709_v45, %s10245_s6  ;;  %v3025_v22 = vsel %vm409_vm0, %v13828_v3, %v3010_v25  ;;  %3690 = vst [vmem:[#allocation3 + $0x900] sm:$0xff] %v3667_v42  ;;  %v8014_v25 = vld [vmem:[#allocation3 + $0x90] sm:$0xf0]  ;;  %v9502_v8 = vld [vmem:[#allocation3 + $0x244] sm:$0xf]  ;;  %vm6744_vm13 = vcmask 261120  }
 0x5bc   : > { %7020 = vmatpush.bf16.msrb.mxu2 %v8273_v34  ;;  %4104 = vrot.lane.b32.xlu0 %v4075_v57, %s10243_s7  ;;  %v12823_v34 = vor.u32 %v9429_v36, %v7940_v15  ;;  %v3026_v60 = vsel %vm3015_vm14, %v12129_v7, %v3025_v22  ;;  %v8446_v57 = vld [vmem:[#allocation3 + $0x3f0] sm:$0xf0]  ;;  %v8241_v36 = vor.u32 %v9502_v8, %v8238_v58  ;;  %v3328_v3 = vld [vmem:[#allocation2 + $0x18] sm:$0xf]  ;;  %v9498_v11 = vld [vmem:[#allocation3 + $0x224] sm:$0xf] }
 0x5bd   : > { %6980 = vmatpush.bf16.msrb.mxu0 %v8049_v40  ;;  %3044 = vst [vmem:[#allocation3 + $0x768] sm:$0xff] %v3026_v60  ;;  %v3636_v45 = vpop.permute.xlu1 %3635  ;;  %v8222_v40 = vld [vmem:[#allocation3 + $0x230] sm:$0xf0]  ;;  %v9411_v7 = vld [vmem:[#allocation4 + $0x2c] sm:$0xf]  ;;  %v13830_v60 = vrot.slane %v12012_v61, 4 }
 0x5be   : > { %13829 = vst [vmem:[#allocation66_spill] sm:$0xff] %v12823_v34  ;;  %v3181_v49 = vpop.permute.xlu0 %3180  ;;  %v3656_v42 = vrot.slane %v3636_v45, 4  ;;  %3360 = vrot.lane.b32.xlu2 %v3331_v24, %s10244_s27  ;;  %v3700_v22 = vld [vmem:[#allocation2 + $0x1c] sm:$0xf]  ;;  %v7998_v21 = vld [vmem:[#allocation3 + $0x70] sm:$0xf0] }
 0x5bf   : > { %v3196_v15 = vrot.slane %v3181_v49, 4  ;;  %6954 = vmatmul.bf16.gmra.mxu2 %v12823_v34  ;;  %v8017_v49 = vor.u32 %v9446_v32, %v8014_v25  ;;  %v9428_v58 = vld [vmem:[#allocation4 + $0xac] sm:$0xf0]  ;;  %v9356_v1 = vld [vmem:[#allocation3 + $0xb00] sm:$0xf]  ;;  %v13831_v32 = vrot.slane %v12076_v59, 4 }
 0x5c0   : > { %7021 = vmatpush.bf16.msrb.mxu2 %v8257_v4  ;;  %v3670_v4 = vsel %vm409_vm0, %v3656_v42, %v13746_v47  ;;  %v4297_v50 = vpop.permute.xlu2 %4296  ;;  %v8225_v47 = vor.u32 %v9498_v11, %v8222_v40  ;;  %v9554_v34 = vld [vmem:[#allocation3 + $0x3e4] sm:$0xf]  ;;  %v8206_v11 = vld [vmem:[#allocation3 + $0x210] sm:$0xf0] }
 0x5c1   : > { %6981 = vmatpush.bf16.msrb.mxu0 %v8033_v14  ;;  %v3211_v24 = vsel %vm409_vm0, %v13830_v60, %v3196_v15  ;;  %v7932_v14 = vld [vmem:[#allocation4 + $0x80] sm:$0xf]  ;;  %v3671_v8 = vsel %vm3666_vm10, %v3636_v45, %v3670_v4  ;;  %v9784_v28 = vld [vmem:[#allocation3 + $0xb0c] sm:$0xf0]  ;;  %v4312_v41 = vrot.slane %v4297_v50, 4  ;;  %v8449_v15 = vor.u32 %v9554_v34, %v8446_v57 }
 0x5c2   : > { %v3212_v29 = vsel %vm3201_vm15, %v12012_v61, %v3211_v24  ;;  %3692 = vst [vmem:[#allocation3 + $0x910] sm:$0xff] %v3671_v8  ;;  %v9357_v42 = vor.u32 %v9784_v28, %v9356_v1  ;;  %v12843_v45 = vor.u32 %v9411_v7, %v7894_v62  ;;  %v9442_v4 = vld [vmem:[#allocation3 + $0x64] sm:$0xf]  ;;  %v7982_v61 = vld [vmem:[#allocation3 + $0x50] sm:$0xf0]  ;;  %v12848_v50 = vor.u32 %v9428_v58, %v7932_v14 }
 0x5c3   : > { %3354 = vrot.lane.b32.xlu1 %v3328_v3, %s10244_s27  ;;  %v4327_v25 = vsel %vm409_vm0, %v13831_v32, %v4312_v41  ;;  %3230 = vst [vmem:[#allocation3 + $0x7e8] sm:$0xff] %v3212_v29  ;;  %v9494_v1 = vld [vmem:[#allocation3 + $0x204] sm:$0xf]  ;;  %v8430_v40 = vld [vmem:[#allocation3 + $0x3d0] sm:$0xf0]  ;;  %v8001_v3 = vor.u32 %v9442_v4, %v7998_v21 }
 0x5c4   : > { %7022 = vmatpush.bf16.msrb.mxu2 %v8241_v36  ;;  %13832 = vst [vmem:[#allocation67_spill] sm:$0xff] %v12843_v45  ;;  %v3985_v36 = vld [vmem:[#allocation2 + $0x5c] sm:$0xf]  ;;  %3726 = vrot.lane.b32.xlu0 %v3700_v22, %s10245_s6  ;;  %v4328_v28 = vsel %vm4317_vm2, %v12076_v59, %v4327_v25  ;;  %v8830_v41 = vld [vmem:[#allocation3 + $0x6f0] sm:$0xf0]  ;;  %v8209_v21 = vor.u32 %v9494_v1, %v8206_v11  ;;  %v13834_v25 = vrot.slane %v11975_v13, 4 }
 0x5c5   : > { %6982 = vmatpush.bf16.msrb.mxu0 %v8017_v49  ;;  %6967 = vmatpush.bf16.msra.mxu3 %v9357_v42  ;;  %13833 = vst [vmem:[#allocation68_spill] sm:$0xff] %v12848_v50  ;;  %v3187_v29 = vpop.permute.xlu1 %3186  ;;  %v8190_v62 = vld [vmem:[#allocation3 + $0x1f0] sm:$0xf0]  ;;  %v9438_v7 = vld [vmem:[#allocation3 + $0x44] sm:$0xf] }
 0x5c6   : > { %4346 = vst [vmem:[#allocation3 + $0xae8] sm:$0xff] %v4328_v28  ;;  %v8414_v34 = vld [vmem:[#allocation3 + $0x3b0] sm:$0xf0]  ;;  %v3175_v57 = vpop.permute.xlu0 %3174  ;;  %v3199_v22 = vrot.slane %v3187_v29, 4  ;;  %v9550_v60 = vld [vmem:[#allocation3 + $0x3c4] sm:$0xf]  ;;  %4017 = vrot.lane.b32.xlu2 %v3985_v36, %s10246_s10  ;;  %v7985_v11 = vor.u32 %v9438_v7, %v7982_v61 }
 0x5c7   : > { %v9650_v24 = vld [vmem:[#allocation3 + $0x6e4] sm:$0xf]  ;;  %v3193_v59 = vrot.slane %v3175_v57, 4  ;;  %v8433_v49 = vor.u32 %v9550_v60, %v8430_v40  ;;  %v3703_v14 = vld [vmem:[#allocation2 + $0x3c] sm:$0xf]  ;;  %v13835_v36 = vrot.slane %v12049_v20, 4 }
 0x5c8   : > { %7023 = vmatpush.bf16.msrb.mxu2 %v8225_v47  ;;  %9386 = vmatmul.msk.bf16.vlgmr.msra.gmra.mxu3 %vm6744_vm13, %v12843_v45  ;;  %v9490_v47 = vld [vmem:[#allocation3 + $0x1e4] sm:$0xf]  ;;  %v8814_v8 = vld [vmem:[#allocation3 + $0x6d0] sm:$0xf0]  ;;  %v3988_v32 = vld [vmem:[#allocation2 + $0x7c] sm:$0xf]  ;;  %v8833_v4 = vor.u32 %v9650_v24, %v8830_v41  ;;  %v3559_v28 = vpop.permute.xlu2 %3558 }
 0x5c9   : > { %7036 = vmatpush.bf16.msrb.mxu3 %v8449_v15  ;;  %6983 = vmatpush.bf16.msrb.mxu0 %v8001_v3  ;;  %v9546_v58 = vld [vmem:[#allocation3 + $0x3a4] sm:$0xf]  ;;  %v3215_v15 = vsel %vm409_vm0, %v13834_v25, %v3199_v22  ;;  %v3207_v3 = vsel %vm409_vm0, %v13835_v36, %v3193_v59  ;;  %v7886_v1 = vld [vmem:[#allocation4 + $0x50] sm:$0xf0]  ;;  %v9100_v60 = vld [vmem:[#allocation3 + $0x900] sm:$0xf]  ;;  %v8193_v59 = vor.u32 %v9490_v47, %v8190_v62 }
 0x5ca   : > { %v9410_v42 = vld [vmem:[#allocation4 + $0x24] sm:$0xf]  ;;  %6916 = vmatmul.bf16.gmra.mxu0 %v12848_v50  ;;  %v7966_v29 = vld [vmem:[#allocation3 + $0x30] sm:$0xf0]  ;;  %v3216_v57 = vsel %vm3201_vm15, %v11975_v13, %v3215_v15  ;;  %v9720_v45 = vld [vmem:[#allocation3 + $0x90c] sm:$0xf0]  ;;  %v3208_v41 = vsel %vm3201_vm15, %v12049_v20, %v3207_v3  ;;  %v8417_v25 = vor.u32 %v9546_v58, %v8414_v34 }
 0x5cb   : > { %v9434_v40 = vld [vmem:[#allocation3 + $0x24] sm:$0xf]  ;;  %v3571_v22 = vrot.slane %v3559_v28, 4  ;;  %3232 = vst [vmem:[#allocation3 + $0x7f8] sm:$0xff] %v3216_v57  ;;  %v9101_v24 = vor.u32 %v9720_v45, %v9100_v60  ;;  %v8174_v61 = vld [vmem:[#allocation3 + $0x1d0] sm:$0xf0]  ;;  %3732 = vrot.lane.b32.xlu1 %v3703_v14, %s10245_s6 }
 0x5cc   : > { %7024 = vmatpush.bf16.msrb.mxu2 %v8209_v21  ;;  %v13836_v7 = vrot.slane %v12115_v44, 4  ;;  %3228 = vst [vmem:[#allocation3 + $0x7d8] sm:$0xff] %v3208_v41  ;;  %v9646_v21 = vld [vmem:[#allocation3 + $0x6c4] sm:$0xf]  ;;  %v3244_v15 = vld [vmem:[#allocation2 + $0x78] sm:$0xf]  ;;  %4023 = vrot.lane.b32.xlu0 %v3988_v32, %s10246_s10  ;;  %v7969_v20 = vor.u32 %v9434_v40, %v7966_v29 }
 0x5cd   : > { %7037 = vmatpush.bf16.msrb.mxu3 %v8433_v49  ;;  %6984 = vmatpush.bf16.msrb.mxu0 %v7985_v11  ;;  %v12868_v49 = vor.u32 %v9410_v42, %v7886_v1  ;;  %v8817_v62 = vor.u32 %v9646_v21, %v8814_v8  ;;  %v8398_v34 = vld [vmem:[#allocation3 + $0x390] sm:$0xf0]  ;;  %v9430_v47 = vld [vmem:[#allocation3 + $0x4] sm:$0xf]  ;;  %v3088_v58 = vpop.permute.xlu1 %3087  ;;  %v13838_v41 = vrot.slane %v12001_v23, 4  ;;  %s10080_s6 = scalar_lea.hbm %s13968_s3, 512 }
 0x5ce   : > { %v3587_v13 = vsel %vm409_vm0, %v13836_v7, %v3571_v22  ;;  %6929 = vmatpush.bf16.msra.mxu1 %v9101_v24  ;;  %v7950_v14 = vld [vmem:[#allocation3 + $0x10] sm:$0xf0]  ;;  %v3076_v36 = vpop.permute.xlu0 %3075  ;;  %v3103_v3 = vrot.slane %v3088_v58, 4  ;;  %v9542_v32 = vld [vmem:[#allocation3 + $0x384] sm:$0xf]  ;;  %3279 = vrot.lane.b32.xlu2 %v3244_v15, %s10247_s23  ;;  %p10082_p4 = scmp.lt.s32.totalorder %s10080_s6, %s10076_s24 }
 0x5cf   : > { %13837 = vst [vmem:[#allocation69_spill] sm:$0xff] %v12868_v49  ;;  %v3588_v45 = vsel %vm3573_vm3, %v12115_v44, %v3587_v13  ;;  %v8798_v28 = vld [vmem:[#allocation3 + $0x6b0] sm:$0xf0]  ;;  %v3097_v11 = vrot.slane %v3076_v36, 4  ;;  %v8401_v8 = vor.u32 %v9542_v32, %v8398_v34  ;;  %v9642_v40 = vld [vmem:[#allocation3 + $0x6a4] sm:$0xf]  ;;  %v7953_v57 = vor.u32 %v9430_v47, %v7950_v14  ;;  %7025 = vmatmul.bf16.vlgmr.msrb.gmra.mxu2 %v12127_v56 }
 0x5d0   : > { %7093 = vmatpush.bf16.msra.mxu2 %v8833_v4  ;;  %3604 = vst [vmem:[#allocation3 + $0x8f8] sm:$0xff] %v3588_v45  ;;  %v9486_v4 = vld [vmem:[#allocation3 + $0x1c4] sm:$0xf]  ;;  %v8158_v42 = vld [vmem:[#allocation3 + $0x1b0] sm:$0xf0]  ;;  %v3118_v24 = vsel %vm409_vm0, %v13838_v41, %v3103_v3  ;;  %v4285_v7 = vpop.permute.xlu2 %4284  ;;  %v13839_v13 = vrot.slane %v12086_v16, 4  ;;  %p10083_p8 = por %p10082_p4, %p10081_p5 }
 0x5d1   : > { %7038 = vmatpush.bf16.msrb.mxu3 %v8417_v25  ;;  %v8382_v1 = vld [vmem:[#allocation3 + $0x370] sm:$0xf0]  ;;  %6930 = vmatmul.bf16.vlgmr.msra.gmra.mxu1 %v12868_v49  ;;  %v8177_v44 = vor.u32 %v9486_v4, %v8174_v61  ;;  %v9482_v29 = vld [vmem:[#allocation3 + $0x1a4] sm:$0xf]  ;;  %v3241_v25 = vld [vmem:[#allocation2 + $0x58] sm:$0xf] }
 0x5d2   : > { %6998 = vmatpush.bf16.msrb.mxu1 %v8193_v59  ;;  %6985 = vmatpush.bf16.msrb.mxu0 %v7969_v20  ;;  %v9586_v60 = vld [vmem:[#allocation3 + $0x4e4] sm:$0xf]  ;;  %v8574_v22 = vld [vmem:[#allocation3 + $0x4f0] sm:$0xf0]  ;;  %v8801_v59 = vor.u32 %v9642_v40, %v8798_v28  ;;  %v3110_v21 = vsel %vm409_vm0, %v13839_v13, %v3097_v11  ;;  %v9423_v15 = vld [vmem:[#allocation4 + $0x8c] sm:$0xf]  ;;  %v3119_v20 = vsel %vm3108_vm1, %v12001_v23, %v3118_v24  ;;  %p10084_p9 = pnand %p10083_p8, %p10079_p10 }
 0x5d3   : > { %v7942_v61 = vld [vmem:[#allocation4 + $0xb8] sm:$0xf0]  ;;  %v4306_v45 = vrot.slane %v4285_v7, 4  ;;  %v8782_v34 = vld [vmem:[#allocation3 + $0x690] sm:$0xf0]  ;;  %3137 = vst [vmem:[#allocation3 + $0x7a8] sm:$0xff] %v3119_v20  ;;  %v8161_v14 = vor.u32 %v9482_v29, %v8158_v42  ;;  %v8577_v4 = vor.u32 %v9586_v60, %v8574_v22  ;;  %3273 = vrot.lane.b32.xlu1 %v3241_v25, %s10247_s23 }
 0x5d4   : > { %7094 = vmatpush.bf16.msra.mxu2 %v8817_v62  ;;  %v3111_v62 = vsel %vm3108_vm1, %v12086_v16, %v3110_v21  ;;  %v4357_v47 = vld [vmem:[#allocation2 + $0x5c] sm:$0xf]  ;;  %v9538_v58 = vld [vmem:[#allocation3 + $0x364] sm:$0xf]  ;;  %v8558_v28 = vld [vmem:[#allocation3 + $0x4d0] sm:$0xf0]  ;;  %v12890_v11 = vor.u32 %v9423_v15, %v7942_v61 }
 0x5d5   : > { %7039 = vmatpush.bf16.msrb.mxu3 %v8401_v8  ;;  %v13840_v36 = vrot.slane %v12164_v26, 4  ;;  %v8385_v3 = vor.u32 %v9538_v58, %v8382_v1  ;;  %3133 = vst [vmem:[#allocation3 + $0x788] sm:$0xff] %v3111_v62  ;;  %v9638_v32 = vld [vmem:[#allocation3 + $0x684] sm:$0xf]  ;;  %v3613_v16 = vld [vmem:[#allocation2 + $0x5c] sm:$0xf]  ;;  %4389 = vrot.lane.b32.xlu0 %v4357_v47, %s10248_s5  ;;  %v3082_v60 = vpop.permute.xlu1 %3081 }
 0x5d6   : > { %6999 = vmatpush.bf16.msrb.mxu1 %v8177_v44  ;;  %13841 = vst [vmem:[#allocation70_spill] sm:$0xff] %v12890_v11  ;;  %6986 = vmatpush.bf16.msrb.mxu0 %v7953_v57  ;;  %v8785_v42 = vor.u32 %v9638_v32, %v8782_v34  ;;  %v9478_v8 = vld [vmem:[#allocation3 + $0x184] sm:$0xf]  ;;  %v8142_v40 = vld [vmem:[#allocation3 + $0x190] sm:$0xf0]  ;;  %v3001_v41 = vpop.permute.xlu0 %3000  ;;  %v3100_v57 = vrot.slane %v3082_v60, 4 }
 0x5d7   : > { %v4319_v23 = vsel %vm409_vm0, %v13840_v36, %v4306_v45  ;;  %v8366_v29 = vld [vmem:[#allocation3 + $0x350] sm:$0xf0]  ;;  %v9582_v24 = vld [vmem:[#allocation3 + $0x4c4] sm:$0xf]  ;;  %3645 = vrot.lane.b32.xlu2 %v3613_v16, %s10249_s4  ;;  %v3013_v25 = vrot.slane %v3001_v41, 4  ;;  %v8145_v13 = vor.u32 %v9478_v8, %v8142_v40  ;;  %v13842_v62 = vrot.slane %v12039_v17, 4 }
 0x5d8   : > { %7095 = vmatpush.bf16.msra.mxu2 %v8801_v59  ;;  %v4320_v44 = vsel %vm4317_vm2, %v12164_v26, %v4319_v23  ;;  %v8766_v1 = vld [vmem:[#allocation3 + $0x670] sm:$0xf0]  ;;  %v9534_v59 = vld [vmem:[#allocation3 + $0x344] sm:$0xf]  ;;  %v8561_v7 = vor.u32 %v9582_v24, %v8558_v28  ;;  %9387 = vmatmul.msk.bf16.gmra.mxu3 %vm6744_vm13, %v12890_v11  ;;  %v3547_v58 = vpop.permute.xlu2 %3546 }
 0x5d9   : > { %4342 = vst [vmem:[#allocation3 + $0xac8] sm:$0xff] %v4320_v44  ;;  %7040 = vmatpush.bf16.msrb.mxu3 %v8385_v3  ;;  %v8126_v22 = vld [vmem:[#allocation3 + $0x170] sm:$0xf0]  ;;  %v8369_v21 = vor.u32 %v9534_v59, %v8366_v29  ;;  %v9634_v15 = vld [vmem:[#allocation3 + $0x664] sm:$0xf]  ;;  %v3114_v34 = vsel %vm409_vm0, %v13842_v62, %v3100_v57  ;;  %v3565_v32 = vrot.slane %v3547_v58, 4 }
 0x5da   : > { %7055 = vmatpush.bf16.msra.mxu0 %v8577_v4  ;;  %7000 = vmatpush.bf16.msrb.mxu1 %v8161_v14  ;;  %v8350_v26 = vld [vmem:[#allocation3 + $0x330] sm:$0xf0]  ;;  %v9474_v61 = vld [vmem:[#allocation3 + $0x164] sm:$0xf]  ;;  %v8769_v47 = vor.u32 %v9634_v15, %v8766_v1  ;;  %v4360_v14 = vld [vmem:[#allocation2 + $0x7c] sm:$0xf]  ;;  %v3115_v3 = vsel %vm3108_vm1, %v12039_v17, %v3114_v34 }
 0x5db   : > { %v9578_v20 = vld [vmem:[#allocation3 + $0x4a4] sm:$0xf]  ;;  %v8542_v45 = vld [vmem:[#allocation3 + $0x4b0] sm:$0xf0]  ;;  %v13843_v4 = vrot.slane %v12131_v63, 4  ;;  %3135 = vst [vmem:[#allocation3 + $0x798] sm:$0xff] %v3115_v3  ;;  %v8129_v8 = vor.u32 %v9474_v61, %v8126_v22  ;;  %6987 = vmatmul.bf16.vlgmr.msrb.gmra.mxu0 %v12156_v12  ;;  %4395 = vrot.lane.b32.xlu1 %v4360_v14, %s10248_s5 }
 0x5dc   : > { %7096 = vmatpush.bf16.msra.mxu2 %v8785_v42  ;;  %v9422_v36 = vld [vmem:[#allocation4 + $0x84] sm:$0xf]  ;;  %v7934_v23 = vld [vmem:[#allocation4 + $0xb0] sm:$0xf0]  ;;  %v3616_v42 = vld [vmem:[#allocation2 + $0x7c] sm:$0xf]  ;;  %v8545_v29 = vor.u32 %v9578_v20, %v8542_v45 }
 0x5dd   : > { %v3029_v28 = vsel %vm409_vm0, %v13843_v4, %v3013_v25  ;;  %7041 = vmatpush.bf16.msrb.mxu3 %v8369_v21  ;;  %v8750_v44 = vld [vmem:[#allocation3 + $0x650] sm:$0xf0]  ;;  %v9530_v40 = vld [vmem:[#allocation3 + $0x324] sm:$0xf]  ;;  %v13844_v17 = vrot.slane %v12206_v9, 4  ;;  %3651 = vrot.lane.b32.xlu0 %v3616_v42, %s10249_s4  ;;  %v2989_v15 = vpop.permute.xlu1 %2988 }
 0x5de   : > { %7056 = vmatpush.bf16.msra.mxu0 %v8561_v7  ;;  %7001 = vmatpush.bf16.msrb.mxu1 %v8145_v13  ;;  %v3030_v16 = vsel %vm3015_vm14, %v12131_v63, %v3029_v28  ;;  %v8526_v60 = vld [vmem:[#allocation3 + $0x490] sm:$0xf0]  ;;  %v8353_v41 = vor.u32 %v9530_v40, %v8350_v26  ;;  %v9630_v24 = vld [vmem:[#allocation3 + $0x644] sm:$0xf]  ;;  %v12913_v63 = vor.u32 %v9422_v36, %v7934_v23  ;;  %v3982_v57 = vld [vmem:[#allocation2 + $0x3c] sm:$0xf]  ;;  %v4303_v61 = vpop.permute.xlu0 %4302 }
 0x5df   : > { %v3579_v1 = vsel %vm409_vm0, %v13844_v17, %v3565_v32  ;;  %3046 = vst [vmem:[#allocation3 + $0x778] sm:$0xff] %v3030_v16  ;;  %v8753_v59 = vor.u32 %v9630_v24, %v8750_v44  ;;  %v9470_v25 = vld [vmem:[#allocation3 + $0x144] sm:$0xf]  ;;  %v8110_v7 = vld [vmem:[#allocation3 + $0x150] sm:$0xf0]  ;;  %v3007_v45 = vrot.slane %v2989_v15, 4  ;;  %4011 = vrot.lane.b32.xlu2 %v3982_v57, %s10246_s10  ;;  %7030 = vmatmul.bf16.gmra.mxu2 %v12588_v38 }
 0x5e0   : > { %7097 = vmatpush.bf16.msra.mxu2 %v8769_v47  ;;  %v3580_v22 = vsel %vm3573_vm3, %v12206_v9, %v3579_v1  ;;  %v8334_v13 = vld [vmem:[#allocation3 + $0x310] sm:$0xf0]  ;;  %v9574_v20 = vld [vmem:[#allocation3 + $0x484] sm:$0xf]  ;;  %v4315_v47 = vrot.slane %v4303_v61, 4  ;;  %v8113_v58 = vor.u32 %v9470_v25, %v8110_v7  ;;  %v13845_v32 = vrot.slane %v12010_v35, 4 }
 0x5e1   : > { %v8734_v21 = vld [vmem:[#allocation3 + $0x630] sm:$0xf0]  ;;  %3600 = vst [vmem:[#allocation3 + $0x8d8] sm:$0xff] %v3580_v22  ;;  %7042 = vmatpush.bf16.msrb.mxu3 %v8353_v41  ;;  %v9526_v62 = vld [vmem:[#allocation3 + $0x304] sm:$0xf]  ;;  %v8529_v14 = vor.u32 %v9574_v20, %v8526_v60  ;;  %6935 = vmatmul.bf16.gmra.mxu1 %v12913_v63  ;;  %v13846_v40 = vrot.slane %v12172_v0, 4 }
 0x5e2   : > { %7057 = vmatpush.bf16.msra.mxu0 %v8545_v29  ;;  %7002 = vmatpush.bf16.msrb.mxu1 %v8129_v8  ;;  %v8958_v26 = vld [vmem:[#allocation3 + $0x7f0] sm:$0xf0]  ;;  %v9626_v34 = vld [vmem:[#allocation3 + $0x624] sm:$0xf]  ;;  %v8337_v4 = vor.u32 %v9526_v62, %v8334_v13  ;;  %v3021_v16 = vsel %vm409_vm0, %v13845_v32, %v3007_v45  ;;  %v3979_v42 = vld [vmem:[#allocation2 + $0x1c] sm:$0xf]  ;;  %v4204_v8 = vpop.permute.xlu2 %4203 }
 0x5e3   : > { %v8094_v9 = vld [vmem:[#allocation3 + $0x130] sm:$0xf0]  ;;  %v8737_v28 = vor.u32 %v9626_v34, %v8734_v21  ;;  %v9682_v36 = vld [vmem:[#allocation3 + $0x7e4] sm:$0xf]  ;;  %v4331_v29 = vsel %vm409_vm0, %v13846_v40, %v4315_v47  ;;  %v3022_v1 = vsel %vm3015_vm14, %v12010_v35, %v3021_v16  ;;  %v4219_v41 = vrot.slane %v4204_v8, 4  ;;  %4005 = vrot.lane.b32.xlu1 %v3979_v42, %s10246_s10  ;;  %v12940_v42 = vpop.f32.mrf.mxu0 }
 0x5e4   : > { %7098 = vmatpush.bf16.msra.mxu2 %v8753_v59  ;;  %v9570_v23 = vld [vmem:[#allocation3 + $0x464] sm:$0xf]  ;;  %v8510_v3 = vld [vmem:[#allocation3 + $0x470] sm:$0xf0]  ;;  %v8961_v44 = vor.u32 %v9682_v36, %v8958_v26  ;;  %v4332_v24 = vsel %vm4317_vm2, %v12172_v0, %v4331_v29  ;;  %v3235_v22 = vld [vmem:[#allocation2 + $0x18] sm:$0xf] }
 0x5e5   : > { %v8718_v60 = vld [vmem:[#allocation3 + $0x610] sm:$0xf0]  ;;  %v9678_v17 = vld [vmem:[#allocation3 + $0x7c4] sm:$0xf]  ;;  %7043 = vmatpush.bf16.msrb.mxu3 %v8337_v4  ;;  %3042 = vst [vmem:[#allocation3 + $0x758] sm:$0xff] %v3022_v1  ;;  %v8513_v13 = vor.u32 %v9570_v23, %v8510_v3  ;;  %v13847_v21 = vrot.slane %v12249_v52, 4  ;;  %3261 = vrot.lane.b32.xlu0 %v3235_v22, %s10247_s23  ;;  %v3553_v4 = vpop.permute.xlu1 %3552 }
 0x5e6   : > { %7058 = vmatpush.bf16.msra.mxu0 %v8529_v14  ;;  %7003 = vmatpush.bf16.msrb.mxu1 %v8113_v58  ;;  %v8942_v57 = vld [vmem:[#allocation3 + $0x7d0] sm:$0xf0]  ;;  %v9466_v59 = vld [vmem:[#allocation3 + $0x124] sm:$0xf]  ;;  %4348 = vst [vmem:[#allocation3 + $0xaf8] sm:$0xff] %v4332_v24  ;;  %v12938_v58 = vpop.f32.mrf.mxu2  ;;  %v3925_v23 = vpop.permute.xlu0 %3924  ;;  %v3568_v3 = vrot.slane %v3553_v4, 4 }
 0x5e7   : > { %v9342_v25 = vld [vmem:[#allocation3 + $0xaf0] sm:$0xf0]  ;;  %v4234_v35 = vsel %vm409_vm0, %v13847_v21, %v4219_v41  ;;  %v8097_v15 = vor.u32 %v9466_v59, %v8094_v9  ;;  %v9622_v26 = vld [vmem:[#allocation3 + $0x604] sm:$0xf]  ;;  %v8945_v45 = vor.u32 %v9678_v17, %v8942_v57  ;;  %v4351_v36 = vld [vmem:[#allocation2 + $0x1c] sm:$0xf] }
 0x5e8   : > { %7099 = vmatpush.bf16.msra.mxu2 %v8737_v28  ;;  %v8078_v7 = vld [vmem:[#allocation3 + $0x110] sm:$0xf0]  ;;  %v4235_v0 = vsel %vm4224_vm5, %v12249_v52, %v4234_v35  ;;  %v8721_v20 = vor.u32 %v9622_v26, %v8718_v60  ;;  %v9778_v62 = vld [vmem:[#allocation3 + $0xae4] sm:$0xf]  ;;  %v3940_v16 = vrot.slane %v3925_v23, 4  ;;  %7044 = vmatmul.bf16.vlgmr.msrb.gmra.mxu3 %v12555_v46  ;;  %v13848_v17 = vrot.slane %v12174_v27, 4 }
 0x5e9   : > { %7112 = vmatpush.bf16.msra.mxu3 %v8961_v44  ;;  %v8494_v61 = vld [vmem:[#allocation3 + $0x450] sm:$0xf0]  ;;  %v9462_v34 = vld [vmem:[#allocation3 + $0x104] sm:$0xf]  ;;  %4253 = vst [vmem:[#allocation3 + $0xaa8] sm:$0xff] %v4235_v0  ;;  %v9345_v9 = vor.u32 %v9778_v62, %v9342_v25  ;;  %4377 = vrot.lane.b32.xlu2 %v4351_v36, %s10248_s5  ;;  %v13849_v59 = vrot.slane %v12218_v19, 4 }
 0x5ea   : > { %7059 = vmatpush.bf16.msra.mxu0 %v8513_v13  ;;  %v8702_v47 = vld [vmem:[#allocation3 + $0x5f0] sm:$0xf0]  ;;  %v9566_v14 = vld [vmem:[#allocation3 + $0x444] sm:$0xf]  ;;  %7004 = vmatpush.bf16.msrb.mxu1 %v8097_v15  ;;  %v8081_v8 = vor.u32 %v9462_v34, %v8078_v7  ;;  %v3583_v1 = vsel %vm409_vm0, %v13848_v17, %v3568_v3  ;;  %v3238_v24 = vld [vmem:[#allocation2 + $0x38] sm:$0xf]  ;;  %v3466_v22 = vpop.permute.xlu2 %3465 }
 0x5eb   : > { %v8926_v28 = vld [vmem:[#allocation3 + $0x7b0] sm:$0xf0]  ;;  %v9618_v52 = vld [vmem:[#allocation3 + $0x5e4] sm:$0xf]  ;;  %v8497_v44 = vor.u32 %v9566_v14, %v8494_v61  ;;  %v3955_v25 = vsel %vm409_vm0, %v13849_v59, %v3940_v16  ;;  %v3584_v7 = vsel %vm3573_vm3, %v12174_v27, %v3583_v1  ;;  %v3478_v35 = vrot.slane %v3466_v22, 4  ;;  %3267 = vrot.lane.b32.xlu1 %v3238_v24, %s10247_s23  ;;  %6992 = vmatmul.bf16.gmra.mxu0 %v12591_v10 }
 0x5ec   : > { %7100 = vmatpush.bf16.msra.mxu2 %v8721_v20  ;;  %v9326_v32 = vld [vmem:[#allocation3 + $0xad0] sm:$0xf0]  ;;  %v8705_v40 = vor.u32 %v9618_v52, %v8702_v47  ;;  %v9674_v29 = vld [vmem:[#allocation3 + $0x7a4] sm:$0xf]  ;;  %v3956_v15 = vsel %vm3945_vm4, %v12218_v19, %v3955_v25  ;;  %v4354_v61 = vld [vmem:[#allocation2 + $0x3c] sm:$0xf] }
 0x5ed   : > { %7113 = vmatpush.bf16.msra.mxu3 %v8945_v45  ;;  %v8478_v60 = vld [vmem:[#allocation3 + $0x430] sm:$0xf0]  ;;  %v8929_v41 = vor.u32 %v9674_v29, %v8926_v28  ;;  %v9774_v57 = vld [vmem:[#allocation3 + $0xac4] sm:$0xf]  ;;  %3602 = vst [vmem:[#allocation3 + $0x8e8] sm:$0xff] %v3584_v7  ;;  %v13850_v62 = vrot.slane %v12286_v43, 4  ;;  %4383 = vrot.lane.b32.xlu0 %v4354_v61, %s10248_s5  ;;  %v3931_v52 = vpop.permute.xlu1 %3930 }
 0x5ee   : > { %7060 = vmatpush.bf16.msra.mxu0 %v8497_v44  ;;  %v8686_v13 = vld [vmem:[#allocation3 + $0x5d0] sm:$0xf0]  ;;  %7005 = vmatpush.bf16.msrb.mxu1 %v8081_v8  ;;  %v9329_v21 = vor.u32 %v9774_v57, %v9326_v32  ;;  %v9562_v20 = vld [vmem:[#allocation3 + $0x424] sm:$0xf]  ;;  %3974 = vst [vmem:[#allocation3 + $0x9e8] sm:$0xff] %v3956_v15  ;;  %v4291_v8 = vpop.permute.xlu0 %4290  ;;  %v12962_v17 = vpop.f32.mrf.mxu2  ;;  %v13851_v57 = vrot.slane %v12220_v31, 4 }
 0x5ef   : > { %v8910_v26 = vld [vmem:[#allocation3 + $0x790] sm:$0xf0]  ;;  %v3494_v27 = vsel %vm409_vm0, %v13850_v62, %v3478_v35  ;;  %v9614_v34 = vld [vmem:[#allocation3 + $0x5c4] sm:$0xf]  ;;  %v8481_v14 = vor.u32 %v9562_v20, %v8478_v60  ;;  %v3610_v44 = vld [vmem:[#allocation2 + $0x3c] sm:$0xf]  ;;  %7101 = vmatmul.bf16.vlgmr.msra.gmra.mxu2 %v12631_v37 }
 0x5f0   : > { %7169 = vmatpush.bf16.msrb.mxu2 %v9345_v9  ;;  %v9310_v0 = vld [vmem:[#allocation3 + $0xab0] sm:$0xf0]  ;;  %v9670_v47 = vld [vmem:[#allocation3 + $0x784] sm:$0xf]  ;;  %v3495_v19 = vsel %vm3480_vm6, %v12286_v43, %v3494_v27  ;;  %v8689_v4 = vor.u32 %v9614_v34, %v8686_v13  ;;  %v4309_v60 = vrot.slane %v4291_v8, 4  ;;  %vm13898_vm14 = vcmask 908288  }
 0x5f1   : > { %7114 = vmatpush.bf16.msra.mxu3 %v8929_v41  ;;  %v8462_v45 = vld [vmem:[#allocation3 + $0x410] sm:$0xf0]  ;;  %v8913_v9 = vor.u32 %v9670_v47, %v8910_v26  ;;  %v9770_v28 = vld [vmem:[#allocation3 + $0xaa4] sm:$0xf]  ;;  %3511 = vst [vmem:[#allocation3 + $0x8b8] sm:$0xff] %v3495_v19  ;;  %7006 = vmatmul.bf16.vlgmr.msrb.gmra.mxu1 %v12176_v2  ;;  %v12972_v26 = vpop.f32.mrf.mxu0  ;;  %v13853_v19 = vrot.slane %v12323_v55, 4  ;;  %vm13905_vm15 = vmmov %vm13898_vm14 }
 0x5f2   : > { %7074 = vmatpush.bf16.msra.mxu1 %v8705_v40  ;;  %v8670_v36 = vld [vmem:[#allocation3 + $0x5b0] sm:$0xf0]  ;;  %v9666_v23 = vld [vmem:[#allocation3 + $0x764] sm:$0xf]  ;;  %v9313_v32 = vor.u32 %v9770_v28, %v9310_v0  ;;  %7061 = vmatpush.bf16.msra.mxu0 %v8481_v14  ;;  %v3943_v40 = vrot.slane %v3931_v52, 4  ;;  %v4192_v7 = vpop.permute.xlu2 %4191  ;;  %vm13912_vm1 = vmmov %vm13898_vm14 }
 0x5f3   : > { %v9558_v3 = vld [vmem:[#allocation3 + $0x404] sm:$0xf]  ;;  %v8894_v16 = vld [vmem:[#allocation3 + $0x770] sm:$0xf0]  ;;  %3639 = vrot.lane.b32.xlu2 %v3610_v44, %s10249_s4  ;;  %v3607_v25 = vld [vmem:[#allocation2 + $0x1c] sm:$0xf] }
 0x5f4   : > { %7170 = vmatpush.bf16.msrb.mxu2 %v9329_v21  ;;  %v9610_v43 = vld [vmem:[#allocation3 + $0x5a4] sm:$0xf]  ;;  %v9294_v29 = vld [vmem:[#allocation3 + $0xa90] sm:$0xf0]  ;;  %v8465_v41 = vor.u32 %v9558_v3, %v8462_v45  ;;  %v3959_v22 = vsel %vm409_vm0, %v13851_v57, %v3943_v40  ;;  %v8897_v59 = vor.u32 %v9666_v23, %v8894_v16  ;;  %v13852_v21 = vrot.slane %v12257_v6, 4  ;;  %3633 = vrot.lane.b32.xlu1 %v3607_v25, %s10249_s4 }
 0x5f5   : > { %7115 = vmatpush.bf16.msra.mxu3 %v8913_v9  ;;  %v8673_v1 = vor.u32 %v9610_v43, %v8670_v36  ;;  %v9086_v24 = vld [vmem:[#allocation3 + $0x8f0] sm:$0xf0]  ;;  %v9766_v13 = vld [vmem:[#allocation3 + $0xa84] sm:$0xf]  ;;  %v3960_v61 = vsel %vm3945_vm4, %v12220_v31, %v3959_v22  ;;  %v4213_v20 = vrot.slane %v4192_v7, 4  ;;  %v3541_v52 = vpop.permute.xlu1 %3540  ;;  %v13855_v7 = vrot.slane %v12294_v54, 4 }
 0x5f6   : > { %7075 = vmatpush.bf16.msra.mxu1 %v8689_v4  ;;  %v4323_v35 = vsel %vm409_vm0, %v13852_v21, %v4309_v60  ;;  %v8654_v15 = vld [vmem:[#allocation3 + $0x590] sm:$0xf0]  ;;  %v9297_v0 = vor.u32 %v9766_v13, %v9294_v29  ;;  %7062 = vmatpush.bf16.msra.mxu0 %v8465_v41  ;;  %v9714_v27 = vld [vmem:[#allocation3 + $0x8e4] sm:$0xf]  ;;  %3976 = vst [vmem:[#allocation3 + $0x9f8] sm:$0xff] %v3960_v61  ;;  %v3913_v8 = vpop.permute.xlu0 %3912  ;;  %v3562_v40 = vrot.slane %v3541_v52, 4  ;;  %v12994_v61 = vpop.f32.mrf.mxu2 }
 0x5f7   : > { %v4324_v45 = vsel %vm4317_vm2, %v12257_v6, %v4323_v35  ;;  %v8878_v62 = vld [vmem:[#allocation3 + $0x750] sm:$0xf0]  ;;  %v9606_v34 = vld [vmem:[#allocation3 + $0x584] sm:$0xf]  ;;  %v9089_v47 = vor.u32 %v9714_v27, %v9086_v24  ;;  %v4226_v31 = vsel %vm409_vm0, %v13853_v19, %v4213_v20  ;;  %v3934_v60 = vrot.slane %v3913_v8, 4  ;;  %vm13917_vm2 = vmmov %vm13912_vm1 }
 0x5f8   : > { %7171 = vmatpush.bf16.msrb.mxu2 %v9313_v32  ;;  %v9278_v14 = vld [vmem:[#allocation3 + $0xa70] sm:$0xf0]  ;;  %4344 = vst [vmem:[#allocation3 + $0xad8] sm:$0xff] %v4324_v45  ;;  %v9662_v4 = vld [vmem:[#allocation3 + $0x744] sm:$0xf]  ;;  %v4227_v6 = vsel %vm4224_vm5, %v12323_v55, %v4226_v31  ;;  %v8657_v28 = vor.u32 %v9606_v34, %v8654_v15  ;;  %7049 = vmatmul.bf16.gmra.mxu3 %v12594_v39  ;;  %v13854_v24 = vrot.slane %v12259_v18, 4 }
 0x5f9   : > { %7116 = vmatpush.bf16.msra.mxu3 %v8897_v59  ;;  %v9070_v9 = vld [vmem:[#allocation3 + $0x8d0] sm:$0xf0]  ;;  %v8881_v36 = vor.u32 %v9662_v4, %v8878_v62  ;;  %v9762_v23 = vld [vmem:[#allocation3 + $0xa64] sm:$0xf]  ;;  %4249 = vst [vmem:[#allocation3 + $0xa88] sm:$0xff] %v4227_v6  ;;  %v3947_v21 = vsel %vm409_vm0, %v13855_v7, %v3934_v60  ;;  %v13856_v4 = vrot.slane %v12368_v51, 4 }
 0x5fa   : > { %7076 = vmatpush.bf16.msra.mxu1 %v8673_v1  ;;  %7131 = vmatpush.bf16.msrb.mxu0 %v9089_v47  ;;  %v8638_v3 = vld [vmem:[#allocation3 + $0x570] sm:$0xf0]  ;;  %v9281_v32 = vor.u32 %v9762_v23, %v9278_v14  ;;  %v9710_v44 = vld [vmem:[#allocation3 + $0x8c4] sm:$0xf]  ;;  %v12985_v1 = vpop.f32.mrf.mxu3  ;;  %v3575_v57 = vsel %vm409_vm0, %v13854_v24, %v3562_v40  ;;  %v3454_v13 = vpop.permute.xlu2 %3453  ;;  %v3948_v62 = vsel %vm3945_vm4, %v12294_v54, %v3947_v21  ;;  %v9525_v8 = vld [vmem:[#allocation3 + $0x2f4] sm:$0xf0] }
 0x5fb   : > { %v8862_v16 = vld [vmem:[#allocation3 + $0x730] sm:$0xf0]  ;;  %v9073_v43 = vor.u32 %v9710_v44, %v9070_v9  ;;  %v9602_v55 = vld [vmem:[#allocation3 + $0x564] sm:$0xf]  ;;  %v3472_v45 = vrot.slane %v3454_v13, 4  ;;  %v13000_v14 = vpop.f32.mrf.mxu0  ;;  %3970 = vst [vmem:[#allocation3 + $0x9c8] sm:$0xff] %v3948_v62  ;;  %7063 = vmatmul.bf16.vlgmr.msra.gmra.mxu0 %v12634_v30 }
 0x5fc   : > { %7172 = vmatpush.bf16.msrb.mxu2 %v9297_v0  ;;  %v9262_v29 = vld [vmem:[#allocation3 + $0xa50] sm:$0xf0]  ;;  %v9658_v41 = vld [vmem:[#allocation3 + $0x724] sm:$0xf]  ;;  %v8641_v22 = vor.u32 %v9602_v55, %v8638_v3  ;;  %v3576_v0 = vsel %vm3573_vm3, %v12259_v18, %v3575_v57  ;;  %v13857_v13 = vrot.slane %v12296_v53, 4  ;;  %vm13922_vm3 = vcmask 736256  }
 0x5fd   : > { %7117 = vmatpush.bf16.msra.mxu3 %v8881_v36  ;;  %v8865_v59 = vor.u32 %v9658_v41, %v8862_v16  ;;  %v9758_v25 = vld [vmem:[#allocation3 + $0xa44] sm:$0xf]  ;;  %v8622_v35 = vld [vmem:[#allocation3 + $0x550] sm:$0xf0]  ;;  %3598 = vst [vmem:[#allocation3 + $0x8c8] sm:$0xff] %v3576_v0  ;;  %v3486_v18 = vsel %vm409_vm0, %v13856_v4, %v3472_v45  ;;  %v13858_v0 = vrot.slane %v12333_v5, 4 }
 0x5fe   : > { %7077 = vmatpush.bf16.msra.mxu1 %v8657_v28  ;;  %7132 = vmatpush.bf16.msrb.mxu0 %v9073_v43  ;;  %v9054_v15 = vld [vmem:[#allocation3 + $0x8b0] sm:$0xf0]  ;;  %v9265_v20 = vor.u32 %v9758_v25, %v9262_v29  ;;  %v9598_v27 = vld [vmem:[#allocation3 + $0x544] sm:$0xf]  ;;  %v3487_v54 = vsel %vm3480_vm6, %v12368_v51, %v3486_v18  ;;  %v4210_v40 = vpop.permute.xlu0 %4209  ;;  %v13008_v43 = vpop.f32.mrf.mxu1  ;;  %v9521_v18 = vld [vmem:[#allocation3 + $0x2d4] sm:$0xf0] }
 0x5ff   : > { %v9654_v34 = vld [vmem:[#allocation3 + $0x704] sm:$0xf]  ;;  %v8846_v47 = vld [vmem:[#allocation3 + $0x710] sm:$0xf0]  ;;  %v8625_v36 = vor.u32 %v9598_v27, %v8622_v35  ;;  %3507 = vst [vmem:[#allocation3 + $0x898] sm:$0xff] %v3487_v54  ;;  %v4222_v41 = vrot.slane %v4210_v40, 4  ;;  %7106 = vmatmul.bf16.gmra.mxu2 %v12674_v48 }
 0x600   : > { %7173 = vmatpush.bf16.msrb.mxu2 %v9281_v32  ;;  %v9706_v19 = vld [vmem:[#allocation3 + $0x8a4] sm:$0xf]  ;;  %v9246_v31 = vld [vmem:[#allocation3 + $0xa30] sm:$0xf0]  ;;  %v8849_v23 = vor.u32 %v9654_v34, %v8846_v47  ;;  %v3919_v32 = vpop.permute.xlu1 %3918  ;;  %v338_v27 = vld [vmem:[#allocation2 + $0x48] sm:$0xff] }
 0x601   : > { %7118 = vmatpush.bf16.msra.mxu3 %v8865_v59  ;;  %v9057_v9 = vor.u32 %v9706_v19, %v9054_v15  ;;  %v9786_v6 = vld [vmem:[#allocation3 + $0xb24] sm:$0xf]  ;;  %v9374_v28 = vld [vmem:[#allocation3 + $0xb30] sm:$0xf0]  ;;  %v3937_v29 = vrot.slane %v3919_v32, 4  ;;  %7011 = vmatmul.bf16.gmra.mxu1 %v12599_v33  ;;  %346 = vst [vmem:[#allocation3 + $0x28] sm:$0xff] %v338_v27 }
 0x602   : > { %7078 = vmatpush.bf16.msra.mxu1 %v8641_v22  ;;  %v9754_v3 = vld [vmem:[#allocation3 + $0xa24] sm:$0xf]  ;;  %v9038_v52 = vld [vmem:[#allocation3 + $0x890] sm:$0xf0]  ;;  %v9377_v60 = vor.u32 %v9786_v6, %v9374_v28  ;;  %v8324_v59 = vld [vmem:[#allocation3 + $0x2e8] sm:$0xf]  ;;  %v4111_v15 = vpop.permute.xlu2 %4110  ;;  %v13022_v6 = vpop.f32.mrf.mxu3 }
 0x603   : > { %7133 = vmatpush.bf16.msrb.mxu0 %v9057_v9  ;;  %v9249_v16 = vor.u32 %v9754_v3, %v9246_v31  ;;  %v8606_v44 = vld [vmem:[#allocation3 + $0x530] sm:$0xf0]  ;;  %v9702_v51 = vld [vmem:[#allocation3 + $0x884] sm:$0xf]  ;;  %v3951_v7 = vsel %vm409_vm0, %v13857_v13, %v3937_v29  ;;  %v4126_v31 = vrot.slane %v4111_v15, 4  ;;  %v340_v9 = vld [vmem:[#allocation2 + $0x68] sm:$0xff]  ;;  %v8325_v54 = vor.u32 %v9525_v8, %v8324_v59  ;;  %v13024_v3 = vpop.f32.mrf.mxu2 }
 0x604   : > { %7174 = vmatpush.bf16.msrb.mxu2 %v9265_v20  ;;  %v9230_v55 = vld [vmem:[#allocation3 + $0xa10] sm:$0xf0]  ;;  %v9594_v24 = vld [vmem:[#allocation3 + $0x524] sm:$0xf]  ;;  %v9041_v57 = vor.u32 %v9702_v51, %v9038_v52  ;;  %v4238_v20 = vsel %vm409_vm0, %v13858_v0, %v4222_v41  ;;  %v3952_v34 = vsel %vm3945_vm4, %v12296_v53, %v3951_v7  ;;  %v9557_v40 = vld [vmem:[#allocation3 + $0x3f4] sm:$0xf0]  ;;  %v13031_v51 = vpop.f32.mrf.mxu0 }
 0x605   : > { %7119 = vmatpush.bf16.msra.mxu3 %v8849_v23  ;;  %v9358_v22 = vld [vmem:[#allocation3 + $0xb10] sm:$0xf0]  ;;  %v8609_v21 = vor.u32 %v9594_v24, %v8606_v44  ;;  %v9750_v35 = vld [vmem:[#allocation3 + $0xa04] sm:$0xf]  ;;  %v4239_v4 = vsel %vm4224_vm5, %v12333_v5, %v4238_v20  ;;  %3972 = vst [vmem:[#allocation3 + $0x9d8] sm:$0xff] %v3952_v34  ;;  %v334_v41 = vld [vmem:[#allocation2 + $0x8] sm:$0xff] }
 0x606   : > { %7079 = vmatpush.bf16.msra.mxu1 %v8625_v36  ;;  %v8590_v25 = vld [vmem:[#allocation3 + $0x510] sm:$0xf0]  ;;  %v9746_v62 = vld [vmem:[#allocation3 + $0x9e4] sm:$0xf]  ;;  %v9233_v47 = vor.u32 %v9750_v35, %v9230_v55  ;;  %4255 = vst [vmem:[#allocation3 + $0xab8] sm:$0xff] %v4239_v4  ;;  %v336_v24 = vld [vmem:[#allocation2 + $0x28] sm:$0xff]  ;;  %v3832_v7 = vpop.permute.xlu0 %3831 }
 0x607   : > { %v9022_v45 = vld [vmem:[#allocation3 + $0x870] sm:$0xf0]  ;;  %7134 = vmatpush.bf16.msrb.mxu0 %v9041_v57  ;;  %v9782_v19 = vld [vmem:[#allocation3 + $0xb04] sm:$0xf]  ;;  %v8452_v44 = vld [vmem:[#allocation3 + $0x3e8] sm:$0xf] }
 0x608   : > { %7175 = vmatpush.bf16.msrb.mxu2 %v9249_v16  ;;  %v9361_v28 = vor.u32 %v9782_v19, %v9358_v22  ;;  %v9698_v36 = vld [vmem:[#allocation3 + $0x864] sm:$0xf]  ;;  %v9214_v23 = vld [vmem:[#allocation3 + $0x9f0] sm:$0xf0]  ;;  %v8308_v29 = vld [vmem:[#allocation3 + $0x2c8] sm:$0xf]  ;;  %v3460_v57 = vpop.permute.xlu1 %3459  ;;  %v8453_v35 = vor.u32 %v9557_v40, %v8452_v44 }
 0x609   : > { %7194 = vmatpush.bf16.msrb.mxu3 %v9377_v60  ;;  %v13859_v53 = vld [vmem:[#allocation27_spill] sm:$0xff]  ;;  %v9025_v16 = vor.u32 %v9698_v36, %v9022_v45  ;;  %v9006_v55 = vld [vmem:[#allocation3 + $0x850] sm:$0xf0]  ;;  %348 = vst [vmem:[#allocation3 + $0x38] sm:$0xff] %v340_v9  ;;  %v9217_v22 = vor.u32 %v9746_v62, %v9214_v23  ;;  %v8309_v15 = vor.u32 %v9521_v18, %v8308_v29  ;;  %v3847_v20 = vrot.slane %v3832_v7, 4  ;;  %v13862_v62 = vld [vmem:[#allocation24_spill] sm:$0xff] }
 0x60a   : > { %7080 = vmatpush.bf16.msra.mxu1 %v8609_v21  ;;  %v13860_v52 = vrot.slane %v13859_v53, 4  ;;  %v9590_v5 = vld [vmem:[#allocation3 + $0x504] sm:$0xf]  ;;  %v9198_v13 = vld [vmem:[#allocation3 + $0x9d0] sm:$0xf0]  ;;  %v3475_v21 = vrot.slane %v3460_v57, 4  ;;  %v3373_v18 = vpop.permute.xlu2 %3372  ;;  %v13049_v57 = vpop.f32.mrf.mxu3  ;;  %vm13927_vm4 = vmmov %vm13922_vm3 }
 0x60b   : > { %v8593_v60 = vor.u32 %v9590_v5, %v8590_v25  ;;  %7135 = vmatpush.bf16.msrb.mxu0 %v9025_v16  ;;  %v9742_v59 = vld [vmem:[#allocation3 + $0x9c4] sm:$0xf]  ;;  %342 = vst [vmem:[#allocation3 + $0x8] sm:$0xff] %v334_v41  ;;  %v13861_v25 = vld [vmem:[#allocation45_spill] sm:$0xff]  ;;  %v9553_v27 = vld [vmem:[#allocation3 + $0x3d4] sm:$0xf0] }
 0x60c   : > { %7176 = vmatpush.bf16.msrb.mxu2 %v9233_v47  ;;  %v4141_v32 = vsel %vm409_vm0, %v13860_v52, %v4126_v31  ;;  %v9694_v0 = vld [vmem:[#allocation3 + $0x844] sm:$0xf]  ;;  %7120 = vmatmul.bf16.vlgmr.msra.gmra.mxu3 %v13861_v25  ;;  %v9517_v34 = vld [vmem:[#allocation3 + $0x2b4] sm:$0xf0]  ;;  %344 = vst [vmem:[#allocation3 + $0x18] sm:$0xff] %v336_v24  ;;  %v13034_v47 = vpop.f32.mrf.mxu1  ;;  %v13863_v19 = vrot.slane %v13862_v62, 4  ;;  %v9201_v23 = vor.u32 %v9742_v59, %v9198_v13 }
 0x60d   : > { %7195 = vmatpush.bf16.msrb.mxu3 %v9361_v28  ;;  %v4142_v8 = vsel %vm4131_vm8, %v13859_v53, %v4141_v32  ;;  %v9009_v45 = vor.u32 %v9694_v0, %v9006_v55  ;;  %v8292_v4 = vld [vmem:[#allocation3 + $0x2a8] sm:$0xf]  ;;  %v13864_v9 = vld [vmem:[#allocation25_spill] sm:$0xff]  ;;  %v3385_v52 = vrot.slane %v3373_v18, 4  ;;  %v9738_v40 = vld [vmem:[#allocation3 + $0x9a4] sm:$0xf] }
 0x60e   : > { %4160 = vst [vmem:[#allocation3 + $0xa68] sm:$0xff] %v4142_v8  ;;  %7081 = vmatpush.bf16.msra.mxu1 %v8593_v60  ;;  %v3490_v31 = vsel %vm409_vm0, %v13863_v19, %v3475_v21  ;;  %v13865_v28 = vrot.slane %v13864_v9, 4  ;;  %v8436_v53 = vld [vmem:[#allocation3 + $0x3c8] sm:$0xf]  ;;  %v8990_v5 = vld [vmem:[#allocation3 + $0x830] sm:$0xf0]  ;;  %v8293_v44 = vor.u32 %v9517_v34, %v8292_v4  ;;  %v13053_v21 = vpop.f32.mrf.mxu2  ;;  %v13056_v34 = vpop.f32.mrf.mxu0 }
 0x60f   : > { %v3491_v36 = vsel %vm3480_vm6, %v13862_v62, %v3490_v31  ;;  %7136 = vmatpush.bf16.msrb.mxu0 %v9009_v45  ;;  %v8437_v16 = vor.u32 %v9553_v27, %v8436_v53  ;;  %v9549_v29 = vld [vmem:[#allocation3 + $0x3b4] sm:$0xf0]  ;;  %v9690_v41 = vld [vmem:[#allocation3 + $0x824] sm:$0xf]  ;;  %v9182_v24 = vld [vmem:[#allocation3 + $0x9b0] sm:$0xf0]  ;;  %v4198_v45 = vpop.permute.xlu0 %4197 }
 0x610   : > { %7245 = vmatpush.bf16.msra.mxu2 %v8325_v54  ;;  %v3862_v54 = vsel %vm409_vm0, %v13865_v28, %v3847_v20  ;;  %3509 = vst [vmem:[#allocation3 + $0x8a8] sm:$0xff] %v3491_v36  ;;  %v13866_v8 = vld [vmem:[#allocation30_spill] sm:$0xff]  ;;  %v8993_v59 = vor.u32 %v9690_v41, %v8990_v5  ;;  %v8420_v13 = vld [vmem:[#allocation3 + $0x3a8] sm:$0xf]  ;;  %v9686_v0 = vld [vmem:[#allocation3 + $0x804] sm:$0xf]  ;;  %v9185_v62 = vor.u32 %v9738_v40, %v9182_v24 }
 0x611   : > { %7264 = vmatpush.bf16.msra.mxu3 %v8453_v35  ;;  %v3863_v32 = vsel %vm3852_vm7, %v13864_v9, %v3862_v54  ;;  %v13867_v60 = vrot.slane %v13866_v8, 4  ;;  %v9513_v7 = vld [vmem:[#allocation3 + $0x294] sm:$0xf0]  ;;  %v3838_v35 = vpop.permute.xlu1 %3837  ;;  %v8974_v20 = vld [vmem:[#allocation3 + $0x810] sm:$0xf0]  ;;  %v8421_v19 = vor.u32 %v9549_v29, %v8420_v13  ;;  %v4216_v18 = vrot.slane %v4198_v45, 4 }
 0x612   : > { %7150 = vmatpush.bf16.msrb.mxu1 %v9217_v22  ;;  %3881 = vst [vmem:[#allocation3 + $0x9a8] sm:$0xff] %v3863_v32  ;;  %v3850_v27 = vrot.slane %v3838_v35, 4  ;;  %v8276_v31 = vld [vmem:[#allocation3 + $0x288] sm:$0xf]  ;;  %v9461_v4 = vld [vmem:[#allocation3 + $0xf4] sm:$0xf0]  ;;  %v8977_v5 = vor.u32 %v9686_v0, %v8974_v20  ;;  %v4099_v40 = vpop.permute.xlu2 %4098 }
 0x613   : > { %v3401_v55 = vsel %vm409_vm0, %v13867_v60, %v3385_v52  ;;  %7137 = vmatpush.bf16.msrb.mxu0 %v8993_v59  ;;  %v13869_v9 = vld [vmem:[#allocation46_spill] sm:$0xff]  ;;  %v8277_v28 = vor.u32 %v9513_v7, %v8276_v31  ;;  %v9734_v54 = vld [vmem:[#allocation3 + $0x984] sm:$0xf]  ;;  %v9166_v36 = vld [vmem:[#allocation3 + $0x990] sm:$0xf0] }
 0x614   : > { %7246 = vmatpush.bf16.msra.mxu2 %v8309_v15  ;;  %v3402_v22 = vsel %vm3387_vm9, %v13866_v8, %v3401_v55  ;;  %v13868_v15 = vld [vmem:[#allocation50_spill] sm:$0xff]  ;;  %7082 = vmatmul.bf16.vlgmr.msra.gmra.mxu1 %v13869_v9  ;;  %v13872_v29 = vld [vmem:[#allocation28_spill] sm:$0xff]  ;;  %v13069_v7 = vpop.f32.mrf.mxu1  ;;  %v9169_v35 = vor.u32 %v9734_v54, %v9166_v36 }
 0x615   : > { %7265 = vmatpush.bf16.msra.mxu3 %v8437_v16  ;;  %3418 = vst [vmem:[#allocation3 + $0x878] sm:$0xff] %v3402_v22  ;;  %7068 = vmatmul.bf16.gmra.mxu0 %v13868_v15  ;;  %v13870_v53 = vld [vmem:[#allocation26_spill] sm:$0xff]  ;;  %v8068_v16 = vld [vmem:[#allocation3 + $0xe8] sm:$0xf]  ;;  %v13873_v8 = vrot.slane %v13872_v29, 4  ;;  %v4120_v22 = vrot.slane %v4099_v40, 4 }
 0x616   : > { %7151 = vmatpush.bf16.msrb.mxu1 %v9201_v23  ;;  %v9545_v23 = vld [vmem:[#allocation3 + $0x394] sm:$0xf0]  ;;  %v13871_v52 = vrot.slane %v13870_v53, 4  ;;  %v8404_v41 = vld [vmem:[#allocation3 + $0x388] sm:$0xf]  ;;  %v8069_v24 = vor.u32 %v9461_v4, %v8068_v16 }
 0x617   : > { %v4230_v60 = vsel %vm409_vm0, %v13873_v8, %v4216_v18  ;;  %v9457_v13 = vld [vmem:[#allocation3 + $0xd4] sm:$0xf0]  ;;  %7138 = vmatpush.bf16.msrb.mxu0 %v8977_v5  ;;  %v8405_v0 = vor.u32 %v9545_v23, %v8404_v41  ;;  %v8260_v20 = vld [vmem:[#allocation3 + $0x268] sm:$0xf]  ;;  %v9730_v18 = vld [vmem:[#allocation3 + $0x964] sm:$0xf]  ;;  %v3820_v5 = vpop.permute.xlu0 %3819  ;;  %v13077_v8 = vpop.f32.mrf.mxu2 }
 0x618   : > { %7247 = vmatpush.bf16.msra.mxu2 %v8293_v44  ;;  %v3866_v32 = vsel %vm409_vm0, %v13871_v52, %v3850_v27  ;;  %v9509_v44 = vld [vmem:[#allocation3 + $0x274] sm:$0xf0]  ;;  %v4231_v59 = vsel %vm4224_vm5, %v13872_v29, %v4230_v60  ;;  %v8052_v54 = vld [vmem:[#allocation3 + $0xc8] sm:$0xf]  ;;  %v13079_v41 = vpop.f32.mrf.mxu3  ;;  %vm13932_vm5 = vmmov %vm13922_vm3 }
 0x619   : > { %7266 = vmatpush.bf16.msra.mxu3 %v8421_v19  ;;  %v3867_v55 = vsel %vm3852_vm7, %v13870_v53, %v3866_v32  ;;  %v9541_v45 = vld [vmem:[#allocation3 + $0x374] sm:$0xf0]  ;;  %v13875_v19 = vld [vmem:[#allocation33_spill] sm:$0xff]  ;;  %4251 = vst [vmem:[#allocation3 + $0xa98] sm:$0xff] %v4231_v59  ;;  %v3448_v23 = vpop.permute.xlu1 %3447  ;;  %v8388_v52 = vld [vmem:[#allocation3 + $0x368] sm:$0xf]  ;;  %v8053_v32 = vor.u32 %v9457_v13, %v8052_v54 }
 0x61a   : > { %7152 = vmatpush.bf16.msrb.mxu1 %v9185_v62  ;;  %3883 = vst [vmem:[#allocation3 + $0x9b8] sm:$0xff] %v3867_v55  ;;  %v13874_v27 = vld [vmem:[#allocation62_spill] sm:$0xff]  ;;  %v8261_v62 = vor.u32 %v9509_v44, %v8260_v20  ;;  %v13876_v31 = vrot.slane %v13875_v19, 4  ;;  %v3469_v16 = vrot.slane %v3448_v23, 4  ;;  %v8389_v40 = vor.u32 %v9541_v45, %v8388_v52  ;;  %v8244_v29 = vld [vmem:[#allocation3 + $0x248] sm:$0xf] }
 0x61b   : > { %7177 = vmatmul.bf16.vlgmr.msrb.gmra.mxu2 %v13874_v27  ;;  %7207 = vmatpush.bf16.msra.mxu0 %v8069_v24  ;;  %v9505_v36 = vld [vmem:[#allocation3 + $0x254] sm:$0xf0]  ;;  %v3841_v55 = vrot.slane %v3820_v5, 4  ;;  %v13877_v24 = vld [vmem:[#allocation51_spill] sm:$0xff]  ;;  %v13878_v20 = vld [vmem:[#allocation29_spill] sm:$0xff] }
 0x61c   : > { %7248 = vmatpush.bf16.msra.mxu2 %v8277_v28  ;;  %v4133_v4 = vsel %vm409_vm0, %v13876_v31, %v4120_v22  ;;  %v9150_v28 = vld [vmem:[#allocation3 + $0x970] sm:$0xf0]  ;;  %v9453_v60 = vld [vmem:[#allocation3 + $0xb4] sm:$0xf0]  ;;  %7125 = vmatmul.bf16.gmra.mxu3 %v13877_v24  ;;  %v8245_v22 = vor.u32 %v9505_v36, %v8244_v29  ;;  %v9726_v59 = vld [vmem:[#allocation3 + $0x944] sm:$0xf] }
 0x61d   : > { %7267 = vmatpush.bf16.msra.mxu3 %v8405_v0  ;;  %v4134_v53 = vsel %vm4131_vm8, %v13875_v19, %v4133_v4  ;;  %v9153_v44 = vor.u32 %v9730_v18, %v9150_v28  ;;  %v9537_v0 = vld [vmem:[#allocation3 + $0x354] sm:$0xf0]  ;;  %v13879_v13 = vrot.slane %v13878_v20, 4  ;;  %v13085_v19 = vpop.f32.mrf.mxu0  ;;  %v8036_v45 = vld [vmem:[#allocation3 + $0xa8] sm:$0xf]  ;;  %v3361_v4 = vpop.permute.xlu2 %3360  ;;  %v13880_v18 = vld [vmem:[#allocation31_spill] sm:$0xff] }
 0x61e   : > { %7153 = vmatpush.bf16.msrb.mxu1 %v9169_v35  ;;  %4156 = vst [vmem:[#allocation3 + $0xa48] sm:$0xff] %v4134_v53  ;;  %v9134_v35 = vld [vmem:[#allocation3 + $0x950] sm:$0xf0]  ;;  %v9501_v31 = vld [vmem:[#allocation3 + $0x234] sm:$0xf0]  ;;  %v13881_v28 = vrot.slane %v13880_v18, 4  ;;  %v8037_v23 = vor.u32 %v9453_v60, %v8036_v45 }
 0x61f   : > { %7208 = vmatpush.bf16.msra.mxu0 %v8053_v32  ;;  %v8372_v36 = vld [vmem:[#allocation3 + $0x348] sm:$0xf]  ;;  %v3379_v52 = vrot.slane %v3361_v4, 4  ;;  %v9137_v5 = vor.u32 %v9726_v59, %v9134_v35  ;;  %v9722_v4 = vld [vmem:[#allocation3 + $0x924] sm:$0xf] }
 0x620   : > { %7249 = vmatpush.bf16.msra.mxu2 %v8261_v62  ;;  %v3482_v62 = vsel %vm409_vm0, %v13879_v13, %v3469_v16  ;;  %v3854_v53 = vsel %vm409_vm0, %v13881_v28, %v3841_v55  ;;  %v8373_v16 = vor.u32 %v9537_v0, %v8372_v36  ;;  %v13882_v13 = vld [vmem:[#allocation36_spill] sm:$0xff]  ;;  %v9497_v0 = vld [vmem:[#allocation3 + $0x214] sm:$0xf0]  ;;  %v4117_v28 = vpop.permute.xlu0 %4116 }
 0x621   : > { %7268 = vmatpush.bf16.msra.mxu3 %v8389_v40  ;;  %v3483_v54 = vsel %vm3480_vm6, %v13878_v20, %v3482_v62  ;;  %v3855_v32 = vsel %vm3852_vm7, %v13880_v18, %v3854_v53  ;;  %v9449_v40 = vld [vmem:[#allocation3 + $0x94] sm:$0xf0]  ;;  %v13883_v24 = vrot.slane %v13882_v13, 4  ;;  %v9118_v20 = vld [vmem:[#allocation3 + $0x930] sm:$0xf0]  ;;  %v13097_v62 = vpop.f32.mrf.mxu1  ;;  %v3826_v45 = vpop.permute.xlu1 %3825  ;;  %vm13943_vm6 = vmmov %vm13922_vm3 }
 0x622   : > { %7154 = vmatpush.bf16.msrb.mxu1 %v9153_v44  ;;  %3505 = vst [vmem:[#allocation3 + $0x888] sm:$0xff] %v3483_v54  ;;  %v8228_v44 = vld [vmem:[#allocation3 + $0x228] sm:$0xf]  ;;  %v9653_v18 = vld [vmem:[#allocation3 + $0x6f4] sm:$0xf0]  ;;  %v3844_v53 = vrot.slane %v3826_v45, 4  ;;  %v9121_v54 = vor.u32 %v9722_v4, %v9118_v20 }
 0x623   : > { %7209 = vmatpush.bf16.msra.mxu0 %v8037_v23  ;;  %v8229_v29 = vor.u32 %v9501_v31, %v8228_v44  ;;  %v3393_v55 = vsel %vm409_vm0, %v13883_v24, %v3379_v52  ;;  %3877 = vst [vmem:[#allocation3 + $0x988] sm:$0xff] %v3855_v32  ;;  %v8356_v59 = vld [vmem:[#allocation3 + $0x328] sm:$0xf]  ;;  %v13884_v31 = vld [vmem:[#allocation63_spill] sm:$0xff]  ;;  %v9445_v52 = vld [vmem:[#allocation3 + $0x74] sm:$0xf0] }
 0x624   : > { %7250 = vmatpush.bf16.msra.mxu2 %v8245_v22  ;;  %v9533_v22 = vld [vmem:[#allocation3 + $0x334] sm:$0xf0]  ;;  %v3394_v60 = vsel %vm3387_vm9, %v13882_v13, %v3393_v55  ;;  %v8020_v35 = vld [vmem:[#allocation3 + $0x88] sm:$0xf]  ;;  %v4129_v32 = vrot.slane %v4117_v28, 4 }
 0x625   : > { %7269 = vmatpush.bf16.msra.mxu3 %v8373_v16  ;;  %3414 = vst [vmem:[#allocation3 + $0x858] sm:$0xff] %v3394_v60  ;;  %7139 = vmatmul.bf16.vlgmr.msrb.gmra.mxu0 %v13884_v31  ;;  %v8021_v24 = vor.u32 %v9449_v40, %v8020_v35  ;;  %v8357_v36 = vor.u32 %v9533_v22, %v8356_v59  ;;  %v8212_v23 = vld [vmem:[#allocation3 + $0x208] sm:$0xf]  ;;  %v9529_v13 = vld [vmem:[#allocation3 + $0x314] sm:$0xf0]  ;;  %v13106_v35 = vpop.f32.mrf.mxu2  ;;  %v4018_v45 = vpop.permute.xlu2 %4017 }
 0x626   : > { %7155 = vmatpush.bf16.msrb.mxu1 %v9137_v5  ;;  %v13885_v5 = vld [vmem:[#allocation52_spill] sm:$0xff]  ;;  %v8213_v16 = vor.u32 %v9497_v0, %v8212_v23  ;;  %v9493_v59 = vld [vmem:[#allocation3 + $0x1f4] sm:$0xf0]  ;;  %v9718_v23 = vld [vmem:[#allocation3 + $0x904] sm:$0xf] }
 0x627   : > { %7087 = vmatmul.bf16.gmra.mxu1 %v13885_v5  ;;  %7210 = vmatpush.bf16.msra.mxu0 %v8021_v24  ;;  %v8836_v44 = vld [vmem:[#allocation3 + $0x6e8] sm:$0xf]  ;;  %v13888_v4 = vld [vmem:[#allocation34_spill] sm:$0xff] }
 0x628   : > { %7251 = vmatpush.bf16.msra.mxu2 %v8229_v29  ;;  %v9102_v29 = vld [vmem:[#allocation3 + $0x910] sm:$0xf0]  ;;  %v13886_v55 = vld [vmem:[#allocation32_spill] sm:$0xff]  ;;  %v8837_v40 = vor.u32 %v9653_v18, %v8836_v44  ;;  %v13889_v28 = vrot.slane %v13888_v4, 4  ;;  %v13117_v44 = vpop.f32.mrf.mxu0  ;;  %v9441_v9 = vld [vmem:[#allocation3 + $0x54] sm:$0xf0] }
 0x629   : > { %v13887_v60 = vrot.slane %v13886_v55, 4  ;;  %7270 = vmatpush.bf16.msra.mxu3 %v8357_v36  ;;  %v8340_v20 = vld [vmem:[#allocation3 + $0x308] sm:$0xf]  ;;  %v13115_v36 = vpop.f32.mrf.mxu3  ;;  %v9485_v15 = vld [vmem:[#allocation3 + $0x1b4] sm:$0xf0] }
 0x62a   : > { %7156 = vmatpush.bf16.msrb.mxu1 %v9121_v54  ;;  %v8004_v22 = vld [vmem:[#allocation3 + $0x68] sm:$0xf]  ;;  %v4145_v0 = vsel %vm409_vm0, %v13889_v28, %v4129_v32  ;;  %v9649_v54 = vld [vmem:[#allocation3 + $0x6d4] sm:$0xf0]  ;;  %v8341_v27 = vor.u32 %v9529_v13, %v8340_v20 }
 0x62b   : > { %v3858_v31 = vsel %vm409_vm0, %v13887_v60, %v3844_v53  ;;  %v8005_v5 = vor.u32 %v9445_v52, %v8004_v22  ;;  %v4033_v53 = vrot.slane %v4018_v45, 4  ;;  %v4146_v18 = vsel %vm4131_vm8, %v13888_v4, %v4145_v0  ;;  %v8196_v32 = vld [vmem:[#allocation3 + $0x1e8] sm:$0xf]  ;;  %v9685_v45 = vld [vmem:[#allocation3 + $0x7f4] sm:$0xf0] }
 0x62c   : > { %v3859_v24 = vsel %vm3852_vm7, %v13886_v55, %v3858_v31  ;;  %7252 = vmatpush.bf16.msra.mxu2 %v8213_v16  ;;  %v9105_v60 = vor.u32 %v9718_v23, %v9102_v29  ;;  %v7988_v28 = vld [vmem:[#allocation3 + $0x48] sm:$0xf]  ;;  %v8197_v31 = vor.u32 %v9493_v59, %v8196_v32  ;;  %v13890_v16 = vld [vmem:[#allocation39_spill] sm:$0xff]  ;;  %4162 = vst [vmem:[#allocation3 + $0xa78] sm:$0xff] %v4146_v18  ;;  %v13892_v4 = vld [vmem:[#allocation66_spill] sm:$0xff]  ;;  %v13125_v18 = vpop.f32.mrf.mxu1 }
 0x62d   : > { %3879 = vst [vmem:[#allocation3 + $0x998] sm:$0xff] %v3859_v24  ;;  %7211 = vmatpush.bf16.msra.mxu0 %v8005_v5  ;;  %v13891_v52 = vrot.slane %v13890_v16, 4  ;;  %v8820_v22 = vld [vmem:[#allocation3 + $0x6c8] sm:$0xf]  ;;  %7182 = vmatmul.bf16.gmra.mxu2 %v13892_v4  ;;  %v9437_v0 = vld [vmem:[#allocation3 + $0x34] sm:$0xf0]  ;;  %v3367_v5 = vpop.permute.xlu1 %3366  ;;  %v7989_v24 = vor.u32 %v9441_v9, %v7988_v28 }
 0x62e   : > { %7157 = vmatpush.bf16.msrb.mxu1 %v9105_v60  ;;  %7271 = vmatpush.bf16.msra.mxu3 %v8341_v27  ;;  %v8821_v13 = vor.u32 %v9649_v54, %v8820_v22  ;;  %v7972_v20 = vld [vmem:[#allocation3 + $0x28] sm:$0xf]  ;;  %v9645_v23 = vld [vmem:[#allocation3 + $0x6b4] sm:$0xf0]  ;;  %v3382_v32 = vrot.slane %v3367_v5, 4  ;;  %v13893_v4 = vld [vmem:[#allocation67_spill] sm:$0xff]  ;;  %v3280_v5 = vpop.permute.xlu2 %3279 }
 0x62f   : > { %v4048_v55 = vsel %vm409_vm0, %v13891_v52, %v4033_v53  ;;  %v8964_v59 = vld [vmem:[#allocation3 + $0x7e8] sm:$0xf]  ;;  %v3739_v53 = vpop.permute.xlu0 %3738  ;;  %9388 = vmatmul.msk.bf16.vlgmr.msrb.gmra.mxu3 %vm6744_vm13, %v13893_v4  ;;  %v13894_v22 = vld [vmem:[#allocation35_spill] sm:$0xff]  ;;  %v9433_v25 = vld [vmem:[#allocation3 + $0x14] sm:$0xf0] }
 0x630   : > { %7321 = vmatpush.bf16.msrb.mxu2 %v8837_v40  ;;  %v4049_v29 = vsel %vm4038_vm11, %v13890_v16, %v4048_v55  ;;  %v9489_v40 = vld [vmem:[#allocation3 + $0x1d4] sm:$0xf0]  ;;  %v8965_v60 = vor.u32 %v9685_v45, %v8964_v59  ;;  %v8180_v27 = vld [vmem:[#allocation3 + $0x1c8] sm:$0xf]  ;;  %v3754_v52 = vrot.slane %v3739_v53, 4  ;;  %v7973_v55 = vor.u32 %v9437_v0, %v7972_v20 }
 0x631   : > { %4067 = vst [vmem:[#allocation3 + $0xa28] sm:$0xff] %v4049_v29  ;;  %7212 = vmatpush.bf16.msra.mxu0 %v7989_v24  ;;  %v8181_v54 = vor.u32 %v9489_v40, %v8180_v27  ;;  %v8804_v16 = vld [vmem:[#allocation3 + $0x6a8] sm:$0xf]  ;;  %v13895_v29 = vrot.slane %v13894_v22, 4  ;;  %v3292_v20 = vrot.slane %v3280_v5, 4  ;;  %v13144_v4 = vpop.f32.mrf.mxu3 }
 0x632   : > { %7226 = vmatpush.bf16.msra.mxu1 %v8197_v31  ;;  %v9681_v31 = vld [vmem:[#allocation3 + $0x7d4] sm:$0xf0]  ;;  %7340 = vmatpush.bf16.msrb.mxu3 %v8965_v60  ;;  %v8805_v28 = vor.u32 %v9645_v23, %v8804_v16  ;;  %v7956_v53 = vld [vmem:[#allocation3 + $0x8] sm:$0xf]  ;;  %v13139_v23 = vpop.f32.mrf.mxu2 }
 0x633   : > { %v3397_v9 = vsel %vm409_vm0, %v13895_v29, %v3382_v32  ;;  %v8948_v24 = vld [vmem:[#allocation3 + $0x7c8] sm:$0xf]  ;;  %v9641_v0 = vld [vmem:[#allocation3 + $0x694] sm:$0xf0]  ;;  %v7957_v5 = vor.u32 %v9433_v25, %v7956_v53 }
 0x634   : > { %7322 = vmatpush.bf16.msrb.mxu2 %v8821_v13  ;;  %v13896_v13 = vld [vmem:[#allocation37_spill] sm:$0xff]  ;;  %v3398_v40 = vsel %vm3387_vm9, %v13894_v22, %v3397_v9  ;;  %v8949_v60 = vor.u32 %v9681_v31, %v8948_v24  ;;  %v8164_v27 = vld [vmem:[#allocation3 + $0x1a8] sm:$0xf]  ;;  %v9589_v16 = vld [vmem:[#allocation3 + $0x4f4] sm:$0xf0] }
 0x635   : > { %v13897_v45 = vrot.slane %v13896_v13, 4  ;;  %3416 = vst [vmem:[#allocation3 + $0x868] sm:$0xff] %v3398_v40  ;;  %7213 = vmatpush.bf16.msra.mxu0 %v7973_v55  ;;  %v13899_v29 = vld [vmem:[#allocation42_spill] sm:$0xff]  ;;  %v8932_v9 = vld [vmem:[#allocation3 + $0x7a8] sm:$0xf] }
 0x636   : > { %7227 = vmatpush.bf16.msra.mxu1 %v8181_v54  ;;  %v8788_v54 = vld [vmem:[#allocation3 + $0x688] sm:$0xf]  ;;  %7341 = vmatpush.bf16.msrb.mxu3 %v8949_v60  ;;  %v9677_v40 = vld [vmem:[#allocation3 + $0x7b4] sm:$0xf0] }
 0x637   : > { %v3769_v59 = vsel %vm409_vm0, %v13897_v45, %v3754_v52  ;;  %v8165_v52 = vor.u32 %v9485_v15, %v8164_v27  ;;  %v13900_v45 = vrot.slane %v13899_v29, 4  ;;  %v8580_v55 = vld [vmem:[#allocation3 + $0x4e8] sm:$0xf]  ;;  %v3745_v15 = vpop.permute.xlu1 %3744  ;;  %7144 = vmatmul.bf16.gmra.mxu0 %v12848_v50  ;;  %v9637_v24 = vld [vmem:[#allocation3 + $0x674] sm:$0xf0]  ;;  %v8933_v53 = vor.u32 %v9677_v40, %v8932_v9  ;;  %7158 = vmatmul.bf16.vlgmr.msrb.gmra.mxu1 %v12868_v49 }
 0x638   : > { %v3770_v32 = vsel %vm13898_vm14, %v13896_v13, %v3769_v59  ;;  %7323 = vmatpush.bf16.msrb.mxu2 %v8805_v28  ;;  %v13146_v13 = vpop.f32.mrf.mxu0  ;;  %v8789_v28 = vor.u32 %v9641_v0, %v8788_v54  ;;  %v9481_v59 = vld [vmem:[#allocation3 + $0x194] sm:$0xf0]  ;;  %v3757_v25 = vrot.slane %v3745_v15, 4  ;;  %v8581_v27 = vor.u32 %v9589_v16, %v8580_v55  ;;  %v3646_v15 = vpop.permute.xlu2 %3645  ;;  %v13903_v16 = vld [vmem:[#allocation40_spill] sm:$0xff] }
 0x639   : > { %v3308_v22 = vsel %vm409_vm0, %v13900_v45, %v3292_v20  ;;  %3788 = vst [vmem:[#allocation3 + $0x968] sm:$0xff] %v3770_v32  ;;  %v4105_v20 = vpop.permute.xlu0 %4104  ;;  %v8148_v32 = vld [vmem:[#allocation3 + $0x188] sm:$0xf]  ;;  %7214 = vmatpush.bf16.msra.mxu0 %v7957_v5  ;;  %v9673_v45 = vld [vmem:[#allocation3 + $0x794] sm:$0xf0]  ;;  %v13904_v55 = vrot.slane %v13903_v16, 4 }
 0x63a   : > { %v3309_v31 = vsel %vm3294_vm12, %v13899_v29, %v3308_v22  ;;  %7228 = vmatpush.bf16.msra.mxu1 %v8165_v52  ;;  %v4123_v60 = vrot.slane %v4105_v20, 4  ;;  %v8149_v0 = vor.u32 %v9481_v59, %v8148_v32  ;;  %v8772_v29 = vld [vmem:[#allocation3 + $0x668] sm:$0xf]  ;;  %v9585_v52 = vld [vmem:[#allocation3 + $0x4d4] sm:$0xf0]  ;;  %v13152_v22 = vpop.f32.mrf.mxu1  ;;  %7342 = vmatpush.bf16.msrb.mxu3 %v8933_v53  ;;  %v6780_v59 = vadd.f32 %v13008_v43, %v12940_v42  ;;  %v13906_v42 = vld [vmem:[#allocation47_spill] sm:$0xff] }
 0x63b   : > { %3325 = vst [vmem:[#allocation3 + $0x838] sm:$0xff] %v3309_v31  ;;  %v13901_v54 = vld [vmem:[#allocation38_spill] sm:$0xff]  ;;  %v8564_v5 = vld [vmem:[#allocation3 + $0x4c8] sm:$0xf]  ;;  %v3661_v49 = vrot.slane %v3646_v15, 4  ;;  %v13907_v43 = vrot.slane %v13906_v42, 4 }
 0x63c   : > { %7324 = vmatpush.bf16.msrb.mxu2 %v8789_v28  ;;  %v13902_v31 = vrot.slane %v13901_v54, 4  ;;  %v8773_v28 = vor.u32 %v9637_v24, %v8772_v29  ;;  %v9477_v9 = vld [vmem:[#allocation3 + $0x174] sm:$0xf0]  ;;  %v4137_v40 = vsel %vm409_vm0, %v13904_v55, %v4123_v60  ;;  %v8916_v32 = vld [vmem:[#allocation3 + $0x788] sm:$0xf]  ;;  %v8565_v29 = vor.u32 %v9585_v52, %v8564_v5 }
 0x63d   : > { %7283 = vmatpush.bf16.msrb.mxu0 %v8581_v27  ;;  %v4138_v24 = vsel %vm4131_vm8, %v13903_v16, %v4137_v40  ;;  %v8917_v53 = vor.u32 %v9673_v45, %v8916_v32  ;;  %v8132_v27 = vld [vmem:[#allocation3 + $0x168] sm:$0xf]  ;;  %v9581_v60 = vld [vmem:[#allocation3 + $0x4b4] sm:$0xf0]  ;;  %7253 = vmatmul.bf16.vlgmr.msra.gmra.mxu2 %v12127_v56  ;;  %v6799_v16 = vadd.f32 %v12938_v58, %v6780_v59 }
 0x63e   : > { %v3773_v50 = vsel %vm409_vm0, %v13902_v31, %v3757_v25  ;;  %7229 = vmatpush.bf16.msra.mxu1 %v8149_v0  ;;  %v9633_v25 = vld [vmem:[#allocation3 + $0x654] sm:$0xf0]  ;;  %v13166_v31 = vpop.f32.mrf.mxu2  ;;  %v8133_v55 = vor.u32 %v9477_v9, %v8132_v27  ;;  %v8756_v0 = vld [vmem:[#allocation3 + $0x648] sm:$0xf]  ;;  %4158 = vst [vmem:[#allocation3 + $0xa58] sm:$0xff] %v4138_v24  ;;  %v6782_v59 = vadd.f32 %v13034_v47, %v12972_v26  ;;  %v13910_v47 = vld [vmem:[#allocation43_spill] sm:$0xff] }
 0x63f   : > { %v3774_v20 = vsel %vm13905_vm15, %v13901_v54, %v3773_v50  ;;  %v3676_v50 = vsel %vm409_vm0, %v13907_v43, %v3661_v49  ;;  %v9669_v54 = vld [vmem:[#allocation3 + $0x774] sm:$0xf0]  ;;  %7343 = vmatpush.bf16.msrb.mxu3 %v8917_v53  ;;  %v8757_v45 = vor.u32 %v9633_v25, %v8756_v0  ;;  %v8548_v15 = vld [vmem:[#allocation3 + $0x4a8] sm:$0xf]  ;;  %v3355_v9 = vpop.permute.xlu1 %3354  ;;  %v13177_v25 = vpop.f32.mrf.mxu3 }
 0x640   : > { %3790 = vst [vmem:[#allocation3 + $0x978] sm:$0xff] %v3774_v20  ;;  %7325 = vmatpush.bf16.msrb.mxu2 %v8773_v28  ;;  %v3677_v28 = vsel %vm3666_vm10, %v13906_v42, %v3676_v50  ;;  %v9473_v52 = vld [vmem:[#allocation3 + $0x154] sm:$0xf0]  ;;  %v8900_v40 = vld [vmem:[#allocation3 + $0x768] sm:$0xf]  ;;  %v13175_v5 = vpop.f32.mrf.mxu0  ;;  %v3376_v20 = vrot.slane %v3355_v9, 4  ;;  %v8549_v53 = vor.u32 %v9581_v60, %v8548_v15  ;;  %9389 = vmatmul.msk.bf16.gmra.mxu3 %vm6744_vm13, %v12890_v11  ;;  %v4012_v15 = vpop.permute.xlu2 %4011 }
 0x641   : > { %7284 = vmatpush.bf16.msrb.mxu0 %v8565_v29  ;;  %3695 = vst [vmem:[#allocation3 + $0x928] sm:$0xff] %v3677_v28  ;;  %v9629_v49 = vld [vmem:[#allocation3 + $0x634] sm:$0xf0]  ;;  %v8901_v32 = vor.u32 %v9669_v54, %v8900_v40  ;;  %v8116_v24 = vld [vmem:[#allocation3 + $0x148] sm:$0xf]  ;;  %v3727_v27 = vpop.permute.xlu0 %3726  ;;  %v6818_v9 = vadd.f32 %v12985_v1, %v6799_v16  ;;  %v13911_v11 = vrot.slane %v13910_v47, 4 }
 0x642   : > { %7230 = vmatpush.bf16.msra.mxu1 %v8133_v55  ;;  %v9577_v42 = vld [vmem:[#allocation3 + $0x494] sm:$0xf0]  ;;  %v8117_v29 = vor.u32 %v9473_v52, %v8116_v24  ;;  %v8740_v43 = vld [vmem:[#allocation3 + $0x628] sm:$0xf]  ;;  %v3748_v58 = vrot.slane %v3727_v27, 4  ;;  %v13908_v55 = vld [vmem:[#allocation41_spill] sm:$0xff] }
 0x643   : > { %v9665_v50 = vld [vmem:[#allocation3 + $0x754] sm:$0xf0]  ;;  %v13909_v0 = vrot.slane %v13908_v55, 4  ;;  %7344 = vmatpush.bf16.msrb.mxu3 %v8901_v32  ;;  %v8741_v60 = vor.u32 %v9629_v49, %v8740_v43  ;;  %v8100_v28 = vld [vmem:[#allocation3 + $0x128] sm:$0xf]  ;;  %v4030_v27 = vrot.slane %v4012_v15, 4  ;;  %v13192_v32 = vpop.f32.mrf.mxu1 }
 0x644   : > { %7326 = vmatpush.bf16.msrb.mxu2 %v8757_v45  ;;  %v9469_v45 = vld [vmem:[#allocation3 + $0x134] sm:$0xf0]  ;;  %v8532_v52 = vld [vmem:[#allocation3 + $0x488] sm:$0xf] }
 0x645   : > { %v3389_v54 = vsel %vm409_vm0, %v13909_v0, %v3376_v20  ;;  %7285 = vmatpush.bf16.msrb.mxu0 %v8549_v53  ;;  %v8884_v24 = vld [vmem:[#allocation3 + $0x748] sm:$0xf]  ;;  %v9625_v26 = vld [vmem:[#allocation3 + $0x614] sm:$0xf0]  ;;  %v3761_v20 = vsel %vm409_vm0, %v13911_v11, %v3748_v58  ;;  %v8533_v1 = vor.u32 %v9577_v42, %v8532_v52  ;;  %v13913_v0 = vld [vmem:[#allocation53_spill] sm:$0xff]  ;;  %v6801_v58 = vadd.f32 %v12962_v17, %v6782_v59 }
 0x646   : > { %v3390_v40 = vsel %vm3387_vm9, %v13908_v55, %v3389_v54  ;;  %7231 = vmatpush.bf16.msra.mxu1 %v8117_v29  ;;  %v8885_v49 = vor.u32 %v9665_v50, %v8884_v24  ;;  %v3762_v53 = vsel %vm13912_vm1, %v13910_v47, %v3761_v20  ;;  %v9781_v16 = vld [vmem:[#allocation3 + $0xaf4] sm:$0xf0]  ;;  %v13196_v55 = vpop.f32.mrf.mxu2  ;;  %v8101_v29 = vor.u32 %v9469_v45, %v8100_v28  ;;  %v8724_v56 = vld [vmem:[#allocation3 + $0x608] sm:$0xf] }
 0x647   : > { %3412 = vst [vmem:[#allocation3 + $0x848] sm:$0xff] %v3390_v40  ;;  %v9573_v43 = vld [vmem:[#allocation3 + $0x474] sm:$0xf0]  ;;  %v13914_v54 = vrot.slane %v13913_v0, 4  ;;  %v9348_v42 = vld [vmem:[#allocation3 + $0xae8] sm:$0xf]  ;;  %v6837_v28 = vadd.f32 %v13056_v34, %v6818_v9  ;;  %v3733_v45 = vpop.permute.xlu1 %3732  ;;  %7215 = vmatmul.bf16.vlgmr.msra.gmra.mxu0 %v12156_v12  ;;  %7163 = vmatmul.bf16.gmra.mxu1 %v12913_v63 }
 0x648   : > { %7327 = vmatpush.bf16.msrb.mxu2 %v8741_v60  ;;  %3784 = vst [vmem:[#allocation3 + $0x948] sm:$0xff] %v3762_v53  ;;  %v9661_v11 = vld [vmem:[#allocation3 + $0x734] sm:$0xf0]  ;;  %7345 = vmatpush.bf16.msrb.mxu3 %v8885_v49  ;;  %v8725_v60 = vor.u32 %v9625_v26, %v8724_v56  ;;  %v8084_v52 = vld [vmem:[#allocation3 + $0x108] sm:$0xf]  ;;  %v13206_v59 = vpop.f32.mrf.mxu0  ;;  %v3751_v20 = vrot.slane %v3733_v45, 4  ;;  %v13216_v45 = vpop.f32.mrf.mxu3 }
 0x649   : > { %v4044_v15 = vsel %vm409_vm0, %v13914_v54, %v4030_v27  ;;  %7286 = vmatpush.bf16.msrb.mxu0 %v8533_v1  ;;  %v9465_v40 = vld [vmem:[#allocation3 + $0x114] sm:$0xf0]  ;;  %v9349_v27 = vor.u32 %v9781_v16, %v9348_v42  ;;  %v8868_v47 = vld [vmem:[#allocation3 + $0x728] sm:$0xf]  ;;  %v4024_v1 = vpop.permute.xlu0 %4023  ;;  %v6820_v54 = vadd.f32 %v13022_v6, %v6801_v58  ;;  %v6856_v42 = vadd.f32 %v13125_v18, %v6837_v28 }
 0x64a   : > { %v4045_v50 = vsel %vm4038_vm11, %v13913_v0, %v4044_v15  ;;  %v9621_v24 = vld [vmem:[#allocation3 + $0x5f4] sm:$0xf0]  ;;  %7232 = vmatpush.bf16.msra.mxu1 %v8101_v29  ;;  %v8516_v17 = vld [vmem:[#allocation3 + $0x468] sm:$0xf]  ;;  %v8869_v56 = vor.u32 %v9661_v11, %v8868_v47  ;;  %v8085_v34 = vor.u32 %v9465_v40, %v8084_v52  ;;  %v4036_v16 = vrot.slane %v4024_v1, 4 }
 0x64b   : > { %4065 = vst [vmem:[#allocation3 + $0xa18] sm:$0xff] %v4045_v50  ;;  %v8517_v26 = vor.u32 %v9573_v43, %v8516_v17  ;;  %v8708_v49 = vld [vmem:[#allocation3 + $0x5e8] sm:$0xf]  ;;  %v9777_v53 = vld [vmem:[#allocation3 + $0xad4] sm:$0xf0]  ;;  %v6785_v15 = vadd.f32 %v13069_v7, %v13000_v14  ;;  %v4378_v17 = vpop.permute.xlu2 %4377 }
 0x64c   : > { %7328 = vmatpush.bf16.msrb.mxu2 %v8725_v60  ;;  %v8709_v9 = vor.u32 %v9621_v24, %v8708_v49  ;;  %v9657_v29 = vld [vmem:[#allocation3 + $0x714] sm:$0xf0]  ;;  %v13915_v50 = vld [vmem:[#allocation44_spill] sm:$0xff]  ;;  %7346 = vmatpush.bf16.msrb.mxu3 %v8869_v56 }
 0x64d   : > { %v9569_v0 = vld [vmem:[#allocation3 + $0x454] sm:$0xf0]  ;;  %v13916_v60 = vrot.slane %v13915_v50, 4  ;;  %7287 = vmatpush.bf16.msrb.mxu0 %v8517_v26  ;;  %v9332_v11 = vld [vmem:[#allocation3 + $0xac8] sm:$0xf]  ;;  %v4399_v26 = vrot.slane %v4378_v17, 4  ;;  %v6804_v1 = vadd.f32 %v12994_v61, %v6785_v15  ;;  %7258 = vmatmul.bf16.gmra.mxu2 %v12588_v38 }
 0x64e   : > { %7233 = vmatpush.bf16.msra.mxu1 %v8085_v34  ;;  %v9333_v40 = vor.u32 %v9777_v53, %v9332_v11  ;;  %v8852_v6 = vld [vmem:[#allocation3 + $0x708] sm:$0xf]  ;;  %v9617_v58 = vld [vmem:[#allocation3 + $0x5d4] sm:$0xf0]  ;;  %v13225_v56 = vpop.f32.mrf.mxu2  ;;  %v6839_v34 = vadd.f32 %v13085_v19, %v6820_v54 }
 0x64f   : > { %v3765_v43 = vsel %vm409_vm0, %v13916_v60, %v3751_v20  ;;  %v13918_v24 = vld [vmem:[#allocation48_spill] sm:$0xff]  ;;  %v8853_v47 = vor.u32 %v9657_v29, %v8852_v6  ;;  %v9773_v20 = vld [vmem:[#allocation3 + $0xab4] sm:$0xf0] }
 0x650   : > { %7397 = vmatpush.bf16.msra.mxu2 %v9349_v27  ;;  %v3766_v52 = vsel %vm13917_vm2, %v13915_v50, %v3765_v43  ;;  %v13919_v14 = vrot.slane %v13918_v24, 4  ;;  %v8500_v27 = vld [vmem:[#allocation3 + $0x448] sm:$0xf]  ;;  %v9565_v53 = vld [vmem:[#allocation3 + $0x434] sm:$0xf0]  ;;  %7272 = vmatmul.bf16.vlgmr.msra.gmra.mxu3 %v12555_v46  ;;  %v6858_v17 = vadd.f32 %v13152_v22, %v6839_v34 }
 0x651   : > { %3786 = vst [vmem:[#allocation3 + $0x958] sm:$0xff] %v3766_v52  ;;  %v8501_v28 = vor.u32 %v9569_v0, %v8500_v27  ;;  %v8692_v49 = vld [vmem:[#allocation3 + $0x5c8] sm:$0xf]  ;;  %7347 = vmatpush.bf16.msrb.mxu3 %v8853_v47  ;;  %v9613_v50 = vld [vmem:[#allocation3 + $0x5b4] sm:$0xf0]  ;;  %v6875_v0 = vadd.f32 %v13053_v21, %v6856_v42  ;;  %v3274_v52 = vpop.permute.xlu1 %3273  ;;  %v4390_v21 = vpop.permute.xlu0 %4389  ;;  %v6823_v27 = vadd.f32 %v13049_v57, %v6804_v1 }
 0x652   : > { %v4052_v7 = vsel %vm409_vm0, %v13919_v14, %v4036_v16  ;;  %7302 = vmatpush.bf16.msrb.mxu1 %v8709_v9  ;;  %v13229_v16 = vpop.f32.mrf.mxu1  ;;  %v8693_v9 = vor.u32 %v9617_v58, %v8692_v49  ;;  %v9316_v29 = vld [vmem:[#allocation3 + $0xaa8] sm:$0xf]  ;;  %v3289_v19 = vrot.slane %v3274_v52, 4  ;;  %v9769_v58 = vld [vmem:[#allocation3 + $0xa94] sm:$0xf0]  ;;  %v4405_v14 = vrot.slane %v4390_v21, 4 }
 0x653   : > { %v4053_v18 = vsel %vm4038_vm11, %v13918_v24, %v4052_v7  ;;  %7288 = vmatpush.bf16.msrb.mxu0 %v8501_v28  ;;  %v13920_v60 = vld [vmem:[#allocation56_spill] sm:$0xff]  ;;  %v13235_v24 = vpop.f32.mrf.mxu0  ;;  %v9561_v7 = vld [vmem:[#allocation3 + $0x414] sm:$0xf0]  ;;  %v6787_v47 = vadd.f32 %v13097_v62, %v13031_v51  ;;  %v3640_v22 = vpop.permute.xlu2 %3639 }
 0x654   : > { %7398 = vmatpush.bf16.msra.mxu2 %v9333_v40  ;;  %4069 = vst [vmem:[#allocation3 + $0xa38] sm:$0xff] %v4053_v18  ;;  %v13921_v43 = vrot.slane %v13920_v60, 4  ;;  %v9317_v40 = vor.u32 %v9773_v20, %v9316_v29  ;;  %v8484_v6 = vld [vmem:[#allocation3 + $0x428] sm:$0xf]  ;;  %v13923_v18 = vld [vmem:[#allocation49_spill] sm:$0xff]  ;;  %v13925_v57 = vld [vmem:[#allocation54_spill] sm:$0xff] }
 0x655   : > { %v8485_v54 = vor.u32 %v9565_v53, %v8484_v6  ;;  %v8676_v15 = vld [vmem:[#allocation3 + $0x5a8] sm:$0xf]  ;;  %v13924_v28 = vrot.slane %v13923_v18, 4  ;;  %v6894_v53 = vadd.f32 %v13115_v36, %v6875_v0  ;;  %v13926_v1 = vrot.slane %v13925_v57, 4  ;;  %v6969_v36 = vpop.f32.mrf.mxu3 }
 0x656   : > { %v4412_v11 = vsel %vm409_vm0, %v13921_v43, %v4399_v26  ;;  %7303 = vmatpush.bf16.msrb.mxu1 %v8693_v9  ;;  %v8677_v42 = vor.u32 %v9613_v50, %v8676_v15  ;;  %v9300_v26 = vld [vmem:[#allocation3 + $0xa88] sm:$0xf]  ;;  %v9609_v50 = vld [vmem:[#allocation3 + $0x594] sm:$0xf0]  ;;  %v3658_v52 = vrot.slane %v3640_v22, 4  ;;  %v6877_v15 = vadd.f32 %v13077_v8, %v6858_v17  ;;  %v13930_v22 = vld [vmem:[#allocation55_spill] sm:$0xff] }
 0x657   : > { %v4413_v61 = vsel %vm13922_vm3, %v13920_v60, %v4412_v11  ;;  %v3304_v20 = vsel %vm409_vm0, %v13924_v28, %v3289_v19  ;;  %7289 = vmatpush.bf16.msrb.mxu0 %v8485_v54  ;;  %v9092_v49 = vld [vmem:[#allocation3 + $0x8e8] sm:$0xf]  ;;  %v9301_v29 = vor.u32 %v9769_v58, %v9300_v26  ;;  %v4420_v51 = vsel %vm409_vm0, %v13926_v1, %v4405_v14  ;;  %v9717_v43 = vld [vmem:[#allocation3 + $0x8f4] sm:$0xf0]  ;;  %v13257_v19 = vpop.f32.mrf.mxu2 }
 0x658   : > { %4435 = vst [vmem:[#allocation3 + $0xb08] sm:$0xff] %v4413_v61  ;;  %7399 = vmatpush.bf16.msra.mxu2 %v9317_v40  ;;  %v3305_v9 = vsel %vm3294_vm12, %v13923_v18, %v3304_v20  ;;  %v8468_v62 = vld [vmem:[#allocation3 + $0x408] sm:$0xf]  ;;  %v4421_v34 = vsel %vm13927_vm4, %v13925_v57, %v4420_v51  ;;  %v9765_v11 = vld [vmem:[#allocation3 + $0xa74] sm:$0xf0]  ;;  %v6913_v0 = vadd.f32 %v13175_v5, %v6894_v53  ;;  %v13928_v18 = vld [vmem:[#allocation59_spill] sm:$0xff] }
 0x659   : > { %3323 = vst [vmem:[#allocation3 + $0x828] sm:$0xff] %v3305_v9  ;;  %v8469_v60 = vor.u32 %v9561_v7, %v8468_v62  ;;  %v8660_v40 = vld [vmem:[#allocation3 + $0x588] sm:$0xf]  ;;  %v9093_v6 = vor.u32 %v9717_v43, %v9092_v49  ;;  %v9605_v61 = vld [vmem:[#allocation3 + $0x574] sm:$0xf0]  ;;  %v6806_v54 = vadd.f32 %v13024_v3, %v6787_v47  ;;  %v6842_v58 = vadd.f32 %v13117_v44, %v6823_v27  ;;  %v4396_v26 = vpop.permute.xlu1 %4395  ;;  %v3652_v9 = vpop.permute.xlu0 %3651 }
 0x65a   : > { %7304 = vmatpush.bf16.msrb.mxu1 %v8677_v42  ;;  %4439 = vst [vmem:[#allocation3 + $0xb28] sm:$0xff] %v4421_v34  ;;  %v6931_v21 = vpop.f32.mrf.mxu1  ;;  %v8661_v42 = vor.u32 %v9609_v50, %v8660_v40  ;;  %v9284_v14 = vld [vmem:[#allocation3 + $0xa68] sm:$0xf]  ;;  %v13929_v28 = vrot.slane %v13928_v18, 4  ;;  %v4408_v44 = vrot.slane %v4396_v26, 4  ;;  %7220 = vmatmul.bf16.gmra.mxu0 %v12591_v10  ;;  %v3664_v57 = vrot.slane %v3652_v9, 4 }
 0x65b   : > { %7290 = vmatpush.bf16.msrb.mxu0 %v8469_v60  ;;  %v9076_v5 = vld [vmem:[#allocation3 + $0x8c8] sm:$0xf]  ;;  %v6932_v7 = vadd.f32 %v6931_v21, %v6913_v0  ;;  %v9285_v49 = vor.u32 %v9765_v11, %v9284_v14  ;;  %v13266_v3 = vpop.f32.mrf.mxu0  ;;  %v9713_v47 = vld [vmem:[#allocation3 + $0x8d4] sm:$0xf0]  ;;  %7234 = vmatmul.bf16.vlgmr.msra.gmra.mxu1 %v12176_v2  ;;  %v6825_v1 = vadd.f32 %v13079_v41, %v6806_v54  ;;  %v13931_v34 = vrot.slane %v13930_v22, 4 }
 0x65c   : > { %7400 = vmatpush.bf16.msra.mxu2 %v9301_v29  ;;  %v3672_v20 = vsel %vm409_vm0, %v13929_v28, %v3658_v52  ;;  %v8644_v53 = vld [vmem:[#allocation3 + $0x568] sm:$0xf]  ;;  %v9761_v17 = vld [vmem:[#allocation3 + $0xa54] sm:$0xf0]  ;;  %v9077_v50 = vor.u32 %v9713_v47, %v9076_v5  ;;  %v6896_v51 = vadd.f32 %v13144_v4, %v6877_v15  ;;  %v6861_v62 = vadd.f32 %v13192_v32, %v6842_v58 }
 0x65d   : > { %v3673_v8 = vsel %vm3666_vm10, %v13928_v18, %v3672_v20  ;;  %v8645_v27 = vor.u32 %v9605_v61, %v8644_v53  ;;  %v6951_v29 = vadd.f32 %v13166_v31, %v6932_v7  ;;  %v4424_v60 = vsel %vm409_vm0, %v13931_v34, %v4408_v44  ;;  %v9268_v43 = vld [vmem:[#allocation3 + $0xa48] sm:$0xf]  ;;  %v9601_v40 = vld [vmem:[#allocation3 + $0x554] sm:$0xf0]  ;;  %v6971_v15 = vpop.f32.mrf.mxu3  ;;  %7329 = vmatmul.bf16.vlgmr.msrb.gmra.mxu2 %v12631_v37 }
 0x65e   : > { %7305 = vmatpush.bf16.msrb.mxu1 %v8661_v42  ;;  %3693 = vst [vmem:[#allocation3 + $0x918] sm:$0xff] %v3673_v8  ;;  %v9060_v11 = vld [vmem:[#allocation3 + $0x8a8] sm:$0xf]  ;;  %v4425_v31 = vsel %vm13932_vm5, %v13930_v22, %v4424_v60  ;;  %v9269_v52 = vor.u32 %v9761_v17, %v9268_v43  ;;  %v9709_v61 = vld [vmem:[#allocation3 + $0x8b4] sm:$0xf0]  ;;  %v6915_v58 = vadd.f32 %v13206_v59, %v6896_v51 }
 0x65f   : > { %7359 = vmatpush.bf16.msra.mxu0 %v9093_v6  ;;  %v6970_v0 = vadd.f32 %v6969_v36, %v6951_v29  ;;  %v13933_v6 = vld [vmem:[#allocation57_spill] sm:$0xff]  ;;  %4441 = vst [vmem:[#allocation3 + $0xb38] sm:$0xff] %v4425_v31  ;;  %v9757_v54 = vld [vmem:[#allocation3 + $0xa34] sm:$0xf0]  ;;  %v8628_v36 = vld [vmem:[#allocation3 + $0x548] sm:$0xf]  ;;  %v9061_v21 = vor.u32 %v9709_v61, %v9060_v11  ;;  %v13292_v42 = vpop.f32.mrf.mxu2  ;;  %v6880_v14 = vadd.f32 %v13106_v35, %v6861_v62 }
 0x660   : > { %7401 = vmatpush.bf16.msra.mxu2 %v9285_v49  ;;  %v13934_v41 = vrot.slane %v13933_v6, 4  ;;  %v8629_v7 = vor.u32 %v9601_v40, %v8628_v36  ;;  %v9252_v18 = vld [vmem:[#allocation3 + $0xa28] sm:$0xf]  ;;  %v6844_v20 = vadd.f32 %v13146_v13, %v6825_v1  ;;  %v9597_v53 = vld [vmem:[#allocation3 + $0x534] sm:$0xf0]  ;;  %7277 = vmatmul.bf16.gmra.mxu3 %v12594_v39 }
 0x661   : > { %7663 = vst [vmem:[%s13289_s11] sm:$0xff] %v6970_v0  ;;  %v9044_v28 = vld [vmem:[#allocation3 + $0x888] sm:$0xf]  ;;  %v4006_v26 = vpop.permute.xlu1 %4005  ;;  %v9253_v49 = vor.u32 %v9757_v54, %v9252_v18  ;;  %v9705_v44 = vld [vmem:[#allocation3 + $0x894] sm:$0xf0]  ;;  %v6899_v29 = vadd.f32 %v13177_v25, %v6880_v14 }
 0x662   : > { %v3680_v4 = vsel %vm409_vm0, %v13934_v41, %v3664_v57  ;;  %7306 = vmatpush.bf16.msrb.mxu1 %v8645_v27  ;;  %v6933_v5 = vpop.f32.mrf.mxu1  ;;  %v4027_v8 = vrot.slane %v4006_v26, 4  ;;  %v3262_v27 = vpop.permute.xlu0 %3261  ;;  %v8612_v47 = vld [vmem:[#allocation3 + $0x528] sm:$0xf]  ;;  %v9045_v17 = vor.u32 %v9705_v44, %v9044_v28  ;;  %v6863_v22 = vadd.f32 %v13229_v16, %v6844_v20  ;;  %v9593_v11 = vld [vmem:[#allocation3 + $0x514] sm:$0xf0] }
 0x663   : > { %7360 = vmatpush.bf16.msra.mxu0 %v9077_v50  ;;  %v3681_v32 = vsel %vm3666_vm10, %v13933_v6, %v3680_v4  ;;  %v6934_v59 = vadd.f32 %v6933_v5, %v6915_v58  ;;  %v13298_v9 = vpop.f32.mrf.mxu0  ;;  %v3283_v13 = vrot.slane %v3262_v27, 4  ;;  %v13935_v50 = vld [vmem:[#allocation58_spill] sm:$0xff]  ;;  %v8613_v51 = vor.u32 %v9597_v53, %v8612_v47  ;;  %v9028_v62 = vld [vmem:[#allocation3 + $0x868] sm:$0xf] }
 0x664   : > { %7402 = vmatpush.bf16.msra.mxu2 %v9269_v52  ;;  %3697 = vst [vmem:[#allocation3 + $0x938] sm:$0xff] %v3681_v32  ;;  %v13936_v57 = vrot.slane %v13935_v50, 4  ;;  %v9380_v60 = vld [vmem:[#allocation3 + $0xb28] sm:$0xf]  ;;  %v9701_v16 = vld [vmem:[#allocation3 + $0x874] sm:$0xf0]  ;;  %v6918_v4 = vadd.f32 %v13235_v24, %v6899_v29  ;;  %v6882_v14 = vadd.f32 %v13139_v23, %v6863_v22 }
 0x665   : > { %v6953_v35 = vadd.f32 %v13196_v55, %v6934_v59  ;;  %v13937_v31 = vld [vmem:[#allocation60_spill] sm:$0xff]  ;;  %v9749_v6 = vld [vmem:[#allocation3 + $0x9f4] sm:$0xf0]  ;;  %v6974_v41 = vpop.f32.mrf.mxu3  ;;  %v9029_v61 = vor.u32 %v9701_v16, %v9028_v62  ;;  %v13939_v23 = vld [vmem:[#allocation61_spill] sm:$0xff] }
 0x666   : > { %7307 = vmatpush.bf16.msrb.mxu1 %v8629_v7  ;;  %v4040_v1 = vsel %vm409_vm0, %v13936_v57, %v4027_v8  ;;  %v9789_v43 = vld [vmem:[#allocation3 + $0xb34] sm:$0xf0]  ;;  %v13938_v0 = vrot.slane %v13937_v31, 4  ;;  %v8596_v32 = vld [vmem:[#allocation3 + $0x508] sm:$0xf]  ;;  %v13940_v27 = vrot.slane %v13939_v23, 4  ;;  %v6901_v29 = vadd.f32 %v13216_v45, %v6882_v14 }
 0x667   : > { %7361 = vmatpush.bf16.msra.mxu0 %v9061_v21  ;;  %v4041_v55 = vsel %vm4038_vm11, %v13935_v50, %v4040_v1  ;;  %v6972_v34 = vadd.f32 %v6971_v15, %v6953_v35  ;;  %v9381_v52 = vor.u32 %v9789_v43, %v9380_v60  ;;  %v13315_v54 = vpop.f32.mrf.mxu2  ;;  %v8597_v58 = vor.u32 %v9593_v11, %v8596_v32  ;;  %v9220_v36 = vld [vmem:[#allocation3 + $0x9e8] sm:$0xf]  ;;  %v9745_v28 = vld [vmem:[#allocation3 + $0x9d4] sm:$0xf0]  ;;  %v13945_v14 = vld [vmem:[#allocation65_spill] sm:$0xff] }
 0x668   : > { %7403 = vmatpush.bf16.msra.mxu2 %v9253_v49  ;;  %v3296_v25 = vsel %vm409_vm0, %v13938_v0, %v3283_v13  ;;  %4063 = vst [vmem:[#allocation3 + $0xa08] sm:$0xff] %v4041_v55  ;;  %v9012_v21 = vld [vmem:[#allocation3 + $0x848] sm:$0xf]  ;;  %v9221_v18 = vor.u32 %v9749_v6, %v9220_v36  ;;  %v9697_v24 = vld [vmem:[#allocation3 + $0x854] sm:$0xf0] }
 0x669   : > { %v3297_v40 = vsel %vm3294_vm12, %v13937_v31, %v3296_v25  ;;  %7667 = vst [vmem:[%s13289_s11 + $0x20] sm:$0xff] %v6972_v34  ;;  %7422 = vmatpush.bf16.msra.mxu3 %v9381_v52  ;;  %v3268_v7 = vpop.permute.xlu1 %3267  ;;  %v9013_v49 = vor.u32 %v9697_v24, %v9012_v21  ;;  %v9204_v53 = vld [vmem:[#allocation3 + $0x9c8] sm:$0xf]  ;;  %v9753_v1 = vld [vmem:[#allocation3 + $0xa14] sm:$0xf0]  ;;  %v6920_v31 = vadd.f32 %v13266_v3, %v6901_v29  ;;  %v13944_v21 = vld [vmem:[#allocation45_spill] sm:$0xff] }
 0x66a   : > { %7308 = vmatpush.bf16.msrb.mxu1 %v8613_v51  ;;  %v6936_v15 = vpop.f32.mrf.mxu1  ;;  %3319 = vst [vmem:[#allocation3 + $0x808] sm:$0xff] %v3297_v40  ;;  %v3286_v20 = vrot.slane %v3268_v7, 4  ;;  %7291 = vmatmul.bf16.vlgmr.msrb.gmra.mxu0 %v12634_v30  ;;  %v4384_v59 = vpop.permute.xlu0 %4383  ;;  %v9205_v47 = vor.u32 %v9745_v28, %v9204_v53  ;;  %v8996_v13 = vld [vmem:[#allocation3 + $0x828] sm:$0xf]  ;;  %v9523_v51 = vld [vmem:[#allocation3 + $0x2ec] sm:$0xf] }
 0x66b   : > { %7362 = vmatpush.bf16.msra.mxu0 %v9045_v17  ;;  %v6937_v5 = vadd.f32 %v6936_v15, %v6918_v4  ;;  %v13320_v8 = vpop.f32.mrf.mxu0  ;;  %v4402_v44 = vrot.slane %v4384_v59, 4  ;;  %7239 = vmatmul.bf16.gmra.mxu1 %v12599_v33  ;;  %v8326_v17 = vld [vmem:[#allocation3 + $0x2f8] sm:$0xf0]  ;;  %v13941_v62 = vld [vmem:[#allocation64_spill] sm:$0xff]  ;;  %v9693_v43 = vld [vmem:[#allocation3 + $0x834] sm:$0xf0] }
 0x66c   : > { %v3300_v35 = vsel %vm409_vm0, %v13940_v27, %v3286_v20  ;;  %v13942_v22 = vrot.slane %v13941_v62, 4  ;;  %v9741_v11 = vld [vmem:[#allocation3 + $0x9b4] sm:$0xf0]  ;;  %v8329_v0 = vor.u32 %v9523_v51, %v8326_v17  ;;  %v8997_v25 = vor.u32 %v9693_v43, %v8996_v13  ;;  %v9188_v16 = vld [vmem:[#allocation3 + $0x9a8] sm:$0xf] }
 0x66d   : > { %v6956_v26 = vadd.f32 %v13225_v56, %v6937_v5  ;;  %v3301_v56 = vsel %vm3294_vm12, %v13939_v23, %v3300_v35  ;;  %v6976_v45 = vpop.f32.mrf.mxu3  ;;  %v8310_v6 = vld [vmem:[#allocation3 + $0x2d8] sm:$0xf0]  ;;  %v9189_v32 = vor.u32 %v9741_v11, %v9188_v16  ;;  %v9519_v15 = vld [vmem:[#allocation3 + $0x2cc] sm:$0xf]  ;;  %7334 = vmatmul.bf16.gmra.mxu2 %v12674_v48  ;;  %v13946_v5 = vrot.slane %v13945_v14, 4 }
 0x66e   : > { %7309 = vmatpush.bf16.msrb.mxu1 %v8597_v58  ;;  %v4416_v55 = vsel %vm409_vm0, %v13942_v22, %v4402_v44  ;;  %3321 = vst [vmem:[#allocation3 + $0x818] sm:$0xff] %v3301_v56  ;;  %v9737_v58 = vld [vmem:[#allocation3 + $0x994] sm:$0xf0]  ;;  %v8313_v36 = vor.u32 %v9519_v15, %v8310_v6  ;;  %v9459_v28 = vld [vmem:[#allocation3 + $0xec] sm:$0xf] }
 0x66f   : > { %7363 = vmatpush.bf16.msra.mxu0 %v9029_v61  ;;  %v6975_v50 = vadd.f32 %v6974_v41, %v6956_v26  ;;  %v9236_v57 = vld [vmem:[#allocation3 + $0xa08] sm:$0xf]  ;;  %v4417_v60 = vsel %vm13943_vm6, %v13941_v62, %v4416_v55  ;;  %v13336_v52 = vpop.f32.mrf.mxu2  ;;  %v8070_v20 = vld [vmem:[#allocation3 + $0xf8] sm:$0xf0]  ;;  %v9515_v23 = vld [vmem:[#allocation3 + $0x2ac] sm:$0xf] }
 0x670   : > { %v9237_v34 = vor.u32 %v9753_v1, %v9236_v57  ;;  %4437 = vst [vmem:[#allocation3 + $0xb18] sm:$0xff] %v4417_v60  ;;  %7348 = vmatmul.bf16.vlgmr.msrb.gmra.mxu3 %v13944_v21  ;;  %v8294_v24 = vld [vmem:[#allocation3 + $0x2b8] sm:$0xf0]  ;;  %v9733_v35 = vld [vmem:[#allocation3 + $0x974] sm:$0xf0]  ;;  %v8073_v29 = vor.u32 %v9459_v28, %v8070_v20 }
 0x671   : > { %7671 = vst [vmem:[%s13289_s11 + $0x40] sm:$0xff] %v6975_v50  ;;  %v3634_v4 = vpop.permute.xlu1 %3633  ;;  %v8980_v53 = vld [vmem:[#allocation3 + $0x808] sm:$0xf]  ;;  %v8054_v17 = vld [vmem:[#allocation3 + $0xd8] sm:$0xf0]  ;;  %v8297_v56 = vor.u32 %v9515_v23, %v8294_v24 }
 0x672   : > { %7378 = vmatpush.bf16.msra.mxu1 %v9221_v18  ;;  %v6938_v40 = vpop.f32.mrf.mxu1  ;;  %7404 = vmatpush.bf16.msra.mxu2 %v9237_v34  ;;  %v3655_v61 = vrot.slane %v3634_v4, 4  ;;  %v9172_v18 = vld [vmem:[#allocation3 + $0x988] sm:$0xf]  ;;  %v8454_v13 = vld [vmem:[#allocation3 + $0x3f8] sm:$0xf0] }
 0x673   : > { %7364 = vmatpush.bf16.msra.mxu0 %v9013_v49  ;;  %v6939_v41 = vadd.f32 %v6938_v40, %v6920_v31  ;;  %v9173_v49 = vor.u32 %v9737_v58, %v9172_v18  ;;  %v9364_v50 = vld [vmem:[#allocation3 + $0xb08] sm:$0xf]  ;;  %v8278_v22 = vld [vmem:[#allocation3 + $0x298] sm:$0xf0]  ;;  %v9555_v34 = vld [vmem:[#allocation3 + $0x3ec] sm:$0xf] }
 0x674   : > { %v3668_v7 = vsel %vm409_vm0, %v13946_v5, %v3655_v61  ;;  %v9156_v62 = vld [vmem:[#allocation3 + $0x968] sm:$0xf]  ;;  %v9455_v43 = vld [vmem:[#allocation3 + $0xcc] sm:$0xf]  ;;  %v8457_v11 = vor.u32 %v9555_v34, %v8454_v13  ;;  %v8038_v6 = vld [vmem:[#allocation3 + $0xb8] sm:$0xf0] }
 0x675   : > { %v6958_v3 = vadd.f32 %v13257_v19, %v6939_v41  ;;  %v3669_v59 = vsel %vm3666_vm10, %v13945_v14, %v3668_v7  ;;  %v13346_v19 = vpop.f32.mrf.mxu0  ;;  %v9689_v44 = vld [vmem:[#allocation3 + $0x814] sm:$0xf0]  ;;  %v9157_v60 = vor.u32 %v9733_v35, %v9156_v62  ;;  %v9511_v31 = vld [vmem:[#allocation3 + $0x28c] sm:$0xf]  ;;  %v8057_v40 = vor.u32 %v9455_v43, %v8054_v17  ;;  %v9140_v4 = vld [vmem:[#allocation3 + $0x948] sm:$0xf] }
 0x676   : > { %7379 = vmatpush.bf16.msra.mxu1 %v9205_v47  ;;  %7473 = vmatpush.bf16.msrb.mxu2 %v8329_v0  ;;  %3691 = vst [vmem:[#allocation3 + $0x908] sm:$0xff] %v3669_v59  ;;  %v8981_v27 = vor.u32 %v9689_v44, %v8980_v53  ;;  %v13348_v47 = vpop.f32.mrf.mxu3  ;;  %v9729_v0 = vld [vmem:[#allocation3 + $0x954] sm:$0xf0]  ;;  %v8281_v16 = vor.u32 %v9511_v31, %v8278_v22  ;;  %v9551_v61 = vld [vmem:[#allocation3 + $0x3cc] sm:$0xf]  ;;  %v13950_v62 = vld [vmem:[#allocation51_spill] sm:$0xff] }
 0x677   : > { %7365 = vmatpush.bf16.msra.mxu0 %v8997_v25  ;;  %v6977_v26 = vadd.f32 %v6976_v45, %v6958_v3  ;;  %v9785_v57 = vld [vmem:[#allocation3 + $0xb14] sm:$0xf0]  ;;  %v13351_v1 = vpop.f32.mrf.mxu2  ;;  %v8438_v25 = vld [vmem:[#allocation3 + $0x3d8] sm:$0xf0]  ;;  %v9141_v15 = vor.u32 %v9729_v0, %v9140_v4  ;;  %v9507_v14 = vld [vmem:[#allocation3 + $0x26c] sm:$0xf] }
 0x678   : > { %v9365_v55 = vor.u32 %v9785_v57, %v9364_v50  ;;  %v13947_v45 = vld [vmem:[#allocation50_spill] sm:$0xff]  ;;  %v8441_v3 = vor.u32 %v9551_v61, %v8438_v25  ;;  %v9547_v23 = vld [vmem:[#allocation3 + $0x3ac] sm:$0xf] }
 0x679   : > { %7675 = vst [vmem:[%s13289_s11 + $0x60] sm:$0xff] %v6977_v26  ;;  %v13948_v41 = vld [vmem:[#allocation46_spill] sm:$0xff]  ;;  %v9124_v26 = vld [vmem:[#allocation3 + $0x928] sm:$0xf]  ;;  %v9503_v35 = vld [vmem:[#allocation3 + $0x24c] sm:$0xf] }
 0x67a   : > { %7380 = vmatpush.bf16.msra.mxu1 %v9189_v32  ;;  %7474 = vmatpush.bf16.msrb.mxu2 %v8313_v36  ;;  %v13353_v51 = vpop.f32.mrf.mxu1  ;;  %v8262_v32 = vld [vmem:[#allocation3 + $0x278] sm:$0xf0]  ;;  %v9451_v36 = vld [vmem:[#allocation3 + $0xac] sm:$0xf]  ;;  %v9725_v5 = vld [vmem:[#allocation3 + $0x934] sm:$0xf0] }
 0x67b   : > { %7366 = vmatpush.bf16.msra.mxu0 %v8981_v27  ;;  %7423 = vmatpush.bf16.msra.mxu3 %v9365_v55  ;;  %v8041_v18 = vor.u32 %v9451_v36, %v8038_v6  ;;  %v8265_v28 = vor.u32 %v9507_v14, %v8262_v32  ;;  %v8422_v20 = vld [vmem:[#allocation3 + $0x3b8] sm:$0xf0]  ;;  %v9125_v44 = vor.u32 %v9725_v5, %v9124_v26  ;;  %v9447_v27 = vld [vmem:[#allocation3 + $0x8c] sm:$0xf]  ;;  %v9721_v55 = vld [vmem:[#allocation3 + $0x914] sm:$0xf0] }
 0x67c   : > { %7296 = vmatmul.bf16.gmra.mxu0 %v13947_v45  ;;  %7310 = vmatmul.bf16.vlgmr.msrb.gmra.mxu1 %v13948_v41  ;;  %v8246_v53 = vld [vmem:[#allocation3 + $0x258] sm:$0xf0]  ;;  %v8425_v13 = vor.u32 %v9547_v23, %v8422_v20  ;;  %v9543_v0 = vld [vmem:[#allocation3 + $0x38c] sm:$0xf] }
 0x67d   : > { %v13357_v58 = vpop.f32.mrf.mxu0  ;;  %v9108_v17 = vld [vmem:[#allocation3 + $0x908] sm:$0xf]  ;;  %v8249_v50 = vor.u32 %v9503_v35, %v8246_v53  ;;  %v8198_v57 = vld [vmem:[#allocation3 + $0x1f8] sm:$0xf0]  ;;  %v9439_v5 = vld [vmem:[#allocation3 + $0x4c] sm:$0xf] }
 0x67e   : > { %7381 = vmatpush.bf16.msra.mxu1 %v9173_v49  ;;  %7475 = vmatpush.bf16.msrb.mxu2 %v8297_v56  ;;  %v13359_v7 = vpop.f32.mrf.mxu3  ;;  %v8022_v49 = vld [vmem:[#allocation3 + $0x98] sm:$0xf0]  ;;  %v9109_v43 = vor.u32 %v9721_v55, %v9108_v17  ;;  %v9539_v26 = vld [vmem:[#allocation3 + $0x36c] sm:$0xf] }
 0x67f   : > { %7435 = vmatpush.bf16.msrb.mxu0 %v8073_v29  ;;  %7492 = vmatpush.bf16.msrb.mxu3 %v8457_v11  ;;  %v13361_v24 = vpop.f32.mrf.mxu2  ;;  %v13949_v29 = vld [vmem:[#allocation62_spill] sm:$0xff]  ;;  %v8025_v56 = vor.u32 %v9447_v27, %v8022_v49  ;;  %v9491_v11 = vld [vmem:[#allocation3 + $0x1ec] sm:$0xf]  ;;  %v13951_v49 = vld [vmem:[#allocation63_spill] sm:$0xff] }
 0x680   : > { %7405 = vmatmul.bf16.vlgmr.msra.gmra.mxu2 %v13949_v29  ;;  %7353 = vmatmul.bf16.gmra.mxu3 %v13950_v62  ;;  %v8406_v22 = vld [vmem:[#allocation3 + $0x398] sm:$0xf0]  ;;  %v8201_v25 = vor.u32 %v9491_v11, %v8198_v57 }
 0x681   : > { %v8006_v34 = vld [vmem:[#allocation3 + $0x78] sm:$0xf0]  ;;  %v8409_v4 = vor.u32 %v9543_v0, %v8406_v22  ;;  %v9651_v22 = vld [vmem:[#allocation3 + $0x6ec] sm:$0xf] }
 0x682   : > { %7382 = vmatpush.bf16.msra.mxu1 %v9157_v60  ;;  %7476 = vmatpush.bf16.msrb.mxu2 %v8281_v16  ;;  %v13363_v59 = vpop.f32.mrf.mxu1  ;;  %v8230_v60 = vld [vmem:[#allocation3 + $0x238] sm:$0xf0]  ;;  %v9499_v16 = vld [vmem:[#allocation3 + $0x22c] sm:$0xf] }
 0x683   : > { %7436 = vmatpush.bf16.msrb.mxu0 %v8057_v40  ;;  %7493 = vmatpush.bf16.msrb.mxu3 %v8441_v3  ;;  %v9443_v40 = vld [vmem:[#allocation3 + $0x6c] sm:$0xf]  ;;  %v8233_v61 = vor.u32 %v9499_v16, %v8230_v60  ;;  %v8182_v14 = vld [vmem:[#allocation3 + $0x1d8] sm:$0xf0] }
 0x684   : > { %v8009_v32 = vor.u32 %v9443_v40, %v8006_v34  ;;  %v8214_v20 = vld [vmem:[#allocation3 + $0x218] sm:$0xf0]  ;;  %v9483_v60 = vld [vmem:[#allocation3 + $0x1ac] sm:$0xf] }
 0x685   : > { %v13367_v31 = vpop.f32.mrf.mxu0  ;;  %v8838_v53 = vld [vmem:[#allocation3 + $0x6f8] sm:$0xf0]  ;;  %v9535_v0 = vld [vmem:[#allocation3 + $0x34c] sm:$0xf] }
 0x686   : > { %7383 = vmatpush.bf16.msra.mxu1 %v9141_v15  ;;  %7477 = vmatpush.bf16.msrb.mxu2 %v8265_v28  ;;  %v13369_v6 = vpop.f32.mrf.mxu3  ;;  %v8390_v15 = vld [vmem:[#allocation3 + $0x378] sm:$0xf0]  ;;  %v9487_v28 = vld [vmem:[#allocation3 + $0x1cc] sm:$0xf]  ;;  %v8841_v34 = vor.u32 %v9651_v22, %v8838_v53 }
 0x687   : > { %7437 = vmatpush.bf16.msrb.mxu0 %v8041_v18  ;;  %7494 = vmatpush.bf16.msrb.mxu3 %v8425_v13  ;;  %v13371_v3 = vpop.f32.mrf.mxu2  ;;  %v7990_v18 = vld [vmem:[#allocation3 + $0x58] sm:$0xf0]  ;;  %v8393_v27 = vor.u32 %v9539_v26, %v8390_v15  ;;  %v8185_v35 = vor.u32 %v9487_v28, %v8182_v14  ;;  %v9495_v13 = vld [vmem:[#allocation3 + $0x20c] sm:$0xf] }
 0x688   : > { %v7974_v23 = vld [vmem:[#allocation3 + $0x38] sm:$0xf0]  ;;  %v7993_v17 = vor.u32 %v9439_v5, %v7990_v18  ;;  %v8217_v57 = vor.u32 %v9495_v13, %v8214_v20  ;;  %v9431_v16 = vld [vmem:[#allocation3 + $0xc] sm:$0xf] }
 0x689   : > { %v8166_v55 = vld [vmem:[#allocation3 + $0x1b8] sm:$0xf0]  ;;  %v9647_v18 = vld [vmem:[#allocation3 + $0x6cc] sm:$0xf] }
 0x68a   : > { %7384 = vmatpush.bf16.msra.mxu1 %v9125_v44  ;;  %7478 = vmatpush.bf16.msrb.mxu2 %v8249_v50  ;;  %v13373_v36 = vpop.f32.mrf.mxu1  ;;  %v9435_v44 = vld [vmem:[#allocation3 + $0x2c] sm:$0xf]  ;;  %v8358_v15 = vld [vmem:[#allocation3 + $0x338] sm:$0xf0] }
 0x68b   : > { %7438 = vmatpush.bf16.msrb.mxu0 %v8025_v56  ;;  %7495 = vmatpush.bf16.msrb.mxu3 %v8409_v4  ;;  %v8374_v56 = vld [vmem:[#allocation3 + $0x358] sm:$0xf0]  ;;  %v13952_v50 = vld [vmem:[#allocation52_spill] sm:$0xff]  ;;  %v7977_v11 = vor.u32 %v9435_v44, %v7974_v23 }
 0x68c   : > { %7367 = vmatmul.bf16.vlgmr.msra.gmra.mxu0 %v13951_v49  ;;  %7315 = vmatmul.bf16.gmra.mxu1 %v13952_v50  ;;  %v7958_v4 = vld [vmem:[#allocation3 + $0x18] sm:$0xf0]  ;;  %v9531_v44 = vld [vmem:[#allocation3 + $0x32c] sm:$0xf] }
 0x68d   : > { %v8150_v28 = vld [vmem:[#allocation3 + $0x198] sm:$0xf0]  ;;  %v7961_v26 = vor.u32 %v9431_v16, %v7958_v4  ;;  %v9479_v23 = vld [vmem:[#allocation3 + $0x18c] sm:$0xf] }
 0x68e   : > { %7385 = vmatpush.bf16.msra.mxu1 %v9109_v43  ;;  %7479 = vmatpush.bf16.msrb.mxu2 %v8233_v61  ;;  %v13377_v43 = vpop.f32.mrf.mxu0  ;;  %v13379_v40 = vpop.f32.mrf.mxu3  ;;  %v8169_v61 = vor.u32 %v9483_v60, %v8166_v55  ;;  %v8582_v53 = vld [vmem:[#allocation3 + $0x4f8] sm:$0xf0]  ;;  %v8153_v13 = vor.u32 %v9479_v23, %v8150_v28  ;;  %v9527_v16 = vld [vmem:[#allocation3 + $0x30c] sm:$0xf] }
 0x68f   : > { %7439 = vmatpush.bf16.msrb.mxu0 %v8009_v32  ;;  %7496 = vmatpush.bf16.msrb.mxu3 %v8393_v27  ;;  %v8377_v32 = vor.u32 %v9535_v0, %v8374_v56  ;;  %v13381_v14 = vpop.f32.mrf.mxu2  ;;  %v8806_v27 = vld [vmem:[#allocation3 + $0x6b8] sm:$0xf0]  ;;  %v9587_v56 = vld [vmem:[#allocation3 + $0x4ec] sm:$0xf] }
 0x690   : > { %v8342_v22 = vld [vmem:[#allocation3 + $0x318] sm:$0xf0]  ;;  %v8585_v55 = vor.u32 %v9587_v56, %v8582_v53  ;;  %v9475_v4 = vld [vmem:[#allocation3 + $0x16c] sm:$0xf] }
 0x691   : > { %v8134_v60 = vld [vmem:[#allocation3 + $0x178] sm:$0xf0]  ;;  %v9683_v28 = vld [vmem:[#allocation3 + $0x7ec] sm:$0xf] }
 0x692   : > { %7454 = vmatpush.bf16.msrb.mxu1 %v8201_v25  ;;  %7480 = vmatpush.bf16.msrb.mxu2 %v8217_v57  ;;  %v8822_v25 = vld [vmem:[#allocation3 + $0x6d8] sm:$0xf0]  ;;  %v13383_v5 = vpop.f32.mrf.mxu1  ;;  %v13954_v57 = vld [vmem:[#allocation67_spill] sm:$0xff]  ;;  %v9583_v53 = vld [vmem:[#allocation3 + $0x4cc] sm:$0xf] }
 0x693   : > { %7440 = vmatpush.bf16.msrb.mxu0 %v7993_v17  ;;  %7497 = vmatpush.bf16.msrb.mxu3 %v8377_v32  ;;  %v8825_v20 = vor.u32 %v9647_v18, %v8822_v25  ;;  %v13953_v17 = vld [vmem:[#allocation66_spill] sm:$0xff]  ;;  %v8345_v18 = vor.u32 %v9527_v16, %v8342_v22  ;;  %v9471_v22 = vld [vmem:[#allocation3 + $0x14c] sm:$0xf] }
 0x694   : > { %7410 = vmatmul.bf16.gmra.mxu2 %v13953_v17  ;;  %9390 = vmatmul.msk.bf16.vlgmr.msra.gmra.mxu3 %vm6744_vm13, %v13954_v57  ;;  %v8566_v25 = vld [vmem:[#allocation3 + $0x4d8] sm:$0xf0]  ;;  %v13956_v17 = vld [vmem:[#allocation69_spill] sm:$0xff]  ;;  %v9675_v57 = vld [vmem:[#allocation3 + $0x7ac] sm:$0xf] }
 0x695   : > { %v8950_v56 = vld [vmem:[#allocation3 + $0x7d8] sm:$0xf0] }
 0x696   : > { %7455 = vmatpush.bf16.msrb.mxu1 %v8185_v35  ;;  %7549 = vmatpush.bf16.msra.mxu2 %v8841_v34  ;;  %v8361_v35 = vor.u32 %v9531_v44, %v8358_v15  ;;  %v9643_v34 = vld [vmem:[#allocation3 + $0x6ac] sm:$0xf]  ;;  %v13388_v32 = vpop.f32.mrf.mxu0  ;;  %v13390_v15 = vpop.f32.mrf.mxu3  ;;  %v8774_v16 = vld [vmem:[#allocation3 + $0x678] sm:$0xf0] }
 0x697   : > { %7441 = vmatpush.bf16.msrb.mxu0 %v7977_v11  ;;  %v8966_v11 = vld [vmem:[#allocation3 + $0x7f8] sm:$0xf0]  ;;  %v8809_v0 = vor.u32 %v9643_v34, %v8806_v27  ;;  %v13392_v23 = vpop.f32.mrf.mxu2  ;;  %v9639_v27 = vld [vmem:[#allocation3 + $0x68c] sm:$0xf] }
 0x698   : > { %7498 = vmatpush.bf16.msrb.mxu3 %v8361_v35  ;;  %v8969_v44 = vor.u32 %v9683_v28, %v8966_v11  ;;  %v8550_v34 = vld [vmem:[#allocation3 + $0x4b8] sm:$0xf0] }
 0x699   : > { %v13958_v49 = vld [vmem:[#allocation70_spill] sm:$0xff] }
 0x69a   : > { %7456 = vmatpush.bf16.msrb.mxu1 %v8169_v61  ;;  %7550 = vmatpush.bf16.msra.mxu2 %v8825_v20  ;;  %v8790_v61 = vld [vmem:[#allocation3 + $0x698] sm:$0xf0]  ;;  %v8137_v20 = vor.u32 %v9475_v4, %v8134_v60  ;;  %v13394_v35 = vpop.f32.mrf.mxu1  ;;  %v13955_v60 = vld [vmem:[#allocation68_spill] sm:$0xff] }
 0x69b   : > { %7442 = vmatpush.bf16.msrb.mxu0 %v7961_v26  ;;  %v8569_v26 = vor.u32 %v9583_v53, %v8566_v25  ;;  %v9579_v4 = vld [vmem:[#allocation3 + $0x4ac] sm:$0xf]  ;;  %v8694_v29 = vld [vmem:[#allocation3 + $0x5d8] sm:$0xf0] }
 0x69c   : > { %7499 = vmatpush.bf16.msrb.mxu3 %v8345_v18  ;;  %7372 = vmatmul.bf16.gmra.mxu0 %v13955_v60  ;;  %v8553_v25 = vor.u32 %v9579_v4, %v8550_v34  ;;  %v9635_v53 = vld [vmem:[#allocation3 + $0x66c] sm:$0xf]  ;;  %v8102_v18 = vld [vmem:[#allocation3 + $0x138] sm:$0xf0] }
 0x69d   : > { %7386 = vmatmul.bf16.vlgmr.msra.gmra.mxu1 %v13956_v17  ;;  %v9631_v17 = vld [vmem:[#allocation3 + $0x64c] sm:$0xf]  ;;  %v8518_v60 = vld [vmem:[#allocation3 + $0x478] sm:$0xf0] }
 0x69e   : > { %7457 = vmatpush.bf16.msrb.mxu1 %v8153_v13  ;;  %7551 = vmatpush.bf16.msra.mxu2 %v8809_v0  ;;  %v8118_v13 = vld [vmem:[#allocation3 + $0x158] sm:$0xf0]  ;;  %v9679_v0 = vld [vmem:[#allocation3 + $0x7cc] sm:$0xf] }
 0x69f   : > { %7511 = vmatpush.bf16.msra.mxu0 %v8585_v55  ;;  %v8793_v55 = vor.u32 %v9639_v27, %v8790_v61  ;;  %v8121_v11 = vor.u32 %v9471_v22, %v8118_v13  ;;  %v8953_v28 = vor.u32 %v9679_v0, %v8950_v56  ;;  %v8777_v61 = vor.u32 %v9635_v53, %v8774_v16  ;;  %v8758_v27 = vld [vmem:[#allocation3 + $0x658] sm:$0xf0]  ;;  %v9575_v22 = vld [vmem:[#allocation3 + $0x48c] sm:$0xf]  ;;  %v13406_v50 = vpop.f32.mrf.mxu2 }
 0x6a0   : > { %7568 = vmatpush.bf16.msra.mxu3 %v8969_v44  ;;  %v9467_v44 = vld [vmem:[#allocation3 + $0x12c] sm:$0xf]  ;;  %v8934_v13 = vld [vmem:[#allocation3 + $0x7b8] sm:$0xf0] }
 0x6a1   : > { %v8105_v56 = vor.u32 %v9467_v44, %v8102_v18  ;;  %v8937_v0 = vor.u32 %v9675_v57, %v8934_v13  ;;  %v8918_v16 = vld [vmem:[#allocation3 + $0x798] sm:$0xf0]  ;;  %v9463_v18 = vld [vmem:[#allocation3 + $0x10c] sm:$0xf]  ;;  %v13957_v44 = vld [vmem:[#allocation23_spill] sm:$0xff] }
 0x6a2   : > { %7458 = vmatpush.bf16.msrb.mxu1 %v8137_v20  ;;  %7552 = vmatpush.bf16.msra.mxu2 %v8793_v55  ;;  %v8534_v20 = vld [vmem:[#allocation3 + $0x498] sm:$0xf0]  ;;  %v13400_v55 = vpop.f32.mrf.mxu3  ;;  %v13402_v34 = vpop.f32.mrf.mxu1  ;;  %v9671_v57 = vld [vmem:[#allocation3 + $0x78c] sm:$0xf] }
 0x6a3   : > { %7512 = vmatpush.bf16.msra.mxu0 %v8569_v26  ;;  %v13398_v26 = vpop.f32.mrf.mxu0  ;;  %v8537_v4 = vor.u32 %v9575_v22, %v8534_v20  ;;  %v8710_v53 = vld [vmem:[#allocation3 + $0x5f8] sm:$0xf0]  ;;  %v9619_v13 = vld [vmem:[#allocation3 + $0x5ec] sm:$0xf] }
 0x6a4   : > { %7569 = vmatpush.bf16.msra.mxu3 %v8953_v28  ;;  %v7008_v28 = vadd.f32 %v13353_v51, %v13298_v9  ;;  %7481 = vmatmul.bf16.vlgmr.msrb.gmra.mxu2 %v13957_v44  ;;  %v9571_v22 = vld [vmem:[#allocation3 + $0x46c] sm:$0xf]  ;;  %v8921_v9 = vor.u32 %v9671_v57, %v8918_v16  ;;  %v8713_v51 = vor.u32 %v9619_v13, %v8710_v53  ;;  %v8502_v62 = vld [vmem:[#allocation3 + $0x458] sm:$0xf0] }
 0x6a5   : > { %9391 = vmatmul.msk.bf16.gmra.mxu3 %vm6744_vm13, %v13958_v49  ;;  %v9667_v44 = vld [vmem:[#allocation3 + $0x76c] sm:$0xf]  ;;  %v9350_v53 = vld [vmem:[#allocation3 + $0xaf8] sm:$0xf0] }
 0x6a6   : > { %7459 = vmatpush.bf16.msrb.mxu1 %v8121_v11  ;;  %7553 = vmatpush.bf16.msra.mxu2 %v8777_v61  ;;  %v8086_v11 = vld [vmem:[#allocation3 + $0x118] sm:$0xf0]  ;;  %v9615_v16 = vld [vmem:[#allocation3 + $0x5cc] sm:$0xf] }
 0x6a7   : > { %7513 = vmatpush.bf16.msra.mxu0 %v8553_v25  ;;  %v8761_v25 = vor.u32 %v9631_v17, %v8758_v27  ;;  %v8742_v61 = vld [vmem:[#allocation3 + $0x638] sm:$0xf0]  ;;  %v8089_v20 = vor.u32 %v9463_v18, %v8086_v11  ;;  %v8521_v17 = vor.u32 %v9571_v22, %v8518_v60  ;;  %v9627_v27 = vld [vmem:[#allocation3 + $0x62c] sm:$0xf] }
 0x6a8   : > { %7570 = vmatpush.bf16.msra.mxu3 %v8937_v0  ;;  %v7027_v0 = vadd.f32 %v13292_v42, %v7008_v28  ;;  %v9567_v60 = vld [vmem:[#allocation3 + $0x44c] sm:$0xf]  ;;  %v8697_v42 = vor.u32 %v9615_v16, %v8694_v29  ;;  %v8486_v49 = vld [vmem:[#allocation3 + $0x438] sm:$0xf0] }
 0x6a9   : > { %v8505_v28 = vor.u32 %v9567_v60, %v8502_v62  ;;  %v9563_v62 = vld [vmem:[#allocation3 + $0x42c] sm:$0xf]  ;;  %v8870_v16 = vld [vmem:[#allocation3 + $0x738] sm:$0xf0] }
 0x6aa   : > { %7460 = vmatpush.bf16.msrb.mxu1 %v8105_v56  ;;  %7554 = vmatpush.bf16.msra.mxu2 %v8761_v25  ;;  %v8902_v56 = vld [vmem:[#allocation3 + $0x778] sm:$0xf0]  ;;  %v13414_v18 = vpop.f32.mrf.mxu3  ;;  %v13416_v13 = vpop.f32.mrf.mxu1  ;;  %v7046_v22 = vadd.f32 %v13348_v47, %v7027_v0  ;;  %v9611_v47 = vld [vmem:[#allocation3 + $0x5ac] sm:$0xf] }
 0x6ab   : > { %7514 = vmatpush.bf16.msra.mxu0 %v8537_v4  ;;  %v8745_v4 = vor.u32 %v9627_v27, %v8742_v61  ;;  %v13412_v11 = vpop.f32.mrf.mxu0  ;;  %v8726_v25 = vld [vmem:[#allocation3 + $0x618] sm:$0xf0]  ;;  %v8905_v57 = vor.u32 %v9667_v44, %v8902_v56  ;;  %v9623_v61 = vld [vmem:[#allocation3 + $0x60c] sm:$0xf] }
 0x6ac   : > { %7571 = vmatpush.bf16.msra.mxu3 %v8921_v9  ;;  %v7010_v9 = vadd.f32 %v13363_v59, %v13320_v8  ;;  %v8678_v27 = vld [vmem:[#allocation3 + $0x5b8] sm:$0xf0]  ;;  %v9663_v44 = vld [vmem:[#allocation3 + $0x74c] sm:$0xf]  ;;  %v7065_v29 = vadd.f32 %v13367_v31, %v7046_v22  ;;  %7443 = vmatmul.bf16.vlgmr.msrb.gmra.mxu0 %v12156_v12 }
 0x6ad   : > { %v9334_v0 = vld [vmem:[#allocation3 + $0xad8] sm:$0xf0]  ;;  %7391 = vmatmul.bf16.gmra.mxu1 %v12913_v63  ;;  %v8681_v59 = vor.u32 %v9611_v47, %v8678_v27  ;;  %v9659_v22 = vld [vmem:[#allocation3 + $0x72c] sm:$0xf] }
 0x6ae   : > { %7461 = vmatpush.bf16.msrb.mxu1 %v8089_v20  ;;  %7555 = vmatpush.bf16.msra.mxu2 %v8745_v4  ;;  %v8886_v20 = vld [vmem:[#allocation3 + $0x758] sm:$0xf0]  ;;  %v13421_v4 = vpop.f32.mrf.mxu2  ;;  %v7029_v60 = vadd.f32 %v13315_v54, %v7010_v9  ;;  %v8873_v27 = vor.u32 %v9659_v22, %v8870_v16 }
 0x6af   : > { %7515 = vmatpush.bf16.msra.mxu0 %v8521_v17  ;;  %v9779_v17 = vld [vmem:[#allocation3 + $0xaec] sm:$0xf]  ;;  %v8889_v8 = vor.u32 %v9663_v44, %v8886_v20  ;;  %v8470_v31 = vld [vmem:[#allocation3 + $0x418] sm:$0xf0] }
 0x6b0   : > { %7572 = vmatpush.bf16.msra.mxu3 %v8905_v57  ;;  %v9353_v56 = vor.u32 %v9779_v17, %v9350_v53  ;;  %v7084_v53 = vadd.f32 %v13394_v35, %v7065_v29  ;;  %v9775_v57 = vld [vmem:[#allocation3 + $0xacc] sm:$0xf]  ;;  %v9318_v17 = vld [vmem:[#allocation3 + $0xab8] sm:$0xf0]  ;;  %v7048_v47 = vadd.f32 %v13359_v7, %v7029_v60 }
 0x6b1   : > { %v9337_v12 = vor.u32 %v9775_v57, %v9334_v0  ;;  %v9715_v20 = vld [vmem:[#allocation3 + $0x8ec] sm:$0xf]  ;;  %v8646_v44 = vld [vmem:[#allocation3 + $0x578] sm:$0xf0] }
 0x6b2   : > { %7530 = vmatpush.bf16.msra.mxu1 %v8713_v51  ;;  %v8729_v51 = vor.u32 %v9623_v61, %v8726_v25  ;;  %v8489_v25 = vor.u32 %v9563_v62, %v8486_v49  ;;  %v13430_v61 = vpop.f32.mrf.mxu3  ;;  %v9559_v49 = vld [vmem:[#allocation3 + $0x40c] sm:$0xf]  ;;  %v13432_v54 = vpop.f32.mrf.mxu1  ;;  %v8854_v29 = vld [vmem:[#allocation3 + $0x718] sm:$0xf0]  ;;  %v7013_v62 = vadd.f32 %v13373_v36, %v13346_v19  ;;  %v7103_v0 = vadd.f32 %v13361_v24, %v7084_v53 }
 0x6b3   : > { %7516 = vmatpush.bf16.msra.mxu0 %v8505_v28  ;;  %v13428_v28 = vpop.f32.mrf.mxu0  ;;  %v8473_v9 = vor.u32 %v9559_v49, %v8470_v31  ;;  %v9382_v16 = vld [vmem:[#allocation3 + $0xb38] sm:$0xf0]  ;;  %v9655_v31 = vld [vmem:[#allocation3 + $0x70c] sm:$0xf]  ;;  %v7067_v22 = vadd.f32 %v13377_v43, %v7048_v47 }
 0x6b4   : > { %7556 = vmatpush.bf16.msra.mxu2 %v8729_v51  ;;  %7573 = vmatpush.bf16.msra.mxu3 %v8889_v8  ;;  %v9607_v51 = vld [vmem:[#allocation3 + $0x58c] sm:$0xf]  ;;  %v9078_v7 = vld [vmem:[#allocation3 + $0x8d8] sm:$0xf0]  ;;  %v8857_v19 = vor.u32 %v9655_v31, %v8854_v29  ;;  %v7122_v49 = vadd.f32 %v13390_v15, %v7103_v0 }
 0x6b5   : > { %v9302_v60 = vld [vmem:[#allocation3 + $0xa98] sm:$0xf0]  ;;  %7500 = vmatmul.bf16.vlgmr.msrb.gmra.mxu3 %v12555_v46  ;;  %v9787_v24 = vld [vmem:[#allocation3 + $0xb2c] sm:$0xf]  ;;  %7486 = vmatmul.bf16.gmra.mxu2 %v12588_v38  ;;  %v7015_v38 = vadd.f32 %v13383_v5, %v13357_v58 }
 0x6b6   : > { %7531 = vmatpush.bf16.msra.mxu1 %v8697_v42  ;;  %v8662_v42 = vld [vmem:[#allocation3 + $0x598] sm:$0xf0]  ;;  %v9707_v29 = vld [vmem:[#allocation3 + $0x8ac] sm:$0xf] }
 0x6b7   : > { %7517 = vmatpush.bf16.msra.mxu0 %v8489_v25  ;;  %v8665_v35 = vor.u32 %v9607_v51, %v8662_v42  ;;  %v9711_v25 = vld [vmem:[#allocation3 + $0x8cc] sm:$0xf]  ;;  %v7032_v51 = vadd.f32 %v13336_v52, %v7013_v62  ;;  %v9366_v43 = vld [vmem:[#allocation3 + $0xb18] sm:$0xf0] }
 0x6b8   : > { %7625 = vmatpush.bf16.msrb.mxu2 %v9353_v56  ;;  %v9094_v56 = vld [vmem:[#allocation3 + $0x8f8] sm:$0xf0]  ;;  %7574 = vmatpush.bf16.msra.mxu3 %v8873_v27  ;;  %v9603_v42 = vld [vmem:[#allocation3 + $0x56c] sm:$0xf]  ;;  %v9081_v53 = vor.u32 %v9711_v25, %v9078_v7 }
 0x6b9   : > { %v9097_v8 = vor.u32 %v9715_v20, %v9094_v56  ;;  %v8649_v36 = vor.u32 %v9603_v42, %v8646_v44  ;;  %v9385_v20 = vor.u32 %v9787_v24, %v9382_v16  ;;  %v9767_v27 = vld [vmem:[#allocation3 + $0xa8c] sm:$0xf]  ;;  %v7141_v44 = vadd.f32 %v13412_v11, %v7122_v49  ;;  %v9286_v62 = vld [vmem:[#allocation3 + $0xa78] sm:$0xf0] }
 0x6ba   : > { %7532 = vmatpush.bf16.msra.mxu1 %v8681_v59  ;;  %v9771_v59 = vld [vmem:[#allocation3 + $0xaac] sm:$0xf]  ;;  %v9305_v46 = vor.u32 %v9767_v27, %v9302_v60  ;;  %v7197_v56 = vpop.f32.mrf.mxu3  ;;  %v9062_v16 = vld [vmem:[#allocation3 + $0x8b8] sm:$0xf0] }
 0x6bb   : > { %7518 = vmatpush.bf16.msra.mxu0 %v8473_v9  ;;  %v9321_v57 = vor.u32 %v9771_v59, %v9318_v17  ;;  %v7086_v17 = vadd.f32 %v13402_v34, %v7067_v22  ;;  %v13446_v9 = vpop.f32.mrf.mxu0  ;;  %v9599_v52 = vld [vmem:[#allocation3 + $0x54c] sm:$0xf]  ;;  %v7159_v34 = vpop.f32.mrf.mxu1  ;;  %v9065_v11 = vor.u32 %v9707_v29, %v9062_v16  ;;  %v9270_v5 = vld [vmem:[#allocation3 + $0xa58] sm:$0xf0] }
 0x6bc   : > { %7626 = vmatpush.bf16.msrb.mxu2 %v9337_v12  ;;  %v13438_v12 = vpop.f32.mrf.mxu2  ;;  %7575 = vmatpush.bf16.msra.mxu3 %v8857_v19  ;;  %v9783_v15 = vld [vmem:[#allocation3 + $0xb0c] sm:$0xf]  ;;  %v7160_v25 = vadd.f32 %v7159_v34, %v7141_v44  ;;  %v7034_v19 = vadd.f32 %v13351_v1, %v7015_v38 }
 0x6bd   : > { %v9369_v0 = vor.u32 %v9783_v15, %v9366_v43  ;;  %v7105_v59 = vadd.f32 %v13371_v3, %v7086_v17  ;;  %v9763_v42 = vld [vmem:[#allocation3 + $0xa6c] sm:$0xf]  ;;  %7448 = vmatmul.bf16.gmra.mxu0 %v12591_v10  ;;  %7462 = vmatmul.bf16.vlgmr.msrb.gmra.mxu1 %v12176_v2  ;;  %v9222_v2 = vld [vmem:[#allocation3 + $0x9f8] sm:$0xf0] }
 0x6be   : > { %7533 = vmatpush.bf16.msra.mxu1 %v8665_v35  ;;  %v8630_v35 = vld [vmem:[#allocation3 + $0x558] sm:$0xf0]  ;;  %v7179_v7 = vadd.f32 %v13406_v50, %v7160_v25  ;;  %v9595_v60 = vld [vmem:[#allocation3 + $0x52c] sm:$0xf] }
 0x6bf   : > { %7587 = vmatpush.bf16.msrb.mxu0 %v9097_v8  ;;  %v8633_v47 = vor.u32 %v9599_v52, %v8630_v35  ;;  %v7051_v8 = vadd.f32 %v13369_v6, %v7032_v51  ;;  %v9289_v6 = vor.u32 %v9763_v42, %v9286_v62  ;;  %v9703_v58 = vld [vmem:[#allocation3 + $0x88c] sm:$0xf]  ;;  %v7124_v24 = vadd.f32 %v13400_v55, %v7105_v59  ;;  %v9046_v50 = vld [vmem:[#allocation3 + $0x898] sm:$0xf0] }
 0x6c0   : > { %7627 = vmatpush.bf16.msrb.mxu2 %v9321_v57  ;;  %7650 = vmatpush.bf16.msrb.mxu3 %v9385_v20  ;;  %v8614_v57 = vld [vmem:[#allocation3 + $0x538] sm:$0xf0]  ;;  %v9049_v10 = vor.u32 %v9703_v58, %v9046_v50  ;;  %v9759_v20 = vld [vmem:[#allocation3 + $0xa4c] sm:$0xf] }
 0x6c1   : > { %v7070_v22 = vadd.f32 %v13388_v32, %v7051_v8  ;;  %v8617_v3 = vor.u32 %v9595_v60, %v8614_v57  ;;  %v7198_v32 = vadd.f32 %v7197_v56, %v7179_v7  ;;  %v7143_v17 = vadd.f32 %v13428_v28, %v7124_v24  ;;  %v9591_v1 = vld [vmem:[#allocation3 + $0x50c] sm:$0xf]  ;;  %v9030_v15 = vld [vmem:[#allocation3 + $0x878] sm:$0xf0] }
 0x6c2   : > { %7534 = vmatpush.bf16.msra.mxu1 %v8649_v36  ;;  %v7199_v49 = vpop.f32.mrf.mxu3  ;;  %v9273_v27 = vor.u32 %v9759_v20, %v9270_v5  ;;  %v9699_v35 = vld [vmem:[#allocation3 + $0x86c] sm:$0xf]  ;;  %v7053_v56 = vadd.f32 %v13379_v40, %v7034_v19  ;;  %v9014_v42 = vld [vmem:[#allocation3 + $0x858] sm:$0xf0] }
 0x6c3   : > { %7588 = vmatpush.bf16.msrb.mxu0 %v9081_v53  ;;  %v7089_v36 = vadd.f32 %v13416_v13, %v7070_v22  ;;  %v8598_v53 = vld [vmem:[#allocation3 + $0x518] sm:$0xf0]  ;;  %v13462_v51 = vpop.f32.mrf.mxu0  ;;  %7664 = vst [vmem:[%s13289_s11 + $0x8] sm:$0xff] %v7198_v32  ;;  %v7161_v55 = vpop.f32.mrf.mxu1  ;;  %v9747_v43 = vld [vmem:[#allocation3 + $0x9ec] sm:$0xf]  ;;  %v9033_v34 = vor.u32 %v9699_v35, %v9030_v15 }
 0x6c4   : > { %7628 = vmatpush.bf16.msrb.mxu2 %v9305_v46  ;;  %7651 = vmatpush.bf16.msrb.mxu3 %v9369_v0  ;;  %v13453_v31 = vpop.f32.mrf.mxu2  ;;  %v8601_v13 = vor.u32 %v9591_v1, %v8598_v53  ;;  %v9254_v46 = vld [vmem:[#allocation3 + $0xa38] sm:$0xf0]  ;;  %v7162_v52 = vadd.f32 %v7161_v55, %v7143_v17  ;;  %v9225_v29 = vor.u32 %v9747_v43, %v9222_v2  ;;  %v9755_v28 = vld [vmem:[#allocation3 + $0xa2c] sm:$0xf] }
 0x6c5   : > { %v7108_v44 = vadd.f32 %v13381_v14, %v7089_v36  ;;  %v7072_v0 = vadd.f32 %v13398_v26, %v7053_v56  ;;  %v9257_v38 = vor.u32 %v9755_v28, %v9254_v46  ;;  %v9695_v59 = vld [vmem:[#allocation3 + $0x84c] sm:$0xf]  ;;  %7505 = vmatmul.bf16.gmra.mxu3 %v12594_v39  ;;  %v9238_v22 = vld [vmem:[#allocation3 + $0xa18] sm:$0xf0]  ;;  %7557 = vmatmul.bf16.vlgmr.msra.gmra.mxu2 %v12631_v37 }
 0x6c6   : > { %7535 = vmatpush.bf16.msra.mxu1 %v8633_v47  ;;  %v9206_v47 = vld [vmem:[#allocation3 + $0x9d8] sm:$0xf0]  ;;  %v7181_v8 = vadd.f32 %v13421_v4, %v7162_v52  ;;  %v9743_v40 = vld [vmem:[#allocation3 + $0x9cc] sm:$0xf]  ;;  %v9017_v26 = vor.u32 %v9695_v59, %v9014_v42  ;;  %v13959_v59 = vld [vmem:[#allocation51_spill] sm:$0xff] }
 0x6c7   : > { %7589 = vmatpush.bf16.msrb.mxu0 %v9065_v11  ;;  %v9751_v14 = vld [vmem:[#allocation3 + $0xa0c] sm:$0xf]  ;;  %v7127_v25 = vadd.f32 %v13414_v18, %v7108_v44  ;;  %v7091_v16 = vadd.f32 %v13432_v54, %v7072_v0  ;;  %v9209_v11 = vor.u32 %v9743_v40, %v9206_v47  ;;  %v9190_v7 = vld [vmem:[#allocation3 + $0x9b8] sm:$0xf0] }
 0x6c8   : > { %7629 = vmatpush.bf16.msrb.mxu2 %v9289_v6  ;;  %v7200_v57 = vadd.f32 %v7199_v49, %v7181_v8  ;;  %v9241_v60 = vor.u32 %v9751_v14, %v9238_v22  ;;  %v9691_v18 = vld [vmem:[#allocation3 + $0x82c] sm:$0xf]  ;;  %v8998_v24 = vld [vmem:[#allocation3 + $0x838] sm:$0xf0] }
 0x6c9   : > { %v7146_v39 = vadd.f32 %v13446_v9, %v7127_v25  ;;  %v9739_v58 = vld [vmem:[#allocation3 + $0x9ac] sm:$0xf]  ;;  %v9001_v36 = vor.u32 %v9691_v18, %v8998_v24  ;;  %v9174_v32 = vld [vmem:[#allocation3 + $0x998] sm:$0xf0] }
 0x6ca   : > { %7536 = vmatpush.bf16.msra.mxu1 %v8617_v3  ;;  %v7202_v6 = vpop.f32.mrf.mxu3  ;;  %7668 = vst [vmem:[%s13289_s11 + $0x28] sm:$0xff] %v7200_v57  ;;  %v7110_v3 = vadd.f32 %v13392_v23, %v7091_v16  ;;  %v9193_v19 = vor.u32 %v9739_v58, %v9190_v7  ;;  %v8982_v9 = vld [vmem:[#allocation3 + $0x818] sm:$0xf0]  ;;  %v9735_v53 = vld [vmem:[#allocation3 + $0x98c] sm:$0xf]  ;;  %v13963_v7 = vld [vmem:[#allocation67_spill] sm:$0xff] }
 0x6cb   : > { %7590 = vmatpush.bf16.msrb.mxu0 %v9049_v10  ;;  %v13475_v4 = vpop.f32.mrf.mxu0  ;;  %v7164_v54 = vpop.f32.mrf.mxu1  ;;  %v9177_v20 = vor.u32 %v9735_v53, %v9174_v32  ;;  %v9687_v2 = vld [vmem:[#allocation3 + $0x80c] sm:$0xf]  ;;  %v13960_v25 = vld [vmem:[#allocation62_spill] sm:$0xff] }
 0x6cc   : > { %7630 = vmatpush.bf16.msrb.mxu2 %v9273_v27  ;;  %v13468_v62 = vpop.f32.mrf.mxu2  ;;  %v7165_v5 = vadd.f32 %v7164_v54, %v7146_v39  ;;  %v7129_v23 = vadd.f32 %v13430_v61, %v7110_v3  ;;  %v8985_v49 = vor.u32 %v9687_v2, %v8982_v9  ;;  %v9158_v27 = vld [vmem:[#allocation3 + $0x978] sm:$0xf0]  ;;  %v9727_v43 = vld [vmem:[#allocation3 + $0x94c] sm:$0xf]  ;;  %v13966_v3 = vld [vmem:[#allocation69_spill] sm:$0xff] }
 0x6cd   : > { %7519 = vmatmul.bf16.vlgmr.msra.gmra.mxu0 %v12634_v30  ;;  %7467 = vmatmul.bf16.gmra.mxu1 %v12599_v33  ;;  %v9731_v33 = vld [vmem:[#allocation3 + $0x96c] sm:$0xf] }
 0x6ce   : > { %7537 = vmatpush.bf16.msra.mxu1 %v8601_v13  ;;  %v7184_v37 = vadd.f32 %v13438_v12, %v7165_v5  ;;  %v7148_v12 = vadd.f32 %v13462_v51, %v7129_v23  ;;  %v9161_v55 = vor.u32 %v9731_v33, %v9158_v27  ;;  %v9142_v13 = vld [vmem:[#allocation3 + $0x958] sm:$0xf0]  ;;  %v9719_v47 = vld [vmem:[#allocation3 + $0x90c] sm:$0xf] }
 0x6cf   : > { %7591 = vmatpush.bf16.msrb.mxu0 %v9033_v34  ;;  %v9145_v44 = vor.u32 %v9727_v43, %v9142_v13  ;;  %v9126_v51 = vld [vmem:[#allocation3 + $0x938] sm:$0xf0]  ;;  %v9723_v34 = vld [vmem:[#allocation3 + $0x92c] sm:$0xf] }
 0x6d0   : > { %7631 = vmatpush.bf16.msrb.mxu2 %v9257_v38  ;;  %v7203_v10 = vadd.f32 %v7202_v6, %v7184_v37  ;;  %v9129_v28 = vor.u32 %v9723_v34, %v9126_v51  ;;  %v13965_v58 = vld [vmem:[#allocation68_spill] sm:$0xff]  ;;  %v13967_v37 = vld [vmem:[#allocation70_spill] sm:$0xff] }
 0x6d2   : > { %7606 = vmatpush.bf16.msrb.mxu1 %v9225_v29  ;;  %v7204_v1 = vpop.f32.mrf.mxu3  ;;  %7672 = vst [vmem:[%s13289_s11 + $0x48] sm:$0xff] %v7203_v10 }
 0x6d3   : > { %7592 = vmatpush.bf16.msrb.mxu0 %v9017_v26  ;;  %v13487_v17 = vpop.f32.mrf.mxu0  ;;  %v7166_v30 = vpop.f32.mrf.mxu1 }
 0x6d4   : > { %7632 = vmatpush.bf16.msrb.mxu2 %v9241_v60  ;;  %v13481_v50 = vpop.f32.mrf.mxu2  ;;  %v7167_v35 = vadd.f32 %v7166_v30, %v7148_v12  ;;  %v13964_v60 = vld [vmem:[#allocation66_spill] sm:$0xff] }
 0x6d5   : > { %7576 = vmatmul.bf16.vlgmr.msra.gmra.mxu3 %v13944_v21  ;;  %7562 = vmatmul.bf16.gmra.mxu2 %v12674_v48  ;;  %v9110_v21 = vld [vmem:[#allocation3 + $0x918] sm:$0xf0] }
 0x6d6   : > { %7607 = vmatpush.bf16.msrb.mxu1 %v9209_v11  ;;  %v7186_v61 = vadd.f32 %v13453_v31, %v7167_v35  ;;  %v9113_v0 = vor.u32 %v9719_v47, %v9110_v21  ;;  %v13961_v11 = vld [vmem:[#allocation63_spill] sm:$0xff] }
 0x6d7   : > { %7593 = vmatpush.bf16.msrb.mxu0 %v9001_v36 }
 0x6d8   : > { %v7205_v56 = vadd.f32 %v7204_v1, %v7186_v61 }
 0x6da   : > { %7608 = vmatpush.bf16.msrb.mxu1 %v9193_v19  ;;  %v7273_v52 = vpop.f32.mrf.mxu3  ;;  %7676 = vst [vmem:[%s13289_s11 + $0x68] sm:$0xff] %v7205_v56 }
 0x6db   : > { %7594 = vmatpush.bf16.msrb.mxu0 %v8985_v49  ;;  %v7221_v29 = vpop.f32.mrf.mxu0  ;;  %v7235_v15 = vpop.f32.mrf.mxu1 }
 0x6dc   : > { %v13493_v46 = vpop.f32.mrf.mxu2  ;;  %v7236_v32 = vadd.f32 %v7235_v15, %v13475_v4 }
 0x6dd   : > { %7524 = vmatmul.bf16.gmra.mxu0 %v13947_v45  ;;  %7538 = vmatmul.bf16.vlgmr.msra.gmra.mxu1 %v13948_v41  ;;  %v13962_v45 = vld [vmem:[#allocation52_spill] sm:$0xff] }
 0x6de   : > { %7609 = vmatpush.bf16.msrb.mxu1 %v9177_v20  ;;  %v7255_v53 = vadd.f32 %v13468_v62, %v7236_v32 }
 0x6e0   : > { %v7274_v2 = vadd.f32 %v7273_v52, %v7255_v53 }
 0x6e2   : > { %7610 = vmatpush.bf16.msrb.mxu1 %v9161_v55  ;;  %v7275_v8 = vpop.f32.mrf.mxu3 }
 0x6e3   : > { %v7223_v38 = vpop.f32.mrf.mxu0  ;;  %v7237_v48 = vpop.f32.mrf.mxu1 }
 0x6e4   : > { %v13499_v31 = vpop.f32.mrf.mxu2  ;;  %v7238_v49 = vadd.f32 %v7237_v48, %v13487_v17 }
 0x6e5   : > { %7581 = vmatmul.bf16.gmra.mxu3 %v13959_v59  ;;  %7633 = vmatmul.bf16.vlgmr.msrb.gmra.mxu2 %v13960_v25 }
 0x6e6   : > { %7611 = vmatpush.bf16.msrb.mxu1 %v9145_v44  ;;  %v7257_v12 = vadd.f32 %v13481_v50, %v7238_v49 }
 0x6e8   : > { %v7276_v55 = vadd.f32 %v7275_v8, %v7257_v12 }
 0x6ea   : > { %7612 = vmatpush.bf16.msrb.mxu1 %v9129_v28  ;;  %v7278_v14 = vpop.f32.mrf.mxu3 }
 0x6eb   : > { %v7292_v16 = vpop.f32.mrf.mxu0  ;;  %v7240_v57 = vpop.f32.mrf.mxu1 }
 0x6ec   : > { %v7330_v40 = vpop.f32.mrf.mxu2  ;;  %v7293_v27 = vadd.f32 %v7292_v16, %v7274_v2  ;;  %v7241_v13 = vadd.f32 %v7240_v57, %v7221_v29 }
 0x6ed   : > { %7595 = vmatmul.bf16.vlgmr.msrb.gmra.mxu0 %v13961_v11  ;;  %7543 = vmatmul.bf16.gmra.mxu1 %v13962_v45 }
 0x6ee   : > { %7613 = vmatpush.bf16.msrb.mxu1 %v9113_v0  ;;  %v7260_v56 = vadd.f32 %v13493_v46, %v7241_v13 }
 0x6f0   : > { %v7279_v34 = vadd.f32 %v7278_v14, %v7260_v56 }
 0x6f2   : > { %v7280_v42 = vpop.f32.mrf.mxu3 }
 0x6f3   : > { %v7294_v26 = vpop.f32.mrf.mxu0  ;;  %v7242_v22 = vpop.f32.mrf.mxu1 }
 0x6f4   : > { %v7332_v41 = vpop.f32.mrf.mxu2  ;;  %v7295_v62 = vadd.f32 %v7294_v26, %v7276_v55  ;;  %v7243_v50 = vadd.f32 %v7242_v22, %v7223_v38 }
 0x6f5   : > { %9392 = vmatmul.msk.bf16.vlgmr.msrb.gmra.mxu3 %vm6744_vm13, %v13963_v7  ;;  %7638 = vmatmul.bf16.gmra.mxu2 %v13964_v60 }
 0x6f6   : > { %v7262_v29 = vadd.f32 %v13499_v31, %v7243_v50 }
 0x6f8   : > { %v7281_v11 = vadd.f32 %v7280_v42, %v7262_v29 }
 0x6fa   : > { %v7349_v39 = vpop.f32.mrf.mxu3 }
 0x6fb   : > { %v7297_v18 = vpop.f32.mrf.mxu0  ;;  %v7311_v54 = vpop.f32.mrf.mxu1 }
 0x6fc   : > { %v7335_v6 = vpop.f32.mrf.mxu2  ;;  %v7312_v30 = vadd.f32 %v7311_v54, %v7293_v27  ;;  %v7298_v21 = vadd.f32 %v7297_v18, %v7279_v34 }
 0x6fd   : > { %7600 = vmatmul.bf16.gmra.mxu0 %v13965_v58  ;;  %7614 = vmatmul.bf16.vlgmr.msrb.gmra.mxu1 %v13966_v3 }
 0x6fe   : > { %v7331_v61 = vadd.f32 %v7330_v40, %v7312_v30 }
 0x700   : > { %v7350_v44 = vadd.f32 %v7349_v39, %v7331_v61 }
 0x702   : > { %v7351_v19 = vpop.f32.mrf.mxu3 }
 0x703   : > { %v7299_v24 = vpop.f32.mrf.mxu0  ;;  %v7313_v36 = vpop.f32.mrf.mxu1 }
 0x704   : > { %v13510_v5 = vpop.f32.mrf.mxu2  ;;  %v7314_v51 = vadd.f32 %v7313_v36, %v7295_v62  ;;  %v7300_v38 = vadd.f32 %v7299_v24, %v7281_v11 }
 0x705   : > { %9393 = vmatmul.msk.bf16.gmra.mxu3 %vm6744_vm13, %v13967_v37 }
 0x706   : > { %v7333_v28 = vadd.f32 %v7332_v41, %v7314_v51 }
 0x708   : > { %v7352_v48 = vadd.f32 %v7351_v19, %v7333_v28 }
 0x70a   : > { %v7354_v23 = vpop.f32.mrf.mxu3 }
 0x70b   : > { %v7368_v10 = vpop.f32.mrf.mxu0  ;;  %v7316_v20 = vpop.f32.mrf.mxu1 }
 0x70c   : > { %v7406_v9 = vpop.f32.mrf.mxu2  ;;  %v7369_v52 = vadd.f32 %v7368_v10, %v7350_v44  ;;  %v7317_v59 = vadd.f32 %v7316_v20, %v7298_v21 }
 0x70d   : > { %7619 = vmatmul.bf16.gmra.mxu1 %v12913_v63 }
 0x70e   : > { %v7336_v45 = vadd.f32 %v7335_v6, %v7317_v59 }
 0x710   : > { %v7355_v22 = vadd.f32 %v7354_v23, %v7336_v45 }
 0x712   : > { %v7356_v4 = vpop.f32.mrf.mxu3 }
 0x713   : > { %v7370_v33 = vpop.f32.mrf.mxu0  ;;  %v7318_v35 = vpop.f32.mrf.mxu1 }
 0x714   : > { %v7408_v1 = vpop.f32.mrf.mxu2  ;;  %v7371_v25 = vadd.f32 %v7370_v33, %v7352_v48  ;;  %v7319_v7 = vadd.f32 %v7318_v35, %v7300_v38 }
 0x716   : > { %v7338_v58 = vadd.f32 %v13510_v5, %v7319_v7 }
 0x718   : > { %v7357_v42 = vadd.f32 %v7356_v4, %v7338_v58 }
 0x71a   : > { %v7425_v17 = vpop.f32.mrf.mxu3 }
 0x71b   : > { %v7373_v63 = vpop.f32.mrf.mxu0  ;;  %v7387_v15 = vpop.f32.mrf.mxu1 }
 0x71c   : > { %v7411_v43 = vpop.f32.mrf.mxu2  ;;  %v7388_v47 = vadd.f32 %v7387_v15, %v7369_v52  ;;  %v7374_v60 = vadd.f32 %v7373_v63, %v7355_v22 }
 0x71e   : > { %v7407_v0 = vadd.f32 %v7406_v9, %v7388_v47 }
 0x720   : > { %v7426_v40 = vadd.f32 %v7425_v17, %v7407_v0 }
 0x722   : > { %v7427_v46 = vpop.f32.mrf.mxu3  ;;  %7665 = vst [vmem:[%s13289_s11 + $0x10] sm:$0xff] %v7426_v40 }
 0x723   : > { %v7375_v16 = vpop.f32.mrf.mxu0  ;;  %v7389_v57 = vpop.f32.mrf.mxu1 }
 0x724   : > { %v7413_v8 = vpop.f32.mrf.mxu2  ;;  %v7390_v14 = vadd.f32 %v7389_v57, %v7371_v25  ;;  %v7376_v32 = vadd.f32 %v7375_v16, %v7357_v42 }
 0x726   : > { %v7409_v41 = vadd.f32 %v7408_v1, %v7390_v14 }
 0x728   : > { %v7428_v39 = vadd.f32 %v7427_v46, %v7409_v41 }
 0x72a   : > { %v7430_v31 = vpop.f32.mrf.mxu3  ;;  %7669 = vst [vmem:[%s13289_s11 + $0x30] sm:$0xff] %v7428_v39 }
 0x72b   : > { %v7444_v18 = vpop.f32.mrf.mxu0  ;;  %v7392_v54 = vpop.f32.mrf.mxu1 }
 0x72c   : > { %v7482_v26 = vpop.f32.mrf.mxu2  ;;  %v7393_v3 = vadd.f32 %v7392_v54, %v7374_v60 }
 0x72e   : > { %v7412_v19 = vadd.f32 %v7411_v43, %v7393_v3 }
 0x730   : > { %v7431_v6 = vadd.f32 %v7430_v31, %v7412_v19 }
 0x732   : > { %v7432_v36 = vpop.f32.mrf.mxu3  ;;  %7673 = vst [vmem:[%s13289_s11 + $0x50] sm:$0xff] %v7431_v6 }
 0x733   : > { %v7446_v37 = vpop.f32.mrf.mxu0  ;;  %v7394_v9 = vpop.f32.mrf.mxu1 }
 0x734   : > { %v7484_v24 = vpop.f32.mrf.mxu2  ;;  %v7395_v53 = vadd.f32 %v7394_v9, %v7376_v32 }
 0x736   : > { %v7414_v23 = vadd.f32 %v7413_v8, %v7395_v53 }
 0x738   : > { %v7433_v10 = vadd.f32 %v7432_v36, %v7414_v23 }
 0x73a   : > { %v7501_v20 = vpop.f32.mrf.mxu3  ;;  %7677 = vst [vmem:[%s13289_s11 + $0x70] sm:$0xff] %v7433_v10 }
 0x73b   : > { %v7449_v2 = vpop.f32.mrf.mxu0  ;;  %v7463_v49 = vpop.f32.mrf.mxu1 }
 0x73c   : > { %v7487_v27 = vpop.f32.mrf.mxu2  ;;  %v7464_v15 = vadd.f32 %v7463_v49, %v7444_v18 }
 0x73e   : > { %v7483_v50 = vadd.f32 %v7482_v26, %v7464_v15 }
 0x740   : > { %v7502_v21 = vadd.f32 %v7501_v20, %v7483_v50 }
 0x742   : > { %v7503_v1 = vpop.f32.mrf.mxu3 }
 0x743   : > { %v7451_v5 = vpop.f32.mrf.mxu0  ;;  %v7465_v12 = vpop.f32.mrf.mxu1 }
 0x744   : > { %v7489_v30 = vpop.f32.mrf.mxu2  ;;  %v7466_v0 = vadd.f32 %v7465_v12, %v7446_v37 }
 0x746   : > { %v7485_v48 = vadd.f32 %v7484_v24, %v7466_v0 }
 0x748   : > { %v7504_v16 = vadd.f32 %v7503_v1, %v7485_v48 }
 0x74a   : > { %v7506_v4 = vpop.f32.mrf.mxu3 }
 0x74b   : > { %v7520_v33 = vpop.f32.mrf.mxu0  ;;  %v7468_v35 = vpop.f32.mrf.mxu1 }
 0x74c   : > { %v7558_v55 = vpop.f32.mrf.mxu2  ;;  %v7521_v29 = vadd.f32 %v7520_v33, %v7502_v21  ;;  %v7469_v57 = vadd.f32 %v7468_v35, %v7449_v2 }
 0x74e   : > { %v7488_v38 = vadd.f32 %v7487_v27, %v7469_v57 }
 0x750   : > { %v7507_v60 = vadd.f32 %v7506_v4, %v7488_v38 }
 0x752   : > { %v7508_v13 = vpop.f32.mrf.mxu3 }
 0x753   : > { %v7470_v61 = vpop.f32.mrf.mxu1  ;;  %v7522_v62 = vpop.f32.mrf.mxu0 }
 0x754   : > { %v7560_v56 = vpop.f32.mrf.mxu2  ;;  %v7523_v45 = vadd.f32 %v7522_v62, %v7504_v16  ;;  %v7471_v18 = vadd.f32 %v7470_v61, %v7451_v5 }
 0x756   : > { %v7490_v42 = vadd.f32 %v7489_v30, %v7471_v18 }
 0x758   : > { %v7509_v23 = vadd.f32 %v7508_v13, %v7490_v42 }
 0x75a   : > { %v7577_v43 = vpop.f32.mrf.mxu3 }
 0x75b   : > { %v7539_v44 = vpop.f32.mrf.mxu1  ;;  %v7525_v51 = vpop.f32.mrf.mxu0 }
 0x75c   : > { %v7563_v63 = vpop.f32.mrf.mxu2  ;;  %v7540_v59 = vadd.f32 %v7539_v44, %v7521_v29  ;;  %v7526_v3 = vadd.f32 %v7525_v51, %v7507_v60 }
 0x75e   : > { %v7559_v11 = vadd.f32 %v7558_v55, %v7540_v59 }
 0x760   : > { %v7578_v41 = vadd.f32 %v7577_v43, %v7559_v11 }
 0x762   : > { %v7579_v17 = vpop.f32.mrf.mxu3 }
 0x763   : > { %v7541_v52 = vpop.f32.mrf.mxu1  ;;  %v7527_v34 = vpop.f32.mrf.mxu0 }
 0x764   : > { %v7565_v8 = vpop.f32.mrf.mxu2  ;;  %v7542_v22 = vadd.f32 %v7541_v52, %v7523_v45  ;;  %v7528_v49 = vadd.f32 %v7527_v34, %v7509_v23 }
 0x766   : > { %v7561_v54 = vadd.f32 %v7560_v56, %v7542_v22 }
 0x768   : > { %v7580_v6 = vadd.f32 %v7579_v17, %v7561_v54 }
 0x76a   : > { %v7582_v28 = vpop.f32.mrf.mxu3 }
 0x76b   : > { %v7544_v47 = vpop.f32.mrf.mxu1  ;;  %v7596_v46 = vpop.f32.mrf.mxu0 }
 0x76c   : > { %v7634_v14 = vpop.f32.mrf.mxu2  ;;  %v7597_v7 = vadd.f32 %v7596_v46, %v7578_v41  ;;  %v7545_v36 = vadd.f32 %v7544_v47, %v7526_v3 }
 0x76e   : > { %v7564_v10 = vadd.f32 %v7563_v63, %v7545_v36 }
 0x770   : > { %v7583_v1 = vadd.f32 %v7582_v28, %v7564_v10 }
 0x772   : > { %v7584_v40 = vpop.f32.mrf.mxu3 }
 0x773   : > { %v7546_v25 = vpop.f32.mrf.mxu1  ;;  %v7598_v39 = vpop.f32.mrf.mxu0 }
 0x774   : > { %v7636_v32 = vpop.f32.mrf.mxu2  ;;  %v7599_v37 = vadd.f32 %v7598_v39, %v7580_v6  ;;  %v7547_v5 = vadd.f32 %v7546_v25, %v7528_v49 }
 0x776   : > { %v7566_v35 = vadd.f32 %v7565_v8, %v7547_v5 }
 0x778   : > { %v7585_v43 = vadd.f32 %v7584_v40, %v7566_v35 }
 0x77a   : > { %v7653_v26 = vpop.f32.mrf.mxu3 }
 0x77b   : > { %v7615_v31 = vpop.f32.mrf.mxu1  ;;  %v7601_v2 = vpop.f32.mrf.mxu0 }
 0x77c   : > { %v7616_v58 = vadd.f32 %v7615_v31, %v7597_v7  ;;  %v7602_v30 = vadd.f32 %v7601_v2, %v7583_v1  ;;  %v7639_v33 = vpop.f32.mrf.mxu2 }
 0x77e   : > { %v7635_v19 = vadd.f32 %v7634_v14, %v7616_v58 }
 0x780   : > { %v7654_v24 = vadd.f32 %v7653_v26, %v7635_v19 }
 0x782   : > { %7666 = vst [vmem:[%s13289_s11 + $0x18] sm:$0xff] %v7654_v24  ;;  %v7655_v53 = vpop.f32.mrf.mxu3 }
 0x783   : > { %v7617_v9 = vpop.f32.mrf.mxu1  ;;  %v7603_v62 = vpop.f32.mrf.mxu0 }
 0x784   : > { %v7618_v20 = vadd.f32 %v7617_v9, %v7599_v37  ;;  %v7604_v44 = vadd.f32 %v7603_v62, %v7585_v43  ;;  %v7641_v52 = vpop.f32.mrf.mxu2 }
 0x786   : > { %v7637_v27 = vadd.f32 %v7636_v32, %v7618_v20 }
 0x788   : > { %v7656_v12 = vadd.f32 %v7655_v53, %v7637_v27 }
 0x78a   : > { %7670 = vst [vmem:[%s13289_s11 + $0x38] sm:$0xff] %v7656_v12  ;;  %v7658_v13 = vpop.f32.mrf.mxu3 }
 0x78b   : > { %v7620_v4 = vpop.f32.mrf.mxu1 }
 0x78c   : > { %v7621_v55 = vadd.f32 %v7620_v4, %v7602_v30 }
 0x78e   : > { %v7640_v61 = vadd.f32 %v7639_v33, %v7621_v55 }
 0x790   : > { %v7659_v56 = vadd.f32 %v7658_v13, %v7640_v61 }
 0x792   : > { %7674 = vst [vmem:[%s13289_s11 + $0x58] sm:$0xff] %v7659_v56  ;;  %v7660_v15 = vpop.f32.mrf.mxu3 }
 0x793   : > { %v7622_v51 = vpop.f32.mrf.mxu1 }
 0x794   : > { %v7623_v17 = vadd.f32 %v7622_v51, %v7604_v44 }
 0x796   : > { %v7642_v63 = vadd.f32 %v7641_v52, %v7623_v17 }
 0x798   : > { %v7661_v34 = vadd.f32 %v7660_v15, %v7642_v63 }
 0x79a   : > { %7678 = vst [vmem:[%s13289_s11 + $0x78] sm:$0xff] %v7661_v34 }
 0x79b   : > { %10087 = shalt.err (!%p10084_p9)
}
 0x79c   : > { %s10250_s0 = smov 512   ;;  %s10251_s5 = smov 1024  }
 0x79d   : > { %s10252_s4 = smov 32  }
 0x79e   : > { %9797 = dma.vmem_to_hbm [thread:$0]  (%p10400_p7), %s7695_s30, 2048, %s7697_s29, %s7680_s8, %s10250_s0, %s10251_s5, %s10252_s4  }
 0x79f PF: > { %s13970_s15 = sld [smem:[#allocation15_spill]]  ;;  %p9809_p11 = scmp.ge.s32.totalorder %s10193_s22, 2 }
 0x7a1   : > { %p9804_p12 = pnand %p9809_p11, %p10407_p2 }
 0x7a3   : > { %p9805_p0 = pneg %p9804_p12 }
 0x7a5   : > { %s7711_s25 = sand.u32 1, %s13970_s15  }
 0x7a6   : > { %s7712_s26 = scalar_lea.sflag [#allocation6], %s7711_s25 }
 0x7a7   : > { %10145 = dma.done.wait (%p9805_p0), %s7712_s26, 2048  }
 0x7a8   : > { %10147 = vsyncadd (%p9805_p0), %s7712_s26, 4294965248  ;;  %s20_s22 = sadd.s32 1, %s10193_s22   ;;  %s13972_s28 = sld [smem:[#allocation20_spill]] }
 0x7a9   : > { %p17_p1 = scmp.ge.s32.totalorder %s20_s22, 6   ;;  %s13973_s18 = sld [smem:[#allocation16_spill]] }
 0x7aa   : > { %s13974_s17 = sld [smem:[#allocation19_spill]]  ;;  %s13977_s12 = smov %s10157_s13 }
 0x7ab   : > { %s13975_s9 = sld [smem:[#allocation17_spill]]  ;;  %s13978_s13 = smov %s10161_s14 }
 0x7ac   : > { %s13976_s30 = sld [smem:[#allocation18_spill]]  ;;  %s13980_s15 = smov %s10169_s16 }
 0x7ad   : > { %s13983_s19 = smov %s10189_s21 }
 0x7ae   : > { %s13979_s14 = smov %s13972_s28  ;;  %19 = sbr.rel (!%p17_p1) target bundleno = 14 (0xe), region = 93 }
 0x7af   : > { %s13981_s16 = smov %s13973_s18  ;;  %s13982_s18 = smov %s10185_s20 }
 0x7b1   : > { %s13984_s20 = smov %s13975_s9 }
 0x7b2   : > { %s13985_s21 = smov %s13976_s30 }
 0x7b3   :  { %7718 = vsyncpa [#allocation5], 1 }
 0x7b4   :  { %7720 = vsyncpa [#allocation5 + $0x1], 1 }
 0x7b5   :  { %7721 = vsyncpa [#allocation8], 1 }
 0x7b6   :  { %7723 = vsyncpa [#allocation8 + $0x1], 1 }
 0x7b7   :  { %7724 = vsyncpa [#allocation6], 1 }
 0x7b8   :  { %7726 = vsyncpa [#allocation6 + $0x1], 1 }

</bundles_post_ra>
